<compile_context>
chip_gen: v6e
topology: v6e:2x2x1
jax: 0.10.0
libtpu: 0.0.40
codegen_flags: <defaults>
</compile_context>

<pallas_src>
import functools

import jax
import jax.numpy as jnp
from jax.experimental import pallas as pl
from jax.experimental.pallas import tpu as pltpu


BLOCK_LIST = [
    {'kernel': 3, 'out_channel': 128, 'stride': 2},
    {'kernel': 3, 'out_channel': 256, 'stride': 2},
    {'kernel': 3, 'out_channel': 256, 'stride': 2},
]

_NEG_SLOPE = 0.01          # nn.LeakyReLU() default


# ---------------------------------------------------------------------------
# Hardware-aware tiling helpers
# ---------------------------------------------------------------------------
def _mxu_lane_width():
    """256 on v6e/v7x (256-wide MXU), 128 otherwise (safe default)."""
    try:
        kind = jax.devices()[0].device_kind.lower()
    except Exception:
        return 128
    if any(tag in kind for tag in ("v6", "v7", "tpu7")):
        return 256
    return 128


_MXU_WIDTH = _mxu_lane_width()


def _round_up(x, m):
    return ((x + m - 1) // m) * m


def _pick_cn(cout):
    """Output-channel (lane) tile: 256 on 256-wide MXUs, else 128."""
    if cout % 256 == 0 and _MXU_WIDTH >= 256:
        return 256
    if cout % 128 == 0:
        return 128
    return cout


def _pick_row_tile(ho, wo, cn):
    """Largest divisor th of ho with th*wo*cn*4 <= ~128 KiB (MXU M target)."""
    m_target = max(8, (128 * 1024) // (4 * max(cn, 1)))
    best = 1
    for th in range(1, ho + 1):
        if ho % th == 0 and th * wo <= m_target:
            best = th
    return best


def _vmem_budget(block_bytes, acc_bytes=0):
    """Scoped VMEM limit: double-buffered blocks + accumulators + slack."""
    need = 2 * int(sum(block_bytes)) + int(acc_bytes) + (8 << 20)
    return int(min(max(need, 32 << 20), 96 << 20))


# ---------------------------------------------------------------------------
# XLA-side layout helpers
# ---------------------------------------------------------------------------
def _space_to_depth_stride2(x):
    """[N,H,W,C] -> ([N,4,H/2+1,W/2+1,C], Ho, Wo) with
    xs[n, 2*pi+pj, hh, ww, c] = pad(x,1)[n, 2*hh+pi, 2*ww+pj, c].

    Pure layout op (one 1x copy).  It lets the kernel read every 3x3/stride-2
    tap as an *unstrided* window, so no 9x im2col matrix ever hits HBM.
    """
    n, h, w, c = x.shape
    assert h % 2 == 0 and w % 2 == 0, "stride-2 path expects even spatial dims"
    xp = jnp.pad(x, ((0, 0), (1, 1), (1, 1), (0, 0)))
    hs, ws = (h + 2) // 2, (w + 2) // 2
    xs = xp.reshape(n, hs, 2, ws, 2, c)
    xs = jnp.transpose(xs, (0, 2, 4, 1, 3, 5))     # [N, 2(pi), 2(pj), Hs, Ws, C]
    return xs.reshape(n, 4, hs, ws, c), h // 2, w // 2


def _im2col_3x3_s2(x):
    """Layer-1 only (Cin=3): [N,H,W,C] -> ([N,H/2,W/2,9*C], Ho, Wo).
    Packs the 9 taps into the contraction dim (K=27) so layer 1 becomes a
    plain matmul.  Cheap at XLA level because C is tiny."""
    n, h, w, c = x.shape
    assert h % 2 == 0 and w % 2 == 0
    xp = jnp.pad(x, ((0, 0), (1, 1), (1, 1), (0, 0)))
    ho, wo = h // 2, w // 2
    taps = []
    for di in range(3):
        for dj in range(3):
            taps.append(xp[:, di:di + h:2, dj:dj + w:2, :])   # (N, ho, wo, C)
    return jnp.concatenate(taps, axis=-1), ho, wo


# ---------------------------------------------------------------------------
# In-kernel conv helpers
# ---------------------------------------------------------------------------
def _conv_tile_batched(x_ref, w_ref, row0, th, wo):
    """Pre-bias conv for a whole (th, wo) tile as 9 big matmuls.
    Returns f32 (th*wo, cn).  Requires wo % 8 == 0 so the (th,wo,Cin) ->
    (th*wo,Cin) flatten is a free sublane-aligned shape cast."""
    cin, cn = w_ref.shape[2], w_ref.shape[3]
    acc = jnp.zeros((th * wo, cn), jnp.float32)
    for di in range(3):
        for dj in range(3):
            pi, ai = di % 2, di // 2
            pj, aj = dj % 2, dj // 2
            slab = x_ref[0, 2 * pi + pj, pl.ds(row0 + ai, th), pl.ds(aj, wo), :]
            acc = acc + jnp.dot(slab.reshape(th * wo, cin), w_ref[di, dj],
                                preferred_element_type=jnp.float32)
    return acc


def _conv_row(x_ref, w_ref, row_idx, wo):
    """Per-row fallback (wo % 8 != 0 only).  Returns f32 (wo, cn)."""
    cn = w_ref.shape[3]
    acc = jnp.zeros((wo, cn), jnp.float32)
    for di in range(3):
        for dj in range(3):
            pi, ai = di % 2, di // 2
            pj, aj = dj % 2, dj // 2
            xrow = x_ref[0, 2 * pi + pj, row_idx + ai, pl.ds(aj, wo), :]
            acc = acc + jnp.dot(xrow, w_ref[di, dj],
                                preferred_element_type=jnp.float32)
    return acc


# ---------------------------------------------------------------------------
# Pallas kernels
# ---------------------------------------------------------------------------
def _mm_bias_leaky_kernel(x_ref, w_ref, b_ref, o_ref, *, slope):
    """Layer 1: (mt, K) x (K, Cout) + bias + LeakyReLU."""
    acc = jnp.dot(x_ref[...], w_ref[...], preferred_element_type=jnp.float32)
    acc = acc + b_ref[...]
    acc = jnp.maximum(acc, slope * acc)
    o_ref[...] = acc.astype(o_ref.dtype)


def _conv_s2_leaky_kernel(x_ref, w_ref, b_ref, o_ref, *, th, wo, slope):
    """Fused stride-2 conv3x3 + bias + LeakyReLU for one (batch, Cout, row) block."""
    r = pl.program_id(2)
    row0 = r * th
    bias = b_ref[...]                                   # (1, cn) f32
    if wo % 8 == 0:
        acc = _conv_tile_batched(x_ref, w_ref, row0, th, wo) + bias
        acc = jnp.maximum(acc, slope * acc)
        cn = acc.shape[-1]
        o_ref[0] = acc.reshape(th, wo, cn).astype(o_ref.dtype)   # single store
    else:
        # Fallback for sublane-unfriendly tiny widths (small images only).
        for h in range(th):
            acc = _conv_row(x_ref, w_ref, row0 + h, wo) + bias
            acc = jnp.maximum(acc, slope * acc)
            o_ref[0, h] = acc.astype(o_ref.dtype)


def _conv_s2_leaky_linear_kernel(x_ref, w_ref, b_ref, lw_ref, lb_ref, o_ref,
                                 acc_ref, *, th, wo, slope):
    """Last conv + LeakyReLU with the output Linear fused into the epilogue.

    The conv activation never leaves VMEM: each block contributes a (1,1)
    partial logit that is accumulated in a VMEM scratch scalar across the
    (Cout, row) grid axes; the output is written once, in the finalize branch.
    """
    j = pl.program_id(1)
    r = pl.program_id(2)
    row0 = r * th
    bias = b_ref[...]

    @pl.when(jnp.logical_and(j == 0, r == 0))
    def _init():
        acc_ref[...] = jnp.zeros_like(acc_ref)

    if wo % 8 == 0:
        act = _conv_tile_batched(x_ref, w_ref, row0, th, wo) + bias   # (M, cn)
        act = jnp.maximum(act, slope * act)
        cn = act.shape[-1]
        prod = act * lw_ref[...].reshape(th * wo, cn)                 # f32
        partial = jnp.sum(jnp.sum(prod, axis=1, keepdims=True),
                          axis=0, keepdims=True)                      # (1, 1)
    else:
        partial = jnp.zeros((1, 1), jnp.float32)
        for h in range(th):
            act = _conv_row(x_ref, w_ref, row0 + h, wo) + bias        # (wo, cn)
            act = jnp.maximum(act, slope * act)
            prod = act * lw_ref[h]
            partial = partial + jnp.sum(jnp.sum(prod, axis=1, keepdims=True),
                                        axis=0, keepdims=True)

    acc_ref[...] = acc_ref[...] + partial

    @pl.when(jnp.logical_and(j == pl.num_programs(1) - 1,
                             r == pl.num_programs(2) - 1))
    def _finalize():
        o_ref[...] = (acc_ref[...] + lb_ref[...]).reshape(1, 1, 1)


# ---------------------------------------------------------------------------
# Wrappers around pallas_call
# ---------------------------------------------------------------------------
def conv1_im2col_matmul(x, w_k, bias, *, slope=_NEG_SLOPE):
    """Layer 1: im2col (K packed) + matmul kernel.
    x: [N,H,W,3] bf16, w_k: [27, Cout] bf16, bias: [1, Cout] f32
    -> [N, H/2, W/2, Cout] bf16."""
    n, h, w, c = x.shape
    k, cout = w_k.shape
    assert k == 9 * c
    patches, ho, wo = _im2col_3x3_s2(x)                 # (N, ho, wo, 9c) bf16
    m_total = n * ho * wo
    flat = patches.reshape(m_total, k)
    mt = 256 if m_total >= 256 else _round_up(m_total, 8)
    m_pad = _round_up(m_total, mt)
    if m_pad != m_total:
        flat = jnp.pad(flat, ((0, m_pad - m_total), (0, 0)))
    grid = (m_pad // mt,)

    flops = 2 * m_total * k * cout
    bytes_accessed = (flat.size * 2 + w_k.size * 2 + bias.size * 4
                      + m_total * cout * 2)
    vmem = _vmem_budget([mt * k * 2, k * cout * 2, cout * 4, mt * cout * 2],
                        acc_bytes=mt * cout * 4)

    kernel = functools.partial(_mm_bias_leaky_kernel, slope=slope)
    out = pl.pallas_call(
        kernel,
        out_shape=jax.ShapeDtypeStruct((m_pad, cout), jnp.bfloat16),
        grid_spec=pltpu.PrefetchScalarGridSpec(
            num_scalar_prefetch=0,
            grid=grid,
            in_specs=[
                pl.BlockSpec((mt, k), lambda i: (i, 0)),
                pl.BlockSpec((k, cout), lambda i: (0, 0)),
                pl.BlockSpec((1, cout), lambda i: (0, 0)),
            ],
            out_specs=pl.BlockSpec((mt, cout), lambda i: (i, 0)),
        ),
        compiler_params=pltpu.CompilerParams(
            dimension_semantics=("parallel",),
            vmem_limit_bytes=vmem),
        cost_estimate=pl.CostEstimate(flops=int(flops), transcendentals=0,
                                      bytes_accessed=int(bytes_accessed)),
    )(flat, w_k, bias)
    return out[:m_total].reshape(n, ho, wo, cout)


def conv2d_s2_leaky(x, w_prep, bias, *, slope=_NEG_SLOPE):
    """x: [N,H,W,Cin] bf16, w_prep: [3,3,Cin,Cout] bf16, bias: [1,Cout] f32
    -> [N,H/2,W/2,Cout] bf16."""
    n, _, _, cin = x.shape
    kh, kw, cin_w, cout = w_prep.shape
    assert (kh, kw) == (3, 3) and cin_w == cin
    xs, ho, wo = _space_to_depth_stride2(x)
    hs, ws = ho + 1, wo + 1
    cn = _pick_cn(cout)
    th = _pick_row_tile(ho, wo, cn)
    grid = (n, cout // cn, ho // th)

    flops = 2 * n * ho * wo * cout * 9 * cin
    bytes_accessed = (xs.size * 2 + w_prep.size * 2 + bias.size * 4
                      + n * ho * wo * cout * 2)
    vmem = _vmem_budget(
        [4 * hs * ws * cin * 2, 9 * cin * cn * 2, cn * 4, th * wo * cn * 2],
        acc_bytes=th * wo * cn * 4)

    kernel = functools.partial(_conv_s2_leaky_kernel, th=th, wo=wo, slope=slope)
    return pl.pallas_call(
        kernel,
        out_shape=jax.ShapeDtypeStruct((n, ho, wo, cout), jnp.bfloat16),
        grid_spec=pltpu.PrefetchScalarGridSpec(
            num_scalar_prefetch=0,
            grid=grid,
            in_specs=[
                # Per-image space-to-depth input, resident across (Cout, row) axes.
                pl.BlockSpec((1, 4, hs, ws, cin), lambda b, j, r: (b, 0, 0, 0, 0)),
                # Weight block, resident across (batch, row) axes.
                pl.BlockSpec((3, 3, cin, cn), lambda b, j, r: (0, 0, 0, j)),
                pl.BlockSpec((1, cn), lambda b, j, r: (0, j)),
            ],
            out_specs=pl.BlockSpec((1, th, wo, cn), lambda b, j, r: (b, r, 0, j)),
        ),
        compiler_params=pltpu.CompilerParams(
            dimension_semantics=("parallel", "parallel", "parallel"),
            vmem_limit_bytes=vmem),
        cost_estimate=pl.CostEstimate(flops=int(flops), transcendentals=0,
                                      bytes_accessed=int(bytes_accessed)),
    )(xs, w_prep, bias)


def conv2d_s2_leaky_fused_linear(x, w_prep, bias, lin_w_hwc, lin_b,
                                 *, slope=_NEG_SLOPE):
    """Last conv layer with the output Linear fused in.  Returns [N, 1] f32."""
    n, _, _, cin = x.shape
    _, _, _, cout = w_prep.shape
    xs, ho, wo = _space_to_depth_stride2(x)
    hs, ws = ho + 1, wo + 1
    cn = _pick_cn(cout)
    th = _pick_row_tile(ho, wo, cn)
    grid = (n, cout // cn, ho // th)

    flops = 2 * n * ho * wo * cout * (9 * cin + 1)
    bytes_accessed = (xs.size * 2 + w_prep.size * 2 + bias.size * 4
                      + lin_w_hwc.size * 4 + n * 4)
    vmem = _vmem_budget(
        [4 * hs * ws * cin * 2, 9 * cin * cn * 2, cn * 4,
         th * wo * cn * 4, 4, 4],
        acc_bytes=2 * th * wo * cn * 4)

    kernel = functools.partial(_conv_s2_leaky_linear_kernel,
                               th=th, wo=wo, slope=slope)
    out = pl.pallas_call(
        kernel,
        out_shape=jax.ShapeDtypeStruct((n, 1, 1), jnp.float32),
        grid_spec=pltpu.PrefetchScalarGridSpec(
            num_scalar_prefetch=0,
            grid=grid,
            in_specs=[
                pl.BlockSpec((1, 4, hs, ws, cin), lambda b, j, r: (b, 0, 0, 0, 0)),
                pl.BlockSpec((3, 3, cin, cn), lambda b, j, r: (0, 0, 0, j)),
                pl.BlockSpec((1, cn), lambda b, j, r: (0, j)),
                # Linear weight, already permuted to NHWC flatten order.
                pl.BlockSpec((th, wo, cn), lambda b, j, r: (r, 0, j)),
                pl.BlockSpec((1, 1), lambda b, j, r: (0, 0)),
            ],
            # (1,1,1) logit block stays resident per image; written in finalize.
            out_specs=pl.BlockSpec((1, 1, 1), lambda b, j, r: (b, 0, 0)),
            scratch_shapes=[pltpu.VMEM((1, 1), jnp.float32)],
        ),
        compiler_params=pltpu.CompilerParams(
            dimension_semantics=("parallel", "arbitrary", "arbitrary"),
            vmem_limit_bytes=vmem),
        cost_estimate=pl.CostEstimate(flops=int(flops), transcendentals=0,
                                      bytes_accessed=int(bytes_accessed)),
    )(xs, w_prep, bias, lin_w_hwc, lin_b)
    return out.reshape(n, 1)


# ---------------------------------------------------------------------------
# Parameters (deterministic, xavier-normal like init_parameters)
# ---------------------------------------------------------------------------
def init_discriminator_params(key, input_size):
    params = {'convs': []}
    in_ch = 3
    figsize = input_size
    for idx, layer in enumerate(BLOCK_LIST):
        assert layer['kernel'] == 3 and layer['stride'] == 2
        k_sz, out_ch = layer['kernel'], layer['out_channel']
        key, wk, bk = jax.random.split(key, 3)
        fan_in, fan_out = in_ch * k_sz * k_sz, out_ch * k_sz * k_sz
        std = (2.0 / (fan_in + fan_out)) ** 0.5            # xavier_normal_
        w_torch = std * jax.random.normal(wk, (out_ch, in_ch, k_sz, k_sz), jnp.float32)
        b = 0.01 * jax.random.normal(bk, (out_ch,), jnp.float32)
        conv = {
            'w_torch': w_torch,                                          # f32 master
            'w': jnp.transpose(w_torch, (2, 3, 1, 0)).astype(jnp.bfloat16),  # [3,3,Cin,Cout]
            'b': b.reshape(1, out_ch),                                   # f32 (1, Cout)
        }
        if idx == 0:
            # K-packed (9*Cin, Cout) weight for the layer-1 im2col matmul.
            conv['w_k'] = jnp.transpose(w_torch, (2, 3, 1, 0)).reshape(
                k_sz * k_sz * in_ch, out_ch).astype(jnp.bfloat16)
        params['convs'].append(conv)
        in_ch = out_ch
        figsize //= layer['stride']

    in_features = figsize * figsize * in_ch
    key, wk = jax.random.split(key)
    std = (2.0 / (in_features + 1)) ** 0.5
    lin_w_torch = std * jax.random.normal(wk, (1, in_features), jnp.float32)
    params['lin_w_torch'] = lin_w_torch
    # torch .view flattens (C, H, W); pre-permute once so the fused kernel can
    # consume the NHWC conv output directly (no transpose at runtime).
    params['lin_w_hwc'] = jnp.transpose(
        lin_w_torch.reshape(in_ch, figsize, figsize), (1, 2, 0))    # [fs, fs, C] f32
    params['lin_b'] = jnp.zeros((1, 1), jnp.float32)                # init_parameters: 0
    params['figsize'] = figsize
    params['out_channel'] = in_ch
    return params


# ---------------------------------------------------------------------------
# Forward pass (matches Discriminator.forward, use_res=False)
# ---------------------------------------------------------------------------
def discriminator_forward(params, x_nchw):
    # PyTorch layout in, NHWC/bf16 internally.
    x = jnp.transpose(x_nchw, (0, 2, 3, 1)).astype(jnp.bfloat16)
    convs = params['convs']
    # Layer 1 (Cin=3): taps packed into the contraction dim, plain MXU matmul.
    x = conv1_im2col_matmul(x, convs[0]['w_k'], convs[0]['b'])
    # Middle layers: space-to-depth stride-2 conv kernels.
    for conv in convs[1:-1]:
        x = conv2d_s2_leaky(x, conv['w'], conv['b'])
    # Last conv with the output Linear fused into its epilogue.
    last = convs[-1]
    return conv2d_s2_leaky_fused_linear(x, last['w'], last['b'],
                                        params['lin_w_hwc'], params['lin_b'])


# ---------------------------------------------------------------------------
# Pure-JAX reference (f32) for a correctness check
# ---------------------------------------------------------------------------
def reference_forward(params, x_nchw):
    x = x_nchw.astype(jnp.float32)
    for conv in params['convs']:
        x = jax.lax.conv_general_dilated(
            x, conv['w_torch'], window_strides=(2, 2),
            padding=((1, 1), (1, 1)),
            dimension_numbers=('NCHW', 'OIHW', 'NCHW'),
            precision=jax.lax.Precision.HIGHEST)
        x = x + conv['b'].reshape(1, -1, 1, 1)
        x = jnp.where(x > 0, x, _NEG_SLOPE * x)
    n = x.shape[0]
    flat = x.reshape(n, -1)                        # NCHW flatten == torch .view
    return jnp.dot(flat, params['lin_w_torch'].T,
                   precision=jax.lax.Precision.HIGHEST) + params['lin_b']


if __name__ == "__main__":
    key = jax.random.PRNGKey(0)
    key, pkey, xkey = jax.random.split(key, 3)

    # 64 keeps shapes small but exercises the batched-row (wo % 8 == 0) path
    # in every conv layer; figsize = 64 // 8 = 8.
    INPUT_SIZE = 64
    BATCH = 2

    params = init_discriminator_params(pkey, INPUT_SIZE)
    x = jax.random.normal(xkey, (BATCH, 3, INPUT_SIZE, INPUT_SIZE), jnp.float32)

    fwd = jax.jit(discriminator_forward)
    out = jax.block_until_ready(fwd(params, x))
    assert out.shape == (BATCH, 1), out.shape

    ref = jax.block_until_ready(reference_forward(params, x))
    assert jnp.allclose(out, ref, rtol=0.1, atol=0.05), (out, ref)

    print("KERNEL_OK")
</pallas_src>

<mosaic_0001>
module attributes {stable_mosaic.version = 11 : i64} {
  func.func @_mm_bias_leaky_kernel(%arg0: i32, %arg1: memref<256x27xbf16, #tpu.memory_space<vmem>>, %arg2: memref<27x128xbf16, #tpu.memory_space<vmem>>, %arg3: memref<1x128xf32, #tpu.memory_space<vmem>>, %arg4: memref<256x128xbf16, #tpu.memory_space<vmem>>) attributes {dimension_semantics = [#tpu.dimension_semantics<parallel>], iteration_bounds = array<i64: 8>, scalar_prefetch = 0 : i64, scratch_operands = 0 : i64, tpu.core_type = #tpu.core_type<tc>, window_params = [{transform_indices = @transform_0, window_bounds = array<i64: 256, 27>}, {pipeline_mode = #tpu.pipeline_mode<synchronous>, transform_indices = @transform_1, window_bounds = array<i64: 27, 128>}, {pipeline_mode = #tpu.pipeline_mode<synchronous>, transform_indices = @transform_2, window_bounds = array<i64: 1, 128>}, {transform_indices = @transform_3, window_bounds = array<i64: 256, 128>}]} {
    %c0 = arith.constant 0 : index
    %c0_0 = arith.constant 0 : index
    %0 = vector.load %arg1[%c0, %c0_0] : memref<256x27xbf16, #tpu.memory_space<vmem>>, vector<256x27xbf16>
    %c0_1 = arith.constant 0 : index
    %c0_2 = arith.constant 0 : index
    %1 = vector.load %arg2[%c0_1, %c0_2] : memref<27x128xbf16, #tpu.memory_space<vmem>>, vector<27x128xbf16>
    %cst = arith.constant dense<0.000000e+00> : vector<256x128xf32>
    %2 = tpu.matmul %0, %1, %cst {dimension_numbers = #tpu.dot_dimension_numbers<[1], [0], [0], [1], [0, 0, 1, 1], [], []>} : vector<256x27xbf16>, vector<27x128xbf16>, vector<256x128xf32> -> vector<256x128xf32>
    %c0_3 = arith.constant 0 : index
    %c0_4 = arith.constant 0 : index
    %3 = vector.load %arg3[%c0_3, %c0_4] : memref<1x128xf32, #tpu.memory_space<vmem>>, vector<1x128xf32>
    %4 = vector.broadcast %3 : vector<1x128xf32> to vector<256x128xf32>
    %5 = arith.addf %2, %4 : vector<256x128xf32>
    %cst_5 = arith.constant 0.00999999977 : f32
    %6 = vector.broadcast %cst_5 : f32 to vector<256x128xf32>
    %7 = arith.mulf %6, %5 : vector<256x128xf32>
    %8 = arith.maximumf %5, %7 : vector<256x128xf32>
    %9 = arith.truncf %8 : vector<256x128xf32> to vector<256x128xbf16>
    %c0_6 = arith.constant 0 : index
    %c0_7 = arith.constant 0 : index
    %10 = vector.load %arg4[%c0_6, %c0_7] : memref<256x128xbf16, #tpu.memory_space<vmem>>, vector<256x128xbf16>
    tpu.vector_store %arg4[%c0_6, %c0_7], %9 {strides = array<i32>} : memref<256x128xbf16, #tpu.memory_space<vmem>>, vector<256x128xbf16>,
    return
  }
  func.func @transform_0(%arg0: i32) -> (i32, i32) {
    %c0_i32 = arith.constant 0 : i32
    %c0_i32_0 = arith.constant 0 : i32
    return %arg0, %c0_i32 : i32, i32
  }
  func.func @transform_1(%arg0: i32) -> (i32, i32) {
    %c0_i32 = arith.constant 0 : i32
    %c0_i32_0 = arith.constant 0 : i32
    %c0_i32_1 = arith.constant 0 : i32
    return %c0_i32, %c0_i32_0 : i32, i32
  }
  func.func @transform_2(%arg0: i32) -> (i32, i32) {
    %c0_i32 = arith.constant 0 : i32
    %c0_i32_0 = arith.constant 0 : i32
    %c0_i32_1 = arith.constant 0 : i32
    return %c0_i32, %c0_i32_0 : i32, i32
  }
  func.func @transform_3(%arg0: i32) -> (i32, i32) {
    %c0_i32 = arith.constant 0 : i32
    %c0_i32_0 = arith.constant 0 : i32
    return %arg0, %c0_i32 : i32, i32
  }
}

module attributes {stable_mosaic.version = 11 : i64} {
  func.func @_conv_s2_leaky_kernel(%arg0: i32, %arg1: i32, %arg2: i32, %arg3: memref<1x4x17x17x128xbf16, #tpu.memory_space<vmem>>, %arg4: memref<3x3x128x128xbf16, #tpu.memory_space<vmem>>, %arg5: memref<1x128xf32, #tpu.memory_space<vmem>>, %arg6: memref<1x16x16x128xbf16, #tpu.memory_space<vmem>>) attributes {dimension_semantics = [#tpu.dimension_semantics<parallel>, #tpu.dimension_semantics<parallel>, #tpu.dimension_semantics<parallel>], iteration_bounds = array<i64: 2, 2, 1>, scalar_prefetch = 0 : i64, scratch_operands = 0 : i64, tpu.core_type = #tpu.core_type<tc>, window_params = [{transform_indices = @transform_0, window_bounds = array<i64: 1, 4, 17, 17, 128>}, {transform_indices = @transform_1, window_bounds = array<i64: 3, 3, 128, 128>}, {transform_indices = @transform_2, window_bounds = array<i64: 1, 128>}, {transform_indices = @transform_3, window_bounds = array<i64: 1, 16, 16, 128>}]} {
    %c16_i32 = arith.constant 16 : i32
    %0 = arith.muli %arg2, %c16_i32 : i32
    %c0 = arith.constant 0 : index
    %c0_0 = arith.constant 0 : index
    %1 = vector.load %arg5[%c0, %c0_0] : memref<1x128xf32, #tpu.memory_space<vmem>>, vector<1x128xf32>
    %cst = arith.constant 0.000000e+00 : f32
    %2 = vector.broadcast %cst : f32 to vector<256x128xf32>
    %c0_i32 = arith.constant 0 : i32
    %3 = arith.addi %0, %c0_i32 : i32
    %c0_1 = arith.constant 0 : index
    %c0_2 = arith.constant 0 : index
    %4 = arith.index_cast %3 : i32 to index
    %c0_3 = arith.constant 0 : index
    %c0_4 = arith.constant 0 : index
    %5 = vector.load %arg3[%c0_1, %c0_2, %4, %c0_3, %c0_4] : memref<1x4x17x17x128xbf16, #tpu.memory_space<vmem>>, vector<1x1x16x16x128xbf16>
    %6 = vector.shape_cast %5 : vector<1x1x16x16x128xbf16> to vector<16x16x128xbf16>
    %7 = vector.shape_cast %6 : vector<16x16x128xbf16> to vector<256x128xbf16>
    %c0_5 = arith.constant 0 : index
    %c0_6 = arith.constant 0 : index
    %c0_7 = arith.constant 0 : index
    %c0_8 = arith.constant 0 : index
    %8 = vector.load %arg4[%c0_5, %c0_6, %c0_7, %c0_8] : memref<3x3x128x128xbf16, #tpu.memory_space<vmem>>, vector<1x1x128x128xbf16>
    %9 = vector.shape_cast %8 : vector<1x1x128x128xbf16> to vector<128x128xbf16>
    %cst_9 = arith.constant dense<0.000000e+00> : vector<256x128xf32>
    %10 = tpu.matmul %7, %9, %cst_9 {dimension_numbers = #tpu.dot_dimension_numbers<[1], [0], [0], [1], [0, 0, 1, 1], [], []>} : vector<256x128xbf16>, vector<128x128xbf16>, vector<256x128xf32> -> vector<256x128xf32>
    %11 = arith.addf %2, %10 : vector<256x128xf32>
    %c0_i32_10 = arith.constant 0 : i32
    %12 = arith.addi %0, %c0_i32_10 : i32
    %c0_11 = arith.constant 0 : index
    %c1 = arith.constant 1 : index
    %13 = arith.index_cast %12 : i32 to index
    %c0_12 = arith.constant 0 : index
    %c0_13 = arith.constant 0 : index
    %14 = vector.load %arg3[%c0_11, %c1, %13, %c0_12, %c0_13] : memref<1x4x17x17x128xbf16, #tpu.memory_space<vmem>>, vector<1x1x16x16x128xbf16>
    %15 = vector.shape_cast %14 : vector<1x1x16x16x128xbf16> to vector<16x16x128xbf16>
    %16 = vector.shape_cast %15 : vector<16x16x128xbf16> to vector<256x128xbf16>
    %c0_14 = arith.constant 0 : index
    %c1_15 = arith.constant 1 : index
    %c0_16 = arith.constant 0 : index
    %c0_17 = arith.constant 0 : index
    %17 = vector.load %arg4[%c0_14, %c1_15, %c0_16, %c0_17] : memref<3x3x128x128xbf16, #tpu.memory_space<vmem>>, vector<1x1x128x128xbf16>
    %18 = vector.shape_cast %17 : vector<1x1x128x128xbf16> to vector<128x128xbf16>
    %cst_18 = arith.constant dense<0.000000e+00> : vector<256x128xf32>
    %19 = tpu.matmul %16, %18, %cst_18 {dimension_numbers = #tpu.dot_dimension_numbers<[1], [0], [0], [1], [0, 0, 1, 1], [], []>} : vector<256x128xbf16>, vector<128x128xbf16>, vector<256x128xf32> -> vector<256x128xf32>
    %20 = arith.addf %11, %19 : vector<256x128xf32>
    %c0_i32_19 = arith.constant 0 : i32
    %21 = arith.addi %0, %c0_i32_19 : i32
    %c0_20 = arith.constant 0 : index
    %c0_21 = arith.constant 0 : index
    %22 = arith.index_cast %21 : i32 to index
    %c1_22 = arith.constant 1 : index
    %c0_23 = arith.constant 0 : index
    %23 = vector.load %arg3[%c0_20, %c0_21, %22, %c1_22, %c0_23] : memref<1x4x17x17x128xbf16, #tpu.memory_space<vmem>>, vector<1x1x16x16x128xbf16>
    %24 = vector.shape_cast %23 : vector<1x1x16x16x128xbf16> to vector<16x16x128xbf16>
    %25 = vector.shape_cast %24 : vector<16x16x128xbf16> to vector<256x128xbf16>
    %c0_24 = arith.constant 0 : index
    %c2 = arith.constant 2 : index
    %c0_25 = arith.constant 0 : index
    %c0_26 = arith.constant 0 : index
    %26 = vector.load %arg4[%c0_24, %c2, %c0_25, %c0_26] : memref<3x3x128x128xbf16, #tpu.memory_space<vmem>>, vector<1x1x128x128xbf16>
    %27 = vector.shape_cast %26 : vector<1x1x128x128xbf16> to vector<128x128xbf16>
    %cst_27 = arith.constant dense<0.000000e+00> : vector<256x128xf32>
    %28 = tpu.matmul %25, %27, %cst_27 {dimension_numbers = #tpu.dot_dimension_numbers<[1], [0], [0], [1], [0, 0, 1, 1], [], []>} : vector<256x128xbf16>, vector<128x128xbf16>, vector<256x128xf32> -> vector<256x128xf32>
    %29 = arith.addf %20, %28 : vector<256x128xf32>
    %c0_i32_28 = arith.constant 0 : i32
    %30 = arith.addi %0, %c0_i32_28 : i32
    %c0_29 = arith.constant 0 : index
    %c2_30 = arith.constant 2 : index
    %31 = arith.index_cast %30 : i32 to index
    %c0_31 = arith.constant 0 : index
    %c0_32 = arith.constant 0 : index
    %32 = vector.load %arg3[%c0_29, %c2_30, %31, %c0_31, %c0_32] : memref<1x4x17x17x128xbf16, #tpu.memory_space<vmem>>, vector<1x1x16x16x128xbf16>
    %33 = vector.shape_cast %32 : vector<1x1x16x16x128xbf16> to vector<16x16x128xbf16>
    %34 = vector.shape_cast %33 : vector<16x16x128xbf16> to vector<256x128xbf16>
    %c1_33 = arith.constant 1 : index
    %c0_34 = arith.constant 0 : index
    %c0_35 = arith.constant 0 : index
    %c0_36 = arith.constant 0 : index
    %35 = vector.load %arg4[%c1_33, %c0_34, %c0_35, %c0_36] : memref<3x3x128x128xbf16, #tpu.memory_space<vmem>>, vector<1x1x128x128xbf16>
    %36 = vector.shape_cast %35 : vector<1x1x128x128xbf16> to vector<128x128xbf16>
    %cst_37 = arith.constant dense<0.000000e+00> : vector<256x128xf32>
    %37 = tpu.matmul %34, %36, %cst_37 {dimension_numbers = #tpu.dot_dimension_numbers<[1], [0], [0], [1], [0, 0, 1, 1], [], []>} : vector<256x128xbf16>, vector<128x128xbf16>, vector<256x128xf32> -> vector<256x128xf32>
    %38 = arith.addf %29, %37 : vector<256x128xf32>
    %c0_i32_38 = arith.constant 0 : i32
    %39 = arith.addi %0, %c0_i32_38 : i32
    %c0_39 = arith.constant 0 : index
    %c3 = arith.constant 3 : index
    %40 = arith.index_cast %39 : i32 to index
    %c0_40 = arith.constant 0 : index
    %c0_41 = arith.constant 0 : index
    %41 = vector.load %arg3[%c0_39, %c3, %40, %c0_40, %c0_41] : memref<1x4x17x17x128xbf16, #tpu.memory_space<vmem>>, vector<1x1x16x16x128xbf16>
    %42 = vector.shape_cast %41 : vector<1x1x16x16x128xbf16> to vector<16x16x128xbf16>
    %43 = vector.shape_cast %42 : vector<16x16x128xbf16> to vector<256x128xbf16>
    %c1_42 = arith.constant 1 : index
    %c1_43 = arith.constant 1 : index
    %c0_44 = arith.constant 0 : index
    %c0_45 = arith.constant 0 : index
    %44 = vector.load %arg4[%c1_42, %c1_43, %c0_44, %c0_45] : memref<3x3x128x128xbf16, #tpu.memory_space<vmem>>, vector<1x1x128x128xbf16>
    %45 = vector.shape_cast %44 : vector<1x1x128x128xbf16> to vector<128x128xbf16>
    %cst_46 = arith.constant dense<0.000000e+00> : vector<256x128xf32>
    %46 = tpu.matmul %43, %45, %cst_46 {dimension_numbers = #tpu.dot_dimension_numbers<[1], [0], [0], [1], [0, 0, 1, 1], [], []>} : vector<256x128xbf16>, vector<128x128xbf16>, vector<256x128xf32> -> vector<256x128xf32>
    %47 = arith.addf %38, %46 : vector<256x128xf32>
    %c0_i32_47 = arith.constant 0 : i32
    %48 = arith.addi %0, %c0_i32_47 : i32
    %c0_48 = arith.constant 0 : index
    %c2_49 = arith.constant 2 : index
    %49 = arith.index_cast %48 : i32 to index
    %c1_50 = arith.constant 1 : index
    %c0_51 = arith.constant 0 : index
    %50 = vector.load %arg3[%c0_48, %c2_49, %49, %c1_50, %c0_51] : memref<1x4x17x17x128xbf16, #tpu.memory_space<vmem>>, vector<1x1x16x16x128xbf16>
    %51 = vector.shape_cast %50 : vector<1x1x16x16x128xbf16> to vector<16x16x128xbf16>
    %52 = vector.shape_cast %51 : vector<16x16x128xbf16> to vector<256x128xbf16>
    %c1_52 = arith.constant 1 : index
    %c2_53 = arith.constant 2 : index
    %c0_54 = arith.constant 0 : index
    %c0_55 = arith.constant 0 : index
    %53 = vector.load %arg4[%c1_52, %c2_53, %c0_54, %c0_55] : memref<3x3x128x128xbf16, #tpu.memory_space<vmem>>, vector<1x1x128x128xbf16>
    %54 = vector.shape_cast %53 : vector<1x1x128x128xbf16> to vector<128x128xbf16>
    %cst_56 = arith.constant dense<0.000000e+00> : vector<256x128xf32>
    %55 = tpu.matmul %52, %54, %cst_56 {dimension_numbers = #tpu.dot_dimension_numbers<[1], [0], [0], [1], [0, 0, 1, 1], [], []>} : vector<256x128xbf16>, vector<128x128xbf16>, vector<256x128xf32> -> vector<256x128xf32>
    %56 = arith.addf %47, %55 : vector<256x128xf32>
    %c1_i32 = arith.constant 1 : i32
    %57 = arith.addi %0, %c1_i32 : i32
    %c0_57 = arith.constant 0 : index
    %c0_58 = arith.constant 0 : index
    %58 = arith.index_cast %57 : i32 to index
    %c0_59 = arith.constant 0 : index
    %c0_60 = arith.constant 0 : index
    %59 = vector.load %arg3[%c0_57, %c0_58, %58, %c0_59, %c0_60] : memref<1x4x17x17x128xbf16, #tpu.memory_space<vmem>>, vector<1x1x16x16x128xbf16>
    %60 = vector.shape_cast %59 : vector<1x1x16x16x128xbf16> to vector<16x16x128xbf16>
    %61 = vector.shape_cast %60 : vector<16x16x128xbf16> to vector<256x128xbf16>
    %c2_61 = arith.constant 2 : index
    %c0_62 = arith.constant 0 : index
    %c0_63 = arith.constant 0 : index
    %c0_64 = arith.constant 0 : index
    %62 = vector.load %arg4[%c2_61, %c0_62, %c0_63, %c0_64] : memref<3x3x128x128xbf16, #tpu.memory_space<vmem>>, vector<1x1x128x128xbf16>
    %63 = vector.shape_cast %62 : vector<1x1x128x128xbf16> to vector<128x128xbf16>
    %cst_65 = arith.constant dense<0.000000e+00> : vector<256x128xf32>
    %64 = tpu.matmul %61, %63, %cst_65 {dimension_numbers = #tpu.dot_dimension_numbers<[1], [0], [0], [1], [0, 0, 1, 1], [], []>} : vector<256x128xbf16>, vector<128x128xbf16>, vector<256x128xf32> -> vector<256x128xf32>
    %65 = arith.addf %56, %64 : vector<256x128xf32>
    %c1_i32_66 = arith.constant 1 : i32
    %66 = arith.addi %0, %c1_i32_66 : i32
    %c0_67 = arith.constant 0 : index
    %c1_68 = arith.constant 1 : index
    %67 = arith.index_cast %66 : i32 to index
    %c0_69 = arith.constant 0 : index
    %c0_70 = arith.constant 0 : index
    %68 = vector.load %arg3[%c0_67, %c1_68, %67, %c0_69, %c0_70] : memref<1x4x17x17x128xbf16, #tpu.memory_space<vmem>>, vector<1x1x16x16x128xbf16>
    %69 = vector.shape_cast %68 : vector<1x1x16x16x128xbf16> to vector<16x16x128xbf16>
    %70 = vector.shape_cast %69 : vector<16x16x128xbf16> to vector<256x128xbf16>
    %c2_71 = arith.constant 2 : index
    %c1_72 = arith.constant 1 : index
    %c0_73 = arith.constant 0 : index
    %c0_74 = arith.constant 0 : index
    %71 = vector.load %arg4[%c2_71, %c1_72, %c0_73, %c0_74] : memref<3x3x128x128xbf16, #tpu.memory_space<vmem>>, vector<1x1x128x128xbf16>
    %72 = vector.shape_cast %71 : vector<1x1x128x128xbf16> to vector<128x128xbf16>
    %cst_75 = arith.constant dense<0.000000e+00> : vector<256x128xf32>
    %73 = tpu.matmul %70, %72, %cst_75 {dimension_numbers = #tpu.dot_dimension_numbers<[1], [0], [0], [1], [0, 0, 1, 1], [], []>} : vector<256x128xbf16>, vector<128x128xbf16>, vector<256x128xf32> -> vector<256x128xf32>
    %74 = arith.addf %65, %73 : vector<256x128xf32>
    %c1_i32_76 = arith.constant 1 : i32
    %75 = arith.addi %0, %c1_i32_76 : i32
    %c0_77 = arith.constant 0 : index
    %c0_78 = arith.constant 0 : index
    %76 = arith.index_cast %75 : i32 to index
    %c1_79 = arith.constant 1 : index
    %c0_80 = arith.constant 0 : index
    %77 = vector.load %arg3[%c0_77, %c0_78, %76, %c1_79, %c0_80] : memref<1x4x17x17x128xbf16, #tpu.memory_space<vmem>>, vector<1x1x16x16x128xbf16>
    %78 = vector.shape_cast %77 : vector<1x1x16x16x128xbf16> to vector<16x16x128xbf16>
    %79 = vector.shape_cast %78 : vector<16x16x128xbf16> to vector<256x128xbf16>
    %c2_81 = arith.constant 2 : index
    %c2_82 = arith.constant 2 : index
    %c0_83 = arith.constant 0 : index
    %c0_84 = arith.constant 0 : index
    %80 = vector.load %arg4[%c2_81, %c2_82, %c0_83, %c0_84] : memref<3x3x128x128xbf16, #tpu.memory_space<vmem>>, vector<1x1x128x128xbf16>
    %81 = vector.shape_cast %80 : vector<1x1x128x128xbf16> to vector<128x128xbf16>
    %cst_85 = arith.constant dense<0.000000e+00> : vector<256x128xf32>
    %82 = tpu.matmul %79, %81, %cst_85 {dimension_numbers = #tpu.dot_dimension_numbers<[1], [0], [0], [1], [0, 0, 1, 1], [], []>} : vector<256x128xbf16>, vector<128x128xbf16>, vector<256x128xf32> -> vector<256x128xf32>
    %83 = arith.addf %74, %82 : vector<256x128xf32>
    %84 = vector.broadcast %1 : vector<1x128xf32> to vector<256x128xf32>
    %85 = arith.addf %83, %84 : vector<256x128xf32>
    %cst_86 = arith.constant 0.00999999977 : f32
    %86 = vector.broadcast %cst_86 : f32 to vector<256x128xf32>
    %87 = arith.mulf %86, %85 : vector<256x128xf32>
    %88 = arith.maximumf %85, %87 : vector<256x128xf32>
    %89 = vector.shape_cast %88 : vector<256x128xf32> to vector<16x16x128xf32>
    %90 = arith.truncf %89 : vector<16x16x128xf32> to vector<16x16x128xbf16>
    %c0_87 = arith.constant 0 : index
    %c0_88 = arith.constant 0 : index
    %c0_89 = arith.constant 0 : index
    %c0_90 = arith.constant 0 : index
    %91 = vector.load %arg6[%c0_87, %c0_88, %c0_89, %c0_90] : memref<1x16x16x128xbf16, #tpu.memory_space<vmem>>, vector<1x16x16x128xbf16>
    %92 = vector.shape_cast %91 : vector<1x16x16x128xbf16> to vector<16x16x128xbf16>
    %93 = vector.shape_cast %90 : vector<16x16x128xbf16> to vector<1x16x16x128xbf16>
    tpu.vector_store %arg6[%c0_87, %c0_88, %c0_89, %c0_90], %93 {strides = array<i32>} : memref<1x16x16x128xbf16, #tpu.memory_space<vmem>>, vector<1x16x16x128xbf16>,
    return
  }
  func.func @transform_0(%arg0: i32, %arg1: i32, %arg2: i32) -> (i32, i32, i32, i32, i32) {
    %c0_i32 = arith.constant 0 : i32
    %c0_i32_0 = arith.constant 0 : i32
    %c0_i32_1 = arith.constant 0 : i32
    %c0_i32_2 = arith.constant 0 : i32
    %c0_i32_3 = arith.constant 0 : i32
    return %arg0, %c0_i32, %c0_i32_0, %c0_i32_1, %c0_i32_2 : i32, i32, i32, i32, i32
  }
  func.func @transform_1(%arg0: i32, %arg1: i32, %arg2: i32) -> (i32, i32, i32, i32) {
    %c0_i32 = arith.constant 0 : i32
    %c0_i32_0 = arith.constant 0 : i32
    %c0_i32_1 = arith.constant 0 : i32
    %c0_i32_2 = arith.constant 0 : i32
    return %c0_i32, %c0_i32_0, %c0_i32_1, %arg1 : i32, i32, i32, i32
  }
  func.func @transform_2(%arg0: i32, %arg1: i32, %arg2: i32) -> (i32, i32) {
    %c0_i32 = arith.constant 0 : i32
    %c0_i32_0 = arith.constant 0 : i32
    return %c0_i32, %arg1 : i32, i32
  }
  func.func @transform_3(%arg0: i32, %arg1: i32, %arg2: i32) -> (i32, i32, i32, i32) {
    %c0_i32 = arith.constant 0 : i32
    %c0_i32_0 = arith.constant 0 : i32
    return %arg0, %arg2, %c0_i32, %arg1 : i32, i32, i32, i32
  }
}

module attributes {stable_mosaic.version = 11 : i64} {
  func.func @_conv_s2_leaky_linear_kernel(%arg0: i32, %arg1: i32, %arg2: i32, %arg3: memref<1x4x9x9x256xbf16, #tpu.memory_space<vmem>>, %arg4: memref<3x3x256x128xbf16, #tpu.memory_space<vmem>>, %arg5: memref<1x128xf32, #tpu.memory_space<vmem>>, %arg6: memref<8x8x128xf32, #tpu.memory_space<vmem>>, %arg7: memref<1x1xf32, #tpu.memory_space<vmem>>, %arg8: memref<1x1x1xf32, #tpu.memory_space<vmem>>, %arg9: memref<1x1xf32, #tpu.memory_space<vmem>>) attributes {dimension_semantics = [#tpu.dimension_semantics<parallel>, #tpu.dimension_semantics<arbitrary>, #tpu.dimension_semantics<arbitrary>], iteration_bounds = array<i64: 2, 2, 1>, scalar_prefetch = 0 : i64, scratch_operands = 1 : i64, tpu.core_type = #tpu.core_type<tc>, window_params = [{transform_indices = @transform_0, window_bounds = array<i64: 1, 4, 9, 9, 256>}, {transform_indices = @transform_1, window_bounds = array<i64: 3, 3, 256, 128>}, {transform_indices = @transform_2, window_bounds = array<i64: 1, 128>}, {transform_indices = @transform_3, window_bounds = array<i64: 8, 8, 128>}, {pipeline_mode = #tpu.pipeline_mode<synchronous>, transform_indices = @transform_4, window_bounds = array<i64: 1, 1>}, {transform_indices = @transform_5, window_bounds = array<i64: 1, 1, 1>}]} {
    %c8_i32 = arith.constant 8 : i32
    %0 = arith.muli %arg2, %c8_i32 : i32
    %c0 = arith.constant 0 : index
    %c0_0 = arith.constant 0 : index
    %1 = vector.load %arg5[%c0, %c0_0] : memref<1x128xf32, #tpu.memory_space<vmem>>, vector<1x128xf32>
    %c0_i32 = arith.constant 0 : i32
    %2 = arith.cmpi eq, %arg1, %c0_i32 : i32
    %c0_i32_1 = arith.constant 0 : i32
    %3 = arith.cmpi eq, %arg2, %c0_i32_1 : i32
    %4 = arith.andi %2, %3 : i1
    %5 = arith.extui %4 : i1 to i32
    %c0_i32_2 = arith.constant 0 : i32
    %6 = arith.cmpi ne, %5, %c0_i32_2 : i32
    scf.if %6 {
      %cst_102 = arith.constant 0.000000e+00 : f32
      %109 = vector.broadcast %cst_102 : f32 to vector<1x1xf32>
      %c0_103 = arith.constant 0 : index
      %c0_104 = arith.constant 0 : index
      %110 = vector.load %arg9[%c0_103, %c0_104] : memref<1x1xf32, #tpu.memory_space<vmem>>, vector<1x1xf32>
      tpu.vector_store %arg9[%c0_103, %c0_104], %109 {strides = array<i32>} : memref<1x1xf32, #tpu.memory_space<vmem>>, vector<1x1xf32>,
    } else {
    }
    %cst = arith.constant 0.000000e+00 : f32
    %7 = vector.broadcast %cst : f32 to vector<64x128xf32>
    %c0_i32_3 = arith.constant 0 : i32
    %8 = arith.addi %0, %c0_i32_3 : i32
    %c0_4 = arith.constant 0 : index
    %c0_5 = arith.constant 0 : index
    %9 = arith.index_cast %8 : i32 to index
    %c0_6 = arith.constant 0 : index
    %c0_7 = arith.constant 0 : index
    %10 = vector.load %arg3[%c0_4, %c0_5, %9, %c0_6, %c0_7] : memref<1x4x9x9x256xbf16, #tpu.memory_space<vmem>>, vector<1x1x8x8x256xbf16>
    %11 = vector.shape_cast %10 : vector<1x1x8x8x256xbf16> to vector<8x8x256xbf16>
    %12 = vector.shape_cast %11 : vector<8x8x256xbf16> to vector<64x256xbf16>
    %c0_8 = arith.constant 0 : index
    %c0_9 = arith.constant 0 : index
    %c0_10 = arith.constant 0 : index
    %c0_11 = arith.constant 0 : index
    %13 = vector.load %arg4[%c0_8, %c0_9, %c0_10, %c0_11] : memref<3x3x256x128xbf16, #tpu.memory_space<vmem>>, vector<1x1x256x128xbf16>
    %14 = vector.shape_cast %13 : vector<1x1x256x128xbf16> to vector<256x128xbf16>
    %cst_12 = arith.constant dense<0.000000e+00> : vector<64x128xf32>
    %15 = tpu.matmul %12, %14, %cst_12 {dimension_numbers = #tpu.dot_dimension_numbers<[1], [0], [0], [1], [0, 0, 1, 1], [], []>} : vector<64x256xbf16>, vector<256x128xbf16>, vector<64x128xf32> -> vector<64x128xf32>
    %16 = arith.addf %7, %15 : vector<64x128xf32>
    %c0_i32_13 = arith.constant 0 : i32
    %17 = arith.addi %0, %c0_i32_13 : i32
    %c0_14 = arith.constant 0 : index
    %c1 = arith.constant 1 : index
    %18 = arith.index_cast %17 : i32 to index
    %c0_15 = arith.constant 0 : index
    %c0_16 = arith.constant 0 : index
    %19 = vector.load %arg3[%c0_14, %c1, %18, %c0_15, %c0_16] : memref<1x4x9x9x256xbf16, #tpu.memory_space<vmem>>, vector<1x1x8x8x256xbf16>
    %20 = vector.shape_cast %19 : vector<1x1x8x8x256xbf16> to vector<8x8x256xbf16>
    %21 = vector.shape_cast %20 : vector<8x8x256xbf16> to vector<64x256xbf16>
    %c0_17 = arith.constant 0 : index
    %c1_18 = arith.constant 1 : index
    %c0_19 = arith.constant 0 : index
    %c0_20 = arith.constant 0 : index
    %22 = vector.load %arg4[%c0_17, %c1_18, %c0_19, %c0_20] : memref<3x3x256x128xbf16, #tpu.memory_space<vmem>>, vector<1x1x256x128xbf16>
    %23 = vector.shape_cast %22 : vector<1x1x256x128xbf16> to vector<256x128xbf16>
    %cst_21 = arith.constant dense<0.000000e+00> : vector<64x128xf32>
    %24 = tpu.matmul %21, %23, %cst_21 {dimension_numbers = #tpu.dot_dimension_numbers<[1], [0], [0], [1], [0, 0, 1, 1], [], []>} : vector<64x256xbf16>, vector<256x128xbf16>, vector<64x128xf32> -> vector<64x128xf32>
    %25 = arith.addf %16, %24 : vector<64x128xf32>
    %c0_i32_22 = arith.constant 0 : i32
    %26 = arith.addi %0, %c0_i32_22 : i32
    %c0_23 = arith.constant 0 : index
    %c0_24 = arith.constant 0 : index
    %27 = arith.index_cast %26 : i32 to index
    %c1_25 = arith.constant 1 : index
    %c0_26 = arith.constant 0 : index
    %28 = vector.load %arg3[%c0_23, %c0_24, %27, %c1_25, %c0_26] : memref<1x4x9x9x256xbf16, #tpu.memory_space<vmem>>, vector<1x1x8x8x256xbf16>
    %29 = vector.shape_cast %28 : vector<1x1x8x8x256xbf16> to vector<8x8x256xbf16>
    %30 = vector.shape_cast %29 : vector<8x8x256xbf16> to vector<64x256xbf16>
    %c0_27 = arith.constant 0 : index
    %c2 = arith.constant 2 : index
    %c0_28 = arith.constant 0 : index
    %c0_29 = arith.constant 0 : index
    %31 = vector.load %arg4[%c0_27, %c2, %c0_28, %c0_29] : memref<3x3x256x128xbf16, #tpu.memory_space<vmem>>, vector<1x1x256x128xbf16>
    %32 = vector.shape_cast %31 : vector<1x1x256x128xbf16> to vector<256x128xbf16>
    %cst_30 = arith.constant dense<0.000000e+00> : vector<64x128xf32>
    %33 = tpu.matmul %30, %32, %cst_30 {dimension_numbers = #tpu.dot_dimension_numbers<[1], [0], [0], [1], [0, 0, 1, 1], [], []>} : vector<64x256xbf16>, vector<256x128xbf16>, vector<64x128xf32> -> vector<64x128xf32>
    %34 = arith.addf %25, %33 : vector<64x128xf32>
    %c0_i32_31 = arith.constant 0 : i32
    %35 = arith.addi %0, %c0_i32_31 : i32
    %c0_32 = arith.constant 0 : index
    %c2_33 = arith.constant 2 : index
    %36 = arith.index_cast %35 : i32 to index
    %c0_34 = arith.constant 0 : index
    %c0_35 = arith.constant 0 : index
    %37 = vector.load %arg3[%c0_32, %c2_33, %36, %c0_34, %c0_35] : memref<1x4x9x9x256xbf16, #tpu.memory_space<vmem>>, vector<1x1x8x8x256xbf16>
    %38 = vector.shape_cast %37 : vector<1x1x8x8x256xbf16> to vector<8x8x256xbf16>
    %39 = vector.shape_cast %38 : vector<8x8x256xbf16> to vector<64x256xbf16>
    %c1_36 = arith.constant 1 : index
    %c0_37 = arith.constant 0 : index
    %c0_38 = arith.constant 0 : index
    %c0_39 = arith.constant 0 : index
    %40 = vector.load %arg4[%c1_36, %c0_37, %c0_38, %c0_39] : memref<3x3x256x128xbf16, #tpu.memory_space<vmem>>, vector<1x1x256x128xbf16>
    %41 = vector.shape_cast %40 : vector<1x1x256x128xbf16> to vector<256x128xbf16>
    %cst_40 = arith.constant dense<0.000000e+00> : vector<64x128xf32>
    %42 = tpu.matmul %39, %41, %cst_40 {dimension_numbers = #tpu.dot_dimension_numbers<[1], [0], [0], [1], [0, 0, 1, 1], [], []>} : vector<64x256xbf16>, vector<256x128xbf16>, vector<64x128xf32> -> vector<64x128xf32>
    %43 = arith.addf %34, %42 : vector<64x128xf32>
    %c0_i32_41 = arith.constant 0 : i32
    %44 = arith.addi %0, %c0_i32_41 : i32
    %c0_42 = arith.constant 0 : index
    %c3 = arith.constant 3 : index
    %45 = arith.index_cast %44 : i32 to index
    %c0_43 = arith.constant 0 : index
    %c0_44 = arith.constant 0 : index
    %46 = vector.load %arg3[%c0_42, %c3, %45, %c0_43, %c0_44] : memref<1x4x9x9x256xbf16, #tpu.memory_space<vmem>>, vector<1x1x8x8x256xbf16>
    %47 = vector.shape_cast %46 : vector<1x1x8x8x256xbf16> to vector<8x8x256xbf16>
    %48 = vector.shape_cast %47 : vector<8x8x256xbf16> to vector<64x256xbf16>
    %c1_45 = arith.constant 1 : index
    %c1_46 = arith.constant 1 : index
    %c0_47 = arith.constant 0 : index
    %c0_48 = arith.constant 0 : index
    %49 = vector.load %arg4[%c1_45, %c1_46, %c0_47, %c0_48] : memref<3x3x256x128xbf16, #tpu.memory_space<vmem>>, vector<1x1x256x128xbf16>
    %50 = vector.shape_cast %49 : vector<1x1x256x128xbf16> to vector<256x128xbf16>
    %cst_49 = arith.constant dense<0.000000e+00> : vector<64x128xf32>
    %51 = tpu.matmul %48, %50, %cst_49 {dimension_numbers = #tpu.dot_dimension_numbers<[1], [0], [0], [1], [0, 0, 1, 1], [], []>} : vector<64x256xbf16>, vector<256x128xbf16>, vector<64x128xf32> -> vector<64x128xf32>
    %52 = arith.addf %43, %51 : vector<64x128xf32>
    %c0_i32_50 = arith.constant 0 : i32
    %53 = arith.addi %0, %c0_i32_50 : i32
    %c0_51 = arith.constant 0 : index
    %c2_52 = arith.constant 2 : index
    %54 = arith.index_cast %53 : i32 to index
    %c1_53 = arith.constant 1 : index
    %c0_54 = arith.constant 0 : index
    %55 = vector.load %arg3[%c0_51, %c2_52, %54, %c1_53, %c0_54] : memref<1x4x9x9x256xbf16, #tpu.memory_space<vmem>>, vector<1x1x8x8x256xbf16>
    %56 = vector.shape_cast %55 : vector<1x1x8x8x256xbf16> to vector<8x8x256xbf16>
    %57 = vector.shape_cast %56 : vector<8x8x256xbf16> to vector<64x256xbf16>
    %c1_55 = arith.constant 1 : index
    %c2_56 = arith.constant 2 : index
    %c0_57 = arith.constant 0 : index
    %c0_58 = arith.constant 0 : index
    %58 = vector.load %arg4[%c1_55, %c2_56, %c0_57, %c0_58] : memref<3x3x256x128xbf16, #tpu.memory_space<vmem>>, vector<1x1x256x128xbf16>
    %59 = vector.shape_cast %58 : vector<1x1x256x128xbf16> to vector<256x128xbf16>
    %cst_59 = arith.constant dense<0.000000e+00> : vector<64x128xf32>
    %60 = tpu.matmul %57, %59, %cst_59 {dimension_numbers = #tpu.dot_dimension_numbers<[1], [0], [0], [1], [0, 0, 1, 1], [], []>} : vector<64x256xbf16>, vector<256x128xbf16>, vector<64x128xf32> -> vector<64x128xf32>
    %61 = arith.addf %52, %60 : vector<64x128xf32>
    %c1_i32 = arith.constant 1 : i32
    %62 = arith.addi %0, %c1_i32 : i32
    %c0_60 = arith.constant 0 : index
    %c0_61 = arith.constant 0 : index
    %63 = arith.index_cast %62 : i32 to index
    %c0_62 = arith.constant 0 : index
    %c0_63 = arith.constant 0 : index
    %64 = vector.load %arg3[%c0_60, %c0_61, %63, %c0_62, %c0_63] : memref<1x4x9x9x256xbf16, #tpu.memory_space<vmem>>, vector<1x1x8x8x256xbf16>
    %65 = vector.shape_cast %64 : vector<1x1x8x8x256xbf16> to vector<8x8x256xbf16>
    %66 = vector.shape_cast %65 : vector<8x8x256xbf16> to vector<64x256xbf16>
    %c2_64 = arith.constant 2 : index
    %c0_65 = arith.constant 0 : index
    %c0_66 = arith.constant 0 : index
    %c0_67 = arith.constant 0 : index
    %67 = vector.load %arg4[%c2_64, %c0_65, %c0_66, %c0_67] : memref<3x3x256x128xbf16, #tpu.memory_space<vmem>>, vector<1x1x256x128xbf16>
    %68 = vector.shape_cast %67 : vector<1x1x256x128xbf16> to vector<256x128xbf16>
    %cst_68 = arith.constant dense<0.000000e+00> : vector<64x128xf32>
    %69 = tpu.matmul %66, %68, %cst_68 {dimension_numbers = #tpu.dot_dimension_numbers<[1], [0], [0], [1], [0, 0, 1, 1], [], []>} : vector<64x256xbf16>, vector<256x128xbf16>, vector<64x128xf32> -> vector<64x128xf32>
    %70 = arith.addf %61, %69 : vector<64x128xf32>
    %c1_i32_69 = arith.constant 1 : i32
    %71 = arith.addi %0, %c1_i32_69 : i32
    %c0_70 = arith.constant 0 : index
    %c1_71 = arith.constant 1 : index
    %72 = arith.index_cast %71 : i32 to index
    %c0_72 = arith.constant 0 : index
    %c0_73 = arith.constant 0 : index
    %73 = vector.load %arg3[%c0_70, %c1_71, %72, %c0_72, %c0_73] : memref<1x4x9x9x256xbf16, #tpu.memory_space<vmem>>, vector<1x1x8x8x256xbf16>
    %74 = vector.shape_cast %73 : vector<1x1x8x8x256xbf16> to vector<8x8x256xbf16>
    %75 = vector.shape_cast %74 : vector<8x8x256xbf16> to vector<64x256xbf16>
    %c2_74 = arith.constant 2 : index
    %c1_75 = arith.constant 1 : index
    %c0_76 = arith.constant 0 : index
    %c0_77 = arith.constant 0 : index
    %76 = vector.load %arg4[%c2_74, %c1_75, %c0_76, %c0_77] : memref<3x3x256x128xbf16, #tpu.memory_space<vmem>>, vector<1x1x256x128xbf16>
    %77 = vector.shape_cast %76 : vector<1x1x256x128xbf16> to vector<256x128xbf16>
    %cst_78 = arith.constant dense<0.000000e+00> : vector<64x128xf32>
    %78 = tpu.matmul %75, %77, %cst_78 {dimension_numbers = #tpu.dot_dimension_numbers<[1], [0], [0], [1], [0, 0, 1, 1], [], []>} : vector<64x256xbf16>, vector<256x128xbf16>, vector<64x128xf32> -> vector<64x128xf32>
    %79 = arith.addf %70, %78 : vector<64x128xf32>
    %c1_i32_79 = arith.constant 1 : i32
    %80 = arith.addi %0, %c1_i32_79 : i32
    %c0_80 = arith.constant 0 : index
    %c0_81 = arith.constant 0 : index
    %81 = arith.index_cast %80 : i32 to index
    %c1_82 = arith.constant 1 : index
    %c0_83 = arith.constant 0 : index
    %82 = vector.load %arg3[%c0_80, %c0_81, %81, %c1_82, %c0_83] : memref<1x4x9x9x256xbf16, #tpu.memory_space<vmem>>, vector<1x1x8x8x256xbf16>
    %83 = vector.shape_cast %82 : vector<1x1x8x8x256xbf16> to vector<8x8x256xbf16>
    %84 = vector.shape_cast %83 : vector<8x8x256xbf16> to vector<64x256xbf16>
    %c2_84 = arith.constant 2 : index
    %c2_85 = arith.constant 2 : index
    %c0_86 = arith.constant 0 : index
    %c0_87 = arith.constant 0 : index
    %85 = vector.load %arg4[%c2_84, %c2_85, %c0_86, %c0_87] : memref<3x3x256x128xbf16, #tpu.memory_space<vmem>>, vector<1x1x256x128xbf16>
    %86 = vector.shape_cast %85 : vector<1x1x256x128xbf16> to vector<256x128xbf16>
    %cst_88 = arith.constant dense<0.000000e+00> : vector<64x128xf32>
    %87 = tpu.matmul %84, %86, %cst_88 {dimension_numbers = #tpu.dot_dimension_numbers<[1], [0], [0], [1], [0, 0, 1, 1], [], []>} : vector<64x256xbf16>, vector<256x128xbf16>, vector<64x128xf32> -> vector<64x128xf32>
    %88 = arith.addf %79, %87 : vector<64x128xf32>
    %89 = vector.broadcast %1 : vector<1x128xf32> to vector<64x128xf32>
    %90 = arith.addf %88, %89 : vector<64x128xf32>
    %cst_89 = arith.constant 0.00999999977 : f32
    %91 = vector.broadcast %cst_89 : f32 to vector<64x128xf32>
    %92 = arith.mulf %91, %90 : vector<64x128xf32>
    %93 = arith.maximumf %90, %92 : vector<64x128xf32>
    %c0_90 = arith.constant 0 : index
    %c0_91 = arith.constant 0 : index
    %c0_92 = arith.constant 0 : index
    %94 = vector.load %arg6[%c0_90, %c0_91, %c0_92] : memref<8x8x128xf32, #tpu.memory_space<vmem>>, vector<8x8x128xf32>
    %95 = vector.shape_cast %94 : vector<8x8x128xf32> to vector<64x128xf32>
    %96 = arith.mulf %93, %95 : vector<64x128xf32>
    %cst_93 = arith.constant dense<0.000000e+00> : vector<64xf32>
    %97 = vector.multi_reduction <add>, %96, %cst_93 [1] : vector<64x128xf32> to vector<64xf32>
    %98 = vector.shape_cast %97 : vector<64xf32> to vector<64x1xf32>
    %cst_94 = arith.constant dense<0.000000e+00> : vector<1xf32>
    %99 = vector.multi_reduction <add>, %98, %cst_94 [0] : vector<64x1xf32> to vector<1xf32>
    %100 = vector.shape_cast %99 : vector<1xf32> to vector<1x1xf32>
    %c0_95 = arith.constant 0 : index
    %c0_96 = arith.constant 0 : index
    %101 = vector.load %arg9[%c0_95, %c0_96] : memref<1x1xf32, #tpu.memory_space<vmem>>, vector<1x1xf32>
    %102 = arith.addf %101, %100 : vector<1x1xf32>
    %c0_97 = arith.constant 0 : index
    %c0_98 = arith.constant 0 : index
    %103 = vector.load %arg9[%c0_97, %c0_98] : memref<1x1xf32, #tpu.memory_space<vmem>>, vector<1x1xf32>
    tpu.vector_store %arg9[%c0_97, %c0_98], %102 {strides = array<i32>} : memref<1x1xf32, #tpu.memory_space<vmem>>, vector<1x1xf32>,
    %c1_i32_99 = arith.constant 1 : i32
    %104 = arith.cmpi eq, %arg1, %c1_i32_99 : i32
    %c0_i32_100 = arith.constant 0 : i32
    %105 = arith.cmpi eq, %arg2, %c0_i32_100 : i32
    %106 = arith.andi %104, %105 : i1
    %107 = arith.extui %106 : i1 to i32
    %c0_i32_101 = arith.constant 0 : i32
    %108 = arith.cmpi ne, %107, %c0_i32_101 : i32
    scf.if %108 {
      %c0_102 = arith.constant 0 : index
      %c0_103 = arith.constant 0 : index
      %109 = vector.load %arg9[%c0_102, %c0_103] : memref<1x1xf32, #tpu.memory_space<vmem>>, vector<1x1xf32>
      %c0_104 = arith.constant 0 : index
      %c0_105 = arith.constant 0 : index
      %110 = vector.load %arg7[%c0_104, %c0_105] : memref<1x1xf32, #tpu.memory_space<vmem>>, vector<1x1xf32>
      %111 = arith.addf %109, %110 : vector<1x1xf32>
      %112 = vector.shape_cast %111 : vector<1x1xf32> to vector<1x1x1xf32>
      %c0_106 = arith.constant 0 : index
      %c0_107 = arith.constant 0 : index
      %c0_108 = arith.constant 0 : index
      %113 = vector.load %arg8[%c0_106, %c0_107, %c0_108] : memref<1x1x1xf32, #tpu.memory_space<vmem>>, vector<1x1x1xf32>
      tpu.vector_store %arg8[%c0_106, %c0_107, %c0_108], %112 {strides = array<i32>} : memref<1x1x1xf32, #tpu.memory_space<vmem>>, vector<1x1x1xf32>,
    } else {
    }
    return
  }
  func.func @transform_0(%arg0: i32, %arg1: i32, %arg2: i32) -> (i32, i32, i32, i32, i32) {
    %c0_i32 = arith.constant 0 : i32
    %c0_i32_0 = arith.constant 0 : i32
    %c0_i32_1 = arith.constant 0 : i32
    %c0_i32_2 = arith.constant 0 : i32
    %c0_i32_3 = arith.constant 0 : i32
    return %arg0, %c0_i32, %c0_i32_0, %c0_i32_1, %c0_i32_2 : i32, i32, i32, i32, i32
  }
  func.func @transform_1(%arg0: i32, %arg1: i32, %arg2: i32) -> (i32, i32, i32, i32) {
    %c0_i32 = arith.constant 0 : i32
    %c0_i32_0 = arith.constant 0 : i32
    %c0_i32_1 = arith.constant 0 : i32
    %c0_i32_2 = arith.constant 0 : i32
    return %c0_i32, %c0_i32_0, %c0_i32_1, %arg1 : i32, i32, i32, i32
  }
  func.func @transform_2(%arg0: i32, %arg1: i32, %arg2: i32) -> (i32, i32) {
    %c0_i32 = arith.constant 0 : i32
    %c0_i32_0 = arith.constant 0 : i32
    return %c0_i32, %arg1 : i32, i32
  }
  func.func @transform_3(%arg0: i32, %arg1: i32, %arg2: i32) -> (i32, i32, i32) {
    %c0_i32 = arith.constant 0 : i32
    %c0_i32_0 = arith.constant 0 : i32
    return %arg2, %c0_i32, %arg1 : i32, i32, i32
  }
  func.func @transform_4(%arg0: i32, %arg1: i32, %arg2: i32) -> (i32, i32) {
    %c0_i32 = arith.constant 0 : i32
    %c0_i32_0 = arith.constant 0 : i32
    %c0_i32_1 = arith.constant 0 : i32
    return %c0_i32, %c0_i32_0 : i32, i32
  }
  func.func @transform_5(%arg0: i32, %arg1: i32, %arg2: i32) -> (i32, i32, i32) {
    %c0_i32 = arith.constant 0 : i32
    %c0_i32_0 = arith.constant 0 : i32
    %c0_i32_1 = arith.constant 0 : i32
    return %arg0, %c0_i32, %c0_i32_0 : i32, i32, i32
  }
}

</mosaic_0001>

<bundles_post_ra>
// kernel: discriminator_forward.3
= control target key start
LH: loop header
LB: loop body
LE: loop exit
PB: predicated region body
PF: predicated region fallthrough
CT: control target
= control target key end

     0   :  { %s1125_s12 = smov 0   ;;  %s1244_s0 = inlined_call_operand.vmem [shape: bf16[2048,27], index: 0, kind: input, shape index: {}]   ;;  %s1245_s1 = inlined_call_operand.vmem [shape: bf16[27,128], index: 1, kind: input, shape index: {}]   ;;  %s1246_s2 = inlined_call_operand.vmem [shape: f32[1,128], index: 2, kind: input, shape index: {}]   ;;  %s1247_s3 = inlined_call_operand.vmem [shape: bf16[2048,128], index: 3, kind: output, shape index: {}]  }
   0x1 LB: > { %s806_s13 = sadd.s32 4294967295, %s1102_s12   ;;  %p810_p0 = scmp.ge.s32.totalorder %s1102_s12, 1  ;;  %s1102_s12 = sphi %s1125_s12, %s13_s12  }
   0x2   : > { %p138_p1 = scmp.lt.s32.totalorder %s1102_s12, 9 }
   0x4   : > { %p139_p2 = pnand %p810_p0, %p138_p1 }
   0x5   : > { %s811_s16 = sshll.u32 (!%p139_p2), %s806_s13, 5 }
   0x6   : > { %142 = sbr.rel (%p139_p2) target bundleno = 256 (0x100), region = 32  ;;  %p163_p3 = scmp.lt.s32.totalorder (!%p139_p2), %s811_s16, 255 }
   0xb   : > { %v1078_v0 = vld [vmem:[%s1245_s1 + $0x8] sm:$0x3f]   ;;  %vm358_vm0 = vcmask 1044480   ;;  %vm359_vm1 = vcmask 1045504   ;;  %v1104_v1 = vmov 65535   ;;  %v1079_v5 = vld [vmem:[%s1245_s1] sm:$0xff]  }
   0xc   : > { %v360_v2 = vsel %vm358_vm0, 4294967295, %v1104_v1  ;;  %s1249_s16 = smov (!%p163_p3, %s811_s16), 255  ;;  %vm309_vm2 = vcmask 220160   ;;  %v1184_v22 = vld [vmem:[%s1246_s2] ss:$0 sm:$0xff] }
   0xd   : > { %v361_v3 = vsel %vm359_vm1, %v360_v2, 0  ;;  %s812_s19 = sshll.u32 %s1249_s16, 2 }
   0xe   : > { %v363_v4 = vand.u32 %v1078_v0, %v361_v3  ;;  %s1147_s22 = scalar_lea.vmem %s1244_s0, %s812_s19  ;;  %s1201_s27 = scalar_lea.vmem %s1247_s3, %s812_s19 }
   0xf   : > { %v1080_v6 = vld [vmem:[%s1147_s22] sm:$0xff]   ;;  %v1082_v8 = vld [vmem:[%s1147_s22 + $0x8] sm:$0xff]   ;;  %v1084_v10 = vld [vmem:[%s1147_s22 + $0x10] sm:$0xff]  }
  0x10   : > { %1029 = vmatprep.subr.bf16.mxu0 %v363_v4  ;;  %1065 = vmatprep.subr.bf16.mxu1 %v363_v4  ;;  %v1081_v7 = vld [vmem:[%s1147_s22 + $0x40] sm:$0xff]   ;;  %v1083_v9 = vld [vmem:[%s1147_s22 + $0x48] sm:$0xff]   ;;  %v1085_v11 = vld [vmem:[%s1147_s22 + $0x50] sm:$0xff]  }
  0x11   : > { %1030 = vmatpush3.bf16.msra.mxu0 %v363_v4  ;;  %1067 = vmatpush3.bf16.msra.mxu1 %v363_v4  ;;  %v1086_v12 = vld [vmem:[%s1147_s22 + $0x18] sm:$0xff]   ;;  %v1088_v14 = vld [vmem:[%s1147_s22 + $0x20] sm:$0xff]   ;;  %v1090_v16 = vld [vmem:[%s1147_s22 + $0x28] sm:$0xff]  }
  0x12   : > { %1031 = vmatprep.subr.bf16.mxu0 %v1079_v5  ;;  %1066 = vmatprep.subr.bf16.mxu1 %v1079_v5  ;;  %v1087_v13 = vld [vmem:[%s1147_s22 + $0x58] sm:$0xff]   ;;  %v1089_v15 = vld [vmem:[%s1147_s22 + $0x60] sm:$0xff]   ;;  %v1091_v17 = vld [vmem:[%s1147_s22 + $0x68] sm:$0xff]  }
  0x13   : > { %1033 = vmatprep.mubr.msk.bf16.mxu0 %vm309_vm2, %v1080_v6  ;;  %1049 = vmatprep.mubr.msk.bf16.mxu1 %vm309_vm2, %v1081_v7  ;;  %v1092_v18 = vld [vmem:[%s1147_s22 + $0x30] sm:$0xff]   ;;  %v1094_v20 = vld [vmem:[%s1147_s22 + $0x38] sm:$0xff]  }
  0x14   : > { %v1093_v19 = vld [vmem:[%s1147_s22 + $0x70] sm:$0xff]   ;;  %v1095_v21 = vld [vmem:[%s1147_s22 + $0x78] sm:$0xff]  }
  0x15   : > { %1032 = vmatpush3.bf16.msra.mxu0 %v1079_v5  ;;  %1068 = vmatpush3.bf16.msra.mxu1 %v1079_v5 }
  0x18   : > { %1034 = vmatmul.mubr.msk.bf16.vlgmr.msra.gmra.mxu0 %vm309_vm2, %v1082_v8  ;;  %1050 = vmatmul.mubr.msk.bf16.vlgmr.msra.gmra.mxu1 %vm309_vm2, %v1083_v9 }
  0x19   : > { %1037 = vmatprep.mubr.msk.bf16.mxu0 %vm309_vm2, %v1084_v10  ;;  %1053 = vmatprep.mubr.msk.bf16.mxu1 %vm309_vm2, %v1085_v11 }
  0x20   : > { %1038 = vmatmul.mubr.msk.bf16.gmra.mxu0 %vm309_vm2, %v1086_v12  ;;  %1054 = vmatmul.mubr.msk.bf16.gmra.mxu1 %vm309_vm2, %v1087_v13 }
  0x21   : > { %1041 = vmatprep.mubr.msk.bf16.mxu0 %vm309_vm2, %v1088_v14  ;;  %1057 = vmatprep.mubr.msk.bf16.mxu1 %vm309_vm2, %v1089_v15 }
  0x28   : > { %1042 = vmatmul.mubr.msk.bf16.gmra.mxu0 %vm309_vm2, %v1090_v16  ;;  %1058 = vmatmul.mubr.msk.bf16.gmra.mxu1 %vm309_vm2, %v1091_v17 }
  0x29   : > { %1045 = vmatprep.mubr.msk.bf16.mxu0 %vm309_vm2, %v1092_v18  ;;  %1061 = vmatprep.mubr.msk.bf16.mxu1 %vm309_vm2, %v1093_v19 }
  0x30   : > { %1046 = vmatmul.mubr.msk.bf16.gmra.mxu0 %vm309_vm2, %v1094_v20  ;;  %1062 = vmatmul.mubr.msk.bf16.gmra.mxu1 %vm309_vm2, %v1095_v21 }
  0xd8   : > { %v1035_v23 = vpop.f32.mrf.mxu0  ;;  %v1051_v24 = vpop.f32.mrf.mxu1 }
  0xd9   : > { %v408_v25 = vadd.f32 %v1035_v23, %v1184_v22  ;;  %v472_v26 = vadd.f32 %v1051_v24, %v1184_v22 }
  0xda   : > { %v399_v27 = vpop.f32.mrf.mxu0  ;;  %v463_v28 = vpop.f32.mrf.mxu1 }
  0xdb   : > { %v400_v29 = vadd.f32 %v1184_v22, %v399_v27  ;;  %v464_v30 = vadd.f32 %v1184_v22, %v463_v28  ;;  %v528_v33 = vmul.f32 0.01, %v408_v25  ;;  %v544_v34 = vmul.f32 0.01, %v472_v26 }
  0xdc   : > { %v1036_v31 = vpop.f32.mrf.mxu0  ;;  %v1052_v32 = vpop.f32.mrf.mxu1 }
  0xdd   : > { %v411_v35 = vadd.f32 %v1036_v31, %v1184_v22  ;;  %v475_v36 = vadd.f32 %v1052_v32, %v1184_v22  ;;  %v526_v39 = vmul.f32 0.01, %v400_v29  ;;  %v542_v40 = vmul.f32 0.01, %v464_v30 }
  0xde   : > { %v402_v37 = vpop.f32.mrf.mxu0  ;;  %v466_v38 = vpop.f32.mrf.mxu1  ;;  %v560_v47 = vmax.f32 %v408_v25, %v528_v33  ;;  %v576_v48 = vmax.f32 %v472_v26, %v544_v34 }
  0xdf   : > { %v403_v41 = vadd.f32 %v1184_v22, %v402_v37  ;;  %v467_v42 = vadd.f32 %v1184_v22, %v466_v38  ;;  %v529_v43 = vmul.f32 0.01, %v411_v35  ;;  %v545_v44 = vmul.f32 0.01, %v475_v36 }
  0xe0   : > { %v1039_v45 = vpop.f32.mrf.mxu0  ;;  %v1055_v46 = vpop.f32.mrf.mxu1  ;;  %v558_v57 = vmax.f32 %v400_v29, %v526_v39  ;;  %v574_v58 = vmax.f32 %v464_v30, %v542_v40 }
  0xe1   : > { %v527_v49 = vmul.f32 0.01, %v403_v41  ;;  %v543_v50 = vmul.f32 0.01, %v467_v42  ;;  %v561_v51 = vmax.f32 %v411_v35, %v529_v43  ;;  %v577_v52 = vmax.f32 %v475_v36, %v545_v44 }
  0xe2   : > { %v424_v53 = vadd.f32 %v1039_v45, %v1184_v22  ;;  %v488_v54 = vadd.f32 %v1055_v46, %v1184_v22  ;;  %v415_v55 = vpop.f32.mrf.mxu0  ;;  %v479_v56 = vpop.f32.mrf.mxu1 }
  0xe3   : > { %v559_v59 = vmax.f32 %v403_v41, %v527_v49  ;;  %v575_v60 = vmax.f32 %v467_v42, %v543_v50  ;;  %v924_v61 = vpack.c.bf16 %v561_v51, %v560_v47  ;;  %v964_v62 = vpack.c.bf16 %v577_v52, %v576_v48 }
  0xe4   : > { %v416_v63 = vadd.f32 %v1184_v22, %v415_v55  ;;  %v480_v0 = vadd.f32 %v1184_v22, %v479_v56  ;;  %v1040_v1 = vpop.f32.mrf.mxu0  ;;  %v1056_v2 = vpop.f32.mrf.mxu1  ;;  %v532_v5 = vmul.f32 0.01, %v424_v53  ;;  %v548_v6 = vmul.f32 0.01, %v488_v54 }
  0xe5   : > { %v919_v3 = vpack.c.bf16 %v559_v59, %v558_v57  ;;  %v959_v4 = vpack.c.bf16 %v575_v60, %v574_v58  ;;  %996 = vst [vmem:[%s1201_s27 + $0x8] sm:$0xff] %v924_v61   ;;  %1004 = vst [vmem:[%s1201_s27 + $0x48] sm:$0xff] %v964_v62   ;;  %v427_v7 = vadd.f32 %v1040_v1, %v1184_v22 }
  0xe6   : > { %v491_v8 = vadd.f32 %v1056_v2, %v1184_v22  ;;  %v418_v9 = vpop.f32.mrf.mxu0  ;;  %v482_v10 = vpop.f32.mrf.mxu1  ;;  %v530_v11 = vmul.f32 0.01, %v416_v63  ;;  %v546_v12 = vmul.f32 0.01, %v480_v0  ;;  %v564_v24 = vmax.f32 %v424_v53, %v532_v5 }
  0xe7   : > { %920 = vst [vmem:[%s1201_s27] sm:$0xff] %v919_v3   ;;  %1003 = vst [vmem:[%s1201_s27 + $0x40] sm:$0xff] %v959_v4   ;;  %v419_v13 = vadd.f32 %v1184_v22, %v418_v9  ;;  %v483_v14 = vadd.f32 %v1184_v22, %v482_v10  ;;  %v533_v15 = vmul.f32 0.01, %v427_v7  ;;  %v580_v25 = vmax.f32 %v488_v54, %v548_v6 }
  0xe8   : > { %v549_v16 = vmul.f32 0.01, %v491_v8  ;;  %v1043_v17 = vpop.f32.mrf.mxu0  ;;  %v1059_v18 = vpop.f32.mrf.mxu1  ;;  %v562_v30 = vmax.f32 %v416_v63, %v530_v11  ;;  %v578_v31 = vmax.f32 %v480_v0, %v546_v12 }
  0xe9   : > { %v531_v19 = vmul.f32 0.01, %v419_v13  ;;  %v547_v20 = vmul.f32 0.01, %v483_v14  ;;  %v440_v21 = vadd.f32 %v1043_v17, %v1184_v22  ;;  %v504_v23 = vadd.f32 %v1059_v18, %v1184_v22 }
  0xea   : > { %v565_v26 = vmax.f32 %v427_v7, %v533_v15  ;;  %v581_v27 = vmax.f32 %v491_v8, %v549_v16  ;;  %v431_v28 = vpop.f32.mrf.mxu0  ;;  %v495_v29 = vpop.f32.mrf.mxu1 }
  0xeb   : > { %v563_v32 = vmax.f32 %v419_v13, %v531_v19  ;;  %v579_v33 = vmax.f32 %v483_v14, %v547_v20  ;;  %v432_v36 = vadd.f32 %v1184_v22, %v431_v28  ;;  %v496_v37 = vadd.f32 %v1184_v22, %v495_v29 }
  0xec   : > { %v934_v34 = vpack.c.bf16 %v565_v26, %v564_v24  ;;  %v974_v35 = vpack.c.bf16 %v581_v27, %v580_v25  ;;  %v1044_v38 = vpop.f32.mrf.mxu0  ;;  %v1060_v39 = vpop.f32.mrf.mxu1  ;;  %v536_v42 = vmul.f32 0.01, %v440_v21  ;;  %v552_v43 = vmul.f32 0.01, %v504_v23 }
  0xed   : > { %v929_v40 = vpack.c.bf16 %v563_v32, %v562_v30  ;;  %v969_v41 = vpack.c.bf16 %v579_v33, %v578_v31  ;;  %v443_v44 = vadd.f32 %v1044_v38, %v1184_v22  ;;  %v507_v45 = vadd.f32 %v1060_v39, %v1184_v22 }
  0xee   : > { %998 = vst [vmem:[%s1201_s27 + $0x18] sm:$0xff] %v934_v34   ;;  %1006 = vst [vmem:[%s1201_s27 + $0x58] sm:$0xff] %v974_v35   ;;  %v434_v46 = vpop.f32.mrf.mxu0  ;;  %v498_v47 = vpop.f32.mrf.mxu1  ;;  %v534_v48 = vmul.f32 0.01, %v432_v36  ;;  %v550_v49 = vmul.f32 0.01, %v496_v37  ;;  %v568_v56 = vmax.f32 %v440_v21, %v536_v42  ;;  %v584_v57 = vmax.f32 %v504_v23, %v552_v43 }
  0xef   : > { %997 = vst [vmem:[%s1201_s27 + $0x10] sm:$0xff] %v929_v40   ;;  %1005 = vst [vmem:[%s1201_s27 + $0x50] sm:$0xff] %v969_v41   ;;  %v435_v50 = vadd.f32 %v1184_v22, %v434_v46  ;;  %v499_v51 = vadd.f32 %v1184_v22, %v498_v47  ;;  %v537_v52 = vmul.f32 0.01, %v443_v44  ;;  %v553_v53 = vmul.f32 0.01, %v507_v45 }
  0xf0   : > { %v1047_v54 = vpop.f32.mrf.mxu0  ;;  %v1063_v55 = vpop.f32.mrf.mxu1  ;;  %v566_v2 = vmax.f32 %v432_v36, %v534_v48  ;;  %v582_v3 = vmax.f32 %v496_v37, %v550_v49 }
  0xf1   : > { %v535_v58 = vmul.f32 0.01, %v435_v50  ;;  %v551_v59 = vmul.f32 0.01, %v499_v51  ;;  %v569_v60 = vmax.f32 %v443_v44, %v537_v52  ;;  %v585_v61 = vmax.f32 %v507_v45, %v553_v53 }
  0xf2   : > { %v456_v62 = vadd.f32 %v1047_v54, %v1184_v22  ;;  %v520_v63 = vadd.f32 %v1063_v55, %v1184_v22  ;;  %v447_v0 = vpop.f32.mrf.mxu0  ;;  %v511_v1 = vpop.f32.mrf.mxu1 }
  0xf3   : > { %v567_v4 = vmax.f32 %v435_v50, %v535_v58  ;;  %v583_v5 = vmax.f32 %v499_v51, %v551_v59  ;;  %v944_v6 = vpack.c.bf16 %v569_v60, %v568_v56  ;;  %v984_v7 = vpack.c.bf16 %v585_v61, %v584_v57 }
  0xf4   : > { %v448_v8 = vadd.f32 %v1184_v22, %v447_v0  ;;  %v512_v9 = vadd.f32 %v1184_v22, %v511_v1  ;;  %v1048_v10 = vpop.f32.mrf.mxu0  ;;  %v1064_v11 = vpop.f32.mrf.mxu1  ;;  %v540_v14 = vmul.f32 0.01, %v456_v62  ;;  %v556_v15 = vmul.f32 0.01, %v520_v63 }
  0xf5   : > { %v939_v12 = vpack.c.bf16 %v567_v4, %v566_v2  ;;  %v979_v13 = vpack.c.bf16 %v583_v5, %v582_v3  ;;  %1000 = vst [vmem:[%s1201_s27 + $0x28] sm:$0xff] %v944_v6   ;;  %1008 = vst [vmem:[%s1201_s27 + $0x68] sm:$0xff] %v984_v7   ;;  %v459_v16 = vadd.f32 %v1048_v10, %v1184_v22 }
  0xf6   : > { %v523_v17 = vadd.f32 %v1064_v11, %v1184_v22  ;;  %v450_v18 = vpop.f32.mrf.mxu0  ;;  %v514_v19 = vpop.f32.mrf.mxu1  ;;  %v538_v20 = vmul.f32 0.01, %v448_v8  ;;  %v554_v21 = vmul.f32 0.01, %v512_v9  ;;  %v572_v29 = vmax.f32 %v456_v62, %v540_v14 }
  0xf7   : > { %999 = vst [vmem:[%s1201_s27 + $0x20] sm:$0xff] %v939_v12   ;;  %1007 = vst [vmem:[%s1201_s27 + $0x60] sm:$0xff] %v979_v13   ;;  %v451_v23 = vadd.f32 %v1184_v22, %v450_v18  ;;  %v515_v24 = vadd.f32 %v1184_v22, %v514_v19  ;;  %v541_v25 = vmul.f32 0.01, %v459_v16  ;;  %v588_v30 = vmax.f32 %v520_v63, %v556_v15 }
  0xf8   : > { %v557_v26 = vmul.f32 0.01, %v523_v17  ;;  %v570_v33 = vmax.f32 %v448_v8, %v538_v20  ;;  %v586_v34 = vmax.f32 %v512_v9, %v554_v21 }
  0xf9   : > { %v539_v27 = vmul.f32 0.01, %v451_v23  ;;  %v555_v28 = vmul.f32 0.01, %v515_v24  ;;  %v573_v31 = vmax.f32 %v459_v16, %v541_v25 }
  0xfa   : > { %v589_v32 = vmax.f32 %v523_v17, %v557_v26 }
  0xfb   : > { %v571_v35 = vmax.f32 %v451_v23, %v539_v27  ;;  %v587_v36 = vmax.f32 %v515_v24, %v555_v28  ;;  %v954_v37 = vpack.c.bf16 %v573_v31, %v572_v29 }
  0xfc   : > { %v994_v38 = vpack.c.bf16 %v589_v32, %v588_v30 }
  0xfd   : > { %v949_v39 = vpack.c.bf16 %v571_v35, %v570_v33  ;;  %v989_v22 = vpack.c.bf16 %v587_v36, %v586_v34  ;;  %1002 = vst [vmem:[%s1201_s27 + $0x38] sm:$0xff] %v954_v37  }
  0xfe   : > { %1010 = vst [vmem:[%s1201_s27 + $0x78] sm:$0xff] %v994_v38  }
  0xff   : > { %1001 = vst [vmem:[%s1201_s27 + $0x30] sm:$0xff] %v949_v39   ;;  %1009 = vst [vmem:[%s1201_s27 + $0x70] sm:$0xff] %v989_v22  }
 0x100 PF: > { %s13_s12 = sadd.s32 1, %s1102_s12  }
 0x101   : > { %p10_p4 = scmp.ge.s32.totalorder %s13_s12, 10  }
 0x103   :  { %12 = sbr.rel (!%p10_p4) target bundleno = 1 (0x1), region = 62 }

// kernel: discriminator_forward.4
= control target key start
LH: loop header
LB: loop body
LE: loop exit
PB: predicated region body
PF: predicated region fallthrough
CT: control target
= control target key end

     0   :  { %s7708_s12 = smov 0   ;;  %s7710_s13 = smov 0   ;;  %s9275_s0 = inlined_call_operand.vmem [shape: bf16[2,4,17,17,128], index: 0, kind: input, shape index: {}]   ;;  %s9276_s1 = inlined_call_operand.vmem [shape: bf16[3,3,128,256], index: 1, kind: input, shape index: {}]   ;;  %s9277_s2 = inlined_call_operand.vmem [shape: f32[1,256], index: 2, kind: input, shape index: {}]   ;;  %s9278_s3 = inlined_call_operand.vmem [shape: bf16[2,16,16,256], index: 3, kind: output, shape index: {}]  }
   0x1   :  { %s7712_s14 = smov 0   ;;  %s7714_s15 = smov 0  }
   0x2   :  { %s7716_s16 = smov 0   ;;  %s7718_s17 = smov 0  }
   0x3   :  { %s7720_s18 = smov 0   ;;  %s7722_s19 = smov 0  }
   0x4   :  { %s7724_s20 = smov 0  }
   0x5 LB: > { %s5936_s21 = sadd.s32 4294967295, %s7686_s20   ;;  %s28_s22 = sadd.s32 1, %s7678_s18  ;;  %s7686_s20 = sphi %s7724_s20, %s13_s20   ;;  %s7682_s19 = sphi %s7722_s19, %s9289_s19   ;;  %s7678_s18 = sphi %s7720_s18, %s9288_s18   ;;  %s7674_s17 = sphi %s7718_s17, %s9287_s17   ;;  %s7670_s16 = sphi %s7716_s16, %s9286_s16   ;;  %s7666_s15 = sphi %s7714_s15, %s9285_s15   ;;  %s7662_s14 = sphi %s7712_s14, %s9284_s14   ;;  %s7658_s13 = sphi %s7710_s13, %s9283_s13   ;;  %s7654_s12 = sphi %s7708_s12, %s9282_s12  }
   0x6   : > { %p30_p0 = scmp.ge.s32.totalorder %s28_s22, 2  ;;  %s32_s23 = sadd.s32 1, %s7682_s19 }
   0x7   : > { %s65_s24 = sadd.s32 1, %s7666_s15  ;;  %p72_p1 = scmp.ne.s32.totalorder %s7666_s15, %s7662_s14 }
   0x8   : > { %s9291_s22 = smov (%p30_p0, %s28_s22), 0  ;;  %s9293_s23 = smov (!%p30_p0, %s32_s23), %s7682_s19 }
   0x9   : > { %s62_s25 = ssub.s32 %s7678_s18, %s9291_s22  ;;  %p73_p2 = scmp.eq.s32.totalorder %s7686_s20, 0 }
   0xa   : > { %p34_p3 = scmp.ge.s32.totalorder %s9293_s23, 2  ;;  %p63_p4 = scmp.eq.s32.totalorder %s62_s25, 0 }
   0xb   : > { %p74_p5 = por %p73_p2, %p72_p1  ;;  %s121_s26 = sadd.s32 1, %s7658_s13 }
   0xc   : > { %s9295_s23 = smov (%p34_p3, %s9293_s23), 0  ;;  %p131_p6 = scmp.ne.s32.totalorder %s7658_s13, %s7654_s12 }
   0xd   : > { %s7769_s27 = scalar_select %p63_p4, %s7666_s15, %s65_s24  }
   0xe   : > { %s114_s28 = ssub.s32 %s7682_s19, %s9295_s23  ;;  %p132_p7 = scmp.eq.s32.totalorder %s5936_s21, 3 }
   0xf   : > { %s118_s29 = sor.u32 %s114_s28, %s62_s25  ;;  %p5939_p10 = scmp.ge.s32.totalorder %s7686_s20, 4 }
  0x10   : > { %p119_p8 = scmp.eq.s32.totalorder %s118_s29, 0  ;;  %p7775_p9 = por %p132_p7, %p131_p6 }
  0x11   : > { %154 = sbr.rel (%p5939_p10) target bundleno = 122 (0x7a), region = 16 }
  0x12   : > { %s7780_s4 = scalar_select %p119_p8, %s7658_s13, %s121_s26  }
  0x16   : > { %165 = sbr.rel (!%p74_p5) target bundleno = 122 (0x7a), region = 24  ;;  %s167_s5 = sand.u32 (%p74_p5), 1, %s7666_s15  }
  0x17   : > { %s5940_s6 = sshll.u32 (%p74_p5), %s7678_s18, 2  ;;  %s7373_s7 = smul.u32 (%p74_p5), 576, %s167_s5 }
  0x18   : > { %s7788_s10 = scalar_lea.vmem (%p74_p5), %s9276_s1, %s5940_s6 }
  0x19   : > { %v188_v0 = vld [vmem:[%s7788_s10] sm:$0xf] (%p74_p5)  ;;  %v190_v1 = vld [vmem:[%s7788_s10 + $0x8] sm:$0xf] (%p74_p5)  ;;  %v192_v2 = vld [vmem:[%s7788_s10 + $0x10] sm:$0xf] (%p74_p5) }
  0x1a   : > { %v194_v3 = vld [vmem:[%s7788_s10 + $0x18] sm:$0xf] (%p74_p5)  ;;  %v196_v4 = vld [vmem:[%s7788_s10 + $0x20] sm:$0xf] (%p74_p5)  ;;  %s7795_s11 = scalar_lea.vmem (%p74_p5), [#allocation2], %s7373_s7 }
  0x1b   : > { %189 = vst [vmem:[%s7795_s11] sm:$0xf] %v188_v0  ;;  %191 = vst [vmem:[%s7795_s11 + $0x4] sm:$0xf] %v190_v1  ;;  %v198_v5 = vld [vmem:[%s7788_s10 + $0x28] sm:$0xf] }
  0x1c   : > { %193 = vst [vmem:[%s7795_s11 + $0x8] sm:$0xf] %v192_v2  ;;  %195 = vst [vmem:[%s7795_s11 + $0xc] sm:$0xf] %v194_v3  ;;  %v200_v6 = vld [vmem:[%s7788_s10 + $0x30] sm:$0xf] }
  0x1d   : > { %197 = vst [vmem:[%s7795_s11 + $0x10] sm:$0xf] %v196_v4  ;;  %v202_v7 = vld [vmem:[%s7788_s10 + $0x38] sm:$0xf]  ;;  %199 = vst [vmem:[%s7795_s11 + $0x14] sm:$0xf] %v198_v5 }
  0x1e   : > { %201 = vst [vmem:[%s7795_s11 + $0x18] sm:$0xf] %v200_v6  ;;  %203 = vst [vmem:[%s7795_s11 + $0x1c] sm:$0xf] %v202_v7  ;;  %v204_v8 = vld [vmem:[%s7788_s10 + $0x40] sm:$0xf] }
  0x1f   : > { %v206_v9 = vld [vmem:[%s7788_s10 + $0x48] sm:$0xf]  ;;  %v208_v10 = vld [vmem:[%s7788_s10 + $0x50] sm:$0xf]  ;;  %205 = vst [vmem:[%s7795_s11 + $0x20] sm:$0xf] %v204_v8 }
  0x20   : > { %207 = vst [vmem:[%s7795_s11 + $0x24] sm:$0xf] %v206_v9  ;;  %209 = vst [vmem:[%s7795_s11 + $0x28] sm:$0xf] %v208_v10  ;;  %v210_v11 = vld [vmem:[%s7788_s10 + $0x58] sm:$0xf] }
  0x21   : > { %v212_v12 = vld [vmem:[%s7788_s10 + $0x60] sm:$0xf]  ;;  %v214_v13 = vld [vmem:[%s7788_s10 + $0x68] sm:$0xf]  ;;  %211 = vst [vmem:[%s7795_s11 + $0x2c] sm:$0xf] %v210_v11 }
  0x22   : > { %213 = vst [vmem:[%s7795_s11 + $0x30] sm:$0xf] %v212_v12  ;;  %215 = vst [vmem:[%s7795_s11 + $0x34] sm:$0xf] %v214_v13  ;;  %v216_v14 = vld [vmem:[%s7788_s10 + $0x70] sm:$0xf] }
  0x23   : > { %v218_v15 = vld [vmem:[%s7788_s10 + $0x78] sm:$0xf]  ;;  %v220_v16 = vld [vmem:[%s7788_s10 + $0x80] sm:$0xf]  ;;  %217 = vst [vmem:[%s7795_s11 + $0x38] sm:$0xf] %v216_v14 }
  0x24   : > { %219 = vst [vmem:[%s7795_s11 + $0x3c] sm:$0xf] %v218_v15  ;;  %221 = vst [vmem:[%s7795_s11 + $0x40] sm:$0xf] %v220_v16  ;;  %v222_v17 = vld [vmem:[%s7788_s10 + $0x88] sm:$0xf] }
  0x25   : > { %v224_v18 = vld [vmem:[%s7788_s10 + $0x90] sm:$0xf]  ;;  %v226_v19 = vld [vmem:[%s7788_s10 + $0x98] sm:$0xf]  ;;  %223 = vst [vmem:[%s7795_s11 + $0x44] sm:$0xf] %v222_v17 }
  0x26   : > { %225 = vst [vmem:[%s7795_s11 + $0x48] sm:$0xf] %v224_v18  ;;  %227 = vst [vmem:[%s7795_s11 + $0x4c] sm:$0xf] %v226_v19  ;;  %v228_v20 = vld [vmem:[%s7788_s10 + $0xa0] sm:$0xf] }
  0x27   : > { %v230_v21 = vld [vmem:[%s7788_s10 + $0xa8] sm:$0xf]  ;;  %v232_v22 = vld [vmem:[%s7788_s10 + $0xb0] sm:$0xf]  ;;  %229 = vst [vmem:[%s7795_s11 + $0x50] sm:$0xf] %v228_v20 }
  0x28   : > { %231 = vst [vmem:[%s7795_s11 + $0x54] sm:$0xf] %v230_v21  ;;  %233 = vst [vmem:[%s7795_s11 + $0x58] sm:$0xf] %v232_v22  ;;  %v234_v23 = vld [vmem:[%s7788_s10 + $0xb8] sm:$0xf] }
  0x29   : > { %v236_v24 = vld [vmem:[%s7788_s10 + $0xc0] sm:$0xf]  ;;  %v238_v25 = vld [vmem:[%s7788_s10 + $0xc8] sm:$0xf]  ;;  %235 = vst [vmem:[%s7795_s11 + $0x5c] sm:$0xf] %v234_v23 }
  0x2a   : > { %237 = vst [vmem:[%s7795_s11 + $0x60] sm:$0xf] %v236_v24  ;;  %239 = vst [vmem:[%s7795_s11 + $0x64] sm:$0xf] %v238_v25  ;;  %v240_v26 = vld [vmem:[%s7788_s10 + $0xd0] sm:$0xf] }
  0x2b   : > { %v242_v27 = vld [vmem:[%s7788_s10 + $0xd8] sm:$0xf]  ;;  %v244_v28 = vld [vmem:[%s7788_s10 + $0xe0] sm:$0xf]  ;;  %241 = vst [vmem:[%s7795_s11 + $0x68] sm:$0xf] %v240_v26 }
  0x2c   : > { %243 = vst [vmem:[%s7795_s11 + $0x6c] sm:$0xf] %v242_v27  ;;  %245 = vst [vmem:[%s7795_s11 + $0x70] sm:$0xf] %v244_v28  ;;  %v246_v29 = vld [vmem:[%s7788_s10 + $0xe8] sm:$0xf] }
  0x2d   : > { %v248_v30 = vld [vmem:[%s7788_s10 + $0xf0] sm:$0xf]  ;;  %v250_v31 = vld [vmem:[%s7788_s10 + $0xf8] sm:$0xf]  ;;  %247 = vst [vmem:[%s7795_s11 + $0x74] sm:$0xf] %v246_v29 }
  0x2e   : > { %249 = vst [vmem:[%s7795_s11 + $0x78] sm:$0xf] %v248_v30  ;;  %251 = vst [vmem:[%s7795_s11 + $0x7c] sm:$0xf] %v250_v31  ;;  %v252_v32 = vld [vmem:[%s7788_s10 + $0x100] sm:$0xf] }
  0x2f   : > { %v254_v33 = vld [vmem:[%s7788_s10 + $0x108] sm:$0xf]  ;;  %v256_v34 = vld [vmem:[%s7788_s10 + $0x110] sm:$0xf]  ;;  %253 = vst [vmem:[%s7795_s11 + $0x80] sm:$0xf] %v252_v32 }
  0x30   : > { %255 = vst [vmem:[%s7795_s11 + $0x84] sm:$0xf] %v254_v33  ;;  %257 = vst [vmem:[%s7795_s11 + $0x88] sm:$0xf] %v256_v34  ;;  %v258_v35 = vld [vmem:[%s7788_s10 + $0x118] sm:$0xf] }
  0x31   : > { %v260_v36 = vld [vmem:[%s7788_s10 + $0x120] sm:$0xf]  ;;  %v262_v37 = vld [vmem:[%s7788_s10 + $0x128] sm:$0xf]  ;;  %259 = vst [vmem:[%s7795_s11 + $0x8c] sm:$0xf] %v258_v35 }
  0x32   : > { %261 = vst [vmem:[%s7795_s11 + $0x90] sm:$0xf] %v260_v36  ;;  %263 = vst [vmem:[%s7795_s11 + $0x94] sm:$0xf] %v262_v37  ;;  %v264_v38 = vld [vmem:[%s7788_s10 + $0x130] sm:$0xf] }
  0x33   : > { %v266_v39 = vld [vmem:[%s7788_s10 + $0x138] sm:$0xf]  ;;  %v268_v40 = vld [vmem:[%s7788_s10 + $0x140] sm:$0xf]  ;;  %265 = vst [vmem:[%s7795_s11 + $0x98] sm:$0xf] %v264_v38 }
  0x34   : > { %267 = vst [vmem:[%s7795_s11 + $0x9c] sm:$0xf] %v266_v39  ;;  %269 = vst [vmem:[%s7795_s11 + $0xa0] sm:$0xf] %v268_v40  ;;  %v270_v41 = vld [vmem:[%s7788_s10 + $0x148] sm:$0xf] }
  0x35   : > { %v272_v42 = vld [vmem:[%s7788_s10 + $0x150] sm:$0xf]  ;;  %v274_v43 = vld [vmem:[%s7788_s10 + $0x158] sm:$0xf]  ;;  %271 = vst [vmem:[%s7795_s11 + $0xa4] sm:$0xf] %v270_v41 }
  0x36   : > { %273 = vst [vmem:[%s7795_s11 + $0xa8] sm:$0xf] %v272_v42  ;;  %275 = vst [vmem:[%s7795_s11 + $0xac] sm:$0xf] %v274_v43  ;;  %v276_v44 = vld [vmem:[%s7788_s10 + $0x160] sm:$0xf] }
  0x37   : > { %v278_v45 = vld [vmem:[%s7788_s10 + $0x168] sm:$0xf]  ;;  %v280_v46 = vld [vmem:[%s7788_s10 + $0x170] sm:$0xf]  ;;  %277 = vst [vmem:[%s7795_s11 + $0xb0] sm:$0xf] %v276_v44 }
  0x38   : > { %279 = vst [vmem:[%s7795_s11 + $0xb4] sm:$0xf] %v278_v45  ;;  %281 = vst [vmem:[%s7795_s11 + $0xb8] sm:$0xf] %v280_v46  ;;  %v282_v47 = vld [vmem:[%s7788_s10 + $0x178] sm:$0xf] }
  0x39   : > { %v284_v48 = vld [vmem:[%s7788_s10 + $0x180] sm:$0xf]  ;;  %v286_v49 = vld [vmem:[%s7788_s10 + $0x188] sm:$0xf]  ;;  %283 = vst [vmem:[%s7795_s11 + $0xbc] sm:$0xf] %v282_v47 }
  0x3a   : > { %285 = vst [vmem:[%s7795_s11 + $0xc0] sm:$0xf] %v284_v48  ;;  %287 = vst [vmem:[%s7795_s11 + $0xc4] sm:$0xf] %v286_v49  ;;  %v288_v50 = vld [vmem:[%s7788_s10 + $0x190] sm:$0xf] }
  0x3b   : > { %v290_v51 = vld [vmem:[%s7788_s10 + $0x198] sm:$0xf]  ;;  %v292_v52 = vld [vmem:[%s7788_s10 + $0x1a0] sm:$0xf]  ;;  %289 = vst [vmem:[%s7795_s11 + $0xc8] sm:$0xf] %v288_v50 }
  0x3c   : > { %291 = vst [vmem:[%s7795_s11 + $0xcc] sm:$0xf] %v290_v51  ;;  %293 = vst [vmem:[%s7795_s11 + $0xd0] sm:$0xf] %v292_v52  ;;  %v294_v53 = vld [vmem:[%s7788_s10 + $0x1a8] sm:$0xf] }
  0x3d   : > { %v296_v54 = vld [vmem:[%s7788_s10 + $0x1b0] sm:$0xf]  ;;  %v298_v55 = vld [vmem:[%s7788_s10 + $0x1b8] sm:$0xf]  ;;  %295 = vst [vmem:[%s7795_s11 + $0xd4] sm:$0xf] %v294_v53 }
  0x3e   : > { %297 = vst [vmem:[%s7795_s11 + $0xd8] sm:$0xf] %v296_v54  ;;  %299 = vst [vmem:[%s7795_s11 + $0xdc] sm:$0xf] %v298_v55  ;;  %v300_v56 = vld [vmem:[%s7788_s10 + $0x1c0] sm:$0xf] }
  0x3f   : > { %v302_v57 = vld [vmem:[%s7788_s10 + $0x1c8] sm:$0xf]  ;;  %v304_v58 = vld [vmem:[%s7788_s10 + $0x1d0] sm:$0xf]  ;;  %301 = vst [vmem:[%s7795_s11 + $0xe0] sm:$0xf] %v300_v56 }
  0x40   : > { %303 = vst [vmem:[%s7795_s11 + $0xe4] sm:$0xf] %v302_v57  ;;  %305 = vst [vmem:[%s7795_s11 + $0xe8] sm:$0xf] %v304_v58  ;;  %v306_v59 = vld [vmem:[%s7788_s10 + $0x1d8] sm:$0xf] }
  0x41   : > { %v308_v60 = vld [vmem:[%s7788_s10 + $0x1e0] sm:$0xf]  ;;  %v310_v61 = vld [vmem:[%s7788_s10 + $0x1e8] sm:$0xf]  ;;  %307 = vst [vmem:[%s7795_s11 + $0xec] sm:$0xf] %v306_v59 }
  0x42   : > { %309 = vst [vmem:[%s7795_s11 + $0xf0] sm:$0xf] %v308_v60  ;;  %311 = vst [vmem:[%s7795_s11 + $0xf4] sm:$0xf] %v310_v61  ;;  %v312_v62 = vld [vmem:[%s7788_s10 + $0x1f0] sm:$0xf] }
  0x43   : > { %v314_v63 = vld [vmem:[%s7788_s10 + $0x1f8] sm:$0xf]  ;;  %v316_v0 = vld [vmem:[%s7788_s10 + $0x200] sm:$0xf]  ;;  %313 = vst [vmem:[%s7795_s11 + $0xf8] sm:$0xf] %v312_v62 }
  0x44   : > { %315 = vst [vmem:[%s7795_s11 + $0xfc] sm:$0xf] %v314_v63  ;;  %317 = vst [vmem:[%s7795_s11 + $0x100] sm:$0xf] %v316_v0  ;;  %v318_v1 = vld [vmem:[%s7788_s10 + $0x208] sm:$0xf] }
  0x45   : > { %v320_v2 = vld [vmem:[%s7788_s10 + $0x210] sm:$0xf]  ;;  %v322_v3 = vld [vmem:[%s7788_s10 + $0x218] sm:$0xf]  ;;  %319 = vst [vmem:[%s7795_s11 + $0x104] sm:$0xf] %v318_v1 }
  0x46   : > { %321 = vst [vmem:[%s7795_s11 + $0x108] sm:$0xf] %v320_v2  ;;  %323 = vst [vmem:[%s7795_s11 + $0x10c] sm:$0xf] %v322_v3  ;;  %v324_v4 = vld [vmem:[%s7788_s10 + $0x220] sm:$0xf] }
  0x47   : > { %v326_v5 = vld [vmem:[%s7788_s10 + $0x228] sm:$0xf]  ;;  %v328_v6 = vld [vmem:[%s7788_s10 + $0x230] sm:$0xf]  ;;  %325 = vst [vmem:[%s7795_s11 + $0x110] sm:$0xf] %v324_v4 }
  0x48   : > { %327 = vst [vmem:[%s7795_s11 + $0x114] sm:$0xf] %v326_v5  ;;  %329 = vst [vmem:[%s7795_s11 + $0x118] sm:$0xf] %v328_v6  ;;  %v330_v7 = vld [vmem:[%s7788_s10 + $0x238] sm:$0xf] }
  0x49   : > { %v332_v8 = vld [vmem:[%s7788_s10 + $0x240] sm:$0xf]  ;;  %v334_v9 = vld [vmem:[%s7788_s10 + $0x248] sm:$0xf]  ;;  %331 = vst [vmem:[%s7795_s11 + $0x11c] sm:$0xf] %v330_v7 }
  0x4a   : > { %333 = vst [vmem:[%s7795_s11 + $0x120] sm:$0xf] %v332_v8  ;;  %335 = vst [vmem:[%s7795_s11 + $0x124] sm:$0xf] %v334_v9  ;;  %v336_v10 = vld [vmem:[%s7788_s10 + $0x250] sm:$0xf] }
  0x4b   : > { %v338_v11 = vld [vmem:[%s7788_s10 + $0x258] sm:$0xf]  ;;  %v340_v12 = vld [vmem:[%s7788_s10 + $0x260] sm:$0xf]  ;;  %337 = vst [vmem:[%s7795_s11 + $0x128] sm:$0xf] %v336_v10 }
  0x4c   : > { %339 = vst [vmem:[%s7795_s11 + $0x12c] sm:$0xf] %v338_v11  ;;  %341 = vst [vmem:[%s7795_s11 + $0x130] sm:$0xf] %v340_v12  ;;  %v342_v13 = vld [vmem:[%s7788_s10 + $0x268] sm:$0xf] }
  0x4d   : > { %v344_v14 = vld [vmem:[%s7788_s10 + $0x270] sm:$0xf]  ;;  %v346_v15 = vld [vmem:[%s7788_s10 + $0x278] sm:$0xf]  ;;  %343 = vst [vmem:[%s7795_s11 + $0x134] sm:$0xf] %v342_v13 }
  0x4e   : > { %345 = vst [vmem:[%s7795_s11 + $0x138] sm:$0xf] %v344_v14  ;;  %347 = vst [vmem:[%s7795_s11 + $0x13c] sm:$0xf] %v346_v15  ;;  %v348_v16 = vld [vmem:[%s7788_s10 + $0x280] sm:$0xf] }
  0x4f   : > { %v350_v17 = vld [vmem:[%s7788_s10 + $0x288] sm:$0xf]  ;;  %v352_v18 = vld [vmem:[%s7788_s10 + $0x290] sm:$0xf]  ;;  %349 = vst [vmem:[%s7795_s11 + $0x140] sm:$0xf] %v348_v16 }
  0x50   : > { %351 = vst [vmem:[%s7795_s11 + $0x144] sm:$0xf] %v350_v17  ;;  %353 = vst [vmem:[%s7795_s11 + $0x148] sm:$0xf] %v352_v18  ;;  %v354_v19 = vld [vmem:[%s7788_s10 + $0x298] sm:$0xf] }
  0x51   : > { %v356_v20 = vld [vmem:[%s7788_s10 + $0x2a0] sm:$0xf]  ;;  %v358_v21 = vld [vmem:[%s7788_s10 + $0x2a8] sm:$0xf]  ;;  %355 = vst [vmem:[%s7795_s11 + $0x14c] sm:$0xf] %v354_v19 }
  0x52   : > { %357 = vst [vmem:[%s7795_s11 + $0x150] sm:$0xf] %v356_v20  ;;  %359 = vst [vmem:[%s7795_s11 + $0x154] sm:$0xf] %v358_v21  ;;  %v360_v22 = vld [vmem:[%s7788_s10 + $0x2b0] sm:$0xf] }
  0x53   : > { %v362_v23 = vld [vmem:[%s7788_s10 + $0x2b8] sm:$0xf]  ;;  %v364_v24 = vld [vmem:[%s7788_s10 + $0x2c0] sm:$0xf]  ;;  %361 = vst [vmem:[%s7795_s11 + $0x158] sm:$0xf] %v360_v22 }
  0x54   : > { %363 = vst [vmem:[%s7795_s11 + $0x15c] sm:$0xf] %v362_v23  ;;  %365 = vst [vmem:[%s7795_s11 + $0x160] sm:$0xf] %v364_v24  ;;  %v366_v25 = vld [vmem:[%s7788_s10 + $0x2c8] sm:$0xf] }
  0x55   : > { %v368_v26 = vld [vmem:[%s7788_s10 + $0x2d0] sm:$0xf]  ;;  %v370_v27 = vld [vmem:[%s7788_s10 + $0x2d8] sm:$0xf]  ;;  %367 = vst [vmem:[%s7795_s11 + $0x164] sm:$0xf] %v366_v25 }
  0x56   : > { %369 = vst [vmem:[%s7795_s11 + $0x168] sm:$0xf] %v368_v26  ;;  %371 = vst [vmem:[%s7795_s11 + $0x16c] sm:$0xf] %v370_v27  ;;  %v372_v28 = vld [vmem:[%s7788_s10 + $0x2e0] sm:$0xf] }
  0x57   : > { %v374_v29 = vld [vmem:[%s7788_s10 + $0x2e8] sm:$0xf]  ;;  %v376_v30 = vld [vmem:[%s7788_s10 + $0x2f0] sm:$0xf]  ;;  %373 = vst [vmem:[%s7795_s11 + $0x170] sm:$0xf] %v372_v28 }
  0x58   : > { %375 = vst [vmem:[%s7795_s11 + $0x174] sm:$0xf] %v374_v29  ;;  %377 = vst [vmem:[%s7795_s11 + $0x178] sm:$0xf] %v376_v30  ;;  %v378_v31 = vld [vmem:[%s7788_s10 + $0x2f8] sm:$0xf] }
  0x59   : > { %v380_v32 = vld [vmem:[%s7788_s10 + $0x300] sm:$0xf]  ;;  %v382_v33 = vld [vmem:[%s7788_s10 + $0x308] sm:$0xf]  ;;  %379 = vst [vmem:[%s7795_s11 + $0x17c] sm:$0xf] %v378_v31 }
  0x5a   : > { %381 = vst [vmem:[%s7795_s11 + $0x180] sm:$0xf] %v380_v32  ;;  %383 = vst [vmem:[%s7795_s11 + $0x184] sm:$0xf] %v382_v33  ;;  %v384_v34 = vld [vmem:[%s7788_s10 + $0x310] sm:$0xf] }
  0x5b   : > { %v386_v35 = vld [vmem:[%s7788_s10 + $0x318] sm:$0xf]  ;;  %v388_v36 = vld [vmem:[%s7788_s10 + $0x320] sm:$0xf]  ;;  %385 = vst [vmem:[%s7795_s11 + $0x188] sm:$0xf] %v384_v34 }
  0x5c   : > { %387 = vst [vmem:[%s7795_s11 + $0x18c] sm:$0xf] %v386_v35  ;;  %389 = vst [vmem:[%s7795_s11 + $0x190] sm:$0xf] %v388_v36  ;;  %v390_v37 = vld [vmem:[%s7788_s10 + $0x328] sm:$0xf] }
  0x5d   : > { %v392_v38 = vld [vmem:[%s7788_s10 + $0x330] sm:$0xf]  ;;  %v394_v39 = vld [vmem:[%s7788_s10 + $0x338] sm:$0xf]  ;;  %391 = vst [vmem:[%s7795_s11 + $0x194] sm:$0xf] %v390_v37 }
  0x5e   : > { %393 = vst [vmem:[%s7795_s11 + $0x198] sm:$0xf] %v392_v38  ;;  %395 = vst [vmem:[%s7795_s11 + $0x19c] sm:$0xf] %v394_v39  ;;  %v396_v40 = vld [vmem:[%s7788_s10 + $0x340] sm:$0xf] }
  0x5f   : > { %v398_v41 = vld [vmem:[%s7788_s10 + $0x348] sm:$0xf]  ;;  %v400_v42 = vld [vmem:[%s7788_s10 + $0x350] sm:$0xf]  ;;  %397 = vst [vmem:[%s7795_s11 + $0x1a0] sm:$0xf] %v396_v40 }
  0x60   : > { %399 = vst [vmem:[%s7795_s11 + $0x1a4] sm:$0xf] %v398_v41  ;;  %401 = vst [vmem:[%s7795_s11 + $0x1a8] sm:$0xf] %v400_v42  ;;  %v402_v43 = vld [vmem:[%s7788_s10 + $0x358] sm:$0xf] }
  0x61   : > { %v404_v44 = vld [vmem:[%s7788_s10 + $0x360] sm:$0xf]  ;;  %v406_v45 = vld [vmem:[%s7788_s10 + $0x368] sm:$0xf]  ;;  %403 = vst [vmem:[%s7795_s11 + $0x1ac] sm:$0xf] %v402_v43 }
  0x62   : > { %405 = vst [vmem:[%s7795_s11 + $0x1b0] sm:$0xf] %v404_v44  ;;  %407 = vst [vmem:[%s7795_s11 + $0x1b4] sm:$0xf] %v406_v45  ;;  %v408_v46 = vld [vmem:[%s7788_s10 + $0x370] sm:$0xf] }
  0x63   : > { %v410_v47 = vld [vmem:[%s7788_s10 + $0x378] sm:$0xf]  ;;  %v412_v48 = vld [vmem:[%s7788_s10 + $0x380] sm:$0xf]  ;;  %409 = vst [vmem:[%s7795_s11 + $0x1b8] sm:$0xf] %v408_v46 }
  0x64   : > { %411 = vst [vmem:[%s7795_s11 + $0x1bc] sm:$0xf] %v410_v47  ;;  %413 = vst [vmem:[%s7795_s11 + $0x1c0] sm:$0xf] %v412_v48  ;;  %v414_v49 = vld [vmem:[%s7788_s10 + $0x388] sm:$0xf] }
  0x65   : > { %v416_v50 = vld [vmem:[%s7788_s10 + $0x390] sm:$0xf]  ;;  %v418_v51 = vld [vmem:[%s7788_s10 + $0x398] sm:$0xf]  ;;  %415 = vst [vmem:[%s7795_s11 + $0x1c4] sm:$0xf] %v414_v49 }
  0x66   : > { %417 = vst [vmem:[%s7795_s11 + $0x1c8] sm:$0xf] %v416_v50  ;;  %419 = vst [vmem:[%s7795_s11 + $0x1cc] sm:$0xf] %v418_v51  ;;  %v420_v52 = vld [vmem:[%s7788_s10 + $0x3a0] sm:$0xf] }
  0x67   : > { %v422_v53 = vld [vmem:[%s7788_s10 + $0x3a8] sm:$0xf]  ;;  %v424_v54 = vld [vmem:[%s7788_s10 + $0x3b0] sm:$0xf]  ;;  %421 = vst [vmem:[%s7795_s11 + $0x1d0] sm:$0xf] %v420_v52 }
  0x68   : > { %423 = vst [vmem:[%s7795_s11 + $0x1d4] sm:$0xf] %v422_v53  ;;  %425 = vst [vmem:[%s7795_s11 + $0x1d8] sm:$0xf] %v424_v54  ;;  %v426_v55 = vld [vmem:[%s7788_s10 + $0x3b8] sm:$0xf] }
  0x69   : > { %v428_v56 = vld [vmem:[%s7788_s10 + $0x3c0] sm:$0xf]  ;;  %v430_v57 = vld [vmem:[%s7788_s10 + $0x3c8] sm:$0xf]  ;;  %427 = vst [vmem:[%s7795_s11 + $0x1dc] sm:$0xf] %v426_v55 }
  0x6a   : > { %429 = vst [vmem:[%s7795_s11 + $0x1e0] sm:$0xf] %v428_v56  ;;  %431 = vst [vmem:[%s7795_s11 + $0x1e4] sm:$0xf] %v430_v57  ;;  %v432_v58 = vld [vmem:[%s7788_s10 + $0x3d0] sm:$0xf] }
  0x6b   : > { %v434_v59 = vld [vmem:[%s7788_s10 + $0x3d8] sm:$0xf]  ;;  %v436_v60 = vld [vmem:[%s7788_s10 + $0x3e0] sm:$0xf]  ;;  %433 = vst [vmem:[%s7795_s11 + $0x1e8] sm:$0xf] %v432_v58 }
  0x6c   : > { %435 = vst [vmem:[%s7795_s11 + $0x1ec] sm:$0xf] %v434_v59  ;;  %437 = vst [vmem:[%s7795_s11 + $0x1f0] sm:$0xf] %v436_v60  ;;  %v438_v61 = vld [vmem:[%s7788_s10 + $0x3e8] sm:$0xf] }
  0x6d   : > { %v440_v62 = vld [vmem:[%s7788_s10 + $0x3f0] sm:$0xf]  ;;  %v442_v63 = vld [vmem:[%s7788_s10 + $0x3f8] sm:$0xf]  ;;  %439 = vst [vmem:[%s7795_s11 + $0x1f4] sm:$0xf] %v438_v61 }
  0x6e   : > { %441 = vst [vmem:[%s7795_s11 + $0x1f8] sm:$0xf] %v440_v62  ;;  %443 = vst [vmem:[%s7795_s11 + $0x1fc] sm:$0xf] %v442_v63  ;;  %v444_v0 = vld [vmem:[%s7788_s10 + $0x400] sm:$0xf] }
  0x6f   : > { %v446_v1 = vld [vmem:[%s7788_s10 + $0x408] sm:$0xf]  ;;  %v448_v2 = vld [vmem:[%s7788_s10 + $0x410] sm:$0xf]  ;;  %445 = vst [vmem:[%s7795_s11 + $0x200] sm:$0xf] %v444_v0 }
  0x70   : > { %447 = vst [vmem:[%s7795_s11 + $0x204] sm:$0xf] %v446_v1  ;;  %449 = vst [vmem:[%s7795_s11 + $0x208] sm:$0xf] %v448_v2  ;;  %v450_v3 = vld [vmem:[%s7788_s10 + $0x418] sm:$0xf] }
  0x71   : > { %v452_v4 = vld [vmem:[%s7788_s10 + $0x420] sm:$0xf]  ;;  %v454_v5 = vld [vmem:[%s7788_s10 + $0x428] sm:$0xf]  ;;  %451 = vst [vmem:[%s7795_s11 + $0x20c] sm:$0xf] %v450_v3 }
  0x72   : > { %453 = vst [vmem:[%s7795_s11 + $0x210] sm:$0xf] %v452_v4  ;;  %455 = vst [vmem:[%s7795_s11 + $0x214] sm:$0xf] %v454_v5  ;;  %v456_v6 = vld [vmem:[%s7788_s10 + $0x430] sm:$0xf] }
  0x73   : > { %v458_v7 = vld [vmem:[%s7788_s10 + $0x438] sm:$0xf]  ;;  %v460_v8 = vld [vmem:[%s7788_s10 + $0x440] sm:$0xf]  ;;  %457 = vst [vmem:[%s7795_s11 + $0x218] sm:$0xf] %v456_v6 }
  0x74   : > { %459 = vst [vmem:[%s7795_s11 + $0x21c] sm:$0xf] %v458_v7  ;;  %461 = vst [vmem:[%s7795_s11 + $0x220] sm:$0xf] %v460_v8  ;;  %v462_v9 = vld [vmem:[%s7788_s10 + $0x448] sm:$0xf] }
  0x75   : > { %v464_v10 = vld [vmem:[%s7788_s10 + $0x450] sm:$0xf]  ;;  %v466_v11 = vld [vmem:[%s7788_s10 + $0x458] sm:$0xf]  ;;  %463 = vst [vmem:[%s7795_s11 + $0x224] sm:$0xf] %v462_v9 }
  0x76   : > { %465 = vst [vmem:[%s7795_s11 + $0x228] sm:$0xf] %v464_v10  ;;  %467 = vst [vmem:[%s7795_s11 + $0x22c] sm:$0xf] %v466_v11  ;;  %v468_v12 = vld [vmem:[%s7788_s10 + $0x460] sm:$0xf] }
  0x77   : > { %v470_v13 = vld [vmem:[%s7788_s10 + $0x468] sm:$0xf]  ;;  %v472_v14 = vld [vmem:[%s7788_s10 + $0x470] sm:$0xf]  ;;  %469 = vst [vmem:[%s7795_s11 + $0x230] sm:$0xf] %v468_v12 }
  0x78   : > { %471 = vst [vmem:[%s7795_s11 + $0x234] sm:$0xf] %v470_v13  ;;  %473 = vst [vmem:[%s7795_s11 + $0x238] sm:$0xf] %v472_v14  ;;  %v474_v15 = vld [vmem:[%s7788_s10 + $0x478] sm:$0xf] }
  0x79   : > { %475 = vst [vmem:[%s7795_s11 + $0x23c] sm:$0xf] %v474_v15 }
  0x7a PF: > { %p5941_p11 = scmp.ge.s32.totalorder %s7686_s20, 1  ;;  %p792_p12 = scmp.lt.s32.totalorder %s7686_s20, 5 }
  0x7c   : > { %p793_p13 = pnand %p5941_p11, %p792_p12 }
  0x7d   : > { %s799_s21 = sand.u32 (!%p793_p13), 1, %s7662_s14   ;;  %p829_p0 = scmp.lt.s32.totalorder (!%p793_p13), %s7674_s17, 1 }
  0x7e   : > { %796 = sbr.rel (%p793_p13) target bundleno = 676 (0x2a4), region = 69  ;;  %p834_p1 = scmp.lt.s32.totalorder (!%p793_p13), %s7670_s16, 1 }
  0x7f   : > { %s7374_s24 = smul.u32 (!%p793_p13), 576, %s799_s21  ;;  %s826_s10 = sand.u32 (!%p793_p13), 1, %s7654_s12  }
  0x80   : > { %s5942_s11 = sshll.u32 (!%p793_p13), %s826_s10, 7 }
  0x81   : > { %s8085_s26 = scalar_lea.vmem (!%p793_p13), [#allocation2], %s7374_s24  ;;  %s9101_s12 = scalar_lea.vmem (!%p793_p13), [#allocation3], %s5942_s11 }
  0x83   : > { %s830_s25 = scalar_select %p829_p0, %s7674_s17, 1  ;;  %v7448_v16 = vld [vmem:[%s8085_s26 + $0x78] sm:$0xff]   ;;  %v7449_v17 = vld [vmem:[%s8085_s26 + $0x70] sm:$0xff]   ;;  %v7450_v18 = vld [vmem:[%s8085_s26 + $0x68] sm:$0xff]   ;;  %vm1602_vm0 = vsmask.f32 3328 }
  0x84   : > { %6925 = vmatprep.subr.bf16.mxu0 %v7448_v16  ;;  %7357 = vmatprep.subr.bf16.mxu1 %v7448_v16  ;;  %v7451_v19 = vld [vmem:[%s8085_s26 + $0x60] sm:$0xff]   ;;  %v7452_v22 = vld [vmem:[%s8085_s26 + $0x58] sm:$0xff]   ;;  %v7453_v23 = vld [vmem:[%s8085_s26 + $0x50] sm:$0xff]   ;;  %vm1603_vm1 = vsmask.f32 7440  ;;  %s835_s6 = scalar_select %p834_p1, %s7670_s16, 1 }
  0x85   : > { %s7375_s28 = smul.u32 816, %s830_s25  ;;  %6926 = vmatpush3.bf16.msra.mxu0 %v7448_v16  ;;  %7365 = vmatpush3.bf16.msra.mxu1 %v7448_v16  ;;  %v7454_v24 = vld [vmem:[%s8085_s26 + $0x48] sm:$0xff]   ;;  %v7455_v25 = vld [vmem:[%s8085_s26 + $0x40] sm:$0xff]   ;;  %v7460_v26 = vld [vmem:[%s8085_s26 + $0x38] sm:$0xff]   ;;  %s6578_s21 = sshll.u32 (%p7775_p9), %s7674_s17, 6 }
  0x86   : > { %6927 = vmatprep.subr.bf16.mxu0 %v7449_v17  ;;  %7358 = vmatprep.subr.bf16.mxu1 %v7449_v17  ;;  %v7461_v28 = vld [vmem:[%s8085_s26 + $0xb8] sm:$0xff]   ;;  %v7462_v30 = vld [vmem:[%s8085_s26 + $0x30] sm:$0xff]   ;;  %v7468_v34 = vld [vmem:[%s8085_s26 + $0x28] sm:$0xff]   ;;  %s836_s9 = scalar_lea.vmem %s9277_s2, %s835_s6  ;;  %s5649_s24 = sadd.s32 (%p7775_p9), %s7670_s16, %s6578_s21 }
  0x87   : > { %s8093_s5 = scalar_lea.vmem %s9275_s0, %s7375_s28  ;;  %v7463_v31 = vld [vmem:[%s8085_s26 + $0xb0] sm:$0xff]   ;;  %v7469_v36 = vld [vmem:[%s8085_s26 + $0xa8] sm:$0xff]   ;;  %v7470_v38 = vld [vmem:[%s8085_s26 + $0x20] sm:$0xff]   ;;  %s6579_s30 = sshll.u32 (%p7775_p9), %s5649_s24, 2 }
  0x88   : > { %v7456_v20 = vld [vmem:[%s8093_s5 + $0xcc] sm:$0xff]   ;;  %v7458_v27 = vld [vmem:[%s8093_s5 + $0xd8] sm:$0xff]   ;;  %v7464_v32 = vld [vmem:[%s8093_s5 + $0xe4] sm:$0xff]   ;;  %s9189_s28 = scalar_lea.vmem (%p7775_p9), %s9278_s3, %s6579_s30 }
  0x89   : > { %6928 = vmatpush3.bf16.msra.mxu0 %v7449_v17  ;;  %7366 = vmatpush3.bf16.msra.mxu1 %v7449_v17  ;;  %v7457_v21 = vld [vmem:[%s8093_s5 + $0x12c] sm:$0xff]   ;;  %v7459_v29 = vld [vmem:[%s8093_s5 + $0x138] sm:$0xff]   ;;  %v7465_v33 = vld [vmem:[%s8093_s5 + $0x144] sm:$0xff]  }
  0x8a   : > { %6929 = vmatprep.subr.bf16.mxu0 %v7450_v18  ;;  %7359 = vmatprep.subr.bf16.mxu1 %v7450_v18  ;;  %v7466_v35 = vld [vmem:[%s8093_s5 + $0xf0] sm:$0xff]   ;;  %v7471_v39 = vld [vmem:[%s8085_s26 + $0xa0] sm:$0xff]   ;;  %v1556_v44 = vld [vmem:[%s8093_s5 + $0x8] sm:$0x1] }
  0x8b   : > { %6941 = vmatprep.mubr.bf16.mxu0 %v7456_v20  ;;  %6957 = vmatprep.mubr.bf16.mxu1 %v7457_v21  ;;  %v7467_v37 = vld [vmem:[%s8093_s5 + $0x150] sm:$0xff]   ;;  %v7472_v40 = vld [vmem:[%s8093_s5 + $0xfc] sm:$0xff]   ;;  %v1555_v43 = vld [vmem:[%s8093_s5 + $0x4] sm:$0xf]  ;;  %v1625_v51 = vshll.u32 %v1556_v44, 16 }
  0x8c   : > { %v7473_v41 = vld [vmem:[%s8093_s5 + $0x15c] sm:$0xff]   ;;  %v1615_v48 = vshll.u32 %v1555_v43, 16  ;;  %v1619_v49 = vshrl.u32 %v1555_v43, 16  ;;  %v1557_v52 = vld [vmem:[%s8093_s5 + $0xc] sm:$0xf]  ;;  %v7478_v0 = vld [vmem:[%s8085_s26 + $0x10] sm:$0xff]  }
  0x8d   : > { %6930 = vmatpush3.bf16.msra.mxu0 %v7450_v18  ;;  %7367 = vmatpush3.bf16.msra.mxu1 %v7450_v18  ;;  %v1554_v42 = vld [vmem:[%s8093_s5] sm:$0xf]  ;;  %v7476_v45 = vld [vmem:[%s8085_s26 + $0x18] sm:$0xff]   ;;  %v7474_v53 = vld [vmem:[%s8093_s5 + $0x108] sm:$0xff]   ;;  %v1630_v61 = vshrl.u32 %v1557_v52, 16  ;;  %v1633_v62 = vshll.u32 %v1557_v52, 16 }
  0x8e   : > { %6931 = vmatprep.subr.bf16.mxu0 %v7451_v19  ;;  %7360 = vmatprep.subr.bf16.mxu1 %v7451_v19  ;;  %v1606_v46 = vshrl.u32 %v1554_v42, 16  ;;  %v1609_v47 = vshll.u32 %v1554_v42, 16  ;;  %v7477_v50 = vld [vmem:[%s8085_s26 + $0x98] sm:$0xff]   ;;  %v1617_v56 = vrot.slane %v1615_v48, 5  ;;  %v1621_v57 = vrot.slane %v1619_v49, 4  ;;  %v7475_v59 = vld [vmem:[%s8093_s5 + $0x168] sm:$0xff]   ;;  %vm8132_vm2 = vmor %vm1602_vm0, %vm1603_vm1 }
  0x8f   : > { %v1558_v58 = vld [vmem:[%s8093_s5 + $0x10] sm:$0xf]  ;;  %v1559_v60 = vld [vmem:[%s8093_s5 + $0x14] sm:$0x1]  ;;  %v1627_v7 = vrot.slane %v1625_v51, 5  ;;  %v1632_v8 = vrot.slane %v1630_v61, 4 }
  0x90   : > { %v1608_v54 = vrot.slane %v1606_v46, 4  ;;  %v1611_v55 = vrot.slane %v1609_v47, 5  ;;  %v1639_v63 = vshll.u32 %v1558_v58, 16  ;;  %v7479_v1 = vld [vmem:[%s8085_s26 + $0x90] sm:$0xff]   ;;  %v1622_v3 = vor.u32 %v1621_v57, %v1617_v56  ;;  %v7484_v17 = vld [vmem:[%s8085_s26 + $0x8] sm:$0xff]   ;;  %v7487_v49 = vld [vmem:[%s8085_s26 + $0x80] sm:$0xff]  }
  0x91   : > { %6932 = vmatpush3.bf16.msra.mxu0 %v7451_v19  ;;  %7368 = vmatpush3.bf16.msra.mxu1 %v7451_v19  ;;  %v1643_v4 = vshrl.u32 %v1558_v58, 16  ;;  %v1649_v5 = vshll.u32 %v1559_v60, 16  ;;  %v1635_v9 = vrot.slane %v1633_v62, 5  ;;  %v7480_v11 = vld [vmem:[%s8093_s5 + $0x114] sm:$0xff]   ;;  %v1564_v43 = vld [vmem:[%s8093_s5 + $0x28] sm:$0xf] }
  0x92   : > { %6933 = vmatprep.subr.bf16.mxu0 %v7452_v22  ;;  %7361 = vmatprep.subr.bf16.mxu1 %v7452_v22  ;;  %v1612_v2 = vor.u32 %v1611_v55, %v1608_v54  ;;  %v8136_v10 = vrot.slane %v1639_v63, 5  ;;  %v1623_v13 = vrot.slane %v1622_v3, 4  ;;  %v7481_v15 = vld [vmem:[%s8093_s5 + $0x174] sm:$0xff]   ;;  %v1565_v46 = vld [vmem:[%s8093_s5 + $0x2c] sm:$0x1]  ;;  %v1687_v51 = vshll.u32 %v1564_v43, 16 }
  0x93   : > { %v1645_v14 = vrot.slane %v1643_v4, 4  ;;  %v1636_v16 = vor.u32 %v1635_v9, %v1632_v8  ;;  %v8144_v20 = vrot.slane %v1649_v5, 5  ;;  %v1560_v21 = vld [vmem:[%s8093_s5 + $0x18] sm:$0xf]  ;;  %v1691_v52 = vshrl.u32 %v1564_v43, 16  ;;  %v7488_v54 = vld [vmem:[%s8093_s5] sm:$0xff]  }
  0x94   : > { %v1613_v12 = vrot.slane %v1612_v2, 4  ;;  %v7491_v60 = vld [vmem:[%s8085_s26 + $0x138] sm:$0xff]   ;;  %v8171_v62 = vrot.slane %v1687_v51, 5  ;;  %v1566_v3 = vld [vmem:[%s8093_s5 + $0x30] sm:$0xf] }
  0x95   : > { %6934 = vmatpush3.bf16.msra.mxu0 %v7452_v22  ;;  %7369 = vmatpush3.bf16.msra.mxu1 %v7452_v22  ;;  %v1646_v19 = vor.u32 %v1645_v14, %v8136_v10  ;;  %v1561_v22 = vld [vmem:[%s8093_s5 + $0x1c] sm:$0xf]  ;;  %v1693_v63 = vrot.slane %v1691_v52, 4  ;;  %v1568_v8 = vld [vmem:[%s8093_s5 + $0x38] sm:$0x1]  ;;  %v1702_v9 = vshrl.u32 %v1566_v3, 16 }
  0x96   : > { %6935 = vmatprep.subr.bf16.mxu0 %v7453_v23  ;;  %7362 = vmatprep.subr.bf16.mxu1 %v7453_v23  ;;  %v1618_v18 = vsel %vm8132_vm2, %v1613_v12, %v1617_v56 }
  0x97   : > { %v1694_v5 = vor.u32 %v1693_v63, %v8171_v62 }
  0x99   : > { %6936 = vmatpush3.bf16.msra.mxu0 %v7453_v23  ;;  %7370 = vmatpush3.bf16.msra.mxu1 %v7453_v23  ;;  %v7485_v23 = vld [vmem:[%s8085_s26 + $0x88] sm:$0xff]  }
  0x9a   : > { %6937 = vmatprep.subr.bf16.mxu0 %v7454_v24  ;;  %7363 = vmatprep.subr.bf16.mxu1 %v7454_v24 }
  0x9d   : > { %6938 = vmatpush3.bf16.msra.mxu0 %v7454_v24  ;;  %7371 = vmatpush3.bf16.msra.mxu1 %v7454_v24  ;;  %v1628_v24 = vsel %vm8132_vm2, %v1623_v13, %v1627_v7  ;;  %v1567_v7 = vld [vmem:[%s8093_s5 + $0x34] sm:$0xf] }
  0x9e   : > { %6939 = vmatprep.subr.bf16.mxu0 %v7455_v25  ;;  %7364 = vmatprep.subr.bf16.mxu1 %v7455_v25  ;;  %v1711_v14 = vshll.u32 %v1567_v7, 16 }
  0xa1   : > { %6940 = vmatpush3.bf16.msra.mxu0 %v7455_v25  ;;  %7372 = vmatpush3.bf16.msra.mxu1 %v7455_v25  ;;  %v8151_v25 = vrot.slane %v1636_v16, 4  ;;  %v7492_v16 = vld [vmem:[%s8093_s5 + $0x18] sm:$0xff]  }
  0xa2   : > { %6973 = vmatprep.subr.bf16.mxu1 %v7460_v26  ;;  %7021 = vmatprep.subr.bf16.mxu0 %v7461_v28 }
  0xa3   : > { %v1642_v44 = vsel %vm8132_vm2, %v8151_v25, %v8136_v10  ;;  %v1705_v10 = vshll.u32 %v1566_v3, 16  ;;  %v1570_v25 = vld [vmem:[%s8093_s5 + $0x40] sm:$0xf] }
  0xa4   : > { %6942 = vmatmul.mubr.bf16.vlgmr.msra.gmra.mxu0 %v7458_v27  ;;  %6958 = vmatmul.mubr.bf16.vlgmr.msra.gmra.mxu1 %v7459_v29  ;;  %v1654_v27 = vshrl.u32 %v1560_v21, 16  ;;  %v7482_v29 = vld [vmem:[%s8093_s5 + $0x120] sm:$0xff]  }
  0xa5   : > { %6974 = vmatpush3.bf16.msra.mxu1 %v7460_v26  ;;  %7022 = vmatpush3.bf16.msra.mxu0 %v7461_v28  ;;  %v1562_v26 = vld [vmem:[%s8093_s5 + $0x20] sm:$0x1]  ;;  %v1657_v28 = vshll.u32 %v1560_v21, 16 }
  0xa6   : > { %6975 = vmatprep.subr.bf16.mxu1 %v7462_v30  ;;  %7023 = vmatprep.subr.bf16.mxu0 %v7463_v31 }
  0xa7   : > { %6945 = vmatprep.mubr.bf16.mxu0 %v7464_v32  ;;  %6961 = vmatprep.mubr.bf16.mxu1 %v7465_v33  ;;  %v1663_v32 = vshll.u32 %v1561_v22, 16  ;;  %v1667_v33 = vshrl.u32 %v1561_v22, 16  ;;  %v1713_v22 = vrot.slane %v1711_v14, 5  ;;  %v1577_v14 = vld [vmem:[%s8093_s5 + $0x5c] sm:$0x1] }
  0xa9   : > { %6976 = vmatpush3.bf16.msra.mxu1 %v7462_v30  ;;  %7024 = vmatpush3.bf16.msra.mxu0 %v7463_v31  ;;  %v7483_v30 = vld [vmem:[%s8093_s5 + $0x180] sm:$0xff]   ;;  %v1647_v31 = vrot.slane %v1646_v19, 4  ;;  %v1707_v19 = vrot.slane %v1705_v10, 5  ;;  %v1576_v10 = vld [vmem:[%s8093_s5 + $0x58] sm:$0xf] }
  0xaa   : > { %6977 = vmatprep.subr.bf16.mxu1 %v7468_v34  ;;  %7025 = vmatprep.subr.bf16.mxu0 %v7469_v36 }
  0xab   : > { %v1652_v55 = vsel %vm8132_vm2, %v1647_v31, %v8144_v20  ;;  %v1721_v20 = vshll.u32 %v1568_v8, 16 }
  0xac   : > { %6946 = vmatmul.mubr.bf16.gmra.mxu0 %v7466_v35  ;;  %6962 = vmatmul.mubr.bf16.gmra.mxu1 %v7467_v37  ;;  %v1656_v35 = vrot.slane %v1654_v27, 4  ;;  %v1563_v37 = vld [vmem:[%s8093_s5 + $0x24] sm:$0xf]  ;;  %v6057_v12 = vcombine.low %v1642_v44, %v1652_v55  ;;  %v1574_v55 = vld [vmem:[%s8093_s5 + $0x50] sm:$0x1] }
  0xad   : > { %6978 = vmatpush3.bf16.msra.mxu1 %v7468_v34  ;;  %7026 = vmatpush3.bf16.msra.mxu0 %v7469_v36  ;;  %v1673_v34 = vshll.u32 %v1562_v26, 16  ;;  %v1659_v36 = vrot.slane %v1657_v28, 5  ;;  %v1678_v47 = vshrl.u32 %v1563_v37, 16  ;;  %v1681_v48 = vshll.u32 %v1563_v37, 16  ;;  %v7494_v28 = vld [vmem:[%s8085_s26 + $0xf0] sm:$0xff]  }
  0xae   : > { %6979 = vmatprep.subr.bf16.mxu1 %v7470_v38  ;;  %7027 = vmatprep.subr.bf16.mxu0 %v7471_v39 }
  0xaf   : > { %6949 = vmatprep.mubr.bf16.mxu0 %v7472_v40  ;;  %6965 = vmatprep.mubr.bf16.mxu1 %v7473_v41  ;;  %v1665_v40 = vrot.slane %v1663_v32, 5  ;;  %v1669_v41 = vrot.slane %v1667_v33, 4  ;;  %v1675_v42 = vrot.slane %v1673_v34, 5  ;;  %v1680_v57 = vrot.slane %v1678_v47, 4  ;;  %v7495_v32 = vld [vmem:[%s8085_s26 + $0x130] sm:$0xff]  }
  0xb0   : > { %v1683_v58 = vrot.slane %v1681_v48, 5  ;;  %v1723_v34 = vrot.slane %v1721_v20, 5  ;;  %v1787_v20 = vshrl.u32 %v1576_v10, 16 }
  0xb1   : > { %6980 = vmatpush3.bf16.msra.mxu1 %v7470_v38  ;;  %7028 = vmatpush3.bf16.msra.mxu0 %v7471_v39  ;;  %v7486_v38 = vld [vmem:[%s8085_s26] sm:$0xff]   ;;  %v6056_v39 = vcombine.low %v1618_v18, %v1628_v24  ;;  %v1704_v18 = vrot.slane %v1702_v9, 4  ;;  %v1569_v24 = vld [vmem:[%s8093_s5 + $0x3c] sm:$0xf] }
  0xb2   : > { %6981 = vmatprep.subr.bf16.mxu1 %v7476_v45  ;;  %7029 = vmatprep.subr.bf16.mxu0 %v7477_v50  ;;  %v1684_v2 = vor.u32 %v1683_v58, %v1680_v57  ;;  %v1726_v31 = vshrl.u32 %v1569_v24, 16 }
  0xb4   : > { %6950 = vmatmul.mubr.bf16.gmra.mxu0 %v7474_v53  ;;  %6966 = vmatmul.mubr.bf16.gmra.mxu1 %v7475_v59  ;;  %v1697_v53 = vshll.u32 %v1565_v46, 16  ;;  %v7490_v59 = vld [vmem:[%s8085_s26 + $0xf8] sm:$0xff]   ;;  %v1685_v13 = vrot.slane %v1684_v2, 4  ;;  %v7493_v46 = vld [vmem:[%s8093_s5 + $0x24] sm:$0xff]  }
  0xb5   : > { %6982 = vmatpush3.bf16.msra.mxu1 %v7476_v45  ;;  %7030 = vmatpush3.bf16.msra.mxu0 %v7477_v50  ;;  %v1660_v45 = vor.u32 %v1659_v36, %v1656_v35  ;;  %v1670_v50 = vor.u32 %v1669_v41, %v1665_v40  ;;  %v1729_v35 = vshll.u32 %v1569_v24, 16  ;;  %v1735_v36 = vshll.u32 %v1570_v25, 16  ;;  %v7498_v41 = vld [vmem:[%s8085_s26 + $0xe8] sm:$0xff]  }
  0xb6   : > { %6983 = vmatprep.subr.bf16.mxu1 %v7478_v0  ;;  %7031 = vmatprep.subr.bf16.mxu0 %v7479_v1  ;;  %v1690_v26 = vsel %vm8132_vm2, %v1685_v13, %v8171_v62 }
  0xb7   : > { %6953 = vmatprep.mubr.bf16.mxu0 %v7480_v11  ;;  %6969 = vmatprep.mubr.bf16.mxu1 %v7481_v15  ;;  %v1661_v56 = vrot.slane %v1660_v45, 4  ;;  %v1671_v61 = vrot.slane %v1670_v50, 4  ;;  %v7489_v11 = vld [vmem:[%s8093_s5 + $0xc] sm:$0xff]   ;;  %v1715_v15 = vshrl.u32 %v1567_v7, 16  ;;  %v1731_v43 = vrot.slane %v1729_v35, 5  ;;  %v7506_v35 = vld [vmem:[%s8085_s26 + $0xd8] sm:$0xff]  }
  0xb8   : > { %v8197_v44 = vrot.slane %v1735_v36, 5  ;;  %v7499_v45 = vld [vmem:[%s8085_s26 + $0x128] sm:$0xff]  }
  0xb9   : > { %6984 = vmatpush3.bf16.msra.mxu1 %v7478_v0  ;;  %7032 = vmatpush3.bf16.msra.mxu0 %v7479_v1  ;;  %v8173_v0 = vrot.slane %v1697_v53, 5  ;;  %v1666_v1 = vsel %vm8132_vm2, %v1661_v56, %v1665_v40  ;;  %v1676_v4 = vsel %vm8132_vm2, %v1671_v61, %v1675_v42  ;;  %v1572_v53 = vld [vmem:[%s8093_s5 + $0x48] sm:$0xf] }
  0xba   : > { %6985 = vmatprep.subr.bf16.mxu1 %v7484_v17  ;;  %7033 = vmatprep.subr.bf16.mxu0 %v7485_v23  ;;  %v6058_v21 = vcombine.low %v1666_v1, %v1676_v4  ;;  %v1750_v58 = vshrl.u32 %v1572_v53, 16  ;;  %v1575_v4 = vld [vmem:[%s8093_s5 + $0x54] sm:$0xf] }
  0xbc   : > { %6954 = vmatmul.mubr.bf16.gmra.mxu0 %v7482_v29  ;;  %6970 = vmatmul.mubr.bf16.gmra.mxu1 %v7483_v30  ;;  %v1708_v29 = vor.u32 %v1707_v19, %v1704_v18  ;;  %v1571_v30 = vld [vmem:[%s8093_s5 + $0x44] sm:$0x1]  ;;  %v1752_v2 = vrot.slane %v1750_v58, 4  ;;  %v1783_v19 = vshll.u32 %v1576_v10, 16 }
  0xbd   : > { %6986 = vmatpush3.bf16.msra.mxu1 %v7484_v17  ;;  %7034 = vmatpush3.bf16.msra.mxu0 %v7485_v23  ;;  %v1695_v17 = vrot.slane %v1694_v5, 4  ;;  %v1717_v23 = vrot.slane %v1715_v15, 4  ;;  %v1745_v40 = vshll.u32 %v1571_v30, 16  ;;  %v7502_v5 = vld [vmem:[%s8085_s26 + $0xe0] sm:$0xff]   ;;  %v1774_v15 = vshrl.u32 %v1575_v4, 16 }
  0xbe   : > { %6987 = vmatprep.subr.bf16.mxu1 %v7486_v38  ;;  %7035 = vmatprep.subr.bf16.mxu0 %v7487_v49  ;;  %v1709_v37 = vrot.slane %v1708_v29, 4  ;;  %v1789_v29 = vrot.slane %v1787_v20, 4 }
  0xbf   : > { %6989 = vmatprep.mubr.bf16.mxu1 %v7488_v54  ;;  %7037 = vmatprep.mubr.bf16.mxu0 %v6056_v39  ;;  %v1700_v27 = vsel %vm8132_vm2, %v1695_v17, %v8173_v0  ;;  %v1718_v33 = vor.u32 %v1717_v23, %v1713_v22  ;;  %v1739_v39 = vshrl.u32 %v1570_v25, 16  ;;  %v1573_v54 = vld [vmem:[%s8093_s5 + $0x4c] sm:$0xf]  ;;  %v1769_v0 = vshll.u32 %v1574_v55, 16  ;;  %v1582_v55 = vld [vmem:[%s8093_s5 + $0x70] sm:$0xf] }
  0xc0   : > { %v1714_v47 = vsel %vm8132_vm2, %v1709_v37, %v1713_v22  ;;  %v6059_v50 = vcombine.low %v1690_v26, %v1700_v27  ;;  %v1759_v62 = vshll.u32 %v1573_v54, 16  ;;  %v1763_v63 = vshrl.u32 %v1573_v54, 16  ;;  %v7500_v26 = vld [vmem:[%s8093_s5 + $0x48] sm:$0xff]  }
  0xc1   : > { %6988 = vmatpush3.bf16.msra.mxu1 %v7486_v38  ;;  %7036 = vmatpush3.bf16.msra.mxu0 %v7487_v49  ;;  %v1728_v38 = vrot.slane %v1726_v31, 4  ;;  %v1719_v42 = vrot.slane %v1718_v33, 4  ;;  %v1741_v48 = vrot.slane %v1739_v39, 4  ;;  %v1747_v49 = vrot.slane %v1745_v40, 5  ;;  %v1580_v39 = vld [vmem:[%s8093_s5 + $0x68] sm:$0x1] }
  0xc2   : > { %7069 = vmatprep.subr.bf16.mxu1 %v7490_v59  ;;  %7117 = vmatprep.subr.bf16.mxu0 %v7491_v60  ;;  %v1761_v7 = vrot.slane %v1759_v62, 5  ;;  %v1765_v8 = vrot.slane %v1763_v63, 4  ;;  %v1771_v9 = vrot.slane %v1769_v0, 5  ;;  %v1776_v23 = vrot.slane %v1774_v15, 4  ;;  %v1581_v54 = vld [vmem:[%s8093_s5 + $0x6c] sm:$0xf] }
  0xc3   : > { %v1724_v51 = vsel %vm8132_vm2, %v1719_v42, %v1723_v34  ;;  %v1732_v52 = vor.u32 %v1731_v43, %v1728_v38  ;;  %v1742_v57 = vor.u32 %v1741_v48, %v8197_v44  ;;  %v1793_v25 = vshll.u32 %v1577_v14, 16  ;;  %v1578_v34 = vld [vmem:[%s8093_s5 + $0x60] sm:$0xf]  ;;  %v1579_v38 = vld [vmem:[%s8093_s5 + $0x64] sm:$0xf] }
  0xc4   : > { %6990 = vmatmul.mubr.bf16.vlgmr.msra.gmra.mxu1 %v7489_v11  ;;  %7038 = vmatmul.mubr.bf16.vlgmr.msra.gmra.mxu0 %v6057_v12  ;;  %v6060_v56 = vcombine.low %v1714_v47, %v1724_v51  ;;  %v7503_v11 = vld [vmem:[%s8085_s26 + $0x120] sm:$0xff]   ;;  %v1766_v18 = vor.u32 %v1765_v8, %v1761_v7  ;;  %v1798_v40 = vshrl.u32 %v1578_v34, 16  ;;  %v1825_v63 = vshll.u32 %v1581_v54, 16  ;;  %v1584_v14 = vld [vmem:[%s8093_s5 + $0x78] sm:$0xf] }
  0xc5   : > { %7070 = vmatpush3.bf16.msra.mxu1 %v7490_v59  ;;  %7118 = vmatpush3.bf16.msra.mxu0 %v7491_v60  ;;  %v1753_v59 = vshll.u32 %v1572_v53, 16  ;;  %v7496_v60 = vld [vmem:[%s8093_s5 + $0x30] sm:$0xff]   ;;  %v1733_v61 = vrot.slane %v1732_v52, 4  ;;  %v1743_v1 = vrot.slane %v1742_v57, 4  ;;  %v1795_v33 = vrot.slane %v1793_v25, 5 }
  0xc6   : > { %6993 = vmatprep.mubr.bf16.mxu1 %v7492_v16  ;;  %7041 = vmatprep.mubr.bf16.mxu0 %v6058_v21  ;;  %v1777_v16 = vshll.u32 %v1575_v4, 16  ;;  %v7497_v21 = vld [vmem:[%s8093_s5 + $0x3c] sm:$0xff]   ;;  %v1767_v27 = vrot.slane %v1766_v18, 4  ;;  %v1800_v48 = vrot.slane %v1798_v40, 4  ;;  %v1831_v0 = vshll.u32 %v1582_v55, 16 }
  0xc7   : > { %7071 = vmatprep.subr.bf16.mxu1 %v7494_v28  ;;  %7119 = vmatprep.subr.bf16.mxu0 %v7495_v32  ;;  %v1755_v3 = vrot.slane %v1753_v59, 5  ;;  %v1738_v12 = vsel %vm8132_vm2, %v1733_v61, %v8197_v44  ;;  %v1748_v17 = vsel %vm8132_vm2, %v1743_v1, %v1747_v49  ;;  %v1807_v44 = vshll.u32 %v1579_v38, 16  ;;  %v1583_v59 = vld [vmem:[%s8093_s5 + $0x74] sm:$0x1]  ;;  %v1586_v18 = vld [vmem:[%s8093_s5 + $0x80] sm:$0x1] }
  0xc8   : > { %v1779_v24 = vrot.slane %v1777_v16, 5  ;;  %v6061_v30 = vcombine.low %v1738_v12, %v1748_v17  ;;  %v1772_v36 = vsel %vm8132_vm2, %v1767_v27, %v1771_v9  ;;  %v7501_v61 = vld [vmem:[%s8093_s5 + $0x54] sm:$0xff]   ;;  %v1841_v4 = vshll.u32 %v1583_v59, 16  ;;  %v1585_v17 = vld [vmem:[%s8093_s5 + $0x7c] sm:$0xf] }
  0xc9   : > { %7072 = vmatpush3.bf16.msra.mxu1 %v7494_v28  ;;  %7120 = vmatpush3.bf16.msra.mxu0 %v7495_v32  ;;  %v1756_v13 = vor.u32 %v1755_v3, %v1752_v2  ;;  %v1785_v28 = vrot.slane %v1783_v19, 5  ;;  %v1809_v52 = vrot.slane %v1807_v44, 5  ;;  %v1835_v3 = vshrl.u32 %v1582_v55, 16  ;;  %v1589_v40 = vld [vmem:[%s8093_s5 + $0x8c] sm:$0x1] }
  0xca   : > { %7073 = vmatprep.subr.bf16.mxu1 %v7498_v41  ;;  %7121 = vmatprep.subr.bf16.mxu0 %v7499_v45  ;;  %v1780_v32 = vor.u32 %v1779_v24, %v1776_v23  ;;  %v1827_v9 = vrot.slane %v1825_v63, 5  ;;  %v1833_v10 = vrot.slane %v1831_v0, 5  ;;  %v1846_v19 = vshrl.u32 %v1584_v14, 16 }
  0xcb   : > { %v1757_v22 = vrot.slane %v1756_v13, 4  ;;  %v1790_v37 = vor.u32 %v1789_v29, %v1785_v28  ;;  %v1837_v12 = vrot.slane %v1835_v3, 4  ;;  %v1843_v13 = vrot.slane %v1841_v4, 5  ;;  %v7510_v29 = vld [vmem:[%s8085_s26 + $0xd0] sm:$0xff]  }
  0xcc   : > { %6994 = vmatmul.mubr.bf16.gmra.mxu1 %v7493_v46  ;;  %7042 = vmatmul.mubr.bf16.gmra.mxu0 %v6059_v50  ;;  %v1781_v43 = vrot.slane %v1780_v32, 4  ;;  %v7507_v46 = vld [vmem:[%s8085_s26 + $0x118] sm:$0xff]   ;;  %v1817_v50 = vshll.u32 %v1580_v39, 16  ;;  %v1849_v20 = vshll.u32 %v1584_v14, 16  ;;  %v1855_v23 = vshll.u32 %v1585_v17, 16  ;;  %v7515_v14 = vld [vmem:[%s8085_s26 + $0x108] sm:$0xff]  }
  0xcd   : > { %6997 = vmatprep.mubr.bf16.mxu1 %v7496_v60  ;;  %7045 = vmatprep.mubr.bf16.mxu0 %v6060_v56  ;;  %v1762_v31 = vsel %vm8132_vm2, %v1757_v22, %v1761_v7  ;;  %v1791_v47 = vrot.slane %v1790_v37, 4  ;;  %v1822_v60 = vshrl.u32 %v1581_v54, 16  ;;  %v7504_v7 = vld [vmem:[%s8093_s5 + $0x60] sm:$0xff]   ;;  %v1838_v22 = vor.u32 %v1837_v12, %v1833_v10  ;;  %v1588_v39 = vld [vmem:[%s8093_s5 + $0x88] sm:$0xf] }
  0xce   : > { %7074 = vmatpush3.bf16.msra.mxu1 %v7498_v41  ;;  %7122 = vmatpush3.bf16.msra.mxu0 %v7499_v45  ;;  %v1801_v41 = vshll.u32 %v1578_v34, 16  ;;  %v6062_v42 = vcombine.low %v1762_v31, %v1772_v36  ;;  %v1811_v45 = vshrl.u32 %v1579_v38, 16  ;;  %v1786_v51 = vsel %vm8132_vm2, %v1781_v43, %v1785_v28  ;;  %v7511_v34 = vld [vmem:[%s8085_s26 + $0x110] sm:$0xff]  }
  0xcf   : > { %7075 = vmatprep.subr.bf16.mxu1 %v7502_v5  ;;  %7123 = vmatprep.subr.bf16.mxu0 %v7503_v11  ;;  %v1796_v56 = vsel %vm8132_vm2, %v1791_v47, %v1795_v33  ;;  %v1819_v58 = vrot.slane %v1817_v50, 5  ;;  %v1824_v2 = vrot.slane %v1822_v60, 4  ;;  %v1859_v24 = vshrl.u32 %v1585_v17, 16  ;;  %v1587_v33 = vld [vmem:[%s8093_s5 + $0x84] sm:$0xf]  ;;  %v7508_v47 = vld [vmem:[%s8093_s5 + $0x78] sm:$0xff]  }
  0xd0   : > { %v1803_v49 = vrot.slane %v1801_v41, 5  ;;  %v1813_v53 = vrot.slane %v1811_v45, 4  ;;  %v1851_v27 = vrot.slane %v1849_v20, 5  ;;  %v1865_v28 = vshll.u32 %v1586_v18, 16  ;;  %v1590_v60 = vld [vmem:[%s8093_s5 + $0x90] sm:$0xf] }
  0xd1   : > { %v1828_v16 = vor.u32 %v1827_v9, %v1824_v2  ;;  %v1857_v31 = vrot.slane %v1855_v23, 5  ;;  %v1861_v32 = vrot.slane %v1859_v24, 4  ;;  %v1870_v41 = vshrl.u32 %v1587_v33, 16  ;;  %v7509_v9 = vld [vmem:[%s8093_s5 + $0x84] sm:$0xff]   ;;  %v1594_v20 = vld [vmem:[%s8093_s5 + $0xa0] sm:$0xf] }
  0xd2   : > { %7076 = vmatpush3.bf16.msra.mxu1 %v7502_v5  ;;  %7124 = vmatpush3.bf16.msra.mxu0 %v7503_v11  ;;  %v1804_v57 = vor.u32 %v1803_v49, %v1800_v48  ;;  %v1814_v62 = vor.u32 %v1813_v53, %v1809_v52  ;;  %v6063_v5 = vcombine.low %v1786_v51, %v1796_v56  ;;  %v1867_v38 = vrot.slane %v1865_v28, 5  ;;  %v1595_v23 = vld [vmem:[%s8093_s5 + $0xa4] sm:$0x1] }
  0xd3   : > { %7077 = vmatprep.subr.bf16.mxu1 %v7506_v35  ;;  %7125 = vmatprep.subr.bf16.mxu0 %v7507_v46  ;;  %v1829_v25 = vrot.slane %v1828_v16, 4  ;;  %v1862_v43 = vor.u32 %v1861_v32, %v1857_v31  ;;  %v1873_v44 = vshll.u32 %v1587_v33, 16  ;;  %v1879_v45 = vshll.u32 %v1588_v39, 16  ;;  %v7512_v16 = vld [vmem:[%s8093_s5 + $0x90] sm:$0xff]  }
  0xd4   : > { %6998 = vmatmul.mubr.bf16.gmra.mxu1 %v7497_v21  ;;  %7046 = vmatmul.mubr.bf16.gmra.mxu0 %v6061_v30  ;;  %v1805_v1 = vrot.slane %v1804_v57, 4  ;;  %v1815_v8 = vrot.slane %v1814_v62, 4  ;;  %v1839_v30 = vrot.slane %v1838_v22, 4  ;;  %v1872_v49 = vrot.slane %v1870_v41, 4  ;;  %v7514_v62 = vld [vmem:[%s8085_s26 + $0xc8] sm:$0xff]   ;;  %v7518_v41 = vld [vmem:[%s8085_s26 + $0xc0] sm:$0xff]  }
  0xd5   : > { %7001 = vmatprep.mubr.bf16.mxu1 %v7500_v26  ;;  %7049 = vmatprep.mubr.bf16.mxu0 %v6062_v42  ;;  %v1848_v26 = vrot.slane %v1846_v19, 4  ;;  %v1834_v36 = vsel %vm8132_vm2, %v1829_v25, %v1833_v10  ;;  %v1883_v50 = vshrl.u32 %v1588_v39, 16  ;;  %v1863_v51 = vrot.slane %v1862_v43, 4 }
  0xd6   : > { %7078 = vmatpush3.bf16.msra.mxu1 %v7506_v35  ;;  %7126 = vmatpush3.bf16.msra.mxu0 %v7507_v46  ;;  %v1810_v11 = vsel %vm8132_vm2, %v1805_v1, %v1809_v52  ;;  %v1820_v15 = vsel %vm8132_vm2, %v1815_v8, %v1819_v58  ;;  %v7505_v35 = vld [vmem:[%s8093_s5 + $0x6c] sm:$0xff]   ;;  %v1844_v42 = vsel %vm8132_vm2, %v1839_v30, %v1843_v13  ;;  %v1875_v52 = vrot.slane %v1873_v44, 5  ;;  %v1592_v1 = vld [vmem:[%s8093_s5 + $0x98] sm:$0x1]  ;;  %v1593_v13 = vld [vmem:[%s8093_s5 + $0x9c] sm:$0xf] }
  0xd7   : > { %v6064_v21 = vcombine.low %v1810_v11, %v1820_v15  ;;  %v1852_v37 = vor.u32 %v1851_v27, %v1848_v26  ;;  %7079 = vmatprep.subr.bf16.mxu1 %v7510_v29  ;;  %7127 = vmatprep.subr.bf16.mxu0 %v7511_v34  ;;  %v6065_v46 = vcombine.low %v1834_v36, %v1844_v42  ;;  %v1881_v53 = vrot.slane %v1879_v45, 5  ;;  %v1597_v44 = vld [vmem:[%s8093_s5 + $0xac] sm:$0xf]  ;;  %v1598_v45 = vld [vmem:[%s8093_s5 + $0xb0] sm:$0x1] }
  0xd8   : > { %v1889_v54 = vshll.u32 %v1589_v40, 16  ;;  %v1885_v56 = vrot.slane %v1883_v50, 4  ;;  %v1868_v57 = vsel %vm8132_vm2, %v1863_v51, %v1867_v38  ;;  %v1876_v58 = vor.u32 %v1875_v52, %v1872_v49  ;;  %v1596_v40 = vld [vmem:[%s8093_s5 + $0xa8] sm:$0xf]  ;;  %v7513_v49 = vld [vmem:[%s8093_s5 + $0x9c] sm:$0xff]  }
  0xd9   : > { %v1853_v48 = vrot.slane %v1852_v37, 4  ;;  %v1894_v2 = vshrl.u32 %v1590_v60, 16  ;;  %v1897_v3 = vshll.u32 %v1590_v60, 16  ;;  %v1913_v8 = vshll.u32 %v1592_v1, 16 }
  0xda   : > { %7080 = vmatpush3.bf16.msra.mxu1 %v7510_v29  ;;  %7128 = vmatpush3.bf16.msra.mxu0 %v7511_v34  ;;  %v1891_v59 = vrot.slane %v1889_v54, 5  ;;  %v1886_v0 = vor.u32 %v1885_v56, %v1881_v53  ;;  %v1877_v4 = vrot.slane %v1876_v58, 4  ;;  %v1918_v24 = vshrl.u32 %v1593_v13, 16 }
  0xdb   : > { %v1858_v55 = vsel %vm8132_vm2, %v1853_v48, %v1857_v31  ;;  %7081 = vmatprep.subr.bf16.mxu1 %v7514_v62  ;;  %v1896_v11 = vrot.slane %v1894_v2, 4  ;;  %v1899_v12 = vrot.slane %v1897_v3, 5  ;;  %v1915_v19 = vrot.slane %v1913_v8, 5  ;;  %7129 = vmatprep.subr.bf16.mxu0 %v7515_v14  ;;  %v1601_v3 = vld [vmem:[%s8093_s5 + $0xbc] sm:$0x1] }
  0xdc   : > { %7002 = vmatmul.mubr.bf16.gmra.mxu1 %v7501_v61  ;;  %7050 = vmatmul.mubr.bf16.gmra.mxu0 %v6063_v5  ;;  %v1591_v61 = vld [vmem:[%s8093_s5 + $0x94] sm:$0xf]  ;;  %v6066_v63 = vcombine.low %v1858_v55, %v1868_v57  ;;  %v1887_v10 = vrot.slane %v1886_v0, 4  ;;  %v1882_v15 = vsel %vm8132_vm2, %v1877_v4, %v1881_v53  ;;  %v1921_v25 = vshll.u32 %v1593_v13, 16  ;;  %v7519_v53 = vld [vmem:[%s8085_s26 + $0x100] sm:$0xff]   ;;  %v7516_v55 = vld [vmem:[%s8093_s5 + $0xa8] sm:$0xff]  }
  0xdd   : > { %7005 = vmatprep.mubr.bf16.mxu1 %v7504_v7  ;;  %7053 = vmatprep.mubr.bf16.mxu0 %v6064_v21  ;;  %v1903_v5 = vshll.u32 %v1591_v61, 16  ;;  %v1907_v7 = vshrl.u32 %v1591_v61, 16  ;;  %v1900_v22 = vor.u32 %v1899_v12, %v1896_v11  ;;  %v1927_v28 = vshll.u32 %v1594_v20, 16 }
  0xde   : > { %7082 = vmatpush3.bf16.msra.mxu1 %v7514_v62  ;;  %v1892_v21 = vsel %vm8132_vm2, %v1887_v10, %v1891_v59  ;;  %v1931_v29 = vshrl.u32 %v1594_v20, 16  ;;  %7130 = vmatpush3.bf16.msra.mxu0 %v7515_v14  ;;  %v1920_v31 = vrot.slane %v1918_v24, 4  ;;  %v1923_v32 = vrot.slane %v1921_v25, 5  ;;  %v1599_v62 = vld [vmem:[%s8093_s5 + $0xb4] sm:$0xf] }
  0xdf   : > { %v1905_v17 = vrot.slane %v1903_v5, 5  ;;  %v1909_v18 = vrot.slane %v1907_v7, 4  ;;  %v6067_v26 = vcombine.low %v1882_v15, %v1892_v21  ;;  %v1901_v30 = vrot.slane %v1900_v22, 4  ;;  %7083 = vmatprep.subr.bf16.mxu1 %v7518_v41  ;;  %7131 = vmatprep.subr.bf16.mxu0 %v7519_v53  ;;  %v7517_v22 = vld [vmem:[%s8093_s5 + $0xb4] sm:$0xff]  }
  0xe0   : > { %v1937_v33 = vshll.u32 %v1595_v23, 16  ;;  %v1933_v36 = vrot.slane %v1931_v29, 4  ;;  %v1924_v38 = vor.u32 %v1923_v32, %v1920_v31  ;;  %v1951_v51 = vshll.u32 %v1597_v44, 16  ;;  %v7521_v32 = vld [vmem:[%s8093_s5 + $0x264] sm:$0xff]  }
  0xe1   : > { %v1910_v27 = vor.u32 %v1909_v18, %v1905_v17  ;;  %v1906_v37 = vsel %vm8132_vm2, %v1901_v30, %v1905_v17  ;;  %v1955_v52 = vshrl.u32 %v1597_v44, 16  ;;  %v1961_v58 = vshll.u32 %v1598_v45, 16  ;;  %v7525_v30 = vld [vmem:[%s8085_s26 + $0x1b8] sm:$0xff]   ;;  %v7532_v44 = vld [vmem:[%s8093_s5 + $0x1c8] sm:$0xff]  }
  0xe2   : > { %v1939_v39 = vrot.slane %v1937_v33, 5  ;;  %v1925_v50 = vrot.slane %v1924_v38, 4  ;;  %7084 = vmatpush3.bf16.msra.mxu1 %v7518_v41  ;;  %v1953_v60 = vrot.slane %v1951_v51, 5  ;;  %v1966_v4 = vshrl.u32 %v1599_v62, 16  ;;  %7132 = vmatpush3.bf16.msra.mxu0 %v7519_v53  ;;  %v7527_v38 = vld [vmem:[%s8093_s5 + $0x27c] sm:$0xff]   ;;  %v7533_v45 = vld [vmem:[%s8093_s5 + $0x294] sm:$0xff]  }
  0xe3   : > { %v1911_v34 = vrot.slane %v1910_v27, 4  ;;  %v1957_v61 = vrot.slane %v1955_v52, 4  ;;  %v1963_v2 = vrot.slane %v1961_v58, 5  ;;  %v1969_v8 = vshll.u32 %v1599_v62, 16  ;;  %7213 = vmatprep.subr.bf16.mxu0 %v7525_v30  ;;  %v7528_v41 = vld [vmem:[%s8093_s5 + $0x1bc] sm:$0xff]   ;;  %v7539_v53 = vld [vmem:[%s8093_s5 + $0x2ac] sm:$0xff]  }
  0xe4   : > { %7006 = vmatmul.mubr.bf16.gmra.mxu1 %v7505_v35  ;;  %7054 = vmatmul.mubr.bf16.gmra.mxu0 %v6065_v46  ;;  %v1929_v35 = vrot.slane %v1927_v28, 5  ;;  %v1942_v46 = vshrl.u32 %v1596_v40, 16  ;;  %v1968_v11 = vrot.slane %v1966_v4, 4  ;;  %v1985_v13 = vshll.u32 %v1601_v3, 16  ;;  %v7524_v28 = vld [vmem:[%s8085_s26 + $0x178] sm:$0xff]   ;;  %v7546_v62 = vld [vmem:[%s8093_s5 + $0x204] sm:$0xff]  }
  0xe5   : > { %7009 = vmatprep.mubr.bf16.mxu1 %v7508_v47  ;;  %7057 = vmatprep.mubr.bf16.mxu0 %v6066_v63  ;;  %v1916_v42 = vsel %vm8132_vm2, %v1911_v34, %v1915_v19  ;;  %v1945_v47 = vshll.u32 %v1596_v40, 16  ;;  %v1600_v63 = vld [vmem:[%s8093_s5 + $0xb8] sm:$0xf]  ;;  %v1958_v7 = vor.u32 %v1957_v61, %v1953_v60  ;;  %v1971_v15 = vrot.slane %v1969_v8, 5  ;;  %v7522_v34 = vld [vmem:[%s8093_s5 + $0x1a4] sm:$0xff]  }
  0xe6   : > { %v1934_v43 = vor.u32 %v1933_v36, %v1929_v35  ;;  %v6068_v48 = vcombine.low %v1906_v37, %v1916_v42  ;;  %v1944_v56 = vrot.slane %v1942_v46, 4  ;;  %v1930_v59 = vsel %vm8132_vm2, %v1925_v50, %v1929_v35  ;;  %7165 = vmatprep.subr.bf16.mxu1 %v7524_v28  ;;  %v7523_v35 = vld [vmem:[%s8093_s5 + $0x270] sm:$0xff]   ;;  %v7536_v40 = vld [vmem:[%s8085_s26 + $0x168] sm:$0xff]   ;;  %v7542_v46 = vld [vmem:[%s8085_s26 + $0x160] sm:$0xff]  }
  0xe7   : > { %v1947_v57 = vrot.slane %v1945_v47, 5  ;;  %v1979_v12 = vshrl.u32 %v1600_v63, 16  ;;  %v1959_v14 = vrot.slane %v1958_v7, 4  ;;  %v1972_v20 = vor.u32 %v1971_v15, %v1968_v11  ;;  %v7526_v36 = vld [vmem:[%s8093_s5 + $0x1b0] sm:$0xff]   ;;  %v7529_v42 = vld [vmem:[%s8093_s5 + $0x288] sm:$0xff]   ;;  %v7543_v47 = vld [vmem:[%s8085_s26 + $0x1a0] sm:$0xff]  }
  0xe8   : > { %v1935_v54 = vrot.slane %v1934_v43, 4  ;;  %v1987_v24 = vrot.slane %v1985_v13, 5  ;;  %v7530_v37 = vld [vmem:[%s8085_s26 + $0x170] sm:$0xff]   ;;  %v7537_v43 = vld [vmem:[%s8085_s26 + $0x1a8] sm:$0xff]   ;;  %v7538_v50 = vld [vmem:[%s8093_s5 + $0x1e0] sm:$0xff]  }
  0xe9   : > { %v1948_v1 = vor.u32 %v1947_v57, %v1944_v56  ;;  %v1981_v18 = vrot.slane %v1979_v12, 4  ;;  %v1964_v19 = vsel %vm8132_vm2, %v1959_v14, %v1963_v2  ;;  %v1973_v25 = vrot.slane %v1972_v20, 4  ;;  %v7548_v51 = vld [vmem:[%s8085_s26 + $0x158] sm:$0xff]   ;;  %v7555_v56 = vld [vmem:[%s8085_s26 + $0x190] sm:$0xff]   ;;  %v7561_v61 = vld [vmem:[%s8085_s26 + $0x188] sm:$0xff]  }
  0xea   : > { %v1940_v0 = vsel %vm8132_vm2, %v1935_v54, %v1939_v39  ;;  %v7531_v39 = vld [vmem:[%s8085_s26 + $0x1b0] sm:$0xff]   ;;  %v7549_v52 = vld [vmem:[%s8085_s26 + $0x198] sm:$0xff]   ;;  %v7566_v2 = vld [vmem:[%s8085_s26 + $0x140] sm:$0xff]  }
  0xeb   : > { %v6069_v5 = vcombine.low %v1930_v59, %v1940_v0  ;;  %v1949_v10 = vrot.slane %v1948_v1, 4  ;;  %v7540_v54 = vld [vmem:[%s8093_s5 + $0x1ec] sm:$0xff]   ;;  %v7544_v57 = vld [vmem:[%s8093_s5 + $0x1f8] sm:$0xff]   ;;  %v7545_v59 = vld [vmem:[%s8093_s5 + $0x2c4] sm:$0xff]  }
  0xec   : > { %7010 = vmatmul.mubr.bf16.gmra.mxu1 %v7509_v9  ;;  %7058 = vmatmul.mubr.bf16.gmra.mxu0 %v6067_v26  ;;  %v1975_v9 = vshll.u32 %v1600_v63, 16  ;;  %v7520_v26 = vld [vmem:[%s8093_s5 + $0x198] sm:$0xff]   ;;  %v7547_v63 = vld [vmem:[%s8093_s5 + $0x2d0] sm:$0xff]   ;;  %v7567_v3 = vld [vmem:[%s8085_s26 + $0x180] sm:$0xff]  }
  0xed   : > { %7013 = vmatprep.mubr.bf16.mxu1 %v7512_v16  ;;  %7061 = vmatprep.mubr.bf16.mxu0 %v6068_v48  ;;  %v1954_v17 = vsel %vm8132_vm2, %v1949_v10, %v1953_v60  ;;  %v7534_v48 = vld [vmem:[%s8093_s5 + $0x1d4] sm:$0xff]   ;;  %v7560_v60 = vld [vmem:[%s8085_s26 + $0x148] sm:$0xff]   ;;  %v7551_v1 = vld [vmem:[%s8093_s5 + $0x2dc] sm:$0xff]  }
  0xee   : > { %v1977_v16 = vrot.slane %v1975_v9, 5  ;;  %v6070_v21 = vcombine.low %v1954_v17, %v1964_v19  ;;  %v7541_v58 = vld [vmem:[%s8093_s5 + $0x2b8] sm:$0xff]   ;;  %v7550_v0 = vld [vmem:[%s8093_s5 + $0x210] sm:$0xff]   ;;  %v6226_v7 = vld [vmem:[%s8093_s5 + $0x1a0] sm:$0x1] }
  0xef   : > { %v6224_v4 = vld [vmem:[%s8093_s5 + $0x198] sm:$0xf]  ;;  %v3157_v12 = vshll.u32 %v6226_v7, 16  ;;  %v6227_v15 = vld [vmem:[%s8093_s5 + $0x1a4] sm:$0xf] }
  0xf0   : > { %v1982_v23 = vor.u32 %v1981_v18, %v1977_v16  ;;  %v1978_v29 = vsel %vm8132_vm2, %v1973_v25, %v1977_v16  ;;  %v3138_v8 = vshrl.u32 %v6224_v4, 16  ;;  %v3141_v9 = vshll.u32 %v6224_v4, 16  ;;  %v7552_v16 = vld [vmem:[%s8093_s5 + $0x21c] sm:$0xff]   ;;  %v6228_v19 = vld [vmem:[%s8093_s5 + $0x1a8] sm:$0xf] }
  0xf1   : > { %v3162_v20 = vshrl.u32 %v6227_v15, 16  ;;  %v3171_v25 = vshll.u32 %v6228_v19, 16 }
  0xf2   : > { %v1983_v27 = vrot.slane %v1982_v23, 4  ;;  %v3140_v13 = vrot.slane %v3138_v8, 4  ;;  %v3143_v14 = vrot.slane %v3141_v9, 5 }
  0xf4   : > { %7014 = vmatmul.mubr.bf16.gmra.mxu1 %v7513_v49  ;;  %7062 = vmatmul.mubr.bf16.gmra.mxu0 %v6069_v5  ;;  %v1988_v31 = vsel %vm8132_vm2, %v1983_v27, %v1987_v24  ;;  %v7535_v49 = vld [vmem:[%s8093_s5 + $0x2a0] sm:$0xff]   ;;  %v6225_v5 = vld [vmem:[%s8093_s5 + $0x19c] sm:$0xf]  ;;  %v3144_v23 = vor.u32 %v3143_v14, %v3140_v13  ;;  %v3165_v24 = vshll.u32 %v6227_v15, 16  ;;  %v7557_v27 = vld [vmem:[%s8093_s5 + $0x2f4] sm:$0xff]  }
  0xf5   : > { %7017 = vmatprep.mubr.bf16.mxu1 %v7516_v55  ;;  %7065 = vmatprep.mubr.bf16.mxu0 %v6070_v21  ;;  %v6071_v33 = vcombine.low %v1978_v29, %v1988_v31  ;;  %v7554_v55 = vld [vmem:[%s8085_s26 + $0x150] sm:$0xff]   ;;  %v3147_v10 = vshll.u32 %v6225_v5, 16  ;;  %v3151_v11 = vshrl.u32 %v6225_v5, 16  ;;  %v7553_v21 = vld [vmem:[%s8093_s5 + $0x2e8] sm:$0xff]   ;;  %v3159_v29 = vrot.slane %v3157_v12, 5 }
  0xf6   : > { %v3145_v31 = vrot.slane %v3144_v23, 4  ;;  %v7564_v12 = vld [vmem:[%s8093_s5 + $0x24c] sm:$0xff]  }
  0xf7   : > { %v8346_v17 = vrot.slane %v3147_v10, 5  ;;  %v3153_v18 = vrot.slane %v3151_v11, 4 }
  0xfc   : > { %7018 = vmatmul.mubr.bf16.gmra.mxu1 %v7517_v22  ;;  %7066 = vmatmul.mubr.bf16.gmra.mxu0 %v6071_v33  ;;  %v7556_v22 = vld [vmem:[%s8093_s5 + $0x228] sm:$0xff]   ;;  %v3167_v33 = vrot.slane %v3165_v24, 5 }
  0xfd   : > { %7085 = vmatprep.mubr.bf16.mxu1 %v7520_v26  ;;  %7133 = vmatprep.mubr.bf16.mxu0 %v7521_v32  ;;  %v3175_v26 = vshrl.u32 %v6228_v19, 16  ;;  %v6229_v32 = vld [vmem:[%s8093_s5 + $0x1ac] sm:$0x1]  ;;  %v6236_v19 = vld [vmem:[%s8093_s5 + $0x1c8] sm:$0xf] }
  0xfe   : > { %v3234_v23 = vshrl.u32 %v6236_v19, 16  ;;  %v3237_v24 = vshll.u32 %v6236_v19, 16 }
 0x104   : > { %7086 = vmatmul.mubr.bf16.vlgmr.msra.gmra.mxu1 %v7522_v34  ;;  %7134 = vmatmul.mubr.bf16.vlgmr.msra.gmra.mxu0 %v7523_v35  ;;  %v8355_v34 = vld [vmem:[%s8085_s26 + $0x1f8] sm:$0xff]  }
 0x105   : > { %7166 = vmatpush3.bf16.msra.mxu1 %v7524_v28  ;;  %7089 = vmatprep.mubr.bf16.mxu1 %v7526_v36  ;;  %v3154_v28 = vor.u32 %v3153_v18, %v8346_v17  ;;  %v8358_v35 = vld [vmem:[%s8085_s26 + $0x238] sm:$0xff]   ;;  %v6230_v36 = vld [vmem:[%s8093_s5 + $0x1b0] sm:$0xf] }
 0x106   : > { %7167 = vmatprep.subr.bf16.mxu1 %v7530_v37  ;;  %7214 = vmatpush3.bf16.msra.mxu0 %v7525_v30  ;;  %v3164_v30 = vrot.slane %v3162_v20, 4  ;;  %v6237_v20 = vld [vmem:[%s8093_s5 + $0x1cc] sm:$0xf] }
 0x107   : > { %7137 = vmatprep.mubr.bf16.mxu0 %v7527_v38  ;;  %7215 = vmatprep.subr.bf16.mxu0 %v7531_v39  ;;  %v8362_v38 = vrot.slane %v3171_v25, 5  ;;  %v3243_v25 = vshll.u32 %v6237_v20, 16 }
 0x109   : > { %7168 = vmatpush3.bf16.msra.mxu1 %v7530_v37  ;;  %v7558_v37 = vld [vmem:[%s8093_s5 + $0x234] sm:$0xff]  }
 0x10a   : > { %7169 = vmatprep.subr.bf16.mxu1 %v7536_v40  ;;  %7216 = vmatpush3.bf16.msra.mxu0 %v7531_v39  ;;  %v3177_v39 = vrot.slane %v3175_v26, 4  ;;  %v7568_v26 = vld [vmem:[%s8093_s5 + $0xc] sm:$0xff]  }
 0x10b   : > { %7217 = vmatprep.subr.bf16.mxu0 %v7537_v43 }
 0x10c   : > { %7090 = vmatmul.mubr.bf16.gmra.mxu1 %v7528_v41  ;;  %7138 = vmatmul.mubr.bf16.gmra.mxu0 %v7529_v42  ;;  %v3186_v41 = vshrl.u32 %v6230_v36, 16  ;;  %v3189_v42 = vshll.u32 %v6230_v36, 16  ;;  %v3239_v36 = vrot.slane %v3237_v24, 5  ;;  %v6245_v24 = vld [vmem:[%s8093_s5 + $0x1ec] sm:$0xf] }
 0x10d   : > { %7093 = vmatprep.mubr.bf16.mxu1 %v7532_v44  ;;  %7170 = vmatpush3.bf16.msra.mxu1 %v7536_v40  ;;  %v6231_v40 = vld [vmem:[%s8093_s5 + $0x1b4] sm:$0xf]  ;;  %v6232_v44 = vld [vmem:[%s8093_s5 + $0x1b8] sm:$0x1] }
 0x10e   : > { %7171 = vmatprep.subr.bf16.mxu1 %v7542_v46  ;;  %7141 = vmatprep.mubr.bf16.mxu0 %v7533_v45  ;;  %v3195_v45 = vshll.u32 %v6231_v40, 16 }
 0x10f   : > { %7218 = vmatpush3.bf16.msra.mxu0 %v7537_v43  ;;  %v3155_v43 = vrot.slane %v3154_v28, 4 }
 0x110   : > { %7219 = vmatprep.subr.bf16.mxu0 %v7543_v47 }
 0x111   : > { %7172 = vmatpush3.bf16.msra.mxu1 %v7542_v46  ;;  %v7559_v46 = vld [vmem:[%s8093_s5 + $0x300] sm:$0xff]  }
 0x112   : > { %7173 = vmatprep.subr.bf16.mxu1 %v7548_v51 }
 0x113   : > { %7220 = vmatpush3.bf16.msra.mxu0 %v7543_v47  ;;  %v7562_v47 = vld [vmem:[%s8093_s5 + $0x240] sm:$0xff]  }
 0x114   : > { %7094 = vmatmul.mubr.bf16.gmra.mxu1 %v7534_v48  ;;  %7221 = vmatprep.subr.bf16.mxu0 %v7549_v52  ;;  %v3168_v48 = vor.u32 %v3167_v33, %v3164_v30  ;;  %v6238_v30 = vld [vmem:[%s8093_s5 + $0x1d0] sm:$0x1]  ;;  %v3236_v33 = vrot.slane %v3234_v23, 4 }
 0x115   : > { %7097 = vmatprep.mubr.bf16.mxu1 %v7538_v50  ;;  %7174 = vmatpush3.bf16.msra.mxu1 %v7548_v51  ;;  %v3191_v50 = vrot.slane %v3189_v42, 5  ;;  %v3199_v51 = vshrl.u32 %v6231_v40, 16 }
 0x116   : > { %7142 = vmatmul.mubr.bf16.gmra.mxu0 %v7535_v49  ;;  %7175 = vmatprep.subr.bf16.mxu1 %v7554_v55  ;;  %v3188_v49 = vrot.slane %v3186_v41, 4  ;;  %v3169_v4 = vrot.slane %v3168_v48, 4 }
 0x117   : > { %7145 = vmatprep.mubr.bf16.mxu0 %v7539_v53  ;;  %7222 = vmatpush3.bf16.msra.mxu0 %v7549_v52  ;;  %v7563_v52 = vld [vmem:[%s8093_s5 + $0x30c] sm:$0xff]   ;;  %v3150_v53 = vsel %vm8132_vm2, %v3145_v31, %v8346_v17  ;;  %v3247_v31 = vshrl.u32 %v6237_v20, 16 }
 0x118   : > { %7223 = vmatprep.subr.bf16.mxu0 %v7555_v56 }
 0x119   : > { %7176 = vmatpush3.bf16.msra.mxu1 %v7554_v55  ;;  %v8374_v55 = vrot.slane %v3195_v45, 5  ;;  %v3249_v42 = vrot.slane %v3247_v31, 4 }
 0x11a   : > { %7177 = vmatprep.subr.bf16.mxu1 %v7560_v60 }
 0x11b   : > { %7224 = vmatpush3.bf16.msra.mxu0 %v7555_v56  ;;  %v6233_v56 = vld [vmem:[%s8093_s5 + $0x1bc] sm:$0xf] }
 0x11c   : > { %7098 = vmatmul.mubr.bf16.gmra.mxu1 %v7540_v54  ;;  %7225 = vmatprep.subr.bf16.mxu0 %v7561_v61  ;;  %v3181_v54 = vshll.u32 %v6229_v32, 16 }
 0x11d   : > { %7101 = vmatprep.mubr.bf16.mxu1 %v7544_v57  ;;  %7178 = vmatpush3.bf16.msra.mxu1 %v7560_v60  ;;  %v6234_v57 = vld [vmem:[%s8093_s5 + $0x1c0] sm:$0xf]  ;;  %v3201_v60 = vrot.slane %v3199_v51, 4 }
 0x11e   : > { %7146 = vmatmul.mubr.bf16.gmra.mxu0 %v7541_v58  ;;  %7179 = vmatprep.subr.bf16.mxu1 %v7566_v2  ;;  %v3178_v58 = vor.u32 %v3177_v39, %v8362_v38  ;;  %v3183_v14 = vrot.slane %v3181_v54, 5  ;;  %v6239_v39 = vld [vmem:[%s8093_s5 + $0x1d4] sm:$0xf] }
 0x11f   : > { %7149 = vmatprep.mubr.bf16.mxu0 %v7545_v59  ;;  %7226 = vmatpush3.bf16.msra.mxu0 %v7561_v61  ;;  %v3192_v59 = vor.u32 %v3191_v50, %v3188_v49  ;;  %v3205_v61 = vshll.u32 %v6232_v44, 16  ;;  %v3202_v5 = vor.u32 %v3201_v60, %v8374_v55  ;;  %v3258_v44 = vshrl.u32 %v6239_v39, 16  ;;  %v7569_v60 = vld [vmem:[%s8093_s5 + $0x18] sm:$0xff]  }
 0x120   : > { %7227 = vmatprep.subr.bf16.mxu0 %v7567_v3  ;;  %v3179_v13 = vrot.slane %v3178_v58, 4  ;;  %v3261_v48 = vshll.u32 %v6239_v39, 16 }
 0x121   : > { %7180 = vmatpush3.bf16.msra.mxu1 %v7566_v2  ;;  %v3223_v2 = vshrl.u32 %v6234_v57, 16  ;;  %v3207_v17 = vrot.slane %v3205_v61, 5  ;;  %v3260_v50 = vrot.slane %v3258_v44, 4 }
 0x122   : > { %7261 = vmatprep.subr.bf16.mxu1 %v8355_v34  ;;  %v3184_v40 = vsel %vm8132_vm2, %v3179_v13, %v3183_v14  ;;  %v3263_v54 = vrot.slane %v3261_v48, 5  ;;  %v7576_v48 = vld [vmem:[%s8093_s5 + $0x3c] sm:$0xff]  }
 0x123   : > { %7228 = vmatpush3.bf16.msra.mxu0 %v7567_v3  ;;  %v3160_v3 = vsel %vm8132_vm2, %v3155_v43, %v3159_v29  ;;  %v3225_v11 = vrot.slane %v3223_v2, 4  ;;  %v6241_v43 = vld [vmem:[%s8093_s5 + $0x1dc] sm:$0x1]  ;;  %v6242_v2 = vld [vmem:[%s8093_s5 + $0x1e0] sm:$0xf] }
 0x124   : > { %7102 = vmatmul.mubr.bf16.gmra.mxu1 %v7546_v62  ;;  %7309 = vmatprep.subr.bf16.mxu0 %v8358_v35  ;;  %v6235_v62 = vld [vmem:[%s8093_s5 + $0x1c4] sm:$0x1]  ;;  %v6288_v15 = vcombine.low %v3150_v53, %v3160_v3 }
 0x125   : > { %7105 = vmatprep.mubr.bf16.mxu1 %v7550_v0  ;;  %v3213_v0 = vshll.u32 %v6233_v56, 16  ;;  %v3229_v7 = vshll.u32 %v6235_v62, 16  ;;  %v7574_v62 = vld [vmem:[%s8085_s26 + $0x1f0] sm:$0xff]   ;;  %v7572_v3 = vld [vmem:[%s8093_s5 + $0x24] sm:$0xff]  }
 0x126   : > { %7150 = vmatmul.mubr.bf16.gmra.mxu0 %v7547_v63  ;;  %v3210_v63 = vshrl.u32 %v6233_v56, 16 }
 0x127   : > { %7153 = vmatprep.mubr.bf16.mxu0 %v7551_v1  ;;  %v3219_v1 = vshll.u32 %v6234_v57, 16  ;;  %v3215_v9 = vrot.slane %v3213_v0, 5  ;;  %v3231_v29 = vrot.slane %v3229_v7, 5  ;;  %v6243_v7 = vld [vmem:[%s8093_s5 + $0x1e4] sm:$0xf] }
 0x128   : > { %v3212_v8 = vrot.slane %v3210_v63, 4  ;;  %v3291_v14 = vshll.u32 %v6243_v7, 16 }
 0x129   : > { %v8383_v10 = vrot.slane %v3219_v1, 5  ;;  %v3264_v1 = vor.u32 %v3263_v54, %v3260_v50  ;;  %v6249_v54 = vld [vmem:[%s8093_s5 + $0x1fc] sm:$0xf] }
 0x12a   : > { %v3216_v18 = vor.u32 %v3215_v9, %v3212_v8  ;;  %v6244_v8 = vld [vmem:[%s8093_s5 + $0x1e8] sm:$0x1]  ;;  %v3282_v9 = vshrl.u32 %v6242_v2, 16 }
 0x12b   : > { %v3226_v28 = vor.u32 %v3225_v11, %v8383_v10  ;;  %v3285_v11 = vshll.u32 %v6242_v2, 16  ;;  %v3301_v19 = vshll.u32 %v6244_v8, 16  ;;  %v6251_v8 = vld [vmem:[%s8093_s5 + $0x204] sm:$0xf] }
 0x12c   : > { %7106 = vmatmul.mubr.bf16.gmra.mxu1 %v7552_v16  ;;  %v3193_v16 = vrot.slane %v3192_v59, 4  ;;  %v3217_v32 = vrot.slane %v3216_v18, 4 }
 0x12d   : > { %7109 = vmatprep.mubr.bf16.mxu1 %v7556_v22  ;;  %v3203_v22 = vrot.slane %v3202_v5, 4  ;;  %v3227_v49 = vrot.slane %v3226_v28, 4  ;;  %v3287_v18 = vrot.slane %v3285_v11, 5  ;;  %v6252_v11 = vld [vmem:[%s8093_s5 + $0x208] sm:$0xf] }
 0x12e   : > { %7154 = vmatmul.mubr.bf16.gmra.mxu0 %v7553_v21  ;;  %v7565_v21 = vld [vmem:[%s8093_s5 + $0x318] sm:$0xff]   ;;  %v3198_v41 = vsel %vm8132_vm2, %v3193_v16, %v8374_v55  ;;  %v3277_v55 = vshll.u32 %v6241_v43, 16  ;;  %v3222_v61 = vsel %vm8132_vm2, %v3217_v32, %v8383_v10  ;;  %v8425_v16 = vrot.slane %v3264_v1, 4  ;;  %v7579_v32 = vld [vmem:[%s8085_s26 + $0x228] sm:$0xff]  }
 0x12f   : > { %7157 = vmatprep.mubr.bf16.mxu0 %v7557_v27  ;;  %v3174_v27 = vsel %vm8132_vm2, %v3169_v4, %v8362_v38  ;;  %v6240_v38 = vld [vmem:[%s8093_s5 + $0x1d8] sm:$0xf]  ;;  %v3208_v45 = vsel %vm8132_vm2, %v3203_v22, %v3207_v17  ;;  %v3232_v4 = vsel %vm8132_vm2, %v3227_v49, %v3231_v29  ;;  %v3284_v17 = vrot.slane %v3282_v9, 4  ;;  %v6247_v29 = vld [vmem:[%s8093_s5 + $0x1f4] sm:$0x1] }
 0x130   : > { %v3267_v51 = vshll.u32 %v6240_v38, 16  ;;  %v6289_v56 = vcombine.low %v3174_v27, %v3184_v40  ;;  %v6290_v57 = vcombine.low %v3198_v41, %v3208_v45  ;;  %v8423_v13 = vrot.slane %v3277_v55, 5  ;;  %v6250_v55 = vld [vmem:[%s8093_s5 + $0x200] sm:$0x1] }
 0x131   : > { %v6291_v20 = vcombine.low %v3222_v61, %v3232_v4  ;;  %v8428_v22 = vrot.slane %v3291_v14, 5  ;;  %v3288_v28 = vor.u32 %v3287_v18, %v3284_v17  ;;  %v3325_v41 = vshll.u32 %v6247_v29, 16  ;;  %v7577_v18 = vld [vmem:[%s8093_s5 + $0x48] sm:$0xff]  }
 0x132   : > { %v8408_v58 = vrot.slane %v3267_v51, 5  ;;  %v3303_v43 = vrot.slane %v3301_v19, 5  ;;  %v6248_v51 = vld [vmem:[%s8093_s5 + $0x1f8] sm:$0xf]  ;;  %v3343_v61 = vshrl.u32 %v6249_v54, 16  ;;  %v3363_v17 = vshll.u32 %v6252_v11, 16 }
 0x133   : > { %v8453_v50 = vrot.slane %v3325_v41, 5  ;;  %v6256_v41 = vld [vmem:[%s8093_s5 + $0x218] sm:$0x1] }
 0x134   : > { %7110 = vmatmul.mubr.bf16.gmra.mxu1 %v7558_v37  ;;  %v8395_v37 = vrot.slane %v3243_v25, 5  ;;  %v6246_v25 = vld [vmem:[%s8093_s5 + $0x1f0] sm:$0xf] }
 0x135   : > { %7113 = vmatprep.mubr.bf16.mxu1 %v7562_v47  ;;  %v3253_v47 = vshll.u32 %v6238_v30, 16  ;;  %v3306_v30 = vshrl.u32 %v6245_v24, 16  ;;  %v3319_v40 = vshrl.u32 %v6246_v25, 16 }
 0x136   : > { %7158 = vmatmul.mubr.bf16.gmra.mxu0 %v7559_v46  ;;  %v3240_v46 = vor.u32 %v3239_v36, %v3236_v33  ;;  %v3250_v53 = vor.u32 %v3249_v42, %v8395_v37  ;;  %v3309_v33 = vshll.u32 %v6245_v24, 16  ;;  %v3315_v36 = vshll.u32 %v6246_v25, 16  ;;  %v7573_v42 = vld [vmem:[%s8093_s5 + $0x30] sm:$0xff]  }
 0x137   : > { %7161 = vmatprep.mubr.bf16.mxu0 %v7563_v52  ;;  %v3271_v52 = vshrl.u32 %v6240_v38, 16  ;;  %v3255_v0 = vrot.slane %v3253_v47, 5  ;;  %v3308_v39 = vrot.slane %v3306_v30, 4  ;;  %v3321_v49 = vrot.slane %v3319_v40, 4  ;;  %v7580_v30 = vld [vmem:[%s8093_s5 + $0x54] sm:$0xff]  }
 0x138   : > { %v3241_v63 = vrot.slane %v3240_v46, 4  ;;  %v3251_v10 = vrot.slane %v3250_v53, 4  ;;  %v3311_v44 = vrot.slane %v3309_v33, 5  ;;  %v8445_v45 = vrot.slane %v3315_v36, 5  ;;  %v7582_v46 = vld [vmem:[%s8085_s26 + $0x1e0] sm:$0xff]  }
 0x139   : > { %v3273_v59 = vrot.slane %v3271_v52, 4  ;;  %v6254_v36 = vld [vmem:[%s8093_s5 + $0x210] sm:$0xf] }
 0x13a   : > { %v3256_v31 = vsel %vm8132_vm2, %v3251_v10, %v3255_v0  ;;  %v3312_v53 = vor.u32 %v3311_v44, %v3308_v39  ;;  %v7583_v0 = vld [vmem:[%s8085_s26 + $0x220] sm:$0xff]   ;;  %v3354_v10 = vshrl.u32 %v6251_v8, 16 }
 0x13b   : > { %v3274_v5 = vor.u32 %v3273_v59, %v8408_v58  ;;  %v3322_v59 = vor.u32 %v3321_v49, %v8445_v45 }
 0x13c   : > { %7114 = vmatmul.mubr.bf16.gmra.mxu1 %v7564_v12  ;;  %v7575_v12 = vld [vmem:[%s8085_s26 + $0x230] sm:$0xff]  }
 0x13d   : > { %7181 = vmatprep.mubr.bf16.mxu1 %v6288_v15  ;;  %v3295_v15 = vshrl.u32 %v6243_v7, 16  ;;  %v8436_v27 = vrot.slane %v3274_v5, 4  ;;  %v3345_v5 = vrot.slane %v3343_v61, 4  ;;  %v3349_v7 = vshll.u32 %v6250_v55, 16  ;;  %v6258_v55 = vld [vmem:[%s8093_s5 + $0x220] sm:$0xf] }
 0x13e   : > { %7162 = vmatmul.mubr.bf16.gmra.mxu0 %v7565_v21  ;;  %v7578_v21 = vld [vmem:[%s8085_s26 + $0x1e8] sm:$0xff]  }
 0x13f   : > { %7229 = vmatprep.mubr.bf16.mxu0 %v7568_v26  ;;  %v3297_v23 = vrot.slane %v3295_v15, 4  ;;  %v3246_v26 = vsel %vm8132_vm2, %v3241_v63, %v8395_v37  ;;  %v3289_v37 = vrot.slane %v3288_v28, 4  ;;  %v3280_v52 = vsel %vm8132_vm2, %v8436_v27, %v8423_v13  ;;  %v7586_v13 = vld [vmem:[%s8085_s26 + $0x1d8] sm:$0xff]  }
 0x140   : > { %v6292_v47 = vcombine.low %v3246_v26, %v3256_v31  ;;  %v8468_v63 = vrot.slane %v3312_v53, 4  ;;  %v3351_v24 = vrot.slane %v3349_v7, 5  ;;  %v8482_v26 = vrot.slane %v3363_v17, 5 }
 0x142   : > { %v3318_v31 = vsel %vm8132_vm2, %v8468_v63, %v8445_v45 }
 0x144   : > { %7182 = vmatmul.mubr.bf16.vlgmr.msra.gmra.mxu1 %v6289_v56  ;;  %v3330_v56 = vshrl.u32 %v6248_v51, 16 }
 0x145   : > { %7262 = vmatpush3.bf16.msra.mxu1 %v8355_v34  ;;  %7185 = vmatprep.mubr.bf16.mxu1 %v6290_v57  ;;  %v3298_v34 = vor.u32 %v3297_v23, %v8428_v22  ;;  %v3333_v57 = vshll.u32 %v6248_v51, 16  ;;  %v7587_v23 = vld [vmem:[%s8085_s26 + $0x218] sm:$0xff]   ;;  %v7590_v51 = vld [vmem:[%s8085_s26 + $0x1d0] sm:$0xff]  }
 0x146   : > { %7230 = vmatmul.mubr.bf16.vlgmr.msra.gmra.mxu0 %v7569_v60  ;;  %7263 = vmatprep.subr.bf16.mxu1 %v7574_v62  ;;  %v3339_v60 = vshll.u32 %v6249_v54, 16  ;;  %v3332_v1 = vrot.slane %v3330_v56, 4  ;;  %v7591_v56 = vld [vmem:[%s8085_s26 + $0x210] sm:$0xff]  }
 0x147   : > { %7310 = vmatpush3.bf16.msra.mxu0 %v8358_v35  ;;  %7233 = vmatprep.mubr.bf16.mxu0 %v7572_v3  ;;  %v3299_v38 = vrot.slane %v3298_v34, 4  ;;  %v3270_v35 = vsel %vm8132_vm2, %v8425_v16, %v8408_v58  ;;  %v3294_v58 = vsel %vm8132_vm2, %v3289_v37, %v8428_v22  ;;  %v3335_v2 = vrot.slane %v3333_v57, 5  ;;  %v6255_v37 = vld [vmem:[%s8093_s5 + $0x214] sm:$0xf] }
 0x148   : > { %7311 = vmatprep.subr.bf16.mxu0 %v7575_v12  ;;  %v8471_v3 = vrot.slane %v3322_v59, 4  ;;  %v8473_v4 = vrot.slane %v3339_v60, 5  ;;  %v6293_v14 = vcombine.low %v3270_v35, %v3280_v52  ;;  %v3357_v16 = vshll.u32 %v6251_v8, 16  ;;  %v6259_v60 = vld [vmem:[%s8093_s5 + $0x224] sm:$0x1]  ;;  %v7584_v8 = vld [vmem:[%s8093_s5 + $0x6c] sm:$0xff]  }
 0x149   : > { %7264 = vmatpush3.bf16.msra.mxu1 %v7574_v62  ;;  %v3304_v62 = vsel %vm8132_vm2, %v3299_v38, %v3303_v43  ;;  %v3336_v9 = vor.u32 %v3335_v2, %v3332_v1  ;;  %v3367_v22 = vshrl.u32 %v6252_v11, 16  ;;  %v3381_v38 = vshll.u32 %v6254_v36, 16 }
 0x14a   : > { %7265 = vmatprep.subr.bf16.mxu1 %v7578_v21  ;;  %v3346_v15 = vor.u32 %v3345_v5, %v8473_v4  ;;  %v6294_v19 = vcombine.low %v3294_v58, %v3304_v62  ;;  %v3359_v25 = vrot.slane %v3357_v16, 5  ;;  %v3387_v44 = vshll.u32 %v6255_v37, 16  ;;  %v7581_v58 = vld [vmem:[%s8093_s5 + $0x60] sm:$0xff]   ;;  %v6260_v16 = vld [vmem:[%s8093_s5 + $0x228] sm:$0xf] }
 0x14b   : > { %7312 = vmatpush3.bf16.msra.mxu0 %v7575_v12  ;;  %v6253_v12 = vld [vmem:[%s8093_s5 + $0x20c] sm:$0x1]  ;;  %v3369_v29 = vrot.slane %v3367_v22, 4  ;;  %v3391_v45 = vshrl.u32 %v6255_v37, 16  ;;  %v3383_v49 = vrot.slane %v3381_v38, 5  ;;  %v3411_v1 = vshll.u32 %v6258_v55, 16 }
 0x14c   : > { %7186 = vmatmul.mubr.bf16.gmra.mxu1 %v6291_v20  ;;  %7313 = vmatprep.subr.bf16.mxu0 %v7579_v32  ;;  %v3337_v20 = vrot.slane %v3336_v9, 4  ;;  %v3373_v27 = vshll.u32 %v6253_v12, 16  ;;  %v3347_v28 = vrot.slane %v3346_v15, 4  ;;  %v3389_v52 = vrot.slane %v3387_v44, 5  ;;  %v6263_v37 = vld [vmem:[%s8093_s5 + $0x234] sm:$0xf] }
 0x14d   : > { %7189 = vmatprep.mubr.bf16.mxu1 %v6292_v47  ;;  %7266 = vmatpush3.bf16.msra.mxu1 %v7578_v21  ;;  %v3356_v21 = vrot.slane %v3354_v10, 4  ;;  %v3370_v40 = vor.u32 %v3369_v29, %v8482_v26  ;;  %v3393_v53 = vrot.slane %v3391_v45, 4  ;;  %v3415_v2 = vshrl.u32 %v6258_v55, 16 }
 0x14e   : > { %7234 = vmatmul.mubr.bf16.gmra.mxu0 %v7573_v42  ;;  %7267 = vmatprep.subr.bf16.mxu1 %v7582_v46  ;;  %v8493_v33 = vrot.slane %v3373_v27, 5  ;;  %v3342_v39 = vsel %vm8132_vm2, %v3337_v20, %v8473_v4  ;;  %v3378_v42 = vshrl.u32 %v6254_v36, 16  ;;  %v3352_v47 = vsel %vm8132_vm2, %v3347_v28, %v3351_v24  ;;  %v6262_v20 = vld [vmem:[%s8093_s5 + $0x230] sm:$0x1]  ;;  %v7594_v27 = vld [vmem:[%s8085_s26 + $0x1c8] sm:$0xff]  }
 0x14f   : > { %7237 = vmatprep.mubr.bf16.mxu0 %v7576_v48  ;;  %7314 = vmatpush3.bf16.msra.mxu0 %v7579_v32  ;;  %v3328_v32 = vsel %vm8132_vm2, %v8471_v3, %v8453_v50  ;;  %v3360_v34 = vor.u32 %v3359_v25, %v3356_v21  ;;  %v3371_v48 = vrot.slane %v3370_v40, 4  ;;  %v6257_v50 = vld [vmem:[%s8093_s5 + $0x21c] sm:$0xf]  ;;  %v6296_v63 = vcombine.low %v3342_v39, %v3352_v47  ;;  %v6264_v39 = vld [vmem:[%s8093_s5 + $0x238] sm:$0xf] }
 0x150   : > { %7315 = vmatprep.subr.bf16.mxu0 %v7583_v0  ;;  %v3380_v35 = vrot.slane %v3378_v42, 4  ;;  %v6295_v57 = vcombine.low %v3318_v31, %v3328_v32  ;;  %v3402_v61 = vshrl.u32 %v6257_v50, 16  ;;  %v3405_v62 = vshll.u32 %v6257_v50, 16 }
 0x151   : > { %7268 = vmatpush3.bf16.msra.mxu1 %v7582_v46  ;;  %v8502_v43 = vrot.slane %v3360_v34, 4  ;;  %v3397_v46 = vshll.u32 %v6256_v41, 16  ;;  %v3421_v7 = vshll.u32 %v6259_v60, 16  ;;  %v8513_v11 = vrot.slane %v3411_v1, 5  ;;  %v7585_v34 = vld [vmem:[%s8093_s5 + $0x78] sm:$0xff]   ;;  %v7588_v41 = vld [vmem:[%s8093_s5 + $0x84] sm:$0xff]  }
 0x152   : > { %7269 = vmatprep.subr.bf16.mxu1 %v7586_v13  ;;  %v3384_v59 = vor.u32 %v3383_v49, %v3380_v35  ;;  %v3404_v4 = vrot.slane %v3402_v61, 4  ;;  %v3407_v5 = vrot.slane %v3405_v62, 5  ;;  %v3417_v12 = vrot.slane %v3415_v2, 4  ;;  %v6266_v62 = vld [vmem:[%s8093_s5 + $0x240] sm:$0xf] }
 0x153   : > { %7316 = vmatpush3.bf16.msra.mxu0 %v7583_v0  ;;  %v3399_v54 = vrot.slane %v3397_v46, 5  ;;  %v3394_v0 = vor.u32 %v3393_v53, %v3389_v52  ;;  %v3366_v10 = vsel %vm8132_vm2, %v8502_v43, %v8482_v26  ;;  %v8522_v15 = vrot.slane %v3421_v7, 5  ;;  %v6265_v43 = vld [vmem:[%s8093_s5 + $0x23c] sm:$0x1] }
 0x154   : > { %7190 = vmatmul.mubr.bf16.gmra.mxu1 %v6293_v14  ;;  %7317 = vmatprep.subr.bf16.mxu0 %v7587_v23  ;;  %v3385_v3 = vrot.slane %v3384_v59, 4  ;;  %v3408_v14 = vor.u32 %v3407_v5, %v3404_v4  ;;  %v3426_v21 = vshrl.u32 %v6260_v16, 16  ;;  %v3429_v22 = vshll.u32 %v6260_v16, 16  ;;  %v6268_v4 = vld [vmem:[%s8093_s5 + $0x248] sm:$0x1] }
 0x155   : > { %7193 = vmatprep.mubr.bf16.mxu1 %v6294_v19  ;;  %7270 = vmatpush3.bf16.msra.mxu1 %v7586_v13  ;;  %v3395_v9 = vrot.slane %v3394_v0, 4  ;;  %v3376_v13 = vsel %vm8132_vm2, %v3371_v48, %v8493_v33  ;;  %v6261_v19 = vld [vmem:[%s8093_s5 + $0x22c] sm:$0xf]  ;;  %v3445_v31 = vshll.u32 %v6262_v20, 16  ;;  %v3450_v44 = vshrl.u32 %v6263_v37, 16  ;;  %v7592_v20 = vld [vmem:[%s8093_s5 + $0x9c] sm:$0xff]  }
 0x156   : > { %7238 = vmatmul.mubr.bf16.gmra.mxu0 %v7577_v18  ;;  %7271 = vmatprep.subr.bf16.mxu1 %v7590_v51  ;;  %v3390_v17 = vsel %vm8132_vm2, %v3385_v3, %v3389_v52  ;;  %v3418_v18 = vor.u32 %v3417_v12, %v8513_v11  ;;  %v3409_v24 = vrot.slane %v3408_v14, 4  ;;  %v3435_v25 = vshll.u32 %v6261_v19, 16  ;;  %v6267_v3 = vld [vmem:[%s8093_s5 + $0x244] sm:$0xf]  ;;  %v7589_v14 = vld [vmem:[%s8093_s5 + $0x90] sm:$0xff]  }
 0x157   : > { %7241 = vmatprep.mubr.bf16.mxu0 %v7580_v30  ;;  %7318 = vmatpush3.bf16.msra.mxu0 %v7587_v23  ;;  %v3400_v23 = vsel %vm8132_vm2, %v3395_v9, %v3399_v54  ;;  %v3439_v26 = vshrl.u32 %v6261_v19, 16  ;;  %v3428_v29 = vrot.slane %v3426_v21, 4  ;;  %v3431_v30 = vrot.slane %v3429_v22, 5 }
 0x158   : > { %7319 = vmatprep.subr.bf16.mxu0 %v7591_v56  ;;  %v3419_v28 = vrot.slane %v3418_v18, 4  ;;  %v6297_v32 = vcombine.low %v3366_v10, %v3376_v13  ;;  %v3437_v33 = vrot.slane %v3435_v25, 5  ;;  %v6298_v40 = vcombine.low %v3390_v17, %v3400_v23  ;;  %v7598_v25 = vld [vmem:[%s8085_s26 + $0x1c0] sm:$0xff]  }
 0x159   : > { %7272 = vmatpush3.bf16.msra.mxu1 %v7590_v51  ;;  %v3441_v36 = vrot.slane %v3439_v26, 4  ;;  %v3432_v42 = vor.u32 %v3431_v30, %v3428_v29  ;;  %v3447_v38 = vrot.slane %v3445_v31, 5  ;;  %v3414_v45 = vsel %vm8132_vm2, %v3409_v24, %v8513_v11  ;;  %v6269_v24 = vld [vmem:[%s8093_s5 + $0x24c] sm:$0xf]  ;;  %v6270_v30 = vld [vmem:[%s8093_s5 + $0x250] sm:$0xf] }
 0x15a   : > { %7273 = vmatprep.subr.bf16.mxu1 %v7594_v27  ;;  %v3453_v47 = vshll.u32 %v6263_v37, 16  ;;  %v3459_v48 = vshll.u32 %v6264_v39, 16  ;;  %v3452_v49 = vrot.slane %v3450_v44, 4  ;;  %v3463_v50 = vshrl.u32 %v6264_v39, 16  ;;  %v6271_v31 = vld [vmem:[%s8093_s5 + $0x254] sm:$0x1] }
 0x15b   : > { %7320 = vmatpush3.bf16.msra.mxu0 %v7591_v56  ;;  %v3442_v46 = vor.u32 %v3441_v36, %v3437_v33  ;;  %v3433_v35 = vrot.slane %v3432_v42, 4  ;;  %v3469_v51 = vshll.u32 %v6265_v43, 16  ;;  %v3424_v54 = vsel %vm8132_vm2, %v3419_v28, %v8522_v15  ;;  %v7599_v44 = vld [vmem:[%s8085_s26 + $0x200] sm:$0xff]  }
 0x15c   : > { %7194 = vmatmul.mubr.bf16.gmra.mxu1 %v6295_v57  ;;  %v3455_v56 = vrot.slane %v3453_v47, 5  ;;  %v8548_v57 = vrot.slane %v3459_v48, 5  ;;  %v3465_v60 = vrot.slane %v3463_v50, 4  ;;  %v3474_v5 = vshrl.u32 %v6266_v62, 16 }
 0x15d   : > { %7197 = vmatprep.mubr.bf16.mxu1 %v6296_v63  ;;  %7274 = vmatpush3.bf16.msra.mxu1 %v7594_v27  ;;  %v3443_v55 = vrot.slane %v3442_v46, 4  ;;  %v3438_v59 = vsel %vm8132_vm2, %v3433_v35, %v3437_v33  ;;  %v8553_v61 = vrot.slane %v3469_v51, 5  ;;  %v3477_v7 = vshll.u32 %v6266_v62, 16  ;;  %v6456_v62 = vld [vmem:[%s8093_s5 + $0xc] sm:$0xf] }
 0x15e   : > { %7242 = vmatmul.mubr.bf16.gmra.mxu0 %v7581_v58  ;;  %v7595_v58 = vld [vmem:[%s8085_s26 + $0x208] sm:$0xff]   ;;  %v3456_v2 = vor.u32 %v3455_v56, %v3452_v49  ;;  %v3466_v9 = vor.u32 %v3465_v60, %v8548_v57  ;;  %v3483_v11 = vshll.u32 %v6267_v3, 16  ;;  %v3487_v12 = vshrl.u32 %v6267_v3, 16  ;;  %7275 = vmatprep.subr.bf16.mxu1 %v7598_v25 }
 0x15f   : > { %7245 = vmatprep.mubr.bf16.mxu0 %v7584_v8  ;;  %v3448_v1 = vsel %vm8132_vm2, %v3443_v55, %v3447_v38  ;;  %7321 = vmatprep.subr.bf16.mxu0 %v7595_v58  ;;  %v6299_v8 = vcombine.low %v3414_v45, %v3424_v54  ;;  %v3476_v16 = vrot.slane %v3474_v5, 4  ;;  %v3479_v17 = vrot.slane %v3477_v7, 5 }
 0x160   : > { %7322 = vmatpush3.bf16.msra.mxu0 %v7595_v58  ;;  %v3457_v15 = vrot.slane %v3456_v2, 4  ;;  %v3493_v18 = vshll.u32 %v6268_v4, 16  ;;  %v6300_v19 = vcombine.low %v3438_v59, %v3448_v1  ;;  %v3467_v21 = vrot.slane %v3466_v9, 4  ;;  %v6457_v1 = vld [vmem:[%s8093_s5 + $0x10] sm:$0xf] }
 0x161   : > { %v3485_v22 = vrot.slane %v3483_v11, 5  ;;  %v3489_v23 = vrot.slane %v3487_v12, 4  ;;  %v3480_v28 = vor.u32 %v3479_v17, %v3476_v16  ;;  %v3501_v36 = vshll.u32 %v6269_v24, 16  ;;  %7276 = vmatpush3.bf16.msra.mxu1 %v7598_v25  ;;  %7323 = vmatprep.subr.bf16.mxu0 %v7599_v44  ;;  %v6458_v2 = vld [vmem:[%s8093_s5 + $0x14] sm:$0x1]  ;;  %v7593_v11 = vld [vmem:[%s8093_s5 + $0xa8] sm:$0xff]  }
 0x162   : > { %v3495_v29 = vrot.slane %v3493_v18, 5  ;;  %v3507_v37 = vshll.u32 %v6270_v30, 16  ;;  %v3511_v43 = vshrl.u32 %v6270_v30, 16  ;;  %v3517_v48 = vshll.u32 %v6271_v31, 16  ;;  %v7596_v16 = vld [vmem:[%s8093_s5 + $0xb4] sm:$0xff]  }
 0x163   : > { %v3490_v33 = vor.u32 %v3489_v23, %v3485_v22  ;;  %v3481_v42 = vrot.slane %v3480_v28, 4  ;;  %v3503_v46 = vrot.slane %v3501_v36, 5  ;;  %v4671_v4 = vshrl.u32 %v6456_v62, 16  ;;  %v6461_v30 = vld [vmem:[%s8093_s5 + $0x20] sm:$0x1] }
 0x164   : > { %v8541_v52 = vpop.f32.mrf.mxu0  ;;  %v8543_v53 = vpop.f32.mrf.mxu1  ;;  %7198 = vmatmul.mubr.bf16.gmra.mxu1 %v6297_v32  ;;  %v3498_v32 = vshrl.u32 %v6269_v24, 16  ;;  %v3509_v47 = vrot.slane %v3507_v37, 5  ;;  %v3513_v51 = vrot.slane %v3511_v43, 4  ;;  %v3519_v56 = vrot.slane %v3517_v48, 5  ;;  %7324 = vmatpush3.bf16.msra.mxu0 %v7599_v44  ;;  %v6462_v44 = vld [vmem:[%s8093_s5 + $0x24] sm:$0xf] }
 0x165   : > { %7201 = vmatprep.mubr.bf16.mxu1 %v6298_v40  ;;  %v3491_v45 = vrot.slane %v3490_v33, 4  ;;  %v3486_v50 = vsel %vm8132_vm2, %v3481_v42, %v3485_v22  ;;  %v4674_v5 = vshll.u32 %v6456_v62, 16  ;;  %v4680_v7 = vshll.u32 %v6457_v1, 16 }
 0x166   : > { %7246 = vmatmul.mubr.bf16.gmra.mxu0 %v7585_v34  ;;  %v8556_v63 = vpop.f32.mrf.mxu0  ;;  %v8558_v0 = vpop.f32.mrf.mxu1  ;;  %v3462_v34 = vsel %vm8132_vm2, %v3457_v15, %v8548_v57  ;;  %v3500_v38 = vrot.slane %v3498_v32, 4  ;;  %v4690_v15 = vshll.u32 %v6458_v2, 16  ;;  %v4673_v18 = vrot.slane %v4671_v4, 4 }
 0x167   : > { %7249 = vmatprep.mubr.bf16.mxu0 %v7588_v41  ;;  %v3472_v41 = vsel %vm8132_vm2, %v3467_v21, %v8553_v61  ;;  %v3496_v54 = vsel %vm8132_vm2, %v3491_v45, %v3495_v29  ;;  %v3514_v61 = vor.u32 %v3513_v51, %v3509_v47  ;;  %v6459_v21 = vld [vmem:[%s8093_s5 + $0x18] sm:$0xf]  ;;  %v6460_v29 = vld [vmem:[%s8093_s5 + $0x1c] sm:$0xf]  ;;  %v4714_v43 = vshll.u32 %v6461_v30, 16 }
 0x168   : > { %v8565_v10 = vpop.f32.mrf.mxu0  ;;  %v8567_v13 = vpop.f32.mrf.mxu1  ;;  %v3504_v55 = vor.u32 %v3503_v46, %v3500_v38  ;;  %v6301_v59 = vcombine.low %v3462_v34, %v3472_v41  ;;  %v6302_v60 = vcombine.low %v3486_v50, %v3496_v54  ;;  %v4692_v28 = vrot.slane %v4690_v15, 5  ;;  %v7600_v45 = vld [vmem:[%s8093_s5 + $0xd8] sm:$0xff]   ;;  %v6463_v50 = vld [vmem:[%s8093_s5 + $0x28] sm:$0xf] }
 0x169   : > { %v3515_v12 = vrot.slane %v3514_v61, 4  ;;  %v4695_v34 = vshrl.u32 %v6459_v21, 16  ;;  %v4698_v33 = vshll.u32 %v6459_v21, 16  ;;  %v4704_v42 = vshll.u32 %v6460_v29, 16 }
 0x16a   : > { %v8573_v26 = vpop.f32.mrf.mxu0  ;;  %v8575_v27 = vpop.f32.mrf.mxu1  ;;  %v3505_v3 = vrot.slane %v3504_v55, 4  ;;  %v4708_v38 = vshrl.u32 %v6460_v29, 16  ;;  %v4719_v51 = vshrl.u32 %v6462_v44, 16  ;;  %v4716_v62 = vrot.slane %v4714_v43, 5 }
 0x16b   : > { %v3520_v24 = vsel %vm8132_vm2, %v3515_v12, %v3519_v56  ;;  %v4700_v48 = vrot.slane %v4698_v33, 5  ;;  %v7597_v56 = vld [vmem:[%s8093_s5 + $0xc0] sm:$0xff]   ;;  %v4728_v15 = vshll.u32 %v6463_v50, 16 }
 0x16c   : > { %v8582_v39 = vpop.f32.mrf.mxu0  ;;  %v8584_v40 = vpop.f32.mrf.mxu1  ;;  %7202 = vmatmul.mubr.bf16.gmra.mxu1 %v6299_v8  ;;  %v3510_v17 = vsel %vm8132_vm2, %v3505_v3, %v3509_v47  ;;  %v4697_v47 = vrot.slane %v4695_v34, 4  ;;  %v4710_v61 = vrot.slane %v4708_v38, 4  ;;  %v4721_v4 = vrot.slane %v4719_v51, 4 }
 0x16d   : > { %7205 = vmatprep.mubr.bf16.mxu1 %v6300_v19  ;;  %v4676_v19 = vrot.slane %v4674_v5, 5  ;;  %v6303_v31 = vcombine.low %v3510_v17, %v3520_v24  ;;  %v4722_v5 = vshll.u32 %v6462_v44, 16  ;;  %v6465_v17 = vld [vmem:[%s8093_s5 + $0x30] sm:$0xf]  ;;  %v4730_v34 = vrot.slane %v4728_v15, 5 }
 0x16e   : > { %7250 = vmatmul.mubr.bf16.gmra.mxu0 %v7589_v14  ;;  %v8590_v35 = vpop.f32.mrf.mxu0  ;;  %v8592_v49 = vpop.f32.mrf.mxu1  ;;  %v4684_v14 = vshrl.u32 %v6457_v1, 16  ;;  %v6464_v1 = vld [vmem:[%s8093_s5 + $0x2c] sm:$0x1]  ;;  %v4701_v3 = vor.u32 %v4700_v48, %v4697_v47  ;;  %v4743_v33 = vshrl.u32 %v6465_v17, 16  ;;  %v4746_v43 = vshll.u32 %v6465_v17, 16 }
 0x16f   : > { %7253 = vmatprep.mubr.bf16.mxu0 %v7592_v20  ;;  %v4682_v20 = vrot.slane %v4680_v7, 5  ;;  %v4677_v32 = vor.u32 %v4676_v19, %v4673_v18  ;;  %v6466_v18 = vld [vmem:[%s8093_s5 + $0x34] sm:$0xf]  ;;  %v4738_v24 = vshll.u32 %v6464_v1, 16  ;;  %v6468_v44 = vld [vmem:[%s8093_s5 + $0x3c] sm:$0xf] }
 0x170   : > { %v8598_v57 = vpop.f32.mrf.mxu0  ;;  %v8600_v58 = vpop.f32.mrf.mxu1  ;;  %v4686_v25 = vrot.slane %v4684_v14, 4  ;;  %v4702_v21 = vrot.slane %v4701_v3, 4  ;;  %v4745_v51 = vrot.slane %v4743_v33, 4 }
 0x171   : > { %v4678_v46 = vrot.slane %v4677_v32, 4  ;;  %v4740_v38 = vrot.slane %v4738_v24, 5 }
 0x172   : > { %v8605_v8 = vpop.f32.mrf.mxu0  ;;  %v8607_v9 = vpop.f32.mrf.mxu1  ;;  %v4687_v41 = vor.u32 %v4686_v25, %v4682_v20  ;;  %v6467_v25 = vld [vmem:[%s8093_s5 + $0x38] sm:$0x1] }
 0x173   : > { %v4683_v2 = vsel %vm8132_vm2, %v4678_v46, %v4682_v20  ;;  %v4724_v20 = vrot.slane %v4722_v5, 5 }
 0x174   : > { %v8614_v22 = vpop.f32.mrf.mxu0  ;;  %v8616_v23 = vpop.f32.mrf.mxu1  ;;  %7206 = vmatmul.mubr.bf16.gmra.mxu1 %v6301_v59  ;;  %v4688_v59 = vrot.slane %v4687_v41, 4 }
 0x175   : > { %7209 = vmatprep.mubr.bf16.mxu1 %v6302_v60  ;;  %v4706_v60 = vrot.slane %v4704_v42, 5  ;;  %v4725_v42 = vor.u32 %v4724_v20, %v4721_v4  ;;  %v6471_v20 = vld [vmem:[%s8093_s5 + $0x48] sm:$0xf] }
 0x176   : > { %7254 = vmatmul.mubr.bf16.gmra.mxu0 %v7593_v11  ;;  %v8622_v36 = vpop.f32.mrf.mxu0  ;;  %v8624_v37 = vpop.f32.mrf.mxu1  ;;  %v4693_v12 = vsel %vm8132_vm2, %v4688_v59, %v4692_v28  ;;  %v6469_v59 = vld [vmem:[%s8093_s5 + $0x40] sm:$0xf] }
 0x177   : > { %7257 = vmatprep.mubr.bf16.mxu0 %v7596_v16  ;;  %v4711_v14 = vor.u32 %v4710_v61, %v4706_v60  ;;  %v4732_v16 = vshrl.u32 %v6463_v50, 16  ;;  %v6520_v19 = vcombine.low %v4683_v2, %v4693_v12  ;;  %v4707_v41 = vsel %vm8132_vm2, %v4702_v21, %v4706_v60  ;;  %v7602_v61 = vld [vmem:[%s8093_s5 + $0xf0] sm:$0xff]  }
 0x178   : > { %v8629_v54 = vpop.f32.mrf.mxu0  ;;  %v8631_v55 = vpop.f32.mrf.mxu1  ;;  %v4726_v1 = vrot.slane %v4725_v42, 4  ;;  %v4748_v2 = vrot.slane %v4746_v43, 5  ;;  %v4770_v21 = vshll.u32 %v6468_v44, 16 }
 0x179   : > { %v4712_v32 = vrot.slane %v4711_v14, 4  ;;  %v4734_v28 = vrot.slane %v4732_v16, 4  ;;  %v4762_v14 = vshll.u32 %v6467_v25, 16 }
 0x17a   : > { %v8637_v7 = vpop.f32.mrf.mxu0  ;;  %v8639_v11 = vpop.f32.mrf.mxu1  ;;  %v4731_v15 = vsel %vm8132_vm2, %v4726_v1, %v4730_v34  ;;  %v4749_v16 = vor.u32 %v4748_v2, %v4745_v51  ;;  %v4780_v51 = vshrl.u32 %v6469_v59, 16  ;;  %v4791_v1 = vshrl.u32 %v6471_v20, 16 }
 0x17b   : > { %v4717_v48 = vsel %vm8132_vm2, %v4712_v32, %v4716_v62  ;;  %v4735_v50 = vor.u32 %v4734_v28, %v4730_v34  ;;  %v4767_v62 = vshrl.u32 %v6468_v44, 16  ;;  %v4764_v28 = vrot.slane %v4762_v14, 5  ;;  %v6472_v14 = vld [vmem:[%s8093_s5 + $0x4c] sm:$0xf] }
 0x17c   : > { %v8646_v29 = vpop.f32.mrf.mxu0  ;;  %v8648_v30 = vpop.f32.mrf.mxu1  ;;  %7210 = vmatmul.mubr.bf16.gmra.mxu1 %v6303_v31  ;;  %v7601_v31 = vld [vmem:[%s8093_s5 + $0xe4] sm:$0xff]   ;;  %v6521_v60 = vcombine.low %v4707_v41, %v4717_v48  ;;  %v4776_v41 = vshll.u32 %v6469_v59, 16  ;;  %v4750_v42 = vrot.slane %v4749_v16, 4  ;;  %v4772_v34 = vrot.slane %v4770_v21, 5  ;;  %v6473_v21 = vld [vmem:[%s8093_s5 + $0x50] sm:$0x1] }
 0x17d   : > { %7277 = vmatprep.mubr.bf16.mxu1 %v7600_v45  ;;  %v4752_v45 = vshll.u32 %v6466_v18, 16  ;;  %v4736_v5 = vrot.slane %v4735_v50, 4  ;;  %v4769_v33 = vrot.slane %v4767_v62, 4  ;;  %v4782_v16 = vrot.slane %v4780_v51, 4 }
 0x17e   : > { %7258 = vmatmul.mubr.bf16.gmra.mxu0 %v7597_v56  ;;  %v8653_v46 = vpop.f32.mrf.mxu0  ;;  %v8655_v47 = vpop.f32.mrf.mxu1  ;;  %v4756_v56 = vshrl.u32 %v6466_v18, 16  ;;  %v4778_v44 = vrot.slane %v4776_v41, 5  ;;  %v4793_v59 = vrot.slane %v4791_v1, 4 }
 0x17f   : > { %7325 = vmatprep.mubr.bf16.mxu0 %v6520_v19  ;;  %v4754_v12 = vrot.slane %v4752_v45, 5  ;;  %v6470_v19 = vld [vmem:[%s8093_s5 + $0x44] sm:$0x1]  ;;  %v4741_v18 = vsel %vm8132_vm2, %v4736_v5, %v4740_v38  ;;  %v4773_v5 = vor.u32 %v4772_v34, %v4769_v33  ;;  %v7603_v33 = vld [vmem:[%s8093_s5 + $0xfc] sm:$0xff]   ;;  %v4800_v34 = vshll.u32 %v6472_v14, 16 }
 0x180   : > { %v8662_v3 = vpop.f32.mrf.mxu0  ;;  %v8664_v4 = vpop.f32.mrf.mxu1  ;;  %v4758_v17 = vrot.slane %v4756_v56, 4  ;;  %v6522_v25 = vcombine.low %v4731_v15, %v4741_v18  ;;  %v4786_v45 = vshll.u32 %v6470_v19, 16 }
 0x181   : > { %v4755_v38 = vsel %vm8132_vm2, %v4750_v42, %v4754_v12  ;;  %v4783_v42 = vor.u32 %v4782_v16, %v4778_v44  ;;  %v6475_v16 = vld [vmem:[%s8093_s5 + $0x58] sm:$0xf] }
 0x182   : > { %v8670_v24 = vpop.f32.mrf.mxu0  ;;  %v8672_v32 = vpop.f32.mrf.mxu1  ;;  %v4759_v43 = vor.u32 %v4758_v17, %v4754_v12  ;;  %v4794_v17 = vshll.u32 %v6471_v20, 16  ;;  %v4774_v12 = vrot.slane %v4773_v5, 4  ;;  %v6474_v20 = vld [vmem:[%s8093_s5 + $0x54] sm:$0xf] }
 0x183   : > { %v4784_v1 = vrot.slane %v4783_v42, 4  ;;  %v6477_v42 = vld [vmem:[%s8093_s5 + $0x60] sm:$0xf] }
 0x184   : > { %v6991_v48 = vpop.f32.mrf.mxu1  ;;  %v7039_v50 = vpop.f32.mrf.mxu0  ;;  %7278 = vmatmul.mubr.bf16.vlgmr.msra.gmra.mxu1 %v7601_v31  ;;  %v4760_v56 = vrot.slane %v4759_v43, 4  ;;  %v4788_v31 = vrot.slane %v4786_v45, 5  ;;  %v4796_v43 = vrot.slane %v4794_v17, 5 }
 0x185   : > { %v1436_v2 = vadd.f32 %v6991_v48, %v8541_v52  ;;  %7281 = vmatprep.mubr.bf16.mxu1 %v7602_v61 }
 0x186   : > { %7326 = vmatmul.mubr.bf16.vlgmr.msra.gmra.mxu0 %v6521_v60  ;;  %v1427_v62 = vpop.f32.mrf.mxu1  ;;  %v2152_v15 = vpop.f32.mrf.mxu0  ;;  %v4765_v61 = vsel %vm8132_vm2, %v4760_v56, %v4764_v28  ;;  %v4804_v28 = vshrl.u32 %v6472_v14, 16  ;;  %v4802_v56 = vrot.slane %v4800_v34, 5 }
 0x187   : > { %v8680_v19 = vadd.f32 %v7039_v50, %v1436_v2  ;;  %v1428_v52 = vadd.f32 %v1427_v62, %v8556_v63  ;;  %7329 = vmatprep.mubr.bf16.mxu0 %v6522_v25  ;;  %v6523_v41 = vcombine.low %v4755_v38, %v4765_v61  ;;  %v7604_v63 = vld [vmem:[%s8093_s5 + $0x108] sm:$0xff]   ;;  %v4779_v25 = vsel %vm8132_vm2, %v4774_v12, %v4778_v44 }
 0x188   : > { %v6992_v18 = vpop.f32.mrf.mxu1  ;;  %v7040_v60 = vpop.f32.mrf.mxu0  ;;  %v4797_v2 = vor.u32 %v4796_v43, %v4793_v59  ;;  %v4810_v38 = vshll.u32 %v6473_v21, 16  ;;  %v4789_v44 = vsel %vm8132_vm2, %v4784_v1, %v4788_v31  ;;  %v4818_v59 = vshll.u32 %v6474_v20, 16 }
 0x189   : > { %v8688_v48 = vadd.f32 %v2152_v15, %v1428_v52  ;;  %v1439_v50 = vadd.f32 %v6992_v18, %v8565_v10  ;;  %v4806_v15 = vrot.slane %v4804_v28, 4  ;;  %v4815_v10 = vshrl.u32 %v6474_v20, 16 }
 0x18a   : > { %v1430_v51 = vpop.f32.mrf.mxu1  ;;  %v2155_v45 = vpop.f32.mrf.mxu0  ;;  %v4798_v14 = vrot.slane %v4797_v2, 4  ;;  %v4812_v61 = vrot.slane %v4810_v38, 5  ;;  %v4824_v28 = vshll.u32 %v6475_v16, 16 }
 0x18b   : > { %v8694_v5 = vadd.f32 %v7040_v60, %v1439_v50  ;;  %v1431_v62 = vadd.f32 %v1430_v51, %v8573_v26  ;;  %v6524_v26 = vcombine.low %v4779_v25, %v4789_v44  ;;  %v4807_v18 = vor.u32 %v4806_v15, %v4802_v56  ;;  %v6476_v60 = vld [vmem:[%s8093_s5 + $0x5c] sm:$0x1]  ;;  %v6479_v44 = vld [vmem:[%s8093_s5 + $0x68] sm:$0x1] }
 0x18c   : > { %v6995_v17 = vpop.f32.mrf.mxu1  ;;  %v7043_v52 = vpop.f32.mrf.mxu0  ;;  %7282 = vmatmul.mubr.bf16.gmra.mxu1 %v7603_v33  ;;  %v4803_v33 = vsel %vm8132_vm2, %v4798_v14, %v4802_v56  ;;  %v4817_v31 = vrot.slane %v4815_v10, 4  ;;  %v4820_v50 = vrot.slane %v4818_v59, 5  ;;  %v4828_v25 = vshrl.u32 %v6475_v16, 16  ;;  %v7606_v10 = vld [vmem:[%s8093_s5 + $0x120] sm:$0xff]  }
 0x18d   : > { %v8700_v12 = vadd.f32 %v2155_v45, %v1431_v62  ;;  %v1452_v21 = vadd.f32 %v6995_v17, %v8582_v39  ;;  %7285 = vmatprep.mubr.bf16.mxu1 %v7604_v63  ;;  %v4808_v63 = vrot.slane %v4807_v18, 4  ;;  %v7605_v45 = vld [vmem:[%s8093_s5 + $0x114] sm:$0xff]   ;;  %v4826_v2 = vrot.slane %v4824_v28, 5 }
 0x18e   : > { %7330 = vmatmul.mubr.bf16.gmra.mxu0 %v6523_v41  ;;  %v1443_v43 = vpop.f32.mrf.mxu1  ;;  %v2168_v34 = vpop.f32.mrf.mxu0  ;;  %v4821_v1 = vor.u32 %v4820_v50, %v4817_v31  ;;  %v4834_v38 = vshll.u32 %v6476_v60, 16  ;;  %v4839_v56 = vshrl.u32 %v6477_v42, 16  ;;  %v4830_v17 = vrot.slane %v4828_v25, 4  ;;  %v6480_v31 = vld [vmem:[%s8093_s5 + $0x6c] sm:$0xf] }
 0x18f   : > { %v8707_v20 = vadd.f32 %v7043_v52, %v1452_v21  ;;  %v1444_v39 = vadd.f32 %v1443_v43, %v8590_v35  ;;  %7333 = vmatprep.mubr.bf16.mxu0 %v6524_v26  ;;  %v4813_v35 = vsel %vm8132_vm2, %v4808_v63, %v4812_v61  ;;  %v6478_v52 = vld [vmem:[%s8093_s5 + $0x64] sm:$0xf] }
 0x190   : > { %v6996_v51 = vpop.f32.mrf.mxu1  ;;  %v7044_v41 = vpop.f32.mrf.mxu0  ;;  %v6525_v59 = vcombine.low %v4803_v33, %v4813_v35  ;;  %v4822_v21 = vrot.slane %v4821_v1, 4  ;;  %v4836_v26 = vrot.slane %v4834_v38, 5  ;;  %v4841_v18 = vrot.slane %v4839_v56, 4 }
 0x191   : > { %v8711_v62 = vadd.f32 %v2168_v34, %v1444_v39  ;;  %v1455_v15 = vadd.f32 %v6996_v51, %v8598_v57  ;;  %v4831_v57 = vor.u32 %v4830_v17, %v4826_v2  ;;  %v4842_v34 = vshll.u32 %v6477_v42, 16  ;;  %v6481_v42 = vld [vmem:[%s8093_s5 + $0x70] sm:$0xf] }
 0x192   : > { %v1446_v16 = vpop.f32.mrf.mxu1  ;;  %v2171_v14 = vpop.f32.mrf.mxu0  ;;  %v4827_v28 = vsel %vm8132_vm2, %v4822_v21, %v4826_v2  ;;  %v4848_v39 = vshll.u32 %v6478_v52, 16  ;;  %v4852_v63 = vshrl.u32 %v6478_v52, 16  ;;  %v4858_v33 = vshll.u32 %v6479_v44, 16  ;;  %v6482_v44 = vld [vmem:[%s8093_s5 + $0x74] sm:$0x1] }
 0x193   : > { %v8719_v60 = vadd.f32 %v7044_v41, %v1455_v15  ;;  %v1447_v43 = vadd.f32 %v1446_v16, %v8605_v8  ;;  %v4832_v8 = vrot.slane %v4831_v57, 4  ;;  %v4844_v41 = vrot.slane %v4842_v34, 5 }
 0x194   : > { %v6999_v50 = vpop.f32.mrf.mxu1  ;;  %v7047_v61 = vpop.f32.mrf.mxu0  ;;  %7286 = vmatmul.mubr.bf16.gmra.mxu1 %v7605_v45  ;;  %v4850_v45 = vrot.slane %v4848_v39, 5  ;;  %v4854_v56 = vrot.slane %v4852_v63, 4  ;;  %v4860_v15 = vrot.slane %v4858_v33, 5  ;;  %v4863_v2 = vshrl.u32 %v6480_v31, 16  ;;  %v6483_v63 = vld [vmem:[%s8093_s5 + $0x78] sm:$0xf] }
 0x195   : > { %v8725_v25 = vadd.f32 %v2171_v14, %v1447_v43  ;;  %v1468_v51 = vadd.f32 %v6999_v50, %v8614_v22  ;;  %7289 = vmatprep.mubr.bf16.mxu1 %v7606_v10  ;;  %v4837_v22 = vsel %vm8132_vm2, %v4832_v8, %v4836_v26  ;;  %v7607_v10 = vld [vmem:[%s8093_s5 + $0x12c] sm:$0xff]   ;;  %v4845_v52 = vor.u32 %v4844_v41, %v4841_v18 }
 0x196   : > { %7334 = vmatmul.mubr.bf16.gmra.mxu0 %v6525_v59  ;;  %v1459_v1 = vpop.f32.mrf.mxu1  ;;  %v2184_v38 = vpop.f32.mrf.mxu0  ;;  %v6526_v59 = vcombine.low %v4827_v28, %v4837_v22  ;;  %v4855_v21 = vor.u32 %v4854_v56, %v4850_v45  ;;  %v4865_v43 = vrot.slane %v4863_v2, 4  ;;  %v4866_v57 = vshll.u32 %v6480_v31, 16  ;;  %v6484_v28 = vld [vmem:[%s8093_s5 + $0x7c] sm:$0xf] }
 0x197   : > { %v8729_v35 = vadd.f32 %v7047_v61, %v1468_v51  ;;  %v1460_v17 = vadd.f32 %v1459_v1, %v8622_v36  ;;  %v4846_v61 = vrot.slane %v4845_v52, 4  ;;  %v7608_v36 = vld [vmem:[%s8093_s5 + $0x138] sm:$0xff]   ;;  %v4872_v39 = vshll.u32 %v6481_v42, 16 }
 0x198   : > { %v7000_v16 = vpop.f32.mrf.mxu1  ;;  %v7048_v14 = vpop.f32.mrf.mxu0  ;;  %7337 = vmatprep.mubr.bf16.mxu0 %v6526_v59  ;;  %v4856_v18 = vrot.slane %v4855_v21, 4  ;;  %v4868_v51 = vrot.slane %v4866_v57, 5  ;;  %v4876_v8 = vshrl.u32 %v6481_v42, 16  ;;  %v4882_v41 = vshll.u32 %v6482_v44, 16 }
 0x199   : > { %v8736_v34 = vadd.f32 %v2184_v38, %v1460_v17  ;;  %v1471_v50 = vadd.f32 %v7000_v16, %v8629_v54  ;;  %v4851_v54 = vsel %vm8132_vm2, %v4846_v61, %v4850_v45  ;;  %v4874_v38 = vrot.slane %v4872_v39, 5 }
 0x19a   : > { %v1462_v33 = vpop.f32.mrf.mxu1  ;;  %v2187_v26 = vpop.f32.mrf.mxu0  ;;  %v4861_v17 = vsel %vm8132_vm2, %v4856_v18, %v4860_v15  ;;  %v4869_v22 = vor.u32 %v4868_v51, %v4865_v43  ;;  %v4878_v52 = vrot.slane %v4876_v8, 4  ;;  %v4884_v42 = vrot.slane %v4882_v41, 5  ;;  %v7609_v8 = vld [vmem:[%s8093_s5 + $0x144] sm:$0xff]  }
 0x19b   : > { %v8742_v1 = vadd.f32 %v7048_v14, %v1471_v50  ;;  %v1463_v31 = vadd.f32 %v1462_v33, %v8637_v7  ;;  %v6527_v14 = vcombine.low %v4851_v54, %v4861_v17  ;;  %v6485_v7 = vld [vmem:[%s8093_s5 + $0x80] sm:$0x1]  ;;  %v4887_v59 = vshrl.u32 %v6483_v63, 16  ;;  %v6486_v33 = vld [vmem:[%s8093_s5 + $0x84] sm:$0xf] }
 0x19c   : > { %v7003_v56 = vpop.f32.mrf.mxu1  ;;  %v7051_v2 = vpop.f32.mrf.mxu0  ;;  %7290 = vmatmul.mubr.bf16.gmra.mxu1 %v7607_v10  ;;  %v4870_v57 = vrot.slane %v4869_v22, 4  ;;  %v4879_v10 = vor.u32 %v4878_v52, %v4874_v38  ;;  %v4890_v50 = vshll.u32 %v6483_v63, 16  ;;  %v4896_v61 = vshll.u32 %v6484_v28, 16 }
 0x19d   : > { %v8749_v44 = vadd.f32 %v2187_v26, %v1463_v31  ;;  %v1484_v16 = vadd.f32 %v7003_v56, %v8646_v29  ;;  %7293 = vmatprep.mubr.bf16.mxu1 %v7608_v36  ;;  %v4889_v39 = vrot.slane %v4887_v59, 4  ;;  %v4900_v29 = vshrl.u32 %v6484_v28, 16 }
 0x19e   : > { %v1475_v45 = vpop.f32.mrf.mxu1  ;;  %v2200_v21 = vpop.f32.mrf.mxu0  ;;  %7338 = vmatmul.mubr.bf16.gmra.mxu0 %v6527_v14  ;;  %v4875_v18 = vsel %vm8132_vm2, %v4870_v57, %v4874_v38  ;;  %v4880_v51 = vrot.slane %v4879_v10, 4  ;;  %v4892_v41 = vrot.slane %v4890_v50, 5  ;;  %v4898_v63 = vrot.slane %v4896_v61, 5  ;;  %v6488_v10 = vld [vmem:[%s8093_s5 + $0x8c] sm:$0x1] }
 0x19f   : > { %v8753_v15 = vadd.f32 %v7051_v2, %v1484_v16  ;;  %v1476_v43 = vadd.f32 %v1475_v45, %v8653_v46  ;;  %v4902_v56 = vrot.slane %v4900_v29, 4  ;;  %v4906_v46 = vshll.u32 %v6485_v7, 16  ;;  %v7610_v2 = vld [vmem:[%s8093_s5 + $0x150] sm:$0xff]   ;;  %v6487_v16 = vld [vmem:[%s8093_s5 + $0x88] sm:$0xf] }
 0x1a0   : > { %v7004_v26 = vpop.f32.mrf.mxu1  ;;  %v7052_v36 = vpop.f32.mrf.mxu0  ;;  %v4885_v22 = vsel %vm8132_vm2, %v4880_v51, %v4884_v42  ;;  %v4893_v52 = vor.u32 %v4892_v41, %v4889_v39  ;;  %v4911_v38 = vshrl.u32 %v6486_v33, 16  ;;  %v4914_v14 = vshll.u32 %v6486_v33, 16 }
 0x1a1   : > { %v8760_v31 = vadd.f32 %v2200_v21, %v1476_v43  ;;  %v1487_v54 = vadd.f32 %v7004_v26, %v8662_v3  ;;  %v6528_v21 = vcombine.low %v4875_v18, %v4885_v22  ;;  %v4903_v57 = vor.u32 %v4902_v56, %v4898_v63 }
 0x1a2   : > { %v1478_v28 = vpop.f32.mrf.mxu1  ;;  %v2203_v17 = vpop.f32.mrf.mxu0  ;;  %v4894_v7 = vrot.slane %v4893_v52, 4  ;;  %v4908_v61 = vrot.slane %v4906_v46, 5  ;;  %v4913_v43 = vrot.slane %v4911_v38, 4  ;;  %v4916_v29 = vrot.slane %v4914_v14, 5  ;;  %v7611_v14 = vld [vmem:[%s8093_s5 + $0x15c] sm:$0xff]  }
 0x1a3   : > { %v8767_v59 = vadd.f32 %v7052_v36, %v1487_v54  ;;  %v1479_v45 = vadd.f32 %v1478_v28, %v8670_v24  ;;  %7341 = vmatprep.mubr.bf16.mxu0 %v6528_v21  ;;  %v4904_v33 = vrot.slane %v4903_v57, 4  ;;  %v4920_v24 = vshll.u32 %v6487_v16, 16  ;;  %v6489_v54 = vld [vmem:[%s8093_s5 + $0x90] sm:$0xf]  ;;  %v6490_v28 = vld [vmem:[%s8093_s5 + $0x94] sm:$0xf] }
 0x1a4   : > { %v7007_v3 = vpop.f32.mrf.mxu1  ;;  %v7055_v50 = vpop.f32.mrf.mxu0  ;;  %7294 = vmatmul.mubr.bf16.gmra.mxu1 %v7609_v8  ;;  %v4899_v26 = vsel %vm8132_vm2, %v4894_v7, %v4898_v63  ;;  %v4917_v51 = vor.u32 %v4916_v29, %v4913_v43  ;;  %v4924_v8 = vshrl.u32 %v6487_v16, 16  ;;  %v4930_v41 = vshll.u32 %v6488_v10, 16  ;;  %v6491_v57 = vld [vmem:[%s8093_s5 + $0x98] sm:$0x1] }
 0x1a5   : > { %v8771_v42 = vadd.f32 %v2203_v17, %v1479_v45  ;;  %v1500_v39 = vadd.f32 %v7007_v3, %v8543_v53  ;;  %7297 = vmatprep.mubr.bf16.mxu1 %v7610_v2  ;;  %v4909_v46 = vsel %vm8132_vm2, %v4904_v33, %v4908_v61  ;;  %v4922_v2 = vrot.slane %v4920_v24, 5  ;;  %v6492_v33 = vld [vmem:[%s8093_s5 + $0x9c] sm:$0xf] }
 0x1a6   : > { %v1491_v36 = vpop.f32.mrf.mxu1  ;;  %v2216_v18 = vpop.f32.mrf.mxu0  ;;  %v6529_v17 = vcombine.low %v4899_v26, %v4909_v46  ;;  %v4918_v52 = vrot.slane %v4917_v51, 4  ;;  %v4926_v38 = vrot.slane %v4924_v8, 4  ;;  %v4932_v16 = vrot.slane %v4930_v41, 5 }
 0x1a7   : > { %v8777_v56 = vadd.f32 %v7055_v50, %v1500_v39  ;;  %v1492_v53 = vadd.f32 %v1491_v36, %v8558_v0  ;;  %v4935_v10 = vshrl.u32 %v6489_v54, 16  ;;  %v4938_v3 = vshll.u32 %v6489_v54, 16  ;;  %v7612_v50 = vld [vmem:[%s8093_s5 + $0x168] sm:$0xff]  }
 0x1a8   : > { %v7008_v63 = vpop.f32.mrf.mxu1  ;;  %v7056_v22 = vpop.f32.mrf.mxu0  ;;  %7342 = vmatmul.mubr.bf16.gmra.mxu0 %v6529_v17  ;;  %v4923_v61 = vsel %vm8132_vm2, %v4918_v52, %v4922_v2  ;;  %v4927_v43 = vor.u32 %v4926_v38, %v4922_v2  ;;  %v4944_v29 = vshll.u32 %v6490_v28, 16  ;;  %v4948_v39 = vshrl.u32 %v6490_v28, 16  ;;  %v6493_v17 = vld [vmem:[%s8093_s5 + $0xa0] sm:$0xf] }
 0x1a9   : > { %v8784_v45 = vadd.f32 %v2216_v18, %v1492_v53  ;;  %v1503_v21 = vadd.f32 %v7008_v63, %v8567_v13  ;;  %v4937_v13 = vrot.slane %v4935_v10, 4  ;;  %v4940_v36 = vrot.slane %v4938_v3, 5 }
 0x1aa   : > { %v1494_v0 = vpop.f32.mrf.mxu1  ;;  %v2219_v7 = vpop.f32.mrf.mxu0  ;;  %v4928_v18 = vrot.slane %v4927_v43, 4  ;;  %v4946_v41 = vrot.slane %v4944_v29, 5  ;;  %v4950_v54 = vrot.slane %v4948_v39, 4  ;;  %v4954_v46 = vshll.u32 %v6491_v57, 16 }
 0x1ab   : > { %v8792_v24 = vadd.f32 %v7056_v22, %v1503_v21  ;;  %v1495_v26 = vadd.f32 %v1494_v0, %v8575_v27  ;;  %v4941_v28 = vor.u32 %v4940_v36, %v4937_v13  ;;  %v4959_v63 = vshrl.u32 %v6492_v33, 16 }
 0x1ac   : > { %v7011_v51 = vpop.f32.mrf.mxu1  ;;  %v7059_v8 = vpop.f32.mrf.mxu0  ;;  %7298 = vmatmul.mubr.bf16.gmra.mxu1 %v7611_v14  ;;  %v4933_v27 = vsel %vm8132_vm2, %v4928_v18, %v4932_v16  ;;  %v4951_v22 = vor.u32 %v4950_v54, %v4946_v41  ;;  %v4956_v52 = vrot.slane %v4954_v46, 5  ;;  %v4962_v21 = vshll.u32 %v6492_v33, 16  ;;  %v6495_v18 = vld [vmem:[%s8093_s5 + $0xa8] sm:$0xf] }
 0x1ad   : > { %v8795_v53 = vadd.f32 %v2219_v7, %v1495_v26  ;;  %v1516_v2 = vadd.f32 %v7011_v51, %v8584_v40  ;;  %7301 = vmatprep.mubr.bf16.mxu1 %v7612_v50  ;;  %v6530_v10 = vcombine.low %v4923_v61, %v4933_v27  ;;  %v4942_v3 = vrot.slane %v4941_v28, 4  ;;  %v6494_v50 = vld [vmem:[%s8093_s5 + $0xa4] sm:$0x1]  ;;  %v7613_v26 = vld [vmem:[%s8093_s5 + $0x174] sm:$0xff]  }
 0x1ae   : > { %v1507_v38 = vpop.f32.mrf.mxu1  ;;  %v2232_v14 = vpop.f32.mrf.mxu0  ;;  %v4952_v0 = vrot.slane %v4951_v22, 4  ;;  %v4961_v29 = vrot.slane %v4959_v63, 4  ;;  %v4964_v16 = vrot.slane %v4962_v21, 5  ;;  %v4968_v39 = vshll.u32 %v6493_v17, 16  ;;  %v6496_v63 = vld [vmem:[%s8093_s5 + $0xac] sm:$0xf] }
 0x1af   : > { %v8801_v57 = vadd.f32 %v7059_v8, %v1516_v2  ;;  %v1508_v40 = vadd.f32 %v1507_v38, %v8592_v49  ;;  %7345 = vmatprep.mubr.bf16.mxu0 %v6530_v10  ;;  %v4947_v61 = vsel %vm8132_vm2, %v4942_v3, %v4946_v41  ;;  %v4972_v36 = vshrl.u32 %v6493_v17, 16  ;;  %v7614_v49 = vld [vmem:[%s8093_s5 + $0x180] sm:$0xff]  }
 0x1b0   : > { %v7012_v7 = vpop.f32.mrf.mxu1  ;;  %v7060_v43 = vpop.f32.mrf.mxu0  ;;  %v4957_v51 = vsel %vm8132_vm2, %v4952_v0, %v4956_v52  ;;  %v4965_v46 = vor.u32 %v4964_v16, %v4961_v29  ;;  %v4970_v2 = vrot.slane %v4968_v39, 5  ;;  %v4978_v28 = vshll.u32 %v6494_v50, 16  ;;  %v6497_v52 = vld [vmem:[%s8093_s5 + $0xb0] sm:$0x1] }
 0x1b1   : > { %v8808_v33 = vadd.f32 %v2232_v14, %v1508_v40  ;;  %v1519_v13 = vadd.f32 %v7012_v7, %v8600_v58  ;;  %v6531_v27 = vcombine.low %v4947_v61, %v4957_v51  ;;  %v4974_v58 = vrot.slane %v4972_v36, 4 }
 0x1b2   : > { %v1510_v8 = vpop.f32.mrf.mxu1  ;;  %v2235_v54 = vpop.f32.mrf.mxu0  ;;  %v4966_v17 = vrot.slane %v4965_v46, 4  ;;  %v4980_v38 = vrot.slane %v4978_v28, 5  ;;  %v4983_v10 = vshrl.u32 %v6495_v18, 16  ;;  %v4986_v3 = vshll.u32 %v6495_v18, 16  ;;  %v7615_v28 = vld [vmem:[%s8093_s5 + $0x18c] sm:$0xff]  }
 0x1b3   : > { %v8816_v22 = vadd.f32 %v7060_v43, %v1519_v13  ;;  %v1511_v41 = vadd.f32 %v1510_v8, %v8607_v9  ;;  %7346 = vmatmul.mubr.bf16.gmra.mxu0 %v6531_v27  ;;  %v4975_v50 = vor.u32 %v4974_v58, %v4970_v2  ;;  %v4992_v7 = vshll.u32 %v6496_v63, 16  ;;  %v6498_v43 = vld [vmem:[%s8093_s5 + $0xb4] sm:$0xf]  ;;  %v6499_v58 = vld [vmem:[%s8093_s5 + $0xb8] sm:$0xf] }
 0x1b4   : > { %v7015_v14 = vpop.f32.mrf.mxu1  ;;  %v7063_v21 = vpop.f32.mrf.mxu0  ;;  %7302 = vmatmul.mubr.bf16.gmra.mxu1 %v7613_v26  ;;  %v4971_v9 = vsel %vm8132_vm2, %v4966_v17, %v4970_v2  ;;  %v4985_v29 = vrot.slane %v4983_v10, 4  ;;  %v4988_v16 = vrot.slane %v4986_v3, 5  ;;  %v4996_v39 = vshrl.u32 %v6496_v63, 16 }
 0x1b5   : > { %v8820_v40 = vadd.f32 %v2235_v54, %v1511_v41  ;;  %v1532_v0 = vadd.f32 %v7015_v14, %v8616_v23  ;;  %7305 = vmatprep.mubr.bf16.mxu1 %v7614_v49  ;;  %v4976_v13 = vrot.slane %v4975_v50, 4  ;;  %v4994_v18 = vrot.slane %v4992_v7, 5  ;;  %v6500_v50 = vld [vmem:[%s8093_s5 + $0xbc] sm:$0x1] }
 0x1b6   : > { %v1523_v26 = vpop.f32.mrf.mxu1  ;;  %v2248_v61 = vpop.f32.mrf.mxu0  ;;  %v5002_v51 = vshll.u32 %v6497_v52, 16  ;;  %v4989_v8 = vor.u32 %v4988_v16, %v4985_v29  ;;  %v4998_v23 = vrot.slane %v4996_v39, 4  ;;  %v5007_v2 = vshrl.u32 %v6498_v43, 16  ;;  %v6501_v16 = vld [vmem:[%s8093_s5 + $0xc0] sm:$0xf] }
 0x1b7   : > { %v8826_v36 = vadd.f32 %v7063_v21, %v1532_v0  ;;  %v1524_v49 = vadd.f32 %v1523_v26, %v8624_v37  ;;  %v4981_v63 = vsel %vm8132_vm2, %v4976_v13, %v4980_v38  ;;  %v5010_v17 = vshll.u32 %v6498_v43, 16 }
 0x1b8   : > { %v7016_v54 = vpop.f32.mrf.mxu1  ;;  %v7064_v46 = vpop.f32.mrf.mxu0  ;;  %v5004_v27 = vrot.slane %v5002_v51, 5  ;;  %v6532_v14 = vcombine.low %v4971_v9, %v4981_v63  ;;  %v4990_v21 = vrot.slane %v4989_v8, 4  ;;  %v4999_v52 = vor.u32 %v4998_v23, %v4994_v18 }
 0x1b9   : > { %v1535_v41 = vadd.f32 %v7016_v54, %v8631_v55  ;;  %v8834_v10 = vadd.f32 %v2248_v61, %v1524_v49  ;;  %v5009_v38 = vrot.slane %v5007_v2, 4  ;;  %v5012_v29 = vrot.slane %v5010_v17, 5  ;;  %v6503_v2 = vld [vmem:[%s8093_s5 + $0xc8] sm:$0x1] }
 0x1ba   : > { %v1526_v37 = vpop.f32.mrf.mxu1  ;;  %v2251_v3 = vpop.f32.mrf.mxu0  ;;  %7349 = vmatprep.mubr.bf16.mxu0 %v6532_v14  ;;  %v4995_v55 = vsel %vm8132_vm2, %v4990_v21, %v4994_v18  ;;  %v5000_v43 = vrot.slane %v4999_v52, 4  ;;  %v5016_v9 = vshll.u32 %v6499_v58, 16  ;;  %v5020_v39 = vshrl.u32 %v6499_v58, 16 }
 0x1bb   : > { %v8837_v0 = vadd.f32 %v7064_v46, %v1535_v41  ;;  %v1527_v7 = vadd.f32 %v1526_v37, %v8639_v11  ;;  %v5013_v13 = vor.u32 %v5012_v29, %v5009_v38  ;;  %v5026_v51 = vshll.u32 %v6500_v50, 16  ;;  %v6502_v11 = vld [vmem:[%s8093_s5 + $0xc4] sm:$0xf] }
 0x1bc   : > { %v7019_v26 = vpop.f32.mrf.mxu1  ;;  %7306 = vmatmul.mubr.bf16.gmra.mxu1 %v7615_v28  ;;  %v5005_v23 = vsel %vm8132_vm2, %v5000_v43, %v5004_v27  ;;  %v5018_v49 = vrot.slane %v5016_v9, 5  ;;  %v5022_v54 = vrot.slane %v5020_v39, 4  ;;  %v7067_v46 = vpop.f32.mrf.mxu0  ;;  %v5031_v18 = vshrl.u32 %v6501_v16, 16 }
 0x1bd   : > { %v8843_v61 = vadd.f32 %v2251_v3, %v1527_v7  ;;  %v1548_v8 = vadd.f32 %v7019_v26, %v8648_v30  ;;  %v6533_v41 = vcombine.low %v4995_v55, %v5005_v23  ;;  %v5014_v58 = vrot.slane %v5013_v13, 4 }
 0x1be   : > { %v1539_v63 = vpop.f32.mrf.mxu1  ;;  %v5028_v17 = vrot.slane %v5026_v51, 5  ;;  %v5023_v14 = vor.u32 %v5022_v54, %v5018_v49  ;;  %v5033_v21 = vrot.slane %v5031_v18, 4  ;;  %v5034_v52 = vshll.u32 %v6501_v16, 16  ;;  %v2264_v30 = vpop.f32.mrf.mxu0 }
 0x1bf   : > { %v8850_v28 = vadd.f32 %v7067_v46, %v1548_v8  ;;  %v5040_v37 = vshll.u32 %v6502_v11, 16  ;;  %7350 = vmatmul.mubr.bf16.gmra.mxu0 %v6533_v41  ;;  %v5019_v27 = vsel %vm8132_vm2, %v5014_v58, %v5018_v49  ;;  %v5044_v50 = vshrl.u32 %v6502_v11, 16 }
 0x1c0   : > { %v7020_v3 = vpop.f32.mrf.mxu1  ;;  %v5050_v7 = vshll.u32 %v6503_v2, 16  ;;  %v1540_v38 = vadd.f32 %v1539_v63, %v8655_v47  ;;  %v5024_v29 = vrot.slane %v5023_v14, 4  ;;  %v5036_v55 = vrot.slane %v5034_v52, 5  ;;  %v7068_v39 = vpop.f32.mrf.mxu0 }
 0x1c1   : > { %v5042_v43 = vrot.slane %v5040_v37, 5  ;;  %v1551_v9 = vadd.f32 %v7020_v3, %v8664_v4  ;;  %v5046_v13 = vrot.slane %v5044_v50, 4 }
 0x1c2   : > { %v1542_v26 = vpop.f32.mrf.mxu1  ;;  %v8856_v16 = vadd.f32 %v2264_v30, %v1540_v38  ;;  %v5029_v8 = vsel %vm8132_vm2, %v5024_v29, %v5028_v17  ;;  %v5037_v23 = vor.u32 %v5036_v55, %v5033_v21  ;;  %v5052_v11 = vrot.slane %v5050_v7, 5  ;;  %v2267_v47 = vpop.f32.mrf.mxu0 }
 0x1c3   : > { %v1543_v51 = vadd.f32 %v1542_v26, %v8672_v32  ;;  %v8861_v49 = vadd.f32 %v7068_v39, %v1551_v9  ;;  %v6534_v46 = vcombine.low %v5019_v27, %v5029_v8  ;;  %v5047_v2 = vor.u32 %v5046_v13, %v5042_v43 }
 0x1c4   : > { %v7087_v54 = vpop.f32.mrf.mxu1  ;;  %v5038_v63 = vrot.slane %v5037_v23, 4  ;;  %v7135_v41 = vpop.f32.mrf.mxu0 }
 0x1c5   : > { %v8863_v18 = vadd.f32 %v2267_v47, %v1543_v51  ;;  %v2670_v4 = vadd.f32 %v7087_v54, %v8680_v19  ;;  %7353 = vmatprep.mubr.bf16.mxu0 %v6534_v46  ;;  %v5048_v32 = vrot.slane %v5047_v2, 4 }
 0x1c6   : > { %v2541_v58 = vpop.f32.mrf.mxu1  ;;  %v5043_v21 = vsel %vm8132_vm2, %v5038_v63, %v5042_v43  ;;  %v2930_v52 = vpop.f32.mrf.mxu0 }
 0x1c7   : > { %v8866_v14 = vadd.f32 %v7135_v41, %v2670_v4  ;;  %v2668_v17 = vadd.f32 %v2541_v58, %v8688_v48  ;;  %v5053_v30 = vsel %vm8132_vm2, %v5048_v32, %v5052_v11 }
 0x1c8   : > { %v7088_v37 = vpop.f32.mrf.mxu1  ;;  %v6535_v27 = vcombine.low %v5043_v21, %v5053_v30  ;;  %v7136_v50 = vpop.f32.mrf.mxu0 }
 0x1c9   : > { %v8873_v3 = vadd.f32 %v2930_v52, %v2668_v17  ;;  %v2671_v19 = vadd.f32 %v7088_v37, %v8694_v5 }
 0x1ca   : > { %v2544_v7 = vpop.f32.mrf.mxu1  ;;  %7354 = vmatmul.mubr.bf16.gmra.mxu0 %v6535_v27  ;;  %v2933_v48 = vpop.f32.mrf.mxu0 }
 0x1cb   : > { %v8876_v38 = vadd.f32 %v7136_v50, %v2671_v19  ;;  %v2669_v29 = vadd.f32 %v2544_v7, %v8700_v12 }
 0x1cc   : > { %v7091_v55 = vpop.f32.mrf.mxu1  ;;  %v7139_v6 = vpop.f32.mrf.mxu0 }
 0x1cd   : > { %v8879_v43 = vadd.f32 %v2933_v48, %v2669_v29  ;;  %v2674_v9 = vadd.f32 %v7091_v55, %v8707_v20 }
 0x1ce   : > { %v2557_v39 = vpop.f32.mrf.mxu1  ;;  %v2946_v13 = vpop.f32.mrf.mxu0 }
 0x1cf   : > { %v8882_v26 = vadd.f32 %v7139_v6, %v2674_v9  ;;  %v2672_v5 = vadd.f32 %v2557_v39, %v8711_v62 }
 0x1d0   : > { %v7092_v51 = vpop.f32.mrf.mxu1  ;;  %v7140_v12 = vpop.f32.mrf.mxu0 }
 0x1d1   : > { %v8885_v8 = vadd.f32 %v2946_v13, %v2672_v5  ;;  %v2675_v23 = vadd.f32 %v7092_v51, %v8719_v60 }
 0x1d2   : > { %v2560_v11 = vpop.f32.mrf.mxu1  ;;  %v2949_v46 = vpop.f32.mrf.mxu0 }
 0x1d3   : > { %v8888_v47 = vadd.f32 %v7140_v12, %v2675_v23  ;;  %v2673_v54 = vadd.f32 %v2560_v11, %v8725_v25 }
 0x1d4   : > { %v7095_v20 = vpop.f32.mrf.mxu1 }
 0x1d5   : > { %v8891_v2 = vadd.f32 %v2949_v46, %v2673_v54  ;;  %v2678_v4 = vadd.f32 %v7095_v20, %v8729_v35 }
 0x1d6   : > { %v7143_v63 = vpop.f32.mrf.mxu0  ;;  %v2573_v62 = vpop.f32.mrf.mxu1 }
 0x1d7   : > { %v8894_v41 = vadd.f32 %v7143_v63, %v2678_v4  ;;  %v2676_v58 = vadd.f32 %v2573_v62, %v8736_v34 }
 0x1d8   : > { %v2962_v32 = vpop.f32.mrf.mxu0  ;;  %v7096_v60 = vpop.f32.mrf.mxu1 }
 0x1d9   : > { %v8897_v17 = vadd.f32 %v2962_v32, %v2676_v58  ;;  %v2679_v21 = vadd.f32 %v7096_v60, %v8742_v1 }
 0x1da   : > { %v7144_v52 = vpop.f32.mrf.mxu0  ;;  %v2576_v25 = vpop.f32.mrf.mxu1 }
 0x1db   : > { %v8900_v37 = vadd.f32 %v7144_v52, %v2679_v21  ;;  %v2677_v30 = vadd.f32 %v2576_v25, %v8749_v44 }
 0x1dc   : > { %v2965_v19 = vpop.f32.mrf.mxu0  ;;  %v7099_v35 = vpop.f32.mrf.mxu1 }
 0x1dd   : > { %v8903_v27 = vadd.f32 %v2965_v19, %v2677_v30  ;;  %v2682_v50 = vadd.f32 %v7099_v35, %v8753_v15 }
 0x1de   : > { %v7147_v7 = vpop.f32.mrf.mxu0  ;;  %v2589_v34 = vpop.f32.mrf.mxu1 }
 0x1df   : > { %v8906_v29 = vadd.f32 %v7147_v7, %v2682_v50  ;;  %v2680_v48 = vadd.f32 %v2589_v34, %v8760_v31 }
 0x1e0   : > { %v2978_v55 = vpop.f32.mrf.mxu0  ;;  %v7100_v1 = vpop.f32.mrf.mxu1 }
 0x1e1   : > { %v8909_v9 = vadd.f32 %v2978_v55, %v2680_v48  ;;  %v2683_v6 = vadd.f32 %v7100_v1, %v8767_v59 }
 0x1e2   : > { %v7148_v39 = vpop.f32.mrf.mxu0  ;;  %v2592_v44 = vpop.f32.mrf.mxu1 }
 0x1e3   : > { %v8912_v5 = vadd.f32 %v7148_v39, %v2683_v6  ;;  %v2681_v13 = vadd.f32 %v2592_v44, %v8771_v42 }
 0x1e4   : > { %v2981_v51 = vpop.f32.mrf.mxu0  ;;  %v7103_v15 = vpop.f32.mrf.mxu1 }
 0x1e5   : > { %v8915_v23 = vadd.f32 %v2981_v51, %v2681_v13  ;;  %v2686_v12 = vadd.f32 %v7103_v15, %v8777_v56 }
 0x1e6   : > { %v7151_v11 = vpop.f32.mrf.mxu0  ;;  %v2605_v31 = vpop.f32.mrf.mxu1 }
 0x1e7   : > { %v8918_v54 = vadd.f32 %v7151_v11, %v2686_v12  ;;  %v2684_v46 = vadd.f32 %v2605_v31, %v8784_v45 }
 0x1e8   : > { %v2994_v20 = vpop.f32.mrf.mxu0  ;;  %v7104_v59 = vpop.f32.mrf.mxu1 }
 0x1e9   : > { %v8921_v4 = vadd.f32 %v2994_v20, %v2684_v46  ;;  %v2687_v63 = vadd.f32 %v7104_v59, %v8792_v24 }
 0x1ea   : > { %v7152_v62 = vpop.f32.mrf.mxu0  ;;  %v2608_v42 = vpop.f32.mrf.mxu1 }
 0x1eb   : > { %v8924_v58 = vadd.f32 %v7152_v62, %v2687_v63  ;;  %v2685_v32 = vadd.f32 %v2608_v42, %v8795_v53 }
 0x1ec   : > { %v2997_v60 = vpop.f32.mrf.mxu0  ;;  %v7107_v56 = vpop.f32.mrf.mxu1 }
 0x1ed   : > { %v8927_v21 = vadd.f32 %v2997_v60, %v2685_v32  ;;  %v2690_v52 = vadd.f32 %v7107_v56, %v8801_v57 }
 0x1ee   : > { %v7155_v25 = vpop.f32.mrf.mxu0  ;;  %v2621_v45 = vpop.f32.mrf.mxu1 }
 0x1ef   : > { %v8930_v30 = vadd.f32 %v7155_v25, %v2690_v52  ;;  %v2688_v19 = vadd.f32 %v2621_v45, %v8808_v33 }
 0x1f0   : > { %v3010_v35 = vpop.f32.mrf.mxu0  ;;  %v7108_v24 = vpop.f32.mrf.mxu1 }
 0x1f1   : > { %v8933_v50 = vadd.f32 %v3010_v35, %v2688_v19  ;;  %v2691_v7 = vadd.f32 %v7108_v24, %v8816_v22 }
 0x1f2   : > { %v7156_v34 = vpop.f32.mrf.mxu0  ;;  %v2624_v53 = vpop.f32.mrf.mxu1 }
 0x1f3   : > { %v8936_v48 = vadd.f32 %v7156_v34, %v2691_v7  ;;  %v2689_v55 = vadd.f32 %v2624_v53, %v8820_v40 }
 0x1f4   : > { %v3013_v1 = vpop.f32.mrf.mxu0  ;;  %v7111_v57 = vpop.f32.mrf.mxu1 }
 0x1f5   : > { %v8939_v6 = vadd.f32 %v3013_v1, %v2689_v55  ;;  %v2694_v39 = vadd.f32 %v7111_v57, %v8826_v36 }
 0x1f6   : > { %v7159_v44 = vpop.f32.mrf.mxu0  ;;  %v2637_v33 = vpop.f32.mrf.mxu1 }
 0x1f7   : > { %v8942_v13 = vadd.f32 %v7159_v44, %v2694_v39  ;;  %v2692_v51 = vadd.f32 %v2637_v33, %v8834_v10 }
 0x1f8   : > { %v3026_v15 = vpop.f32.mrf.mxu0  ;;  %v7112_v22 = vpop.f32.mrf.mxu1 }
 0x1f9   : > { %v8945_v12 = vadd.f32 %v3026_v15, %v2692_v51  ;;  %v2695_v11 = vadd.f32 %v7112_v22, %v8837_v0 }
 0x1fa   : > { %v7160_v31 = vpop.f32.mrf.mxu0  ;;  %v2640_v40 = vpop.f32.mrf.mxu1 }
 0x1fb   : > { %v8948_v46 = vadd.f32 %v7160_v31, %v2695_v11  ;;  %v2693_v20 = vadd.f32 %v2640_v40, %v8843_v61 }
 0x1fc   : > { %v3029_v59 = vpop.f32.mrf.mxu0  ;;  %v7115_v36 = vpop.f32.mrf.mxu1 }
 0x1fd   : > { %v8951_v63 = vadd.f32 %v3029_v59, %v2693_v20  ;;  %v2698_v62 = vadd.f32 %v7115_v36, %v8850_v28 }
 0x1fe   : > { %v7163_v42 = vpop.f32.mrf.mxu0  ;;  %v2653_v10 = vpop.f32.mrf.mxu1 }
 0x1ff   : > { %v8954_v32 = vadd.f32 %v7163_v42, %v2698_v62  ;;  %v2696_v60 = vadd.f32 %v2653_v10, %v8856_v16 }
 0x200   : > { %v3042_v56 = vpop.f32.mrf.mxu0  ;;  %v7116_v0 = vpop.f32.mrf.mxu1 }
 0x201   : > { %v8957_v52 = vadd.f32 %v3042_v56, %v2696_v60  ;;  %v2699_v25 = vadd.f32 %v7116_v0, %v8861_v49 }
 0x202   : > { %v7164_v45 = vpop.f32.mrf.mxu0  ;;  %v2656_v61 = vpop.f32.mrf.mxu1 }
 0x203   : > { %v8960_v19 = vadd.f32 %v7164_v45, %v2699_v25  ;;  %v2697_v35 = vadd.f32 %v2656_v61, %v8863_v18 }
 0x204   : > { %v3045_v24 = vpop.f32.mrf.mxu0  ;;  %v7183_v28 = vpop.f32.mrf.mxu1 }
 0x205   : > { %v8963_v7 = vadd.f32 %v3045_v24, %v2697_v35  ;;  %v3813_v34 = vadd.f32 %v7183_v28, %v8866_v14 }
 0x206   : > { %v7231_v53 = vpop.f32.mrf.mxu0  ;;  %v3684_v16 = vpop.f32.mrf.mxu1 }
 0x207   : > { %v8966_v55 = vadd.f32 %v7231_v53, %v3813_v34  ;;  %v3811_v1 = vadd.f32 %v3684_v16, %v8873_v3 }
 0x208   : > { %v4074_v57 = vpop.f32.mrf.mxu0  ;;  %v8969_v49 = vpop.f32.mrf.mxu1 }
 0x209   : > { %v8971_v39 = vadd.f32 %v4074_v57, %v3811_v1 }
 0x20a   : > { %v8973_v44 = vpop.f32.mrf.mxu0  ;;  %v8975_v18 = vpop.f32.mrf.mxu1 }
 0x20c   : > { %v8977_v33 = vpop.f32.mrf.mxu0  ;;  %v7187_v51 = vpop.f32.mrf.mxu1 }
 0x20d   : > { %v3817_v14 = vadd.f32 %v7187_v51, %v8882_v26 }
 0x20e   : > { %v7235_v15 = vpop.f32.mrf.mxu0  ;;  %v3700_v22 = vpop.f32.mrf.mxu1 }
 0x20f   : > { %v8980_v11 = vadd.f32 %v7235_v15, %v3817_v14  ;;  %v3815_v3 = vadd.f32 %v3700_v22, %v8885_v8 }
 0x210   : > { %v4090_v31 = vpop.f32.mrf.mxu0  ;;  %v8983_v40 = vpop.f32.mrf.mxu1 }
 0x211   : > { %v8985_v20 = vadd.f32 %v4090_v31, %v3815_v3 }
 0x212   : > { %v8987_v59 = vpop.f32.mrf.mxu0  ;;  %v8989_v36 = vpop.f32.mrf.mxu1 }
 0x214   : > { %v8991_v62 = vpop.f32.mrf.mxu0  ;;  %v7191_v42 = vpop.f32.mrf.mxu1 }
 0x215   : > { %v3821_v26 = vadd.f32 %v7191_v42, %v8894_v41 }
 0x216   : > { %v7239_v10 = vpop.f32.mrf.mxu0  ;;  %v3716_v60 = vpop.f32.mrf.mxu1 }
 0x217   : > { %v8994_v56 = vadd.f32 %v7239_v10, %v3821_v26  ;;  %v3819_v8 = vadd.f32 %v3716_v60, %v8897_v17 }
 0x218   : > { %v4106_v0 = vpop.f32.mrf.mxu0  ;;  %v8997_v25 = vpop.f32.mrf.mxu1 }
 0x219   : > { %v8999_v45 = vadd.f32 %v4106_v0, %v3819_v8 }
 0x21a   : > { %v9001_v61 = vpop.f32.mrf.mxu0  ;;  %v9003_v35 = vpop.f32.mrf.mxu1 }
 0x21c   : > { %v9005_v24 = vpop.f32.mrf.mxu0  ;;  %v7195_v28 = vpop.f32.mrf.mxu1 }
 0x21d   : > { %v3825_v41 = vadd.f32 %v7195_v28, %v8906_v29 }
 0x21e   : > { %v7243_v34 = vpop.f32.mrf.mxu0  ;;  %v3732_v53 = vpop.f32.mrf.mxu1 }
 0x21f   : > { %v9008_v16 = vadd.f32 %v7243_v34, %v3825_v41  ;;  %v3823_v17 = vadd.f32 %v3732_v53, %v8909_v9 }
 0x220   : > { %v4122_v1 = vpop.f32.mrf.mxu0  ;;  %v9011_v57 = vpop.f32.mrf.mxu1 }
 0x221   : > { %v9013_v51 = vadd.f32 %v4122_v1, %v3823_v17 }
 0x222   : > { %v9015_v14 = vpop.f32.mrf.mxu0  ;;  %v9017_v15 = vpop.f32.mrf.mxu1 }
 0x224   : > { %v9019_v22 = vpop.f32.mrf.mxu0  ;;  %v7199_v3 = vpop.f32.mrf.mxu1 }
 0x225   : > { %v3829_v29 = vadd.f32 %v7199_v3, %v8918_v54 }
 0x226   : > { %v7247_v31 = vpop.f32.mrf.mxu0  ;;  %v3748_v42 = vpop.f32.mrf.mxu1 }
 0x227   : > { %v9022_v26 = vadd.f32 %v7247_v31, %v3829_v29  ;;  %v3827_v9 = vadd.f32 %v3748_v42, %v8921_v4 }
 0x228   : > { %v4138_v10 = vpop.f32.mrf.mxu0  ;;  %v7200_v60 = vpop.f32.mrf.mxu1 }
 0x229   : > { %v9025_v8 = vadd.f32 %v4138_v10, %v3827_v9  ;;  %v3830_v0 = vadd.f32 %v7200_v60, %v8924_v58 }
 0x22a   : > { %v7248_v28 = vpop.f32.mrf.mxu0  ;;  %v3751_v41 = vpop.f32.mrf.mxu1 }
 0x22b   : > { %v9028_v34 = vadd.f32 %v7248_v28, %v3830_v0  ;;  %v3828_v53 = vadd.f32 %v3751_v41, %v8927_v21 }
 0x22c   : > { %v4141_v17 = vpop.f32.mrf.mxu0  ;;  %v7203_v54 = vpop.f32.mrf.mxu1 }
 0x22d   : > { %v9031_v1 = vadd.f32 %v4141_v17, %v3828_v53  ;;  %v3833_v3 = vadd.f32 %v7203_v54, %v8930_v30 }
 0x22e   : > { %v7251_v29 = vpop.f32.mrf.mxu0  ;;  %v3764_v4 = vpop.f32.mrf.mxu1 }
 0x22f   : > { %v9034_v31 = vadd.f32 %v7251_v29, %v3833_v3  ;;  %v3831_v42 = vadd.f32 %v3764_v4, %v8933_v50 }
 0x230   : > { %v4154_v9 = vpop.f32.mrf.mxu0  ;;  %v7204_v58 = vpop.f32.mrf.mxu1 }
 0x231   : > { %v9037_v10 = vadd.f32 %v4154_v9, %v3831_v42  ;;  %v3834_v60 = vadd.f32 %v7204_v58, %v8936_v48 }
 0x232   : > { %v7252_v0 = vpop.f32.mrf.mxu0  ;;  %v3767_v21 = vpop.f32.mrf.mxu1 }
 0x233   : > { %v9040_v28 = vadd.f32 %v7252_v0, %v3834_v60  ;;  %v3832_v41 = vadd.f32 %v3767_v21, %v8939_v6 }
 0x234   : > { %v4157_v53 = vpop.f32.mrf.mxu0  ;;  %v7207_v30 = vpop.f32.mrf.mxu1 }
 0x235   : > { %v9043_v17 = vadd.f32 %v4157_v53, %v3832_v41  ;;  %v3837_v54 = vadd.f32 %v7207_v30, %v8942_v13 }
 0x236   : > { %v7255_v50 = vpop.f32.mrf.mxu0  ;;  %v3780_v3 = vpop.f32.mrf.mxu1 }
 0x237   : > { %v9046_v29 = vadd.f32 %v7255_v50, %v3837_v54  ;;  %v3835_v4 = vadd.f32 %v3780_v3, %v8945_v12 }
 0x238   : > { %v4170_v48 = vpop.f32.mrf.mxu0  ;;  %v7208_v42 = vpop.f32.mrf.mxu1 }
 0x239   : > { %v9049_v9 = vadd.f32 %v4170_v48, %v3835_v4  ;;  %v3838_v6 = vadd.f32 %v7208_v42, %v8948_v46 }
 0x23a   : > { %v7256_v58 = vpop.f32.mrf.mxu0  ;;  %v3783_v60 = vpop.f32.mrf.mxu1 }
 0x23b   : > { %v9052_v0 = vadd.f32 %v7256_v58, %v3838_v6  ;;  %v3836_v21 = vadd.f32 %v3783_v60, %v8951_v63  ;;  %v3814_v58 = vadd.f32 %v8969_v49, %v8876_v38 }
 0x23c   : > { %v4173_v13 = vpop.f32.mrf.mxu0  ;;  %v7211_v41 = vpop.f32.mrf.mxu1 }
 0x23d   : > { %v9056_v53 = vadd.f32 %v4173_v13, %v3836_v21  ;;  %v3841_v12 = vadd.f32 %v7211_v41, %v8954_v32  ;;  %v3812_v13 = vadd.f32 %v8975_v18, %v8879_v43 }
 0x23e   : > { %v7259_v30 = vpop.f32.mrf.mxu0  ;;  %v3796_v54 = vpop.f32.mrf.mxu1 }
 0x23f   : > { %v9059_v50 = vadd.f32 %v7259_v30, %v3841_v12  ;;  %v3839_v3 = vadd.f32 %v3796_v54, %v8957_v52  ;;  %v9079_v12 = vld [vmem:[%s836_s9] ss:$0 sm:$0xff]  ;;  %v4204_v30 = vadd.f32 %v8973_v44, %v3814_v58 }
 0x240   : > { %v4186_v46 = vpop.f32.mrf.mxu0  ;;  %v7212_v4 = vpop.f32.mrf.mxu1 }
 0x241   : > { %v9063_v48 = vadd.f32 %v4186_v46, %v3839_v3  ;;  %v3842_v63 = vadd.f32 %v7212_v4, %v8960_v19  ;;  %v4202_v4 = vadd.f32 %v8977_v33, %v3812_v13 }
 0x242   : > { %v7260_v42 = vpop.f32.mrf.mxu0  ;;  %v3799_v6 = vpop.f32.mrf.mxu1 }
 0x243   : > { %v9068_v60 = vadd.f32 %v7260_v42, %v3842_v63  ;;  %v3840_v32 = vadd.f32 %v3799_v6, %v8963_v7 }
 0x244   : > { %v4189_v52 = vpop.f32.mrf.mxu0  ;;  %v7279_v21 = vpop.f32.mrf.mxu1 }
 0x245   : > { %v9076_v41 = vadd.f32 %v4189_v52, %v3840_v32  ;;  %v4592_v19 = vadd.f32 %v7279_v21, %v8966_v55  ;;  %v3818_v55 = vadd.f32 %v8983_v40, %v8888_v47 }
 0x246   : > { %v7327_v38 = vpop.f32.mrf.mxu0  ;;  %v4463_v49 = vpop.f32.mrf.mxu1 }
 0x247   : > { %v5346_v7 = vadd.f32 %v7327_v38, %v4592_v19  ;;  %v4590_v54 = vadd.f32 %v4463_v49, %v8971_v39  ;;  %v4208_v13 = vadd.f32 %v8987_v59, %v3818_v55  ;;  %v3816_v38 = vadd.f32 %v8989_v36, %v8891_v2 }
 0x248   : > { %v5217_v3 = vpop.f32.mrf.mxu0  ;;  %v7280_v46 = vpop.f32.mrf.mxu1 }
 0x249   : > { %v5384_v43 = vadd.f32 %v9079_v12, %v5346_v7  ;;  %v5344_v18 = vadd.f32 %v5217_v3, %v4590_v54  ;;  %v4593_v63 = vadd.f32 %v7280_v46, %v4204_v30  ;;  %v4206_v2 = vadd.f32 %v8991_v62, %v3816_v38 }
 0x24a   : > { %v7328_v42 = vpop.f32.mrf.mxu0  ;;  %v4466_v6 = vpop.f32.mrf.mxu1 }
 0x24b   : > { %v5382_v32 = vadd.f32 %v9079_v12, %v5344_v18  ;;  %v5347_v44 = vadd.f32 %v7328_v42, %v4593_v63  ;;  %v4591_v58 = vadd.f32 %v4466_v6, %v4202_v4  ;;  %v5416_v52 = vmul.f32 0.01, %v5384_v43 }
 0x24c   : > { %v5220_v39 = vpop.f32.mrf.mxu0  ;;  %v7283_v21 = vpop.f32.mrf.mxu1 }
 0x24d   : > { %v5385_v19 = vadd.f32 %v9079_v12, %v5347_v44  ;;  %v5345_v33 = vadd.f32 %v5220_v39, %v4591_v58  ;;  %v4596_v47 = vadd.f32 %v7283_v21, %v8980_v11  ;;  %v5414_v30 = vmul.f32 0.01, %v5382_v32 }
 0x24e   : > { %v7331_v40 = vpop.f32.mrf.mxu0  ;;  %v4479_v49 = vpop.f32.mrf.mxu1  ;;  %v5448_v46 = vmax.f32 %v5384_v43, %v5416_v52  ;;  %v3822_v11 = vadd.f32 %v8997_v25, %v8900_v37 }
 0x24f   : > { %v5417_v7 = vmul.f32 0.01, %v5385_v19  ;;  %v5383_v54 = vadd.f32 %v9079_v12, %v5345_v33  ;;  %v4594_v3 = vadd.f32 %v4479_v49, %v8985_v20  ;;  %v5350_v4 = vadd.f32 %v7331_v40, %v4596_v47 }
 0x250   : > { %v5233_v18 = vpop.f32.mrf.mxu0  ;;  %v7284_v63 = vpop.f32.mrf.mxu1  ;;  %v5446_v39 = vmax.f32 %v5382_v32, %v5414_v30  ;;  %v3820_v32 = vadd.f32 %v9003_v35, %v8903_v27  ;;  %v4212_v30 = vadd.f32 %v9001_v61, %v3822_v11 }
 0x251   : > { %v5449_v42 = vmax.f32 %v5385_v19, %v5417_v7  ;;  %v5415_v59 = vmul.f32 0.01, %v5383_v54  ;;  %v5348_v55 = vadd.f32 %v5233_v18, %v4594_v3  ;;  %v4597_v6 = vadd.f32 %v7284_v63, %v4208_v13 }
 0x252   : > { %v5388_v36 = vadd.f32 %v9079_v12, %v5350_v4  ;;  %v7332_v44 = vpop.f32.mrf.mxu0  ;;  %v4482_v58 = vpop.f32.mrf.mxu1 }
 0x253   : > { %v6622_v21 = vpack.c.bf16 %v5449_v42, %v5448_v46  ;;  %v5447_v20 = vmax.f32 %v5383_v54, %v5415_v59  ;;  %v5351_v43 = vadd.f32 %v7332_v44, %v4597_v6  ;;  %v5386_v33 = vadd.f32 %v9079_v12, %v5348_v55 }
 0x254   : > { %v5420_v52 = vmul.f32 0.01, %v5388_v36  ;;  %v4595_v19 = vadd.f32 %v4482_v58, %v4206_v2  ;;  %v5236_v47 = vpop.f32.mrf.mxu0  ;;  %v7287_v40 = vpop.f32.mrf.mxu1  ;;  %v4210_v55 = vadd.f32 %v9005_v24, %v3820_v32 }
 0x255   : > { %6694 = vst [vmem:[%s9101_s12 + $0x8] sm:$0xff] %v6622_v21   ;;  %v6617_v37 = vpack.c.bf16 %v5447_v20, %v5446_v39  ;;  %v5389_v62 = vadd.f32 %v9079_v12, %v5351_v43  ;;  %v4600_v25 = vadd.f32 %v7287_v40, %v8994_v56  ;;  %v5418_v4 = vmul.f32 0.01, %v5386_v33 }
 0x256   : > { %v5349_v13 = vadd.f32 %v5236_v47, %v4595_v19  ;;  %v7335_v38 = vpop.f32.mrf.mxu0  ;;  %v4495_v49 = vpop.f32.mrf.mxu1  ;;  %v5452_v46 = vmax.f32 %v5388_v36, %v5420_v52  ;;  %v3824_v52 = vadd.f32 %v9017_v15, %v8915_v23 }
 0x257   : > { %6618 = vst [vmem:[%s9101_s12] sm:$0xff] %v6617_v37   ;;  %v5421_v7 = vmul.f32 0.01, %v5389_v62  ;;  %v5354_v54 = vadd.f32 %v7335_v38, %v4600_v25  ;;  %v4598_v3 = vadd.f32 %v4495_v49, %v8999_v45  ;;  %v3826_v45 = vadd.f32 %v9011_v57, %v8912_v5 }
 0x258   : > { %v5387_v18 = vadd.f32 %v9079_v12, %v5349_v13  ;;  %v5249_v63 = vpop.f32.mrf.mxu0  ;;  %v7288_v42 = vpop.f32.mrf.mxu1  ;;  %v5450_v44 = vmax.f32 %v5386_v33, %v5418_v4  ;;  %v4214_v38 = vadd.f32 %v9019_v22, %v3824_v52 }
 0x259   : > { %v5453_v56 = vmax.f32 %v5389_v62, %v5421_v7  ;;  %v5392_v59 = vadd.f32 %v9079_v12, %v5354_v54  ;;  %v5352_v27 = vadd.f32 %v5249_v63, %v4598_v3  ;;  %v4601_v35 = vadd.f32 %v7288_v42, %v4212_v30 }
 0x25a   : > { %v5419_v61 = vmul.f32 0.01, %v5387_v18  ;;  %v7336_v6 = vpop.f32.mrf.mxu0  ;;  %v4498_v2 = vpop.f32.mrf.mxu1  ;;  %v4216_v33 = vadd.f32 %v9015_v14, %v3826_v45 }
 0x25b   : > { %v6632_v11 = vpack.c.bf16 %v5453_v56, %v5452_v46  ;;  %v5355_v36 = vadd.f32 %v7336_v6, %v4601_v35  ;;  %v5390_v39 = vadd.f32 %v9079_v12, %v5352_v27  ;;  %v4599_v21 = vadd.f32 %v4498_v2, %v4210_v55 }
 0x25c   : > { %v5451_v58 = vmax.f32 %v5387_v18, %v5419_v61  ;;  %v5252_v20 = vpop.f32.mrf.mxu0  ;;  %v7291_v43 = vpop.f32.mrf.mxu1  ;;  %v5424_v24 = vmul.f32 0.01, %v5392_v59 }
 0x25d   : > { %6696 = vst [vmem:[%s9101_s12 + $0x18] sm:$0xff] %v6632_v11   ;;  %v5393_v19 = vadd.f32 %v9079_v12, %v5355_v36  ;;  %v4604_v47 = vadd.f32 %v7291_v43, %v9008_v16  ;;  %v5353_v57 = vadd.f32 %v5252_v20, %v4599_v21  ;;  %v5422_v32 = vmul.f32 0.01, %v5390_v39 }
 0x25e   : > { %v6627_v5 = vpack.c.bf16 %v5451_v58, %v5450_v44  ;;  %v4511_v40 = vpop.f32.mrf.mxu1  ;;  %v7339_v62 = vpop.f32.mrf.mxu0  ;;  %v5456_v49 = vmax.f32 %v5392_v59, %v5424_v24 }
 0x25f   : > { %v5425_v37 = vmul.f32 0.01, %v5393_v19  ;;  %v4602_v25 = vadd.f32 %v4511_v40, %v9013_v51  ;;  %v5391_v13 = vadd.f32 %v9079_v12, %v5353_v57  ;;  %v5358_v23 = vadd.f32 %v7339_v62, %v4604_v47 }
 0x260   : > { %6695 = vst [vmem:[%s9101_s12 + $0x10] sm:$0xff] %v6627_v5   ;;  %v7292_v15 = vpop.f32.mrf.mxu1  ;;  %v5265_v30 = vpop.f32.mrf.mxu0  ;;  %v5454_v63 = vmax.f32 %v5390_v39, %v5422_v32 }
 0x261   : > { %v5457_v16 = vmax.f32 %v5393_v19, %v5425_v37  ;;  %v4605_v7 = vadd.f32 %v7292_v15, %v4216_v33  ;;  %v5423_v54 = vmul.f32 0.01, %v5391_v13  ;;  %v5396_v14 = vadd.f32 %v9079_v12, %v5358_v23 }
 0x262   : > { %v5356_v3 = vadd.f32 %v5265_v30, %v4602_v25  ;;  %v4514_v46 = vpop.f32.mrf.mxu1  ;;  %v7340_v51 = vpop.f32.mrf.mxu0 }
 0x263   : > { %v6642_v4 = vpack.c.bf16 %v5457_v16, %v5456_v49  ;;  %v4603_v18 = vadd.f32 %v4514_v46, %v4214_v38  ;;  %v5455_v42 = vmax.f32 %v5391_v13, %v5423_v54  ;;  %v5359_v27 = vadd.f32 %v7340_v51, %v4605_v7 }
 0x264   : > { %v5394_v56 = vadd.f32 %v9079_v12, %v5356_v3  ;;  %v7295_v22 = vpop.f32.mrf.mxu1  ;;  %v5428_v35 = vmul.f32 0.01, %v5396_v14  ;;  %v5268_v61 = vpop.f32.mrf.mxu0 }
 0x265   : > { %6698 = vst [vmem:[%s9101_s12 + $0x28] sm:$0xff] %v6642_v4   ;;  %v6637_v59 = vpack.c.bf16 %v5455_v42, %v5454_v63  ;;  %v5397_v55 = vadd.f32 %v9079_v12, %v5359_v27  ;;  %v5357_v2 = vadd.f32 %v5268_v61, %v4603_v18  ;;  %v4608_v45 = vadd.f32 %v7295_v22, %v9022_v26 }
 0x266   : > { %v4527_v6 = vpop.f32.mrf.mxu1  ;;  %v5426_v11 = vmul.f32 0.01, %v5394_v56  ;;  %v5460_v21 = vmax.f32 %v5396_v14, %v5428_v35 }
 0x267   : > { %6697 = vst [vmem:[%s9101_s12 + $0x20] sm:$0xff] %v6637_v59   ;;  %v5429_v36 = vmul.f32 0.01, %v5397_v55  ;;  %v5395_v58 = vadd.f32 %v9079_v12, %v5357_v2  ;;  %v4606_v39 = vadd.f32 %v4527_v6, %v9025_v8 }
 0x268   : > { %v7296_v44 = vpop.f32.mrf.mxu1  ;;  %v7343_v43 = vpop.f32.mrf.mxu0  ;;  %v5458_v5 = vmax.f32 %v5394_v56, %v5426_v11 }
 0x269   : > { %v5461_v20 = vmax.f32 %v5397_v55, %v5429_v36  ;;  %v5427_v24 = vmul.f32 0.01, %v5395_v58  ;;  %v5362_v19 = vadd.f32 %v7343_v43, %v4608_v45  ;;  %v4609_v47 = vadd.f32 %v7296_v44, %v9028_v34 }
 0x26a   : > { %v4530_v52 = vpop.f32.mrf.mxu1  ;;  %v5281_v57 = vpop.f32.mrf.mxu0 }
 0x26b   : > { %v6652_v26 = vpack.c.bf16 %v5461_v20, %v5460_v21  ;;  %v5459_v33 = vmax.f32 %v5395_v58, %v5427_v24  ;;  %v5400_v37 = vadd.f32 %v9079_v12, %v5362_v19  ;;  %v5360_v62 = vadd.f32 %v5281_v57, %v4606_v39 }
 0x26c   : > { %v7299_v40 = vpop.f32.mrf.mxu1  ;;  %v4607_v8 = vadd.f32 %v4530_v52, %v9031_v1  ;;  %v7344_v25 = vpop.f32.mrf.mxu0 }
 0x26d   : > { %6700 = vst [vmem:[%s9101_s12 + $0x38] sm:$0xff] %v6652_v26   ;;  %v6647_v13 = vpack.c.bf16 %v5459_v33, %v5458_v5  ;;  %v5398_v23 = vadd.f32 %v9079_v12, %v5360_v62  ;;  %v5363_v15 = vadd.f32 %v7344_v25, %v4609_v47  ;;  %v5432_v49 = vmul.f32 0.01, %v5400_v37 }
 0x26e   : > { %v4543_v32 = vpop.f32.mrf.mxu1  ;;  %v5284_v38 = vpop.f32.mrf.mxu0  ;;  %v4612_v7 = vadd.f32 %v7299_v40, %v9034_v31 }
 0x26f   : > { %6699 = vst [vmem:[%s9101_s12 + $0x30] sm:$0xff] %v6647_v13   ;;  %v5401_v16 = vadd.f32 %v9079_v12, %v5363_v15  ;;  %v5361_v30 = vadd.f32 %v5284_v38, %v4607_v8  ;;  %v5430_v14 = vmul.f32 0.01, %v5398_v23  ;;  %v4610_v46 = vadd.f32 %v4543_v32, %v9037_v10 }
 0x270   : > { %v7300_v34 = vpop.f32.mrf.mxu1  ;;  %v5464_v51 = vmax.f32 %v5400_v37, %v5432_v49 }
 0x271   : > { %v5433_v3 = vmul.f32 0.01, %v5401_v16  ;;  %v5399_v1 = vadd.f32 %v9079_v12, %v5361_v30  ;;  %v4613_v27 = vadd.f32 %v7300_v34, %v9040_v28  ;;  %v5462_v59 = vmax.f32 %v5398_v23, %v5430_v14 }
 0x272   : > { %v4546_v54 = vpop.f32.mrf.mxu1 }
 0x273   : > { %v5465_v18 = vmax.f32 %v5401_v16, %v5433_v3  ;;  %v5431_v63 = vmul.f32 0.01, %v5399_v1  ;;  %v7347_v42 = vpop.f32.mrf.mxu0  ;;  %v4611_v10 = vadd.f32 %v4546_v54, %v9043_v17 }
 0x274   : > { %v7303_v4 = vpop.f32.mrf.mxu1  ;;  %v5366_v56 = vadd.f32 %v7347_v42, %v4612_v7 }
 0x275   : > { %v6662_v31 = vpack.c.bf16 %v5465_v18, %v5464_v51  ;;  %v5463_v35 = vmax.f32 %v5399_v1, %v5431_v63  ;;  %v5297_v55 = vpop.f32.mrf.mxu0  ;;  %v4616_v17 = vadd.f32 %v7303_v4, %v9046_v29 }
 0x276   : > { %v4559_v22 = vpop.f32.mrf.mxu1  ;;  %v5404_v61 = vadd.f32 %v9079_v12, %v5366_v56  ;;  %v5364_v6 = vadd.f32 %v5297_v55, %v4610_v46 }
 0x277   : > { %6702 = vst [vmem:[%s9101_s12 + $0x48] sm:$0xff] %v6662_v31   ;;  %v6657_v45 = vpack.c.bf16 %v5463_v35, %v5462_v59  ;;  %v7348_v11 = vpop.f32.mrf.mxu0  ;;  %v4614_v26 = vadd.f32 %v4559_v22, %v9049_v9 }
 0x278   : > { %v7304_v2 = vpop.f32.mrf.mxu1  ;;  %v5402_v36 = vadd.f32 %v9079_v12, %v5364_v6  ;;  %v5367_v44 = vadd.f32 %v7348_v11, %v4613_v27  ;;  %v5436_v28 = vmul.f32 0.01, %v5404_v61 }
 0x279   : > { %6701 = vst [vmem:[%s9101_s12 + $0x40] sm:$0xff] %v6657_v45   ;;  %v5300_v58 = vpop.f32.mrf.mxu0  ;;  %v4617_v33 = vadd.f32 %v7304_v2, %v9052_v0 }
 0x27a   : > { %v5405_v39 = vadd.f32 %v9079_v12, %v5367_v44  ;;  %v5365_v21 = vadd.f32 %v5300_v58, %v4611_v10  ;;  %v4562_v20 = vpop.f32.mrf.mxu1  ;;  %v5434_v43 = vmul.f32 0.01, %v5402_v36  ;;  %v5468_v19 = vmax.f32 %v5404_v61, %v5436_v28 }
 0x27b   : > { %v4615_v15 = vadd.f32 %v4562_v20, %v9056_v53 }
 0x27c   : > { %v5437_v52 = vmul.f32 0.01, %v5405_v39  ;;  %v5403_v24 = vadd.f32 %v9079_v12, %v5365_v21  ;;  %v7307_v57 = vpop.f32.mrf.mxu1  ;;  %v5466_v37 = vmax.f32 %v5402_v36, %v5434_v43 }
 0x27d   : > { %v4620_v14 = vadd.f32 %v7307_v57, %v9059_v50  ;;  %v5680_v57 = vld [vmem:[%s9101_s12 + $0x18] sm:$0xf] (%p7775_p9) }
 0x27e   : > { %v5469_v47 = vmax.f32 %v5405_v39, %v5437_v52  ;;  %v5435_v5 = vmul.f32 0.01, %v5403_v24  ;;  %v4575_v38 = vpop.f32.mrf.mxu1  ;;  %5681 = vst [vmem:[%s9189_s28 + $0x30] sm:$0xf] (%p7775_p9), %v5680_v57 }
 0x27f   : > { %v7351_v40 = vpop.f32.mrf.mxu0  ;;  %v4618_v53 = vadd.f32 %v4575_v38, %v9063_v48  ;;  %v5704_v38 = vld [vmem:[%s9101_s12 + $0x48] sm:$0xf] (%p7775_p9) }
 0x280   : > { %v6672_v62 = vpack.c.bf16 %v5469_v47, %v5468_v19  ;;  %v5467_v8 = vmax.f32 %v5403_v24, %v5435_v5  ;;  %v5370_v25 = vadd.f32 %v7351_v40, %v4616_v17  ;;  %v7308_v54 = vpop.f32.mrf.mxu1  ;;  %v5670_v17 = vld [vmem:[%s9101_s12 + $0x4] sm:$0xf] (%p7775_p9)  ;;  %v5672_v19 = vld [vmem:[%s9101_s12 + $0x8] sm:$0xf] (%p7775_p9)  ;;  %v5674_v47 = vld [vmem:[%s9101_s12 + $0xc] sm:$0xf] (%p7775_p9) }
 0x281   : > { %v5313_v32 = vpop.f32.mrf.mxu0  ;;  %v4621_v27 = vadd.f32 %v7308_v54, %v9068_v60  ;;  %v5676_v5 = vld [vmem:[%s9101_s12 + $0x10] sm:$0xf] (%p7775_p9)  ;;  %v5682_v40 = vld [vmem:[%s9101_s12 + $0x1c] sm:$0xf] (%p7775_p9)  ;;  %5671 = vst [vmem:[%s9189_s28 + $0x8] sm:$0xf] (%p7775_p9), %v5670_v17 }
 0x282   : > { %6704 = vst [vmem:[%s9101_s12 + $0x58] sm:$0xff] %v6672_v62   ;;  %v6667_v13 = vpack.c.bf16 %v5467_v8, %v5466_v37  ;;  %v5408_v23 = vadd.f32 %v9079_v12, %v5370_v25  ;;  %v5368_v29 = vadd.f32 %v5313_v32, %v4614_v26  ;;  %v4578_v42 = vpop.f32.mrf.mxu1  ;;  %v5678_v26 = vld [vmem:[%s9101_s12 + $0x14] sm:$0xf] (%p7775_p9)  ;;  %v5686_v37 = vld [vmem:[%s9101_s12 + $0x24] sm:$0xf] (%p7775_p9) }
 0x283   : > { %v7352_v34 = vpop.f32.mrf.mxu0  ;;  %v4619_v61 = vadd.f32 %v4578_v42, %v9076_v41  ;;  %5673 = vst [vmem:[%s9189_s28 + $0x10] sm:$0xf] (%p7775_p9), %v5672_v19  ;;  %5675 = vst [vmem:[%s9189_s28 + $0x18] sm:$0xf] (%p7775_p9), %v5674_v47  ;;  %v5688_v62 = vld [vmem:[%s9101_s12 + $0x28] sm:$0xf] (%p7775_p9) }
 0x284   : > { %6703 = vst [vmem:[%s9101_s12 + $0x50] sm:$0xff] %v6667_v13   ;;  %v5406_v9 = vadd.f32 %v9079_v12, %v5368_v29  ;;  %v5371_v49 = vadd.f32 %v7352_v34, %v4617_v33  ;;  %v5440_v0 = vmul.f32 0.01, %v5408_v23  ;;  %v5684_v33 = vld [vmem:[%s9101_s12 + $0x20] sm:$0xf] (%p7775_p9) }
 0x285   : > { %v5316_v16 = vpop.f32.mrf.mxu0  ;;  %5677 = vst [vmem:[%s9189_s28 + $0x20] sm:$0xf] (%p7775_p9), %v5676_v5  ;;  %5679 = vst [vmem:[%s9189_s28 + $0x28] sm:$0xf] (%p7775_p9), %v5678_v26  ;;  %v5690_v8 = vld [vmem:[%s9101_s12 + $0x2c] sm:$0xf] (%p7775_p9) }
 0x286   : > { %v5409_v30 = vadd.f32 %v9079_v12, %v5371_v49  ;;  %v5369_v7 = vadd.f32 %v5316_v16, %v4615_v15  ;;  %v5438_v3 = vmul.f32 0.01, %v5406_v9  ;;  %v5472_v4 = vmax.f32 %v5408_v23, %v5440_v0  ;;  %5683 = vst [vmem:[%s9189_s28 + $0x38] sm:$0xf] (%p7775_p9), %v5682_v40  ;;  %5685 = vst [vmem:[%s9189_s28 + $0x40] sm:$0xf] (%p7775_p9), %v5684_v33 }
 0x287   : > { %5687 = vst [vmem:[%s9189_s28 + $0x48] sm:$0xf] (%p7775_p9), %v5686_v37  ;;  %v5692_v25 = vld [vmem:[%s9101_s12 + $0x30] sm:$0xf] (%p7775_p9)  ;;  %5689 = vst [vmem:[%s9189_s28 + $0x50] sm:$0xf] (%p7775_p9), %v5688_v62 }
 0x288   : > { %v5441_v1 = vmul.f32 0.01, %v5409_v30  ;;  %v5407_v46 = vadd.f32 %v9079_v12, %v5369_v7  ;;  %v5470_v22 = vmax.f32 %v5406_v9, %v5438_v3  ;;  %5691 = vst [vmem:[%s9189_s28 + $0x58] sm:$0xf] (%p7775_p9), %v5690_v8  ;;  %5693 = vst [vmem:[%s9189_s28 + $0x60] sm:$0xf] (%p7775_p9), %v5692_v25 }
 0x289   : > { %v5694_v32 = vld [vmem:[%s9101_s12 + $0x34] sm:$0xf] (%p7775_p9)  ;;  %v5696_v13 = vld [vmem:[%s9101_s12 + $0x38] sm:$0xf] (%p7775_p9)  ;;  %v5698_v23 = vld [vmem:[%s9101_s12 + $0x3c] sm:$0xf] (%p7775_p9) }
 0x28a   : > { %v5473_v51 = vmax.f32 %v5409_v30, %v5441_v1  ;;  %v5439_v18 = vmul.f32 0.01, %v5407_v46  ;;  %v7355_v63 = vpop.f32.mrf.mxu0  ;;  %5695 = vst [vmem:[%s9189_s28 + $0x68] sm:$0xf] (%p7775_p9), %v5694_v32  ;;  %5697 = vst [vmem:[%s9189_s28 + $0x70] sm:$0xf] (%p7775_p9), %v5696_v13 }
 0x28b   : > { %v5374_v56 = vadd.f32 %v7355_v63, %v4620_v14  ;;  %5699 = vst [vmem:[%s9189_s28 + $0x78] sm:$0xf] (%p7775_p9), %v5698_v23  ;;  %v5700_v29 = vld [vmem:[%s9101_s12 + $0x40] sm:$0xf] (%p7775_p9)  ;;  %v5702_v15 = vld [vmem:[%s9101_s12 + $0x44] sm:$0xf] (%p7775_p9) }
 0x28c   : > { %v6682_v59 = vpack.c.bf16 %v5473_v51, %v5472_v4  ;;  %v5471_v31 = vmax.f32 %v5407_v46, %v5439_v18  ;;  %v5329_v50 = vpop.f32.mrf.mxu0  ;;  %5701 = vst [vmem:[%s9189_s28 + $0x80] sm:$0xf] (%p7775_p9), %v5700_v29  ;;  %5703 = vst [vmem:[%s9189_s28 + $0x88] sm:$0xf] (%p7775_p9), %v5702_v15  ;;  %v5706_v34 = vld [vmem:[%s9101_s12 + $0x4c] sm:$0xf] (%p7775_p9) }
 0x28d   : > { %v5412_v35 = vadd.f32 %v9079_v12, %v5374_v56  ;;  %v5372_v55 = vadd.f32 %v5329_v50, %v4618_v53  ;;  %5705 = vst [vmem:[%s9189_s28 + $0x90] sm:$0xf] (%p7775_p9), %v5704_v38  ;;  %v5708_v9 = vld [vmem:[%s9101_s12 + $0x50] sm:$0xf] (%p7775_p9)  ;;  %v5710_v49 = vld [vmem:[%s9101_s12 + $0x54] sm:$0xf] (%p7775_p9) }
 0x28e   : > { %6706 = vst [vmem:[%s9101_s12 + $0x68] sm:$0xff] %v6682_v59   ;;  %v6677_v48 = vpack.c.bf16 %v5471_v31, %v5470_v22  ;;  %v7356_v6 = vpop.f32.mrf.mxu0  ;;  %5707 = vst [vmem:[%s9189_s28 + $0x98] sm:$0xf] (%p7775_p9), %v5706_v34  ;;  %v5712_v16 = vld [vmem:[%s9101_s12 + $0x58] sm:$0xf] (%p7775_p9) }
 0x28f   : > { %v5410_v10 = vadd.f32 %v9079_v12, %v5372_v55  ;;  %v5375_v2 = vadd.f32 %v7356_v6, %v4621_v27  ;;  %v5444_v60 = vmul.f32 0.01, %v5412_v35  ;;  %5709 = vst [vmem:[%s9189_s28 + $0xa0] sm:$0xf] (%p7775_p9), %v5708_v9  ;;  %5711 = vst [vmem:[%s9189_s28 + $0xa8] sm:$0xf] (%p7775_p9), %v5710_v49 }
 0x290   : > { %6705 = vst [vmem:[%s9101_s12 + $0x60] sm:$0xff] %v6677_v48   ;;  %v5332_v45 = vpop.f32.mrf.mxu0  ;;  %v5714_v0 = vld [vmem:[%s9101_s12 + $0x5c] sm:$0xf] (%p7775_p9)  ;;  %5713 = vst [vmem:[%s9189_s28 + $0xb0] sm:$0xf] (%p7775_p9), %v5712_v16 }
 0x291   : > { %v5413_v11 = vadd.f32 %v9079_v12, %v5375_v2  ;;  %v5373_v36 = vadd.f32 %v5332_v45, %v4619_v61  ;;  %v5442_v44 = vmul.f32 0.01, %v5410_v10  ;;  %v5476_v39 = vmax.f32 %v5412_v35, %v5444_v60  ;;  %5715 = vst [vmem:[%s9189_s28 + $0xb8] sm:$0xf] (%p7775_p9), %v5714_v0 }
 0x293   : > { %v5445_v58 = vmul.f32 0.01, %v5413_v11  ;;  %v5411_v28 = vadd.f32 %v9079_v12, %v5373_v36  ;;  %v5474_v20 = vmax.f32 %v5410_v10, %v5442_v44  ;;  %v5668_v12 = vld [vmem:[%s9101_s12] sm:$0xf] (%p7775_p9) }
 0x294   : > { %5669 = vst [vmem:[%s9189_s28] sm:$0xf] (%p7775_p9), %v5668_v12 }
 0x295   : > { %v5477_v41 = vmax.f32 %v5413_v11, %v5445_v58  ;;  %v5443_v21 = vmul.f32 0.01, %v5411_v28  ;;  %v5720_v54 = vld [vmem:[%s9101_s12 + $0x68] sm:$0xf] (%p7775_p9)  ;;  %v5722_v14 = vld [vmem:[%s9101_s12 + $0x6c] sm:$0xf] (%p7775_p9) }
 0x296   : > { %5721 = vst [vmem:[%s9189_s28 + $0xd0] sm:$0xf] (%p7775_p9), %v5720_v54  ;;  %5723 = vst [vmem:[%s9189_s28 + $0xd8] sm:$0xf] (%p7775_p9), %v5722_v14 }
 0x297   : > { %v6692_v43 = vpack.c.bf16 %v5477_v41, %v5476_v39  ;;  %v5475_v52 = vmax.f32 %v5411_v28, %v5443_v21  ;;  %5644 = sbr.rel (!%p7775_p9) target bundleno = 676 (0x2a4), region = 77  ;;  %v5716_v30 = vld [vmem:[%s9101_s12 + $0x60] sm:$0xf] (%p7775_p9)  ;;  %v5718_v7 = vld [vmem:[%s9101_s12 + $0x64] sm:$0xf] (%p7775_p9) }
 0x298   : > { %5717 = vst [vmem:[%s9189_s28 + $0xc0] sm:$0xf] (%p7775_p9), %v5716_v30  ;;  %5719 = vst [vmem:[%s9189_s28 + $0xc8] sm:$0xf] (%p7775_p9), %v5718_v7 }
 0x299   : > { %6708 = vst [vmem:[%s9101_s12 + $0x78] sm:$0xff] %v6692_v43   ;;  %v6687_v24 = vpack.c.bf16 %v5475_v52, %v5474_v20 }
 0x29b   : > { %6707 = vst [vmem:[%s9101_s12 + $0x70] sm:$0xff] %v6687_v24  }
 0x2a0   : > { %v5728_v46 = vld [vmem:[%s9101_s12 + $0x78] sm:$0xf]  ;;  %v5730_v53 = vld [vmem:[%s9101_s12 + $0x7c] sm:$0xf] }
 0x2a1   : > { %5729 = vst [vmem:[%s9189_s28 + $0xf0] sm:$0xf] %v5728_v46  ;;  %5731 = vst [vmem:[%s9189_s28 + $0xf8] sm:$0xf] %v5730_v53 }
 0x2a2   : > { %v5724_v3 = vld [vmem:[%s9101_s12 + $0x70] sm:$0xf]  ;;  %v5726_v1 = vld [vmem:[%s9101_s12 + $0x74] sm:$0xf] }
 0x2a3   : > { %5725 = vst [vmem:[%s9189_s28 + $0xe0] sm:$0xf] %v5724_v3  ;;  %5727 = vst [vmem:[%s9189_s28 + $0xe8] sm:$0xf] %v5726_v1 }
 0x2a4 PF: > { %s13_s20 = sadd.s32 1, %s7686_s20   ;;  %s9282_s12 = smov %s7658_s13 }
 0x2a5   : > { %p10_p2 = scmp.ge.s32.totalorder %s13_s20, 6   ;;  %s9283_s13 = smov %s7780_s4 }
 0x2a6   : > { %s9284_s14 = smov %s7666_s15  ;;  %s9285_s15 = smov %s7769_s27 }
 0x2a7   : > { %s9286_s16 = smov %s7678_s18  ;;  %s9287_s17 = smov %s7682_s19 }
 0x2a8   : > { %s9288_s18 = smov %s9291_s22  ;;  %s9289_s19 = smov %s9295_s23 }
 0x2a9   :  { %12 = sbr.rel (!%p10_p2) target bundleno = 5 (0x5), region = 169 }

// kernel: discriminator_forward.5
= control target key start
LH: loop header
LB: loop body
LE: loop exit
PB: predicated region body
PF: predicated region fallthrough
CT: control target
= control target key end

     0   :  { %s6860_s0 = inlined_call_operand.vmem [shape: bf16[2,4,9,9,256], index: 0, kind: input, shape index: {}]   ;;  %s6861_s1 = inlined_call_operand.vmem [shape: bf16[3,3,256,256], index: 1, kind: input, shape index: {}]   ;;  %s6862_s2 = inlined_call_operand.vmem [shape: f32[1,256], index: 2, kind: input, shape index: {}]   ;;  %s6863_s3 = inlined_call_operand.vmem [shape: f32[8,8,256], index: 3, kind: input, shape index: {}]   ;;  %s6864_s4 = inlined_call_operand.<no memory space> [shape: f32[1,1], index: 4, kind: input, shape index: {}]   ;;  %s6865_s5 = inlined_call_operand.vmem [shape: f32[2,1,1], index: 5, kind: output, shape index: {}]  }
   0x1   :  { %v10_v0 = vstv %s6864_s4 }
   0x2   :  { %11 = vst [vmem:[#allocation3] sm:$0x1] %v10_v0 }
   0x3   :  { %s5668_s20 = smov 0   ;;  %s5670_s21 = smov 0  }
   0x4   :  { %s5672_s22 = smov 0   ;;  %s5674_s23 = smov 0  }
   0x5   :  { %s5676_s24 = smov 0   ;;  %s5678_s25 = smov 0  }
   0x6   :  { %s5680_s26 = smov 0  }
   0x7 LB: > { %s32_s4 = sadd.s32 1, %s5624_s24  ;;  %s36_s27 = sadd.s32 1, %s5628_s25  ;;  %s5632_s26 = sphi %s5680_s26, %s17_s26   ;;  %s5628_s25 = sphi %s5678_s25, %s6905_s25   ;;  %s5624_s24 = sphi %s5676_s24, %s6904_s24   ;;  %s5620_s23 = sphi %s5674_s23, %s6903_s23   ;;  %s5616_s22 = sphi %s5672_s22, %s6902_s22   ;;  %s5612_s21 = sphi %s5670_s21, %s6901_s21   ;;  %s5608_s20 = sphi %s5668_s20, %s6900_s20  }
   0x8   : > { %p34_p0 = scmp.ge.s32.totalorder %s32_s4, 2  ;;  %s69_s28 = sadd.s32 1, %s5612_s21 }
   0x9   : > { %p76_p1 = scmp.ne.s32.totalorder %s5612_s21, %s5608_s20  ;;  %p77_p2 = scmp.eq.s32.totalorder %s5632_s26, 0 }
   0xa   : > { %s6907_s4 = smov (%p34_p0, %s32_s4), 0  ;;  %s6909_s27 = smov (!%p34_p0, %s36_s27), %s5628_s25 }
   0xb   : > { %s66_s29 = ssub.s32 %s5624_s24, %s6907_s4  ;;  %p5714_p3 = por %p77_p2, %p76_p1 }
   0xc   : > { %p38_p4 = scmp.ge.s32.totalorder %s6909_s27, 2  ;;  %p67_p5 = scmp.eq.s32.totalorder %s66_s29, 0 }
   0xd   : > { %p4380_p6 = scmp.ge.s32.totalorder %s5632_s26, 4 }
   0xe   : > { %s6911_s27 = smov (%p38_p4, %s6909_s27), 0 }
   0xf   : > { %s5721_s6 = scalar_select %p67_p5, %s5612_s21, %s69_s28  }
  0x10   : > { %206 = sbr.rel (%p4380_p6) target bundleno = 225 (0xe1), region = 20 }
  0x15   : > { %217 = sbr.rel (!%p5714_p3) target bundleno = 217 (0xd9), region = 28  ;;  %s219_s7 = sand.u32 (%p5714_p3), 1, %s5612_s21  }
  0x16   : > { %s4381_s8 = sshll.u32 (%p5714_p3), %s5624_s24, 2  ;;  %s5314_s9 = smul.u32 (%p5714_p3), 1152, %s219_s7 }
  0x17   : > { %s5731_s12 = scalar_lea.vmem (%p5714_p3), %s6861_s1, %s4381_s8 }
  0x18   : > { %v240_v1 = vld [vmem:[%s5731_s12] sm:$0xf] (%p5714_p3)  ;;  %v242_v2 = vld [vmem:[%s5731_s12 + $0x8] sm:$0xf] (%p5714_p3)  ;;  %v244_v3 = vld [vmem:[%s5731_s12 + $0x10] sm:$0xf] (%p5714_p3) }
  0x19   : > { %v246_v4 = vld [vmem:[%s5731_s12 + $0x18] sm:$0xf] (%p5714_p3)  ;;  %v248_v5 = vld [vmem:[%s5731_s12 + $0x20] sm:$0xf] (%p5714_p3)  ;;  %s5738_s13 = scalar_lea.vmem (%p5714_p3), [#allocation4], %s5314_s9 }
  0x1a   : > { %241 = vst [vmem:[%s5738_s13] sm:$0xf] %v240_v1  ;;  %243 = vst [vmem:[%s5738_s13 + $0x4] sm:$0xf] %v242_v2  ;;  %v250_v6 = vld [vmem:[%s5731_s12 + $0x28] sm:$0xf] }
  0x1b   : > { %245 = vst [vmem:[%s5738_s13 + $0x8] sm:$0xf] %v244_v3  ;;  %247 = vst [vmem:[%s5738_s13 + $0xc] sm:$0xf] %v246_v4  ;;  %v252_v7 = vld [vmem:[%s5731_s12 + $0x30] sm:$0xf] }
  0x1c   : > { %249 = vst [vmem:[%s5738_s13 + $0x10] sm:$0xf] %v248_v5  ;;  %v254_v8 = vld [vmem:[%s5731_s12 + $0x38] sm:$0xf]  ;;  %251 = vst [vmem:[%s5738_s13 + $0x14] sm:$0xf] %v250_v6 }
  0x1d   : > { %253 = vst [vmem:[%s5738_s13 + $0x18] sm:$0xf] %v252_v7  ;;  %255 = vst [vmem:[%s5738_s13 + $0x1c] sm:$0xf] %v254_v8  ;;  %v256_v9 = vld [vmem:[%s5731_s12 + $0x40] sm:$0xf] }
  0x1e   : > { %v258_v10 = vld [vmem:[%s5731_s12 + $0x48] sm:$0xf]  ;;  %v260_v11 = vld [vmem:[%s5731_s12 + $0x50] sm:$0xf]  ;;  %257 = vst [vmem:[%s5738_s13 + $0x20] sm:$0xf] %v256_v9 }
  0x1f   : > { %259 = vst [vmem:[%s5738_s13 + $0x24] sm:$0xf] %v258_v10  ;;  %261 = vst [vmem:[%s5738_s13 + $0x28] sm:$0xf] %v260_v11  ;;  %v262_v12 = vld [vmem:[%s5731_s12 + $0x58] sm:$0xf] }
  0x20   : > { %v264_v13 = vld [vmem:[%s5731_s12 + $0x60] sm:$0xf]  ;;  %v266_v14 = vld [vmem:[%s5731_s12 + $0x68] sm:$0xf]  ;;  %263 = vst [vmem:[%s5738_s13 + $0x2c] sm:$0xf] %v262_v12 }
  0x21   : > { %265 = vst [vmem:[%s5738_s13 + $0x30] sm:$0xf] %v264_v13  ;;  %267 = vst [vmem:[%s5738_s13 + $0x34] sm:$0xf] %v266_v14  ;;  %v268_v15 = vld [vmem:[%s5731_s12 + $0x70] sm:$0xf] }
  0x22   : > { %v270_v16 = vld [vmem:[%s5731_s12 + $0x78] sm:$0xf]  ;;  %v272_v17 = vld [vmem:[%s5731_s12 + $0x80] sm:$0xf]  ;;  %269 = vst [vmem:[%s5738_s13 + $0x38] sm:$0xf] %v268_v15 }
  0x23   : > { %271 = vst [vmem:[%s5738_s13 + $0x3c] sm:$0xf] %v270_v16  ;;  %273 = vst [vmem:[%s5738_s13 + $0x40] sm:$0xf] %v272_v17  ;;  %v274_v18 = vld [vmem:[%s5731_s12 + $0x88] sm:$0xf] }
  0x24   : > { %v276_v19 = vld [vmem:[%s5731_s12 + $0x90] sm:$0xf]  ;;  %v278_v20 = vld [vmem:[%s5731_s12 + $0x98] sm:$0xf]  ;;  %275 = vst [vmem:[%s5738_s13 + $0x44] sm:$0xf] %v274_v18 }
  0x25   : > { %277 = vst [vmem:[%s5738_s13 + $0x48] sm:$0xf] %v276_v19  ;;  %279 = vst [vmem:[%s5738_s13 + $0x4c] sm:$0xf] %v278_v20  ;;  %v280_v21 = vld [vmem:[%s5731_s12 + $0xa0] sm:$0xf] }
  0x26   : > { %v282_v22 = vld [vmem:[%s5731_s12 + $0xa8] sm:$0xf]  ;;  %v284_v23 = vld [vmem:[%s5731_s12 + $0xb0] sm:$0xf]  ;;  %281 = vst [vmem:[%s5738_s13 + $0x50] sm:$0xf] %v280_v21 }
  0x27   : > { %283 = vst [vmem:[%s5738_s13 + $0x54] sm:$0xf] %v282_v22  ;;  %285 = vst [vmem:[%s5738_s13 + $0x58] sm:$0xf] %v284_v23  ;;  %v286_v24 = vld [vmem:[%s5731_s12 + $0xb8] sm:$0xf] }
  0x28   : > { %v288_v25 = vld [vmem:[%s5731_s12 + $0xc0] sm:$0xf]  ;;  %v290_v26 = vld [vmem:[%s5731_s12 + $0xc8] sm:$0xf]  ;;  %287 = vst [vmem:[%s5738_s13 + $0x5c] sm:$0xf] %v286_v24 }
  0x29   : > { %289 = vst [vmem:[%s5738_s13 + $0x60] sm:$0xf] %v288_v25  ;;  %291 = vst [vmem:[%s5738_s13 + $0x64] sm:$0xf] %v290_v26  ;;  %v292_v27 = vld [vmem:[%s5731_s12 + $0xd0] sm:$0xf] }
  0x2a   : > { %v294_v28 = vld [vmem:[%s5731_s12 + $0xd8] sm:$0xf]  ;;  %v296_v29 = vld [vmem:[%s5731_s12 + $0xe0] sm:$0xf]  ;;  %293 = vst [vmem:[%s5738_s13 + $0x68] sm:$0xf] %v292_v27 }
  0x2b   : > { %295 = vst [vmem:[%s5738_s13 + $0x6c] sm:$0xf] %v294_v28  ;;  %297 = vst [vmem:[%s5738_s13 + $0x70] sm:$0xf] %v296_v29  ;;  %v298_v30 = vld [vmem:[%s5731_s12 + $0xe8] sm:$0xf] }
  0x2c   : > { %v300_v31 = vld [vmem:[%s5731_s12 + $0xf0] sm:$0xf]  ;;  %v302_v32 = vld [vmem:[%s5731_s12 + $0xf8] sm:$0xf]  ;;  %299 = vst [vmem:[%s5738_s13 + $0x74] sm:$0xf] %v298_v30 }
  0x2d   : > { %301 = vst [vmem:[%s5738_s13 + $0x78] sm:$0xf] %v300_v31  ;;  %303 = vst [vmem:[%s5738_s13 + $0x7c] sm:$0xf] %v302_v32  ;;  %v304_v33 = vld [vmem:[%s5731_s12 + $0x100] sm:$0xf] }
  0x2e   : > { %v306_v34 = vld [vmem:[%s5731_s12 + $0x108] sm:$0xf]  ;;  %v308_v35 = vld [vmem:[%s5731_s12 + $0x110] sm:$0xf]  ;;  %305 = vst [vmem:[%s5738_s13 + $0x80] sm:$0xf] %v304_v33 }
  0x2f   : > { %307 = vst [vmem:[%s5738_s13 + $0x84] sm:$0xf] %v306_v34  ;;  %309 = vst [vmem:[%s5738_s13 + $0x88] sm:$0xf] %v308_v35  ;;  %v310_v36 = vld [vmem:[%s5731_s12 + $0x118] sm:$0xf] }
  0x30   : > { %v312_v37 = vld [vmem:[%s5731_s12 + $0x120] sm:$0xf]  ;;  %v314_v38 = vld [vmem:[%s5731_s12 + $0x128] sm:$0xf]  ;;  %311 = vst [vmem:[%s5738_s13 + $0x8c] sm:$0xf] %v310_v36 }
  0x31   : > { %313 = vst [vmem:[%s5738_s13 + $0x90] sm:$0xf] %v312_v37  ;;  %315 = vst [vmem:[%s5738_s13 + $0x94] sm:$0xf] %v314_v38  ;;  %v316_v39 = vld [vmem:[%s5731_s12 + $0x130] sm:$0xf] }
  0x32   : > { %v318_v40 = vld [vmem:[%s5731_s12 + $0x138] sm:$0xf]  ;;  %v320_v41 = vld [vmem:[%s5731_s12 + $0x140] sm:$0xf]  ;;  %317 = vst [vmem:[%s5738_s13 + $0x98] sm:$0xf] %v316_v39 }
  0x33   : > { %319 = vst [vmem:[%s5738_s13 + $0x9c] sm:$0xf] %v318_v40  ;;  %321 = vst [vmem:[%s5738_s13 + $0xa0] sm:$0xf] %v320_v41  ;;  %v322_v42 = vld [vmem:[%s5731_s12 + $0x148] sm:$0xf] }
  0x34   : > { %v324_v43 = vld [vmem:[%s5731_s12 + $0x150] sm:$0xf]  ;;  %v326_v44 = vld [vmem:[%s5731_s12 + $0x158] sm:$0xf]  ;;  %323 = vst [vmem:[%s5738_s13 + $0xa4] sm:$0xf] %v322_v42 }
  0x35   : > { %325 = vst [vmem:[%s5738_s13 + $0xa8] sm:$0xf] %v324_v43  ;;  %327 = vst [vmem:[%s5738_s13 + $0xac] sm:$0xf] %v326_v44  ;;  %v328_v45 = vld [vmem:[%s5731_s12 + $0x160] sm:$0xf] }
  0x36   : > { %v330_v46 = vld [vmem:[%s5731_s12 + $0x168] sm:$0xf]  ;;  %v332_v47 = vld [vmem:[%s5731_s12 + $0x170] sm:$0xf]  ;;  %329 = vst [vmem:[%s5738_s13 + $0xb0] sm:$0xf] %v328_v45 }
  0x37   : > { %331 = vst [vmem:[%s5738_s13 + $0xb4] sm:$0xf] %v330_v46  ;;  %333 = vst [vmem:[%s5738_s13 + $0xb8] sm:$0xf] %v332_v47  ;;  %v334_v48 = vld [vmem:[%s5731_s12 + $0x178] sm:$0xf] }
  0x38   : > { %v336_v49 = vld [vmem:[%s5731_s12 + $0x180] sm:$0xf]  ;;  %v338_v50 = vld [vmem:[%s5731_s12 + $0x188] sm:$0xf]  ;;  %335 = vst [vmem:[%s5738_s13 + $0xbc] sm:$0xf] %v334_v48 }
  0x39   : > { %337 = vst [vmem:[%s5738_s13 + $0xc0] sm:$0xf] %v336_v49  ;;  %339 = vst [vmem:[%s5738_s13 + $0xc4] sm:$0xf] %v338_v50  ;;  %v340_v51 = vld [vmem:[%s5731_s12 + $0x190] sm:$0xf] }
  0x3a   : > { %v342_v52 = vld [vmem:[%s5731_s12 + $0x198] sm:$0xf]  ;;  %v344_v53 = vld [vmem:[%s5731_s12 + $0x1a0] sm:$0xf]  ;;  %341 = vst [vmem:[%s5738_s13 + $0xc8] sm:$0xf] %v340_v51 }
  0x3b   : > { %343 = vst [vmem:[%s5738_s13 + $0xcc] sm:$0xf] %v342_v52  ;;  %345 = vst [vmem:[%s5738_s13 + $0xd0] sm:$0xf] %v344_v53  ;;  %v346_v54 = vld [vmem:[%s5731_s12 + $0x1a8] sm:$0xf] }
  0x3c   : > { %v348_v55 = vld [vmem:[%s5731_s12 + $0x1b0] sm:$0xf]  ;;  %v350_v56 = vld [vmem:[%s5731_s12 + $0x1b8] sm:$0xf]  ;;  %347 = vst [vmem:[%s5738_s13 + $0xd4] sm:$0xf] %v346_v54 }
  0x3d   : > { %349 = vst [vmem:[%s5738_s13 + $0xd8] sm:$0xf] %v348_v55  ;;  %351 = vst [vmem:[%s5738_s13 + $0xdc] sm:$0xf] %v350_v56  ;;  %v352_v57 = vld [vmem:[%s5731_s12 + $0x1c0] sm:$0xf] }
  0x3e   : > { %v354_v58 = vld [vmem:[%s5731_s12 + $0x1c8] sm:$0xf]  ;;  %v356_v59 = vld [vmem:[%s5731_s12 + $0x1d0] sm:$0xf]  ;;  %353 = vst [vmem:[%s5738_s13 + $0xe0] sm:$0xf] %v352_v57 }
  0x3f   : > { %355 = vst [vmem:[%s5738_s13 + $0xe4] sm:$0xf] %v354_v58  ;;  %357 = vst [vmem:[%s5738_s13 + $0xe8] sm:$0xf] %v356_v59  ;;  %v358_v60 = vld [vmem:[%s5731_s12 + $0x1d8] sm:$0xf] }
  0x40   : > { %v360_v61 = vld [vmem:[%s5731_s12 + $0x1e0] sm:$0xf]  ;;  %v362_v62 = vld [vmem:[%s5731_s12 + $0x1e8] sm:$0xf]  ;;  %359 = vst [vmem:[%s5738_s13 + $0xec] sm:$0xf] %v358_v60 }
  0x41   : > { %361 = vst [vmem:[%s5738_s13 + $0xf0] sm:$0xf] %v360_v61  ;;  %363 = vst [vmem:[%s5738_s13 + $0xf4] sm:$0xf] %v362_v62  ;;  %v364_v63 = vld [vmem:[%s5731_s12 + $0x1f0] sm:$0xf] }
  0x42   : > { %v366_v0 = vld [vmem:[%s5731_s12 + $0x1f8] sm:$0xf]  ;;  %v368_v1 = vld [vmem:[%s5731_s12 + $0x200] sm:$0xf]  ;;  %365 = vst [vmem:[%s5738_s13 + $0xf8] sm:$0xf] %v364_v63 }
  0x43   : > { %367 = vst [vmem:[%s5738_s13 + $0xfc] sm:$0xf] %v366_v0  ;;  %369 = vst [vmem:[%s5738_s13 + $0x100] sm:$0xf] %v368_v1  ;;  %v370_v2 = vld [vmem:[%s5731_s12 + $0x208] sm:$0xf] }
  0x44   : > { %v372_v3 = vld [vmem:[%s5731_s12 + $0x210] sm:$0xf]  ;;  %v374_v4 = vld [vmem:[%s5731_s12 + $0x218] sm:$0xf]  ;;  %371 = vst [vmem:[%s5738_s13 + $0x104] sm:$0xf] %v370_v2 }
  0x45   : > { %373 = vst [vmem:[%s5738_s13 + $0x108] sm:$0xf] %v372_v3  ;;  %375 = vst [vmem:[%s5738_s13 + $0x10c] sm:$0xf] %v374_v4  ;;  %v376_v5 = vld [vmem:[%s5731_s12 + $0x220] sm:$0xf] }
  0x46   : > { %v378_v6 = vld [vmem:[%s5731_s12 + $0x228] sm:$0xf]  ;;  %v380_v7 = vld [vmem:[%s5731_s12 + $0x230] sm:$0xf]  ;;  %377 = vst [vmem:[%s5738_s13 + $0x110] sm:$0xf] %v376_v5 }
  0x47   : > { %379 = vst [vmem:[%s5738_s13 + $0x114] sm:$0xf] %v378_v6  ;;  %381 = vst [vmem:[%s5738_s13 + $0x118] sm:$0xf] %v380_v7  ;;  %v382_v8 = vld [vmem:[%s5731_s12 + $0x238] sm:$0xf] }
  0x48   : > { %v384_v9 = vld [vmem:[%s5731_s12 + $0x240] sm:$0xf]  ;;  %v386_v10 = vld [vmem:[%s5731_s12 + $0x248] sm:$0xf]  ;;  %383 = vst [vmem:[%s5738_s13 + $0x11c] sm:$0xf] %v382_v8 }
  0x49   : > { %385 = vst [vmem:[%s5738_s13 + $0x120] sm:$0xf] %v384_v9  ;;  %387 = vst [vmem:[%s5738_s13 + $0x124] sm:$0xf] %v386_v10  ;;  %v388_v11 = vld [vmem:[%s5731_s12 + $0x250] sm:$0xf] }
  0x4a   : > { %v390_v12 = vld [vmem:[%s5731_s12 + $0x258] sm:$0xf]  ;;  %v392_v13 = vld [vmem:[%s5731_s12 + $0x260] sm:$0xf]  ;;  %389 = vst [vmem:[%s5738_s13 + $0x128] sm:$0xf] %v388_v11 }
  0x4b   : > { %391 = vst [vmem:[%s5738_s13 + $0x12c] sm:$0xf] %v390_v12  ;;  %393 = vst [vmem:[%s5738_s13 + $0x130] sm:$0xf] %v392_v13  ;;  %v394_v14 = vld [vmem:[%s5731_s12 + $0x268] sm:$0xf] }
  0x4c   : > { %v396_v15 = vld [vmem:[%s5731_s12 + $0x270] sm:$0xf]  ;;  %v398_v16 = vld [vmem:[%s5731_s12 + $0x278] sm:$0xf]  ;;  %395 = vst [vmem:[%s5738_s13 + $0x134] sm:$0xf] %v394_v14 }
  0x4d   : > { %397 = vst [vmem:[%s5738_s13 + $0x138] sm:$0xf] %v396_v15  ;;  %399 = vst [vmem:[%s5738_s13 + $0x13c] sm:$0xf] %v398_v16  ;;  %v400_v17 = vld [vmem:[%s5731_s12 + $0x280] sm:$0xf] }
  0x4e   : > { %v402_v18 = vld [vmem:[%s5731_s12 + $0x288] sm:$0xf]  ;;  %v404_v19 = vld [vmem:[%s5731_s12 + $0x290] sm:$0xf]  ;;  %401 = vst [vmem:[%s5738_s13 + $0x140] sm:$0xf] %v400_v17 }
  0x4f   : > { %403 = vst [vmem:[%s5738_s13 + $0x144] sm:$0xf] %v402_v18  ;;  %405 = vst [vmem:[%s5738_s13 + $0x148] sm:$0xf] %v404_v19  ;;  %v406_v20 = vld [vmem:[%s5731_s12 + $0x298] sm:$0xf] }
  0x50   : > { %v408_v21 = vld [vmem:[%s5731_s12 + $0x2a0] sm:$0xf]  ;;  %v410_v22 = vld [vmem:[%s5731_s12 + $0x2a8] sm:$0xf]  ;;  %407 = vst [vmem:[%s5738_s13 + $0x14c] sm:$0xf] %v406_v20 }
  0x51   : > { %409 = vst [vmem:[%s5738_s13 + $0x150] sm:$0xf] %v408_v21  ;;  %411 = vst [vmem:[%s5738_s13 + $0x154] sm:$0xf] %v410_v22  ;;  %v412_v23 = vld [vmem:[%s5731_s12 + $0x2b0] sm:$0xf] }
  0x52   : > { %v414_v24 = vld [vmem:[%s5731_s12 + $0x2b8] sm:$0xf]  ;;  %v416_v25 = vld [vmem:[%s5731_s12 + $0x2c0] sm:$0xf]  ;;  %413 = vst [vmem:[%s5738_s13 + $0x158] sm:$0xf] %v412_v23 }
  0x53   : > { %415 = vst [vmem:[%s5738_s13 + $0x15c] sm:$0xf] %v414_v24  ;;  %417 = vst [vmem:[%s5738_s13 + $0x160] sm:$0xf] %v416_v25  ;;  %v418_v26 = vld [vmem:[%s5731_s12 + $0x2c8] sm:$0xf] }
  0x54   : > { %v420_v27 = vld [vmem:[%s5731_s12 + $0x2d0] sm:$0xf]  ;;  %v422_v28 = vld [vmem:[%s5731_s12 + $0x2d8] sm:$0xf]  ;;  %419 = vst [vmem:[%s5738_s13 + $0x164] sm:$0xf] %v418_v26 }
  0x55   : > { %421 = vst [vmem:[%s5738_s13 + $0x168] sm:$0xf] %v420_v27  ;;  %423 = vst [vmem:[%s5738_s13 + $0x16c] sm:$0xf] %v422_v28  ;;  %v424_v29 = vld [vmem:[%s5731_s12 + $0x2e0] sm:$0xf] }
  0x56   : > { %v426_v30 = vld [vmem:[%s5731_s12 + $0x2e8] sm:$0xf]  ;;  %v428_v31 = vld [vmem:[%s5731_s12 + $0x2f0] sm:$0xf]  ;;  %425 = vst [vmem:[%s5738_s13 + $0x170] sm:$0xf] %v424_v29 }
  0x57   : > { %427 = vst [vmem:[%s5738_s13 + $0x174] sm:$0xf] %v426_v30  ;;  %429 = vst [vmem:[%s5738_s13 + $0x178] sm:$0xf] %v428_v31  ;;  %v430_v32 = vld [vmem:[%s5731_s12 + $0x2f8] sm:$0xf] }
  0x58   : > { %v432_v33 = vld [vmem:[%s5731_s12 + $0x300] sm:$0xf]  ;;  %v434_v34 = vld [vmem:[%s5731_s12 + $0x308] sm:$0xf]  ;;  %431 = vst [vmem:[%s5738_s13 + $0x17c] sm:$0xf] %v430_v32 }
  0x59   : > { %433 = vst [vmem:[%s5738_s13 + $0x180] sm:$0xf] %v432_v33  ;;  %435 = vst [vmem:[%s5738_s13 + $0x184] sm:$0xf] %v434_v34  ;;  %v436_v35 = vld [vmem:[%s5731_s12 + $0x310] sm:$0xf] }
  0x5a   : > { %v438_v36 = vld [vmem:[%s5731_s12 + $0x318] sm:$0xf]  ;;  %v440_v37 = vld [vmem:[%s5731_s12 + $0x320] sm:$0xf]  ;;  %437 = vst [vmem:[%s5738_s13 + $0x188] sm:$0xf] %v436_v35 }
  0x5b   : > { %439 = vst [vmem:[%s5738_s13 + $0x18c] sm:$0xf] %v438_v36  ;;  %441 = vst [vmem:[%s5738_s13 + $0x190] sm:$0xf] %v440_v37  ;;  %v442_v38 = vld [vmem:[%s5731_s12 + $0x328] sm:$0xf] }
  0x5c   : > { %v444_v39 = vld [vmem:[%s5731_s12 + $0x330] sm:$0xf]  ;;  %v446_v40 = vld [vmem:[%s5731_s12 + $0x338] sm:$0xf]  ;;  %443 = vst [vmem:[%s5738_s13 + $0x194] sm:$0xf] %v442_v38 }
  0x5d   : > { %445 = vst [vmem:[%s5738_s13 + $0x198] sm:$0xf] %v444_v39  ;;  %447 = vst [vmem:[%s5738_s13 + $0x19c] sm:$0xf] %v446_v40  ;;  %v448_v41 = vld [vmem:[%s5731_s12 + $0x340] sm:$0xf] }
  0x5e   : > { %v450_v42 = vld [vmem:[%s5731_s12 + $0x348] sm:$0xf]  ;;  %v452_v43 = vld [vmem:[%s5731_s12 + $0x350] sm:$0xf]  ;;  %449 = vst [vmem:[%s5738_s13 + $0x1a0] sm:$0xf] %v448_v41 }
  0x5f   : > { %451 = vst [vmem:[%s5738_s13 + $0x1a4] sm:$0xf] %v450_v42  ;;  %453 = vst [vmem:[%s5738_s13 + $0x1a8] sm:$0xf] %v452_v43  ;;  %v454_v44 = vld [vmem:[%s5731_s12 + $0x358] sm:$0xf] }
  0x60   : > { %v456_v45 = vld [vmem:[%s5731_s12 + $0x360] sm:$0xf]  ;;  %v458_v46 = vld [vmem:[%s5731_s12 + $0x368] sm:$0xf]  ;;  %455 = vst [vmem:[%s5738_s13 + $0x1ac] sm:$0xf] %v454_v44 }
  0x61   : > { %457 = vst [vmem:[%s5738_s13 + $0x1b0] sm:$0xf] %v456_v45  ;;  %459 = vst [vmem:[%s5738_s13 + $0x1b4] sm:$0xf] %v458_v46  ;;  %v460_v47 = vld [vmem:[%s5731_s12 + $0x370] sm:$0xf] }
  0x62   : > { %v462_v48 = vld [vmem:[%s5731_s12 + $0x378] sm:$0xf]  ;;  %v464_v49 = vld [vmem:[%s5731_s12 + $0x380] sm:$0xf]  ;;  %461 = vst [vmem:[%s5738_s13 + $0x1b8] sm:$0xf] %v460_v47 }
  0x63   : > { %463 = vst [vmem:[%s5738_s13 + $0x1bc] sm:$0xf] %v462_v48  ;;  %465 = vst [vmem:[%s5738_s13 + $0x1c0] sm:$0xf] %v464_v49  ;;  %v466_v50 = vld [vmem:[%s5731_s12 + $0x388] sm:$0xf] }
  0x64   : > { %v468_v51 = vld [vmem:[%s5731_s12 + $0x390] sm:$0xf]  ;;  %v470_v52 = vld [vmem:[%s5731_s12 + $0x398] sm:$0xf]  ;;  %467 = vst [vmem:[%s5738_s13 + $0x1c4] sm:$0xf] %v466_v50 }
  0x65   : > { %469 = vst [vmem:[%s5738_s13 + $0x1c8] sm:$0xf] %v468_v51  ;;  %471 = vst [vmem:[%s5738_s13 + $0x1cc] sm:$0xf] %v470_v52  ;;  %v472_v53 = vld [vmem:[%s5731_s12 + $0x3a0] sm:$0xf] }
  0x66   : > { %v474_v54 = vld [vmem:[%s5731_s12 + $0x3a8] sm:$0xf]  ;;  %v476_v55 = vld [vmem:[%s5731_s12 + $0x3b0] sm:$0xf]  ;;  %473 = vst [vmem:[%s5738_s13 + $0x1d0] sm:$0xf] %v472_v53 }
  0x67   : > { %475 = vst [vmem:[%s5738_s13 + $0x1d4] sm:$0xf] %v474_v54  ;;  %477 = vst [vmem:[%s5738_s13 + $0x1d8] sm:$0xf] %v476_v55  ;;  %v478_v56 = vld [vmem:[%s5731_s12 + $0x3b8] sm:$0xf] }
  0x68   : > { %v480_v57 = vld [vmem:[%s5731_s12 + $0x3c0] sm:$0xf]  ;;  %v482_v58 = vld [vmem:[%s5731_s12 + $0x3c8] sm:$0xf]  ;;  %479 = vst [vmem:[%s5738_s13 + $0x1dc] sm:$0xf] %v478_v56 }
  0x69   : > { %481 = vst [vmem:[%s5738_s13 + $0x1e0] sm:$0xf] %v480_v57  ;;  %483 = vst [vmem:[%s5738_s13 + $0x1e4] sm:$0xf] %v482_v58  ;;  %v484_v59 = vld [vmem:[%s5731_s12 + $0x3d0] sm:$0xf] }
  0x6a   : > { %v486_v60 = vld [vmem:[%s5731_s12 + $0x3d8] sm:$0xf]  ;;  %v488_v61 = vld [vmem:[%s5731_s12 + $0x3e0] sm:$0xf]  ;;  %485 = vst [vmem:[%s5738_s13 + $0x1e8] sm:$0xf] %v484_v59 }
  0x6b   : > { %487 = vst [vmem:[%s5738_s13 + $0x1ec] sm:$0xf] %v486_v60  ;;  %489 = vst [vmem:[%s5738_s13 + $0x1f0] sm:$0xf] %v488_v61  ;;  %v490_v62 = vld [vmem:[%s5731_s12 + $0x3e8] sm:$0xf] }
  0x6c   : > { %v492_v63 = vld [vmem:[%s5731_s12 + $0x3f0] sm:$0xf]  ;;  %v494_v0 = vld [vmem:[%s5731_s12 + $0x3f8] sm:$0xf]  ;;  %491 = vst [vmem:[%s5738_s13 + $0x1f4] sm:$0xf] %v490_v62 }
  0x6d   : > { %493 = vst [vmem:[%s5738_s13 + $0x1f8] sm:$0xf] %v492_v63  ;;  %495 = vst [vmem:[%s5738_s13 + $0x1fc] sm:$0xf] %v494_v0  ;;  %v496_v1 = vld [vmem:[%s5731_s12 + $0x400] sm:$0xf] }
  0x6e   : > { %v498_v2 = vld [vmem:[%s5731_s12 + $0x408] sm:$0xf]  ;;  %v500_v3 = vld [vmem:[%s5731_s12 + $0x410] sm:$0xf]  ;;  %497 = vst [vmem:[%s5738_s13 + $0x200] sm:$0xf] %v496_v1 }
  0x6f   : > { %499 = vst [vmem:[%s5738_s13 + $0x204] sm:$0xf] %v498_v2  ;;  %501 = vst [vmem:[%s5738_s13 + $0x208] sm:$0xf] %v500_v3  ;;  %v502_v4 = vld [vmem:[%s5731_s12 + $0x418] sm:$0xf] }
  0x70   : > { %v504_v5 = vld [vmem:[%s5731_s12 + $0x420] sm:$0xf]  ;;  %v506_v6 = vld [vmem:[%s5731_s12 + $0x428] sm:$0xf]  ;;  %503 = vst [vmem:[%s5738_s13 + $0x20c] sm:$0xf] %v502_v4 }
  0x71   : > { %505 = vst [vmem:[%s5738_s13 + $0x210] sm:$0xf] %v504_v5  ;;  %507 = vst [vmem:[%s5738_s13 + $0x214] sm:$0xf] %v506_v6  ;;  %v508_v7 = vld [vmem:[%s5731_s12 + $0x430] sm:$0xf] }
  0x72   : > { %v510_v8 = vld [vmem:[%s5731_s12 + $0x438] sm:$0xf]  ;;  %v512_v9 = vld [vmem:[%s5731_s12 + $0x440] sm:$0xf]  ;;  %509 = vst [vmem:[%s5738_s13 + $0x218] sm:$0xf] %v508_v7 }
  0x73   : > { %511 = vst [vmem:[%s5738_s13 + $0x21c] sm:$0xf] %v510_v8  ;;  %513 = vst [vmem:[%s5738_s13 + $0x220] sm:$0xf] %v512_v9  ;;  %v514_v10 = vld [vmem:[%s5731_s12 + $0x448] sm:$0xf] }
  0x74   : > { %v516_v11 = vld [vmem:[%s5731_s12 + $0x450] sm:$0xf]  ;;  %v518_v12 = vld [vmem:[%s5731_s12 + $0x458] sm:$0xf]  ;;  %515 = vst [vmem:[%s5738_s13 + $0x224] sm:$0xf] %v514_v10 }
  0x75   : > { %517 = vst [vmem:[%s5738_s13 + $0x228] sm:$0xf] %v516_v11  ;;  %519 = vst [vmem:[%s5738_s13 + $0x22c] sm:$0xf] %v518_v12  ;;  %v520_v13 = vld [vmem:[%s5731_s12 + $0x460] sm:$0xf] }
  0x76   : > { %v522_v14 = vld [vmem:[%s5731_s12 + $0x468] sm:$0xf]  ;;  %v524_v15 = vld [vmem:[%s5731_s12 + $0x470] sm:$0xf]  ;;  %521 = vst [vmem:[%s5738_s13 + $0x230] sm:$0xf] %v520_v13 }
  0x77   : > { %523 = vst [vmem:[%s5738_s13 + $0x234] sm:$0xf] %v522_v14  ;;  %525 = vst [vmem:[%s5738_s13 + $0x238] sm:$0xf] %v524_v15  ;;  %v526_v16 = vld [vmem:[%s5731_s12 + $0x478] sm:$0xf] }
  0x78   : > { %v528_v17 = vld [vmem:[%s5731_s12 + $0x480] sm:$0xf]  ;;  %v530_v18 = vld [vmem:[%s5731_s12 + $0x488] sm:$0xf]  ;;  %527 = vst [vmem:[%s5738_s13 + $0x23c] sm:$0xf] %v526_v16 }
  0x79   : > { %529 = vst [vmem:[%s5738_s13 + $0x240] sm:$0xf] %v528_v17  ;;  %531 = vst [vmem:[%s5738_s13 + $0x244] sm:$0xf] %v530_v18  ;;  %v532_v19 = vld [vmem:[%s5731_s12 + $0x490] sm:$0xf] }
  0x7a   : > { %v534_v20 = vld [vmem:[%s5731_s12 + $0x498] sm:$0xf]  ;;  %v536_v21 = vld [vmem:[%s5731_s12 + $0x4a0] sm:$0xf]  ;;  %533 = vst [vmem:[%s5738_s13 + $0x248] sm:$0xf] %v532_v19 }
  0x7b   : > { %535 = vst [vmem:[%s5738_s13 + $0x24c] sm:$0xf] %v534_v20  ;;  %537 = vst [vmem:[%s5738_s13 + $0x250] sm:$0xf] %v536_v21  ;;  %v538_v22 = vld [vmem:[%s5731_s12 + $0x4a8] sm:$0xf] }
  0x7c   : > { %v540_v23 = vld [vmem:[%s5731_s12 + $0x4b0] sm:$0xf]  ;;  %v542_v24 = vld [vmem:[%s5731_s12 + $0x4b8] sm:$0xf]  ;;  %539 = vst [vmem:[%s5738_s13 + $0x254] sm:$0xf] %v538_v22 }
  0x7d   : > { %541 = vst [vmem:[%s5738_s13 + $0x258] sm:$0xf] %v540_v23  ;;  %543 = vst [vmem:[%s5738_s13 + $0x25c] sm:$0xf] %v542_v24  ;;  %v544_v25 = vld [vmem:[%s5731_s12 + $0x4c0] sm:$0xf] }
  0x7e   : > { %v546_v26 = vld [vmem:[%s5731_s12 + $0x4c8] sm:$0xf]  ;;  %v548_v27 = vld [vmem:[%s5731_s12 + $0x4d0] sm:$0xf]  ;;  %545 = vst [vmem:[%s5738_s13 + $0x260] sm:$0xf] %v544_v25 }
  0x7f   : > { %547 = vst [vmem:[%s5738_s13 + $0x264] sm:$0xf] %v546_v26  ;;  %549 = vst [vmem:[%s5738_s13 + $0x268] sm:$0xf] %v548_v27  ;;  %v550_v28 = vld [vmem:[%s5731_s12 + $0x4d8] sm:$0xf] }
  0x80   : > { %v552_v29 = vld [vmem:[%s5731_s12 + $0x4e0] sm:$0xf]  ;;  %v554_v30 = vld [vmem:[%s5731_s12 + $0x4e8] sm:$0xf]  ;;  %551 = vst [vmem:[%s5738_s13 + $0x26c] sm:$0xf] %v550_v28 }
  0x81   : > { %553 = vst [vmem:[%s5738_s13 + $0x270] sm:$0xf] %v552_v29  ;;  %555 = vst [vmem:[%s5738_s13 + $0x274] sm:$0xf] %v554_v30  ;;  %v556_v31 = vld [vmem:[%s5731_s12 + $0x4f0] sm:$0xf] }
  0x82   : > { %v558_v32 = vld [vmem:[%s5731_s12 + $0x4f8] sm:$0xf]  ;;  %v560_v33 = vld [vmem:[%s5731_s12 + $0x500] sm:$0xf]  ;;  %557 = vst [vmem:[%s5738_s13 + $0x278] sm:$0xf] %v556_v31 }
  0x83   : > { %559 = vst [vmem:[%s5738_s13 + $0x27c] sm:$0xf] %v558_v32  ;;  %561 = vst [vmem:[%s5738_s13 + $0x280] sm:$0xf] %v560_v33  ;;  %v562_v34 = vld [vmem:[%s5731_s12 + $0x508] sm:$0xf] }
  0x84   : > { %v564_v35 = vld [vmem:[%s5731_s12 + $0x510] sm:$0xf]  ;;  %v566_v36 = vld [vmem:[%s5731_s12 + $0x518] sm:$0xf]  ;;  %563 = vst [vmem:[%s5738_s13 + $0x284] sm:$0xf] %v562_v34 }
  0x85   : > { %565 = vst [vmem:[%s5738_s13 + $0x288] sm:$0xf] %v564_v35  ;;  %567 = vst [vmem:[%s5738_s13 + $0x28c] sm:$0xf] %v566_v36  ;;  %v568_v37 = vld [vmem:[%s5731_s12 + $0x520] sm:$0xf] }
  0x86   : > { %v570_v38 = vld [vmem:[%s5731_s12 + $0x528] sm:$0xf]  ;;  %v572_v39 = vld [vmem:[%s5731_s12 + $0x530] sm:$0xf]  ;;  %569 = vst [vmem:[%s5738_s13 + $0x290] sm:$0xf] %v568_v37 }
  0x87   : > { %571 = vst [vmem:[%s5738_s13 + $0x294] sm:$0xf] %v570_v38  ;;  %573 = vst [vmem:[%s5738_s13 + $0x298] sm:$0xf] %v572_v39  ;;  %v574_v40 = vld [vmem:[%s5731_s12 + $0x538] sm:$0xf] }
  0x88   : > { %v576_v41 = vld [vmem:[%s5731_s12 + $0x540] sm:$0xf]  ;;  %v578_v42 = vld [vmem:[%s5731_s12 + $0x548] sm:$0xf]  ;;  %575 = vst [vmem:[%s5738_s13 + $0x29c] sm:$0xf] %v574_v40 }
  0x89   : > { %577 = vst [vmem:[%s5738_s13 + $0x2a0] sm:$0xf] %v576_v41  ;;  %579 = vst [vmem:[%s5738_s13 + $0x2a4] sm:$0xf] %v578_v42  ;;  %v580_v43 = vld [vmem:[%s5731_s12 + $0x550] sm:$0xf] }
  0x8a   : > { %v582_v44 = vld [vmem:[%s5731_s12 + $0x558] sm:$0xf]  ;;  %v584_v45 = vld [vmem:[%s5731_s12 + $0x560] sm:$0xf]  ;;  %581 = vst [vmem:[%s5738_s13 + $0x2a8] sm:$0xf] %v580_v43 }
  0x8b   : > { %583 = vst [vmem:[%s5738_s13 + $0x2ac] sm:$0xf] %v582_v44  ;;  %585 = vst [vmem:[%s5738_s13 + $0x2b0] sm:$0xf] %v584_v45  ;;  %v586_v46 = vld [vmem:[%s5731_s12 + $0x568] sm:$0xf] }
  0x8c   : > { %v588_v47 = vld [vmem:[%s5731_s12 + $0x570] sm:$0xf]  ;;  %v590_v48 = vld [vmem:[%s5731_s12 + $0x578] sm:$0xf]  ;;  %587 = vst [vmem:[%s5738_s13 + $0x2b4] sm:$0xf] %v586_v46 }
  0x8d   : > { %589 = vst [vmem:[%s5738_s13 + $0x2b8] sm:$0xf] %v588_v47  ;;  %591 = vst [vmem:[%s5738_s13 + $0x2bc] sm:$0xf] %v590_v48  ;;  %v592_v49 = vld [vmem:[%s5731_s12 + $0x580] sm:$0xf] }
  0x8e   : > { %v594_v50 = vld [vmem:[%s5731_s12 + $0x588] sm:$0xf]  ;;  %v596_v51 = vld [vmem:[%s5731_s12 + $0x590] sm:$0xf]  ;;  %593 = vst [vmem:[%s5738_s13 + $0x2c0] sm:$0xf] %v592_v49 }
  0x8f   : > { %595 = vst [vmem:[%s5738_s13 + $0x2c4] sm:$0xf] %v594_v50  ;;  %597 = vst [vmem:[%s5738_s13 + $0x2c8] sm:$0xf] %v596_v51  ;;  %v598_v52 = vld [vmem:[%s5731_s12 + $0x598] sm:$0xf] }
  0x90   : > { %v600_v53 = vld [vmem:[%s5731_s12 + $0x5a0] sm:$0xf]  ;;  %v602_v54 = vld [vmem:[%s5731_s12 + $0x5a8] sm:$0xf]  ;;  %599 = vst [vmem:[%s5738_s13 + $0x2cc] sm:$0xf] %v598_v52 }
  0x91   : > { %601 = vst [vmem:[%s5738_s13 + $0x2d0] sm:$0xf] %v600_v53  ;;  %603 = vst [vmem:[%s5738_s13 + $0x2d4] sm:$0xf] %v602_v54  ;;  %v604_v55 = vld [vmem:[%s5731_s12 + $0x5b0] sm:$0xf] }
  0x92   : > { %v606_v56 = vld [vmem:[%s5731_s12 + $0x5b8] sm:$0xf]  ;;  %v608_v57 = vld [vmem:[%s5731_s12 + $0x5c0] sm:$0xf]  ;;  %605 = vst [vmem:[%s5738_s13 + $0x2d8] sm:$0xf] %v604_v55 }
  0x93   : > { %607 = vst [vmem:[%s5738_s13 + $0x2dc] sm:$0xf] %v606_v56  ;;  %609 = vst [vmem:[%s5738_s13 + $0x2e0] sm:$0xf] %v608_v57  ;;  %v610_v58 = vld [vmem:[%s5731_s12 + $0x5c8] sm:$0xf] }
  0x94   : > { %v612_v59 = vld [vmem:[%s5731_s12 + $0x5d0] sm:$0xf]  ;;  %v614_v60 = vld [vmem:[%s5731_s12 + $0x5d8] sm:$0xf]  ;;  %611 = vst [vmem:[%s5738_s13 + $0x2e4] sm:$0xf] %v610_v58 }
  0x95   : > { %613 = vst [vmem:[%s5738_s13 + $0x2e8] sm:$0xf] %v612_v59  ;;  %615 = vst [vmem:[%s5738_s13 + $0x2ec] sm:$0xf] %v614_v60  ;;  %v616_v61 = vld [vmem:[%s5731_s12 + $0x5e0] sm:$0xf] }
  0x96   : > { %v618_v62 = vld [vmem:[%s5731_s12 + $0x5e8] sm:$0xf]  ;;  %v620_v63 = vld [vmem:[%s5731_s12 + $0x5f0] sm:$0xf]  ;;  %617 = vst [vmem:[%s5738_s13 + $0x2f0] sm:$0xf] %v616_v61 }
  0x97   : > { %619 = vst [vmem:[%s5738_s13 + $0x2f4] sm:$0xf] %v618_v62  ;;  %621 = vst [vmem:[%s5738_s13 + $0x2f8] sm:$0xf] %v620_v63  ;;  %v622_v0 = vld [vmem:[%s5731_s12 + $0x5f8] sm:$0xf] }
  0x98   : > { %v624_v1 = vld [vmem:[%s5731_s12 + $0x600] sm:$0xf]  ;;  %v626_v2 = vld [vmem:[%s5731_s12 + $0x608] sm:$0xf]  ;;  %623 = vst [vmem:[%s5738_s13 + $0x2fc] sm:$0xf] %v622_v0 }
  0x99   : > { %625 = vst [vmem:[%s5738_s13 + $0x300] sm:$0xf] %v624_v1  ;;  %627 = vst [vmem:[%s5738_s13 + $0x304] sm:$0xf] %v626_v2  ;;  %v628_v3 = vld [vmem:[%s5731_s12 + $0x610] sm:$0xf] }
  0x9a   : > { %v630_v4 = vld [vmem:[%s5731_s12 + $0x618] sm:$0xf]  ;;  %v632_v5 = vld [vmem:[%s5731_s12 + $0x620] sm:$0xf]  ;;  %629 = vst [vmem:[%s5738_s13 + $0x308] sm:$0xf] %v628_v3 }
  0x9b   : > { %631 = vst [vmem:[%s5738_s13 + $0x30c] sm:$0xf] %v630_v4  ;;  %633 = vst [vmem:[%s5738_s13 + $0x310] sm:$0xf] %v632_v5  ;;  %v634_v6 = vld [vmem:[%s5731_s12 + $0x628] sm:$0xf] }
  0x9c   : > { %v636_v7 = vld [vmem:[%s5731_s12 + $0x630] sm:$0xf]  ;;  %v638_v8 = vld [vmem:[%s5731_s12 + $0x638] sm:$0xf]  ;;  %635 = vst [vmem:[%s5738_s13 + $0x314] sm:$0xf] %v634_v6 }
  0x9d   : > { %637 = vst [vmem:[%s5738_s13 + $0x318] sm:$0xf] %v636_v7  ;;  %639 = vst [vmem:[%s5738_s13 + $0x31c] sm:$0xf] %v638_v8  ;;  %v640_v9 = vld [vmem:[%s5731_s12 + $0x640] sm:$0xf] }
  0x9e   : > { %v642_v10 = vld [vmem:[%s5731_s12 + $0x648] sm:$0xf]  ;;  %v644_v11 = vld [vmem:[%s5731_s12 + $0x650] sm:$0xf]  ;;  %641 = vst [vmem:[%s5738_s13 + $0x320] sm:$0xf] %v640_v9 }
  0x9f   : > { %643 = vst [vmem:[%s5738_s13 + $0x324] sm:$0xf] %v642_v10  ;;  %645 = vst [vmem:[%s5738_s13 + $0x328] sm:$0xf] %v644_v11  ;;  %v646_v12 = vld [vmem:[%s5731_s12 + $0x658] sm:$0xf] }
  0xa0   : > { %v648_v13 = vld [vmem:[%s5731_s12 + $0x660] sm:$0xf]  ;;  %v650_v14 = vld [vmem:[%s5731_s12 + $0x668] sm:$0xf]  ;;  %647 = vst [vmem:[%s5738_s13 + $0x32c] sm:$0xf] %v646_v12 }
  0xa1   : > { %649 = vst [vmem:[%s5738_s13 + $0x330] sm:$0xf] %v648_v13  ;;  %651 = vst [vmem:[%s5738_s13 + $0x334] sm:$0xf] %v650_v14  ;;  %v652_v15 = vld [vmem:[%s5731_s12 + $0x670] sm:$0xf] }
  0xa2   : > { %v654_v16 = vld [vmem:[%s5731_s12 + $0x678] sm:$0xf]  ;;  %v656_v17 = vld [vmem:[%s5731_s12 + $0x680] sm:$0xf]  ;;  %653 = vst [vmem:[%s5738_s13 + $0x338] sm:$0xf] %v652_v15 }
  0xa3   : > { %655 = vst [vmem:[%s5738_s13 + $0x33c] sm:$0xf] %v654_v16  ;;  %657 = vst [vmem:[%s5738_s13 + $0x340] sm:$0xf] %v656_v17  ;;  %v658_v18 = vld [vmem:[%s5731_s12 + $0x688] sm:$0xf] }
  0xa4   : > { %v660_v19 = vld [vmem:[%s5731_s12 + $0x690] sm:$0xf]  ;;  %v662_v20 = vld [vmem:[%s5731_s12 + $0x698] sm:$0xf]  ;;  %659 = vst [vmem:[%s5738_s13 + $0x344] sm:$0xf] %v658_v18 }
  0xa5   : > { %661 = vst [vmem:[%s5738_s13 + $0x348] sm:$0xf] %v660_v19  ;;  %663 = vst [vmem:[%s5738_s13 + $0x34c] sm:$0xf] %v662_v20  ;;  %v664_v21 = vld [vmem:[%s5731_s12 + $0x6a0] sm:$0xf] }
  0xa6   : > { %v666_v22 = vld [vmem:[%s5731_s12 + $0x6a8] sm:$0xf]  ;;  %v668_v23 = vld [vmem:[%s5731_s12 + $0x6b0] sm:$0xf]  ;;  %665 = vst [vmem:[%s5738_s13 + $0x350] sm:$0xf] %v664_v21 }
  0xa7   : > { %667 = vst [vmem:[%s5738_s13 + $0x354] sm:$0xf] %v666_v22  ;;  %669 = vst [vmem:[%s5738_s13 + $0x358] sm:$0xf] %v668_v23  ;;  %v670_v24 = vld [vmem:[%s5731_s12 + $0x6b8] sm:$0xf] }
  0xa8   : > { %v672_v25 = vld [vmem:[%s5731_s12 + $0x6c0] sm:$0xf]  ;;  %v674_v26 = vld [vmem:[%s5731_s12 + $0x6c8] sm:$0xf]  ;;  %671 = vst [vmem:[%s5738_s13 + $0x35c] sm:$0xf] %v670_v24 }
  0xa9   : > { %673 = vst [vmem:[%s5738_s13 + $0x360] sm:$0xf] %v672_v25  ;;  %675 = vst [vmem:[%s5738_s13 + $0x364] sm:$0xf] %v674_v26  ;;  %v676_v27 = vld [vmem:[%s5731_s12 + $0x6d0] sm:$0xf] }
  0xaa   : > { %v678_v28 = vld [vmem:[%s5731_s12 + $0x6d8] sm:$0xf]  ;;  %v680_v29 = vld [vmem:[%s5731_s12 + $0x6e0] sm:$0xf]  ;;  %677 = vst [vmem:[%s5738_s13 + $0x368] sm:$0xf] %v676_v27 }
  0xab   : > { %679 = vst [vmem:[%s5738_s13 + $0x36c] sm:$0xf] %v678_v28  ;;  %681 = vst [vmem:[%s5738_s13 + $0x370] sm:$0xf] %v680_v29  ;;  %v682_v30 = vld [vmem:[%s5731_s12 + $0x6e8] sm:$0xf] }
  0xac   : > { %v684_v31 = vld [vmem:[%s5731_s12 + $0x6f0] sm:$0xf]  ;;  %v686_v32 = vld [vmem:[%s5731_s12 + $0x6f8] sm:$0xf]  ;;  %683 = vst [vmem:[%s5738_s13 + $0x374] sm:$0xf] %v682_v30 }
  0xad   : > { %685 = vst [vmem:[%s5738_s13 + $0x378] sm:$0xf] %v684_v31  ;;  %687 = vst [vmem:[%s5738_s13 + $0x37c] sm:$0xf] %v686_v32  ;;  %v688_v33 = vld [vmem:[%s5731_s12 + $0x700] sm:$0xf] }
  0xae   : > { %v690_v34 = vld [vmem:[%s5731_s12 + $0x708] sm:$0xf]  ;;  %v692_v35 = vld [vmem:[%s5731_s12 + $0x710] sm:$0xf]  ;;  %689 = vst [vmem:[%s5738_s13 + $0x380] sm:$0xf] %v688_v33 }
  0xaf   : > { %691 = vst [vmem:[%s5738_s13 + $0x384] sm:$0xf] %v690_v34  ;;  %693 = vst [vmem:[%s5738_s13 + $0x388] sm:$0xf] %v692_v35  ;;  %v694_v36 = vld [vmem:[%s5731_s12 + $0x718] sm:$0xf] }
  0xb0   : > { %v696_v37 = vld [vmem:[%s5731_s12 + $0x720] sm:$0xf]  ;;  %v698_v38 = vld [vmem:[%s5731_s12 + $0x728] sm:$0xf]  ;;  %695 = vst [vmem:[%s5738_s13 + $0x38c] sm:$0xf] %v694_v36 }
  0xb1   : > { %697 = vst [vmem:[%s5738_s13 + $0x390] sm:$0xf] %v696_v37  ;;  %699 = vst [vmem:[%s5738_s13 + $0x394] sm:$0xf] %v698_v38  ;;  %v700_v39 = vld [vmem:[%s5731_s12 + $0x730] sm:$0xf] }
  0xb2   : > { %v702_v40 = vld [vmem:[%s5731_s12 + $0x738] sm:$0xf]  ;;  %v704_v41 = vld [vmem:[%s5731_s12 + $0x740] sm:$0xf]  ;;  %701 = vst [vmem:[%s5738_s13 + $0x398] sm:$0xf] %v700_v39 }
  0xb3   : > { %703 = vst [vmem:[%s5738_s13 + $0x39c] sm:$0xf] %v702_v40  ;;  %705 = vst [vmem:[%s5738_s13 + $0x3a0] sm:$0xf] %v704_v41  ;;  %v706_v42 = vld [vmem:[%s5731_s12 + $0x748] sm:$0xf] }
  0xb4   : > { %v708_v43 = vld [vmem:[%s5731_s12 + $0x750] sm:$0xf]  ;;  %v710_v44 = vld [vmem:[%s5731_s12 + $0x758] sm:$0xf]  ;;  %707 = vst [vmem:[%s5738_s13 + $0x3a4] sm:$0xf] %v706_v42 }
  0xb5   : > { %709 = vst [vmem:[%s5738_s13 + $0x3a8] sm:$0xf] %v708_v43  ;;  %711 = vst [vmem:[%s5738_s13 + $0x3ac] sm:$0xf] %v710_v44  ;;  %v712_v45 = vld [vmem:[%s5731_s12 + $0x760] sm:$0xf] }
  0xb6   : > { %v714_v46 = vld [vmem:[%s5731_s12 + $0x768] sm:$0xf]  ;;  %v716_v47 = vld [vmem:[%s5731_s12 + $0x770] sm:$0xf]  ;;  %713 = vst [vmem:[%s5738_s13 + $0x3b0] sm:$0xf] %v712_v45 }
  0xb7   : > { %715 = vst [vmem:[%s5738_s13 + $0x3b4] sm:$0xf] %v714_v46  ;;  %717 = vst [vmem:[%s5738_s13 + $0x3b8] sm:$0xf] %v716_v47  ;;  %v718_v48 = vld [vmem:[%s5731_s12 + $0x778] sm:$0xf] }
  0xb8   : > { %v720_v49 = vld [vmem:[%s5731_s12 + $0x780] sm:$0xf]  ;;  %v722_v50 = vld [vmem:[%s5731_s12 + $0x788] sm:$0xf]  ;;  %719 = vst [vmem:[%s5738_s13 + $0x3bc] sm:$0xf] %v718_v48 }
  0xb9   : > { %721 = vst [vmem:[%s5738_s13 + $0x3c0] sm:$0xf] %v720_v49  ;;  %723 = vst [vmem:[%s5738_s13 + $0x3c4] sm:$0xf] %v722_v50  ;;  %v724_v51 = vld [vmem:[%s5731_s12 + $0x790] sm:$0xf] }
  0xba   : > { %v726_v52 = vld [vmem:[%s5731_s12 + $0x798] sm:$0xf]  ;;  %v728_v53 = vld [vmem:[%s5731_s12 + $0x7a0] sm:$0xf]  ;;  %725 = vst [vmem:[%s5738_s13 + $0x3c8] sm:$0xf] %v724_v51 }
  0xbb   : > { %727 = vst [vmem:[%s5738_s13 + $0x3cc] sm:$0xf] %v726_v52  ;;  %729 = vst [vmem:[%s5738_s13 + $0x3d0] sm:$0xf] %v728_v53  ;;  %v730_v54 = vld [vmem:[%s5731_s12 + $0x7a8] sm:$0xf] }
  0xbc   : > { %v732_v55 = vld [vmem:[%s5731_s12 + $0x7b0] sm:$0xf]  ;;  %v734_v56 = vld [vmem:[%s5731_s12 + $0x7b8] sm:$0xf]  ;;  %731 = vst [vmem:[%s5738_s13 + $0x3d4] sm:$0xf] %v730_v54 }
  0xbd   : > { %733 = vst [vmem:[%s5738_s13 + $0x3d8] sm:$0xf] %v732_v55  ;;  %735 = vst [vmem:[%s5738_s13 + $0x3dc] sm:$0xf] %v734_v56  ;;  %v736_v57 = vld [vmem:[%s5731_s12 + $0x7c0] sm:$0xf] }
  0xbe   : > { %v738_v58 = vld [vmem:[%s5731_s12 + $0x7c8] sm:$0xf]  ;;  %v740_v59 = vld [vmem:[%s5731_s12 + $0x7d0] sm:$0xf]  ;;  %737 = vst [vmem:[%s5738_s13 + $0x3e0] sm:$0xf] %v736_v57 }
  0xbf   : > { %739 = vst [vmem:[%s5738_s13 + $0x3e4] sm:$0xf] %v738_v58  ;;  %741 = vst [vmem:[%s5738_s13 + $0x3e8] sm:$0xf] %v740_v59  ;;  %v742_v60 = vld [vmem:[%s5731_s12 + $0x7d8] sm:$0xf] }
  0xc0   : > { %v744_v61 = vld [vmem:[%s5731_s12 + $0x7e0] sm:$0xf]  ;;  %v746_v62 = vld [vmem:[%s5731_s12 + $0x7e8] sm:$0xf]  ;;  %743 = vst [vmem:[%s5738_s13 + $0x3ec] sm:$0xf] %v742_v60 }
  0xc1   : > { %745 = vst [vmem:[%s5738_s13 + $0x3f0] sm:$0xf] %v744_v61  ;;  %747 = vst [vmem:[%s5738_s13 + $0x3f4] sm:$0xf] %v746_v62  ;;  %v748_v63 = vld [vmem:[%s5731_s12 + $0x7f0] sm:$0xf] }
  0xc2   : > { %v750_v0 = vld [vmem:[%s5731_s12 + $0x7f8] sm:$0xf]  ;;  %v752_v1 = vld [vmem:[%s5731_s12 + $0x800] sm:$0xf]  ;;  %749 = vst [vmem:[%s5738_s13 + $0x3f8] sm:$0xf] %v748_v63 }
  0xc3   : > { %751 = vst [vmem:[%s5738_s13 + $0x3fc] sm:$0xf] %v750_v0  ;;  %753 = vst [vmem:[%s5738_s13 + $0x400] sm:$0xf] %v752_v1  ;;  %v754_v2 = vld [vmem:[%s5731_s12 + $0x808] sm:$0xf] }
  0xc4   : > { %v756_v3 = vld [vmem:[%s5731_s12 + $0x810] sm:$0xf]  ;;  %v758_v4 = vld [vmem:[%s5731_s12 + $0x818] sm:$0xf]  ;;  %755 = vst [vmem:[%s5738_s13 + $0x404] sm:$0xf] %v754_v2 }
  0xc5   : > { %757 = vst [vmem:[%s5738_s13 + $0x408] sm:$0xf] %v756_v3  ;;  %759 = vst [vmem:[%s5738_s13 + $0x40c] sm:$0xf] %v758_v4  ;;  %v760_v5 = vld [vmem:[%s5731_s12 + $0x820] sm:$0xf] }
  0xc6   : > { %v762_v6 = vld [vmem:[%s5731_s12 + $0x828] sm:$0xf]  ;;  %v764_v7 = vld [vmem:[%s5731_s12 + $0x830] sm:$0xf]  ;;  %761 = vst [vmem:[%s5738_s13 + $0x410] sm:$0xf] %v760_v5 }
  0xc7   : > { %763 = vst [vmem:[%s5738_s13 + $0x414] sm:$0xf] %v762_v6  ;;  %765 = vst [vmem:[%s5738_s13 + $0x418] sm:$0xf] %v764_v7  ;;  %v766_v8 = vld [vmem:[%s5731_s12 + $0x838] sm:$0xf] }
  0xc8   : > { %v768_v9 = vld [vmem:[%s5731_s12 + $0x840] sm:$0xf]  ;;  %v770_v10 = vld [vmem:[%s5731_s12 + $0x848] sm:$0xf]  ;;  %767 = vst [vmem:[%s5738_s13 + $0x41c] sm:$0xf] %v766_v8 }
  0xc9   : > { %769 = vst [vmem:[%s5738_s13 + $0x420] sm:$0xf] %v768_v9  ;;  %771 = vst [vmem:[%s5738_s13 + $0x424] sm:$0xf] %v770_v10  ;;  %v772_v11 = vld [vmem:[%s5731_s12 + $0x850] sm:$0xf] }
  0xca   : > { %v774_v12 = vld [vmem:[%s5731_s12 + $0x858] sm:$0xf]  ;;  %v776_v13 = vld [vmem:[%s5731_s12 + $0x860] sm:$0xf]  ;;  %773 = vst [vmem:[%s5738_s13 + $0x428] sm:$0xf] %v772_v11 }
  0xcb   : > { %775 = vst [vmem:[%s5738_s13 + $0x42c] sm:$0xf] %v774_v12  ;;  %777 = vst [vmem:[%s5738_s13 + $0x430] sm:$0xf] %v776_v13  ;;  %v778_v14 = vld [vmem:[%s5731_s12 + $0x868] sm:$0xf] }
  0xcc   : > { %v780_v15 = vld [vmem:[%s5731_s12 + $0x870] sm:$0xf]  ;;  %v782_v16 = vld [vmem:[%s5731_s12 + $0x878] sm:$0xf]  ;;  %779 = vst [vmem:[%s5738_s13 + $0x434] sm:$0xf] %v778_v14 }
  0xcd   : > { %781 = vst [vmem:[%s5738_s13 + $0x438] sm:$0xf] %v780_v15  ;;  %783 = vst [vmem:[%s5738_s13 + $0x43c] sm:$0xf] %v782_v16  ;;  %v784_v17 = vld [vmem:[%s5731_s12 + $0x880] sm:$0xf] }
  0xce   : > { %v786_v18 = vld [vmem:[%s5731_s12 + $0x888] sm:$0xf]  ;;  %v788_v19 = vld [vmem:[%s5731_s12 + $0x890] sm:$0xf]  ;;  %785 = vst [vmem:[%s5738_s13 + $0x440] sm:$0xf] %v784_v17 }
  0xcf   : > { %787 = vst [vmem:[%s5738_s13 + $0x444] sm:$0xf] %v786_v18  ;;  %789 = vst [vmem:[%s5738_s13 + $0x448] sm:$0xf] %v788_v19  ;;  %v790_v20 = vld [vmem:[%s5731_s12 + $0x898] sm:$0xf] }
  0xd0   : > { %v792_v21 = vld [vmem:[%s5731_s12 + $0x8a0] sm:$0xf]  ;;  %v794_v22 = vld [vmem:[%s5731_s12 + $0x8a8] sm:$0xf]  ;;  %791 = vst [vmem:[%s5738_s13 + $0x44c] sm:$0xf] %v790_v20 }
  0xd1   : > { %793 = vst [vmem:[%s5738_s13 + $0x450] sm:$0xf] %v792_v21  ;;  %795 = vst [vmem:[%s5738_s13 + $0x454] sm:$0xf] %v794_v22  ;;  %v796_v23 = vld [vmem:[%s5731_s12 + $0x8b0] sm:$0xf] }
  0xd2   : > { %v798_v24 = vld [vmem:[%s5731_s12 + $0x8b8] sm:$0xf]  ;;  %v800_v25 = vld [vmem:[%s5731_s12 + $0x8c0] sm:$0xf]  ;;  %797 = vst [vmem:[%s5738_s13 + $0x458] sm:$0xf] %v796_v23 }
  0xd3   : > { %799 = vst [vmem:[%s5738_s13 + $0x45c] sm:$0xf] %v798_v24  ;;  %801 = vst [vmem:[%s5738_s13 + $0x460] sm:$0xf] %v800_v25  ;;  %v802_v26 = vld [vmem:[%s5731_s12 + $0x8c8] sm:$0xf] }
  0xd4   : > { %v804_v27 = vld [vmem:[%s5731_s12 + $0x8d0] sm:$0xf]  ;;  %v806_v28 = vld [vmem:[%s5731_s12 + $0x8d8] sm:$0xf]  ;;  %803 = vst [vmem:[%s5738_s13 + $0x464] sm:$0xf] %v802_v26 }
  0xd5   : > { %805 = vst [vmem:[%s5738_s13 + $0x468] sm:$0xf] %v804_v27  ;;  %807 = vst [vmem:[%s5738_s13 + $0x46c] sm:$0xf] %v806_v28  ;;  %v808_v29 = vld [vmem:[%s5731_s12 + $0x8e0] sm:$0xf] }
  0xd6   : > { %v810_v30 = vld [vmem:[%s5731_s12 + $0x8e8] sm:$0xf]  ;;  %v812_v31 = vld [vmem:[%s5731_s12 + $0x8f0] sm:$0xf]  ;;  %809 = vst [vmem:[%s5738_s13 + $0x470] sm:$0xf] %v808_v29 }
  0xd7   : > { %811 = vst [vmem:[%s5738_s13 + $0x474] sm:$0xf] %v810_v30  ;;  %813 = vst [vmem:[%s5738_s13 + $0x478] sm:$0xf] %v812_v31  ;;  %v814_v32 = vld [vmem:[%s5731_s12 + $0x8f8] sm:$0xf] }
  0xd8   : > { %815 = vst [vmem:[%s5738_s13 + $0x47c] sm:$0xf] %v814_v32 }
  0xd9 PF: > { %1421 = sbr.rel (!%p5714_p3) target bundleno = 225 (0xe1), region = 73  ;;  %s1423_s14 = sand.u32 (%p5714_p3), 1, %s5612_s21  }
  0xda   : > { %s4383_s15 = sshll.u32 (%p5714_p3), %s5624_s24, 3  ;;  %s4382_s16 = sshll.u32 (%p5714_p3), %s1423_s14, 6 }
  0xdb   : > { %s1430_s19 = scalar_lea.vmem (%p5714_p3), %s6863_s3, %s4383_s15  ;;  %s1425_s28 = scalar_lea.vmem (%p5714_p3), [#allocation5], %s4382_s16 }
  0xdc   : > { %v1473_v33 = vld [vmem:[%s1430_s19] sm:$0xff] (%p5714_p3)  ;;  %v1475_v34 = vld [vmem:[%s1430_s19 + $0x10] sm:$0xff] (%p5714_p3) }
  0xdd   : > { %v1477_v35 = vld [vmem:[%s1430_s19 + $0x20] sm:$0xff] (%p5714_p3)  ;;  %1474 = vst [vmem:[%s1425_s28] sm:$0xff] (%p5714_p3), %v1473_v33  ;;  %1476 = vst [vmem:[%s1425_s28 + $0x8] sm:$0xff] (%p5714_p3), %v1475_v34  ;;  %v1479_v36 = vld [vmem:[%s1430_s19 + $0x30] sm:$0xff] (%p5714_p3) }
  0xde   : > { %1478 = vst [vmem:[%s1425_s28 + $0x10] sm:$0xff] %v1477_v35  ;;  %v1481_v37 = vld [vmem:[%s1430_s19 + $0x40] sm:$0xff]  ;;  %v1483_v38 = vld [vmem:[%s1430_s19 + $0x50] sm:$0xff]  ;;  %1480 = vst [vmem:[%s1425_s28 + $0x18] sm:$0xff] %v1479_v36 }
  0xdf   : > { %1482 = vst [vmem:[%s1425_s28 + $0x20] sm:$0xff] %v1481_v37  ;;  %1484 = vst [vmem:[%s1425_s28 + $0x28] sm:$0xff] %v1483_v38  ;;  %v1485_v39 = vld [vmem:[%s1430_s19 + $0x60] sm:$0xff]  ;;  %v1487_v40 = vld [vmem:[%s1430_s19 + $0x70] sm:$0xff] }
  0xe0   : > { %1486 = vst [vmem:[%s1425_s28 + $0x30] sm:$0xff] %v1485_v39  ;;  %1488 = vst [vmem:[%s1425_s28 + $0x38] sm:$0xff] %v1487_v40 }
  0xe1 PF: > { %p4384_p7 = scmp.ge.s32.totalorder %s5632_s26, 1  ;;  %p1493_p8 = scmp.lt.s32.totalorder %s5632_s26, 5 }
  0xe3   : > { %p1494_p9 = pnand %p4384_p7, %p1493_p8 }
  0xe5   : > { %1497 = sbr.rel (%p1494_p9) target bundleno = 800 (0x320), region = 111 }
  0xea   : > { %s1500_s29 = sand.u32 1, %s5608_s20   ;;  %p1544_p10 = scmp.lt.s32.totalorder %s5620_s23, 1 }
  0xeb   : > { %s5315_s30 = smul.u32 1152, %s1500_s29  ;;  %s4385_s7 = sshll.u32 %s1500_s29, 6 }
  0xec   : > { %p1549_p11 = scmp.lt.s32.totalorder %s5616_s22, 1  ;;  %p1559_p12 = scmp.eq.s32.totalorder %s5616_s22, 0 }
  0xed   : > { %s6913_s23 = smov (!%p1544_p10, %s5620_s23), 1  ;;  %s6343_s18 = scalar_lea.vmem [#allocation4], %s5315_s30  ;;  %vm1565_vm0 = vcmask (%p1559_p12), 0   ;;  %v5634_v42 = vmov (%p1559_p12), 0.0  }
  0xee   : > { %s1550_s8 = scalar_select %p1549_p11, %s5616_s22, 1  ;;  %1566 = vst.msk [vmem:[#allocation2] sm:$0x1] (%p1559_p12), %vm1565_vm0, %v5634_v42 }
  0xef   : > { %s5316_s9 = smul.u32 576, %s6913_s23  ;;  %s1555_s12 = scalar_lea.vmem %s6865_s5, %s6913_s23 }
  0xf0   : > { %s1551_s15 = scalar_lea.vmem %s6862_s2, %s1550_s8  ;;  %s6345_s19 = scalar_lea.vmem [#allocation5], %s4385_s7 }
  0xf1   : > { %s6339_s17 = scalar_lea.vmem %s6860_s0, %s5316_s9  ;;  %v6341_v41 = vld [vmem:[%s1551_s15] ss:$0 sm:$0xff]  ;;  %1564 = sbr.rel (!%p1559_p12) target bundleno = 246 (0xf6), region = 123 }
  0xf2   : > { %6868 = vst [vmem:[#allocation6_spill] sm:$0xff] %v6341_v41 }
  0xf6 PF: > { %v5374_v43 = vld [vmem:[%s6343_s18 + $0xf8] sm:$0xff]   ;;  %v5378_v47 = vld [vmem:[%s6343_s18 + $0xf0] sm:$0xff]   ;;  %v5382_v51 = vld [vmem:[%s6343_s18 + $0xe8] sm:$0xff]   ;;  %vm2072_vm1 = vsmask.f32 3328  ;;  %p4237_p13 = scmp.eq.s32.totalorder %s5616_s22, 1 }
  0xf7   : > { %v5375_v44 = vld [vmem:[%s6343_s18 + $0x78] sm:$0xff]   ;;  %4938 = vmatprep.subr.bf16.mxu0 %v5374_v43  ;;  %v5379_v48 = vld [vmem:[%s6343_s18 + $0x70] sm:$0xff]   ;;  %v5383_v52 = vld [vmem:[%s6343_s18 + $0x68] sm:$0xff]   ;;  %vm2073_vm2 = vsmask.f32 7440  ;;  %vm4235_vm4 = vcmask 0  }
  0xf8   : > { %v5376_v45 = vld [vmem:[%s6343_s18 + $0xb8] sm:$0xff]   ;;  %4978 = vmatprep.subr.bf16.mxu1 %v5375_v44  ;;  %v5380_v49 = vld [vmem:[%s6343_s18 + $0xb0] sm:$0xff]   ;;  %v5384_v53 = vld [vmem:[%s6343_s18 + $0xa8] sm:$0xff]  }
  0xf9   : > { %v5377_v46 = vld [vmem:[%s6343_s18 + $0x38] sm:$0xff]   ;;  %4939 = vmatpush3.bf16.msra.mxu0 %v5376_v45  ;;  %v5381_v50 = vld [vmem:[%s6343_s18 + $0x30] sm:$0xff]   ;;  %v5385_v54 = vld [vmem:[%s6343_s18 + $0x28] sm:$0xff]  }
  0xfa   : > { %4979 = vmatpush3.bf16.msra.mxu1 %v5377_v46  ;;  %4940 = vmatprep.subr.bf16.mxu0 %v5378_v47  ;;  %v5386_v55 = vld [vmem:[%s6343_s18 + $0xe0] sm:$0xff]   ;;  %v5390_v59 = vld [vmem:[%s6343_s18 + $0xd8] sm:$0xff]   ;;  %v5394_v63 = vld [vmem:[%s6343_s18 + $0xd0] sm:$0xff]  }
  0xfb   : > { %4980 = vmatprep.subr.bf16.mxu1 %v5379_v48  ;;  %v5387_v56 = vld [vmem:[%s6343_s18 + $0x60] sm:$0xff]   ;;  %v5391_v60 = vld [vmem:[%s6343_s18 + $0x58] sm:$0xff]   ;;  %v5395_v0 = vld [vmem:[%s6343_s18 + $0x50] sm:$0xff]  }
  0xfc   : > { %v5388_v57 = vld [vmem:[%s6343_s18 + $0xa0] sm:$0xff]   ;;  %v5392_v61 = vld [vmem:[%s6343_s18 + $0x98] sm:$0xff]   ;;  %v5396_v1 = vld [vmem:[%s6343_s18 + $0x90] sm:$0xff]  }
  0xfd   : > { %4941 = vmatpush3.bf16.msra.mxu0 %v5380_v49  ;;  %v5389_v58 = vld [vmem:[%s6343_s18 + $0x20] sm:$0xff]   ;;  %v5393_v62 = vld [vmem:[%s6343_s18 + $0x18] sm:$0xff]   ;;  %v5397_v2 = vld [vmem:[%s6343_s18 + $0x10] sm:$0xff]  }
  0xfe   : > { %4981 = vmatpush3.bf16.msra.mxu1 %v5381_v50  ;;  %4942 = vmatprep.subr.bf16.mxu0 %v5382_v51  ;;  %v5398_v3 = vld [vmem:[%s6343_s18 + $0xc8] sm:$0xff]   ;;  %v5402_v7 = vld [vmem:[%s6343_s18 + $0xc0] sm:$0xff]   ;;  %v5411_v17 = vld [vmem:[%s6343_s18 + $0x178] sm:$0xff]  }
  0xff   : > { %4982 = vmatprep.subr.bf16.mxu1 %v5383_v52  ;;  %v5399_v4 = vld [vmem:[%s6343_s18 + $0x48] sm:$0xff]   ;;  %v5403_v8 = vld [vmem:[%s6343_s18 + $0x40] sm:$0xff]   ;;  %v5412_v18 = vld [vmem:[%s6343_s18 + $0x1f8] sm:$0xff]  }
 0x100   : > { %v5400_v5 = vld [vmem:[%s6343_s18 + $0x88] sm:$0xff]   ;;  %v5404_v9 = vld [vmem:[%s6343_s18 + $0x80] sm:$0xff]   ;;  %v5413_v19 = vld [vmem:[%s6343_s18 + $0x138] sm:$0xff]  }
 0x101   : > { %4943 = vmatpush3.bf16.msra.mxu0 %v5384_v53  ;;  %v5401_v6 = vld [vmem:[%s6343_s18 + $0x8] sm:$0xff]   ;;  %v5405_v10 = vld [vmem:[%s6343_s18] sm:$0xff]   ;;  %v5414_v20 = vld [vmem:[%s6343_s18 + $0x1b8] sm:$0xff]  }
 0x102   : > { %4983 = vmatpush3.bf16.msra.mxu1 %v5385_v54  ;;  %4944 = vmatprep.subr.bf16.mxu0 %v5386_v55  ;;  %v5406_v11 = vld [vmem:[%s6339_s17 + $0x90] ss:$16 sps:$4 sm:$0xff]   ;;  %v5408_v12 = vld [vmem:[%s6339_s17 + $0x94] ss:$16 sps:$4 sm:$0xff]   ;;  %vm6449_vm3 = vmor %vm2072_vm1, %vm2073_vm2 }
 0x103   : > { %4984 = vmatprep.subr.bf16.mxu1 %v5387_v56  ;;  %v1570_v13 = vld [vmem:[%s6339_s17] sm:$0xff]  ;;  %v1571_v14 = vld [vmem:[%s6339_s17 + $0x10] sm:$0xff]  ;;  %1822 = vmatprep.mubr.bf16.mxu0 %v5408_v12 }
 0x104   : > { %v4452_v15 = vcombine.low %v1570_v13, %v1571_v14  ;;  %v4453_v16 = vcombine.high %v1570_v13, %v1571_v14  ;;  %v5415_v21 = vld [vmem:[%s6343_s18 + $0x170] sm:$0xff]   ;;  %v2076_v22 = vshrl.u32 %v1570_v13, 16  ;;  %v2079_v24 = vshll.u32 %v1570_v13, 16  ;;  %v1572_v30 = vld [vmem:[%s6339_s17 + $0x20] sm:$0xff]  ;;  %v5424_v37 = vld [vmem:[%s6343_s18 + $0x168] sm:$0xff]  }
 0x105   : > { %4945 = vmatpush3.bf16.msra.mxu0 %v5388_v57  ;;  %v5416_v23 = vld [vmem:[%s6343_s18 + $0x1f0] sm:$0xff]   ;;  %v2090_v26 = vshrl.u32 %v1571_v14, 16  ;;  %v2093_v28 = vshll.u32 %v1571_v14, 16  ;;  %v5425_v39 = vld [vmem:[%s6343_s18 + $0x1e8] sm:$0xff]   ;;  %v5428_v44 = vld [vmem:[%s6343_s18 + $0x160] sm:$0xff]   ;;  %v2104_v48 = vshrl.u32 %v1572_v30, 16 }
 0x106   : > { %4985 = vmatpush3.bf16.msra.mxu1 %v5389_v58  ;;  %4946 = vmatprep.subr.bf16.mxu0 %v5390_v59  ;;  %v5417_v25 = vld [vmem:[%s6343_s18 + $0x130] sm:$0xff]   ;;  %v2078_v33 = vrot.slane %v2076_v22, 4  ;;  %v2081_v34 = vrot.slane %v2079_v24, 5  ;;  %v5426_v42 = vld [vmem:[%s6343_s18 + $0x128] sm:$0xff]   ;;  %v5429_v46 = vld [vmem:[%s6343_s18 + $0x1e0] sm:$0xff]   ;;  %v2107_v50 = vshll.u32 %v1572_v30, 16 }
 0x107   : > { %4986 = vmatprep.subr.bf16.mxu1 %v5391_v60  ;;  %2023 = vmatprep.mubr.bf16.mxu1 %v4453_v16  ;;  %v5418_v27 = vld [vmem:[%s6343_s18 + $0x1b0] sm:$0xff]   ;;  %v2092_v38 = vrot.slane %v2090_v26, 4  ;;  %v2095_v40 = vrot.slane %v2093_v28, 5  ;;  %v5427_v43 = vld [vmem:[%s6343_s18 + $0x1a8] sm:$0xff]   ;;  %v5430_v49 = vld [vmem:[%s6343_s18 + $0x120] sm:$0xff]   ;;  %v6415_v58 = vrot.slane %v2104_v48, 4 }
 0x108   : > { %v5419_v29 = vld [vmem:[%s6339_s17 + $0xb4] ss:$16 sps:$4 sm:$0xff]   ;;  %v5422_v32 = vld [vmem:[%s6339_s17 + $0xb0] ss:$16 sps:$4 sm:$0xff]   ;;  %v2082_v45 = vor.u32 %v2081_v34, %v2078_v33 }
 0x109   : > { %4947 = vmatpush3.bf16.msra.mxu0 %v5392_v61  ;;  %v6394_v31 = vld [vmem:[%s6339_s17 + $0x30] sm:$0xff]  ;;  %v2096_v47 = vor.u32 %v2095_v40, %v2092_v38  ;;  %v5431_v51 = vld [vmem:[%s6343_s18 + $0x1a0] sm:$0xff]   ;;  %v5437_v61 = vld [vmem:[%s6343_s18 + $0x158] sm:$0xff]  }
 0x10a   : > { %4987 = vmatpush3.bf16.msra.mxu1 %v5393_v62  ;;  %4948 = vmatprep.subr.bf16.mxu0 %v5394_v63  ;;  %v4455_v35 = vcombine.high %v1572_v30, %v6394_v31  ;;  %v4454_v36 = vcombine.low %v1572_v30, %v6394_v31  ;;  %v5432_v52 = vld [vmem:[%s6339_s17 + $0xd4] ss:$16 sps:$4 sm:$0xff]   ;;  %v6408_v53 = vrot.slane %v2082_v45, 4  ;;  %v5435_v56 = vld [vmem:[%s6339_s17 + $0xd0] ss:$16 sps:$4 sm:$0xff]   ;;  %v6418_v62 = vrot.slane %v2107_v50, 5 }
 0x10b   : > { %4988 = vmatprep.subr.bf16.mxu1 %v5395_v0  ;;  %v1574_v54 = vld [vmem:[%s6339_s17 + $0x40] sm:$0xff]  ;;  %v1575_v55 = vld [vmem:[%s6339_s17 + $0x50] sm:$0xff]  ;;  %v6413_v57 = vrot.slane %v2096_v47, 4  ;;  %v2118_v0 = vshrl.u32 %v6394_v31, 16 }
 0x10c   : > { %v4457_v59 = vcombine.high %v1574_v54, %v1575_v55  ;;  %v4456_v60 = vcombine.low %v1574_v54, %v1575_v55  ;;  %v5438_v63 = vld [vmem:[%s6343_s18 + $0x1d8] sm:$0xff]   ;;  %v5445_v13 = vld [vmem:[%s6339_s17 + $0xf4] ss:$16 sps:$4 sm:$0xff]   ;;  %v2110_v30 = vor.u32 %v6418_v62, %v6415_v58 }
 0x10d   : > { %4949 = vmatpush3.bf16.msra.mxu0 %v5396_v1  ;;  %v5439_v1 = vld [vmem:[%s6343_s18 + $0x118] sm:$0xff]   ;;  %v5455_v34 = vld [vmem:[%s6343_s18 + $0x1c0] sm:$0xff]  }
 0x10e   : > { %4989 = vmatpush3.bf16.msra.mxu1 %v5397_v2  ;;  %4950 = vmatprep.subr.bf16.mxu0 %v5398_v3  ;;  %v2121_v2 = vshll.u32 %v6394_v31, 16  ;;  %v5440_v3 = vld [vmem:[%s6343_s18 + $0x198] sm:$0xff]   ;;  %v6443_v40 = vrot.slane %v2110_v30, 4 }
 0x10f   : > { %4990 = vmatprep.subr.bf16.mxu1 %v5399_v4  ;;  %v2132_v4 = vshrl.u32 %v1574_v54, 16  ;;  %v1576_v16 = vld [vmem:[%s6339_s17 + $0x60] sm:$0xff] }
 0x110   : > { %v2123_v12 = vrot.slane %v2121_v2, 5  ;;  %v2160_v24 = vshrl.u32 %v1576_v16, 16  ;;  %v2163_v26 = vshll.u32 %v1576_v16, 16  ;;  %v6454_v50 = vld [vmem:[%s6339_s17 + $0x120] sm:$0xff] }
 0x111   : > { %4951 = vmatpush3.bf16.msra.mxu0 %v5400_v5  ;;  %v5441_v5 = vld [vmem:[%s6343_s18 + $0x150] sm:$0xff]   ;;  %v2134_v14 = vrot.slane %v2132_v4, 4  ;;  %v5461_v62 = vld [vmem:[%s6343_s18 + $0x2f8] sm:$0xff]  }
 0x112   : > { %4991 = vmatpush3.bf16.msra.mxu1 %v5401_v6  ;;  %4952 = vmatprep.subr.bf16.mxu0 %v5402_v7  ;;  %v2135_v6 = vshll.u32 %v1574_v54, 16  ;;  %v5442_v7 = vld [vmem:[%s6343_s18 + $0x1d0] sm:$0xff]   ;;  %v2162_v31 = vrot.slane %v2160_v24, 4  ;;  %v2165_v33 = vrot.slane %v2163_v26, 5  ;;  %v5463_v4 = vld [vmem:[%s6343_s18 + $0x2b8] sm:$0xff]  }
 0x113   : > { %4992 = vmatprep.subr.bf16.mxu1 %v5403_v8  ;;  %v2146_v8 = vshrl.u32 %v1575_v55, 16 }
 0x115   : > { %4953 = vmatpush3.bf16.msra.mxu0 %v5404_v9  ;;  %v5443_v9 = vld [vmem:[%s6343_s18 + $0x110] sm:$0xff]  }
 0x116   : > { %4993 = vmatpush3.bf16.msra.mxu1 %v5405_v10  ;;  %5018 = vmatprep.subr.bf16.mxu0 %v5411_v17  ;;  %v2120_v10 = vrot.slane %v2118_v0, 4  ;;  %v1577_v17 = vld [vmem:[%s6339_s17 + $0x70] sm:$0xff]  ;;  %v5462_v0 = vld [vmem:[%s6343_s18 + $0x238] sm:$0xff]  }
 0x117   : > { %5058 = vmatprep.subr.bf16.mxu1 %v5412_v18  ;;  %v5448_v18 = vld [vmem:[%s6339_s17 + $0xf0] ss:$16 sps:$4 sm:$0xff]   ;;  %v4458_v22 = vcombine.low %v1576_v16, %v1577_v17  ;;  %v2177_v38 = vshll.u32 %v1577_v17, 16 }
 0x118   : > { %1823 = vmatmul.mubr.bf16.vlgmr.msra.gmra.mxu0 %v5406_v11  ;;  %v5444_v11 = vld [vmem:[%s6343_s18 + $0x190] sm:$0xff]  }
 0x119   : > { %2024 = vmatmul.mubr.bf16.vlgmr.msra.gmra.mxu1 %v4452_v15  ;;  %5019 = vmatpush3.bf16.msra.mxu0 %v5413_v19  ;;  %v2149_v15 = vshll.u32 %v1575_v55, 16  ;;  %v2137_v19 = vrot.slane %v2135_v6, 5  ;;  %v2179_v47 = vrot.slane %v2177_v38, 5  ;;  %v5476_v38 = vld [vmem:[%s6343_s18 + $0x220] sm:$0xff]  }
 0x11a   : > { %5059 = vmatpush3.bf16.msra.mxu1 %v5414_v20  ;;  %5020 = vmatprep.subr.bf16.mxu0 %v5415_v21  ;;  %v2148_v20 = vrot.slane %v2146_v8, 4  ;;  %v4459_v21 = vcombine.high %v1576_v16, %v1577_v17  ;;  %v5464_v8 = vld [vmem:[%s6343_s18 + $0x270] sm:$0xff]  }
 0x11b   : > { %5060 = vmatprep.subr.bf16.mxu1 %v5416_v23  ;;  %1830 = vmatprep.mubr.bf16.mxu0 %v5419_v29  ;;  %v5450_v23 = vld [vmem:[%s6343_s18 + $0x148] sm:$0xff]   ;;  %v2151_v28 = vrot.slane %v2149_v15, 5  ;;  %v2063_v15 = vld [vmem:[%s6339_s17 + $0x38] sm:$0x11] }
 0x11c   : > { %2031 = vmatprep.mubr.bf16.mxu1 %v4455_v35  ;;  %v5453_v29 = vld [vmem:[%s6343_s18 + $0x188] sm:$0xff]   ;;  %v2174_v35 = vshrl.u32 %v1577_v17, 16  ;;  %v6490_v17 = vld [vmem:[%s6339_s17 + $0x140] sm:$0xff] }
 0x11d   : > { %5021 = vmatpush3.bf16.msra.mxu0 %v5417_v25  ;;  %v5451_v25 = vld [vmem:[%s6343_s18 + $0x1c8] sm:$0xff]  }
 0x11e   : > { %5061 = vmatpush3.bf16.msra.mxu1 %v5418_v27  ;;  %5022 = vmatprep.subr.bf16.mxu0 %v5424_v37  ;;  %v5452_v27 = vld [vmem:[%s6343_s18 + $0x108] sm:$0xff]   ;;  %v2124_v37 = vor.u32 %v2123_v12, %v2120_v10  ;;  %v2944_v10 = vshrl.u32 %v6454_v50, 16  ;;  %v5467_v12 = vld [vmem:[%s6343_s18 + $0x2b0] sm:$0xff]  }
 0x11f   : > { %5062 = vmatprep.subr.bf16.mxu1 %v5425_v39  ;;  %v5457_v39 = vld [vmem:[%s6343_s18 + $0x180] sm:$0xff]  }
 0x120   : > { %1831 = vmatmul.mubr.bf16.gmra.mxu0 %v5422_v32  ;;  %v5454_v32 = vld [vmem:[%s6343_s18 + $0x140] sm:$0xff]   ;;  %v2125_v58 = vrot.slane %v2124_v37, 4  ;;  %v6507_v30 = vrot.slane %v2944_v10, 4  ;;  %v2071_v10 = vld [vmem:[%s6339_s17 + $0x78] sm:$0x11] }
 0x121   : > { %2032 = vmatmul.mubr.bf16.gmra.mxu1 %v4454_v36  ;;  %5023 = vmatpush3.bf16.msra.mxu0 %v5426_v42  ;;  %v5456_v36 = vld [vmem:[%s6343_s18 + $0x100] sm:$0xff]   ;;  %v2138_v42 = vor.u32 %v2137_v19, %v2134_v14  ;;  %v2947_v14 = vshll.u32 %v6454_v50, 16 }
 0x122   : > { %5063 = vmatpush3.bf16.msra.mxu1 %v5427_v43  ;;  %5024 = vmatprep.subr.bf16.mxu0 %v5428_v44  ;;  %v2057_v43 = vld [vmem:[%s6339_s17 + $0x8] sm:$0x11]  ;;  %v2059_v44 = vld [vmem:[%s6339_s17 + $0x18] sm:$0x11] }
 0x123   : > { %5064 = vmatprep.subr.bf16.mxu1 %v5429_v46  ;;  %1838 = vmatprep.mubr.bf16.mxu0 %v5432_v52  ;;  %v2176_v46 = vrot.slane %v2174_v35, 4  ;;  %v2085_v48 = vshll.u32 %v2057_v43, 16  ;;  %v2152_v52 = vor.u32 %v2151_v28, %v2148_v20  ;;  %v2127_v20 = vshll.u32 %v2063_v15, 16  ;;  %v2065_v43 = vld [vmem:[%s6339_s17 + $0x48] sm:$0x11]  ;;  %v6556_v15 = vld [vmem:[%s6339_s17 + $0x190] sm:$0xff] }
 0x124   : > { %2039 = vmatprep.mubr.bf16.mxu1 %v4457_v59  ;;  %v2166_v59 = vor.u32 %v2165_v33, %v2162_v31  ;;  %v6512_v33 = vrot.slane %v2947_v14, 5  ;;  %v6553_v14 = vld [vmem:[%s6339_s17 + $0x180] sm:$0xff] }
 0x125   : > { %5025 = vmatpush3.bf16.msra.mxu0 %v5430_v49  ;;  %v2099_v49 = vshll.u32 %v2059_v44, 16  ;;  %v2129_v26 = vrot.slane %v2127_v20, 5  ;;  %v2067_v44 = vld [vmem:[%s6339_s17 + $0x58] sm:$0x11] }
 0x126   : > { %5065 = vmatpush3.bf16.msra.mxu1 %v5431_v51  ;;  %5026 = vmatprep.subr.bf16.mxu0 %v5437_v61  ;;  %v6457_v51 = vld [vmem:[%s6339_s17 + $0x130] sm:$0xff] }
 0x127   : > { %5066 = vmatprep.subr.bf16.mxu1 %v5438_v63  ;;  %v4572_v54 = vcombine.low %v6454_v50, %v6457_v51  ;;  %v4573_v55 = vcombine.high %v6454_v50, %v6457_v51  ;;  %v2101_v61 = vrot.slane %v2099_v49, 5  ;;  %v6465_v63 = vrot.slane %v2138_v42, 4  ;;  %v6528_v50 = vld [vmem:[%s6339_s17 + $0x170] sm:$0xff] }
 0x128   : > { %1839 = vmatmul.mubr.bf16.gmra.mxu0 %v5435_v56  ;;  %v5460_v56 = vld [vmem:[%s6343_s18 + $0x278] sm:$0xff]   ;;  %v2958_v19 = vshrl.u32 %v6457_v51, 16  ;;  %v2130_v31 = vsel %vm6449_vm3, %v2125_v58, %v2129_v26  ;;  %v2972_v42 = vshrl.u32 %v6490_v17, 16  ;;  %v2155_v49 = vshll.u32 %v2067_v44, 16 }
 0x129   : > { %2040 = vmatmul.mubr.bf16.gmra.mxu1 %v4456_v60  ;;  %5027 = vmatpush3.bf16.msra.mxu0 %v5439_v1  ;;  %v2087_v60 = vrot.slane %v2085_v48, 5  ;;  %v2180_v1 = vor.u32 %v2179_v47, %v2176_v46  ;;  %v6524_v46 = vld [vmem:[%s6339_s17 + $0x160] sm:$0xff]  ;;  %v2975_v47 = vshll.u32 %v6490_v17, 16  ;;  %v2141_v48 = vshll.u32 %v2065_v43, 16 }
 0x12a   : > { %5067 = vmatpush3.bf16.msra.mxu1 %v5440_v3  ;;  %5028 = vmatprep.subr.bf16.mxu0 %v5441_v5  ;;  %v2102_v3 = vsel %vm6449_vm3, %v6413_v57, %v2101_v61  ;;  %v6475_v5 = vrot.slane %v2152_v52, 4  ;;  %v5466_v57 = vld [vmem:[%s6343_s18 + $0x230] sm:$0xff]   ;;  %v6515_v37 = vrot.slane %v2958_v19, 4  ;;  %v4577_v52 = vcombine.high %v6524_v46, %v6528_v50  ;;  %v5481_v58 = vld [vmem:[%s6343_s18 + $0x2d8] sm:$0xff]   ;;  %v5490_v19 = vld [vmem:[%s6343_s18 + $0x248] sm:$0xff]  }
 0x12b   : > { %5068 = vmatprep.subr.bf16.mxu1 %v5442_v7  ;;  %1846 = vmatprep.mubr.bf16.mxu0 %v5445_v13  ;;  %v2088_v2 = vsel %vm6449_vm3, %v6408_v53, %v2087_v60  ;;  %v5465_v53 = vld [vmem:[%s6343_s18 + $0x2f0] sm:$0xff]   ;;  %v2061_v13 = vld [vmem:[%s6339_s17 + $0x28] sm:$0x11]  ;;  %v3003_v43 = vshll.u32 %v6524_v46, 16  ;;  %v3014_v44 = vshrl.u32 %v6528_v50, 16 }
 0x12c   : > { %2047 = vmatprep.mubr.bf16.mxu1 %v4459_v21  ;;  %v4508_v6 = vcombine.low %v2088_v2, %v2102_v3  ;;  %v4509_v7 = vcombine.high %v2088_v2, %v2102_v3  ;;  %v2113_v16 = vshll.u32 %v2061_v13, 16  ;;  %v5484_v3 = vld [vmem:[%s6343_s18 + $0x250] sm:$0xff]   ;;  %v2183_v13 = vshll.u32 %v2071_v10, 16 }
 0x12d   : > { %5029 = vmatpush3.bf16.msra.mxu0 %v5443_v9  ;;  %v6478_v9 = vrot.slane %v2166_v59, 4  ;;  %v5482_v59 = vld [vmem:[%s6343_s18 + $0x218] sm:$0xff]   ;;  %v5509_v10 = vld [vmem:[%s6339_s17 + $0x1d4] ss:$16 sps:$4 sm:$0xff]  }
 0x12e   : > { %5069 = vmatpush3.bf16.msra.mxu1 %v5444_v11  ;;  %5030 = vmatprep.subr.bf16.mxu0 %v5450_v23  ;;  %v6483_v11 = vrot.slane %v2180_v1, 4  ;;  %v5470_v23 = vld [vmem:[%s6343_s18 + $0x268] sm:$0xff]   ;;  %v2115_v24 = vrot.slane %v2113_v16, 5  ;;  %v4579_v16 = vcombine.high %v6553_v14, %v6556_v15 }
 0x12f   : > { %5070 = vmatprep.subr.bf16.mxu1 %v5451_v25  ;;  %v5471_v25 = vld [vmem:[%s6343_s18 + $0x2e8] sm:$0xff]  }
 0x130   : > { %1847 = vmatmul.mubr.bf16.gmra.mxu0 %v5448_v18  ;;  %v6493_v18 = vld [vmem:[%s6339_s17 + $0x150] sm:$0xff]  ;;  %v2116_v28 = vsel %vm6449_vm3, %v6443_v40, %v2115_v24  ;;  %v5477_v40 = vld [vmem:[%s6343_s18 + $0x2a0] sm:$0xff]   ;;  %v2950_v24 = vor.u32 %v6512_v33, %v6507_v30  ;;  %v3000_v33 = vshrl.u32 %v6524_v46, 16 }
 0x131   : > { %2048 = vmatmul.mubr.bf16.gmra.mxu1 %v4458_v22  ;;  %5031 = vmatpush3.bf16.msra.mxu0 %v5452_v27  ;;  %v4575_v21 = vcombine.high %v6490_v17, %v6493_v18  ;;  %v4574_v22 = vcombine.low %v6490_v17, %v6493_v18  ;;  %v5472_v27 = vld [vmem:[%s6343_s18 + $0x228] sm:$0xff]   ;;  %v4510_v35 = vcombine.low %v2116_v28, %v2130_v31  ;;  %v5494_v30 = vld [vmem:[%s6343_s18 + $0x240] sm:$0xff]  }
 0x132   : > { %5071 = vmatpush3.bf16.msra.mxu1 %v5453_v29  ;;  %5032 = vmatprep.subr.bf16.mxu0 %v5454_v32  ;;  %v5473_v29 = vld [vmem:[%s6343_s18 + $0x2a8] sm:$0xff]   ;;  %v5474_v32 = vld [vmem:[%s6343_s18 + $0x260] sm:$0xff]   ;;  %v4578_v17 = vcombine.low %v6553_v14, %v6556_v15 }
 0x133   : > { %5072 = vmatprep.subr.bf16.mxu1 %v5455_v34  ;;  %2633 = vmatprep.mubr.bf16.mxu1 %v4573_v55  ;;  %v4511_v34 = vcombine.high %v2116_v28, %v2130_v31  ;;  %v2143_v55 = vrot.slane %v2141_v48, 5  ;;  %v5493_v28 = vld [vmem:[%s6343_s18 + $0x288] sm:$0xff]  }
 0x134   : > { %2380 = vmatprep.mubr.bf16.mxu0 %v4509_v7  ;;  %v2977_v7 = vrot.slane %v2975_v47, 5  ;;  %v5498_v47 = vld [vmem:[%s6339_s17 + $0x1b0] ss:$16 sps:$4 sm:$0xff]   ;;  %v4661_v48 = vld [vmem:[%s6339_s17 + $0x128] sm:$0x11] }
 0x135   : > { %5033 = vmatpush3.bf16.msra.mxu0 %v5456_v36  ;;  %v5475_v36 = vld [vmem:[%s6343_s18 + $0x2e0] sm:$0xff]   ;;  %v2144_v60 = vsel %vm6449_vm3, %v6465_v63, %v2143_v55  ;;  %v5485_v63 = vld [vmem:[%s6343_s18 + $0x2d0] sm:$0xff]   ;;  %v5502_v55 = vld [vmem:[%s6343_s18 + $0x3f8] sm:$0xff]  }
 0x136   : > { %5073 = vmatpush3.bf16.msra.mxu1 %v5457_v39  ;;  %5098 = vmatprep.subr.bf16.mxu0 %v5460_v56  ;;  %v2961_v39 = vshll.u32 %v6457_v51, 16  ;;  %v5480_v51 = vld [vmem:[%s6343_s18 + $0x258] sm:$0xff]   ;;  %v2157_v56 = vrot.slane %v2155_v49, 5 }
 0x137   : > { %5138 = vmatprep.subr.bf16.mxu1 %v5461_v62  ;;  %v5483_v62 = vld [vmem:[%s6343_s18 + $0x298] sm:$0xff]  }
 0x138   : > { %2381 = vmatmul.mubr.bf16.vlgmr.msra.gmra.mxu0 %v4508_v6  ;;  %v2158_v61 = vsel %vm6449_vm3, %v6475_v5, %v2157_v56  ;;  %v2986_v6 = vshrl.u32 %v6493_v18, 16  ;;  %v5486_v5 = vld [vmem:[%s6343_s18 + $0x210] sm:$0xff]  }
 0x139   : > { %2634 = vmatmul.mubr.bf16.vlgmr.msra.gmra.mxu1 %v4572_v54  ;;  %5099 = vmatpush3.bf16.msra.mxu0 %v5462_v0  ;;  %v4576_v54 = vcombine.low %v6524_v46, %v6528_v50  ;;  %v2963_v0 = vrot.slane %v2961_v39, 5  ;;  %v4513_v1 = vcombine.high %v2144_v60, %v2158_v61  ;;  %v4512_v2 = vcombine.low %v2144_v60, %v2158_v61  ;;  %v5500_v39 = vld [vmem:[%s6339_s17 + $0x1b4] ss:$16 sps:$4 sm:$0xff]   ;;  %v4663_v49 = vld [vmem:[%s6339_s17 + $0x138] sm:$0x11] }
 0x13a   : > { %5139 = vmatpush3.bf16.msra.mxu1 %v5463_v4  ;;  %5100 = vmatprep.subr.bf16.mxu0 %v5464_v8  ;;  %v2974_v4 = vrot.slane %v2972_v42, 4  ;;  %v5487_v8 = vld [vmem:[%s6343_s18 + $0x290] sm:$0xff]   ;;  %v2988_v20 = vrot.slane %v2986_v6, 4  ;;  %v6583_v42 = vrot.slane %v3000_v33, 4  ;;  %v5503_v46 = vld [vmem:[%s6343_s18 + $0x338] sm:$0xff]  }
 0x13b   : > { %5140 = vmatprep.subr.bf16.mxu1 %v5465_v53  ;;  %2641 = vmatprep.mubr.bf16.mxu1 %v4575_v21  ;;  %v2069_v53 = vld [vmem:[%s6339_s17 + $0x68] sm:$0x11]  ;;  %v5504_v60 = vld [vmem:[%s6343_s18 + $0x3b8] sm:$0xff]   ;;  %v5507_v6 = vld [vmem:[%s6343_s18 + $0x330] sm:$0xff]  }
 0x13c   : > { %2388 = vmatprep.mubr.bf16.mxu0 %v4511_v34 }
 0x13d   : > { %5101 = vmatpush3.bf16.msra.mxu0 %v5466_v57  ;;  %v2989_v57 = vshll.u32 %v6493_v18, 16  ;;  %v5491_v18 = vld [vmem:[%s6343_s18 + $0x2c8] sm:$0xff]  }
 0x13e   : > { %5141 = vmatpush3.bf16.msra.mxu1 %v5467_v12  ;;  %5102 = vmatprep.subr.bf16.mxu0 %v5470_v23  ;;  %v2169_v12 = vshll.u32 %v2069_v53, 16  ;;  %v5492_v23 = vld [vmem:[%s6343_s18 + $0x208] sm:$0xff]   ;;  %v3031_v53 = vshll.u32 %v6553_v14, 16 }
 0x13f   : > { %5142 = vmatprep.subr.bf16.mxu1 %v5471_v25  ;;  %v2964_v25 = vor.u32 %v2963_v0, %v6515_v37  ;;  %v2991_v31 = vrot.slane %v2989_v57, 5  ;;  %v5505_v0 = vld [vmem:[%s6343_s18 + $0x370] sm:$0xff]   ;;  %v4665_v57 = vld [vmem:[%s6339_s17 + $0x148] sm:$0x11] }
 0x140   : > { %2389 = vmatmul.mubr.bf16.gmra.mxu0 %v4510_v35  ;;  %v2171_v21 = vrot.slane %v2169_v12, 5  ;;  %v2951_v35 = vrot.slane %v2950_v24, 4  ;;  %v5515_v24 = vld [vmem:[%s6343_s18 + $0x3a8] sm:$0xff]  }
 0x141   : > { %2642 = vmatmul.mubr.bf16.gmra.mxu1 %v4574_v22  ;;  %5103 = vmatpush3.bf16.msra.mxu0 %v5472_v27  ;;  %v2185_v22 = vrot.slane %v2183_v13, 5  ;;  %v2965_v37 = vrot.slane %v2964_v25, 4  ;;  %v4667_v13 = vld [vmem:[%s6339_s17 + $0x158] sm:$0x11] }
 0x142   : > { %5143 = vmatpush3.bf16.msra.mxu1 %v5473_v29  ;;  %5104 = vmatprep.subr.bf16.mxu0 %v5474_v32  ;;  %v2172_v26 = vsel %vm6449_vm3, %v6478_v9, %v2171_v21  ;;  %v2978_v29 = vor.u32 %v2977_v7, %v2974_v4  ;;  %v5495_v9 = vld [vmem:[%s6343_s18 + $0x2c0] sm:$0xff]   ;;  %v5506_v4 = vld [vmem:[%s6343_s18 + $0x3f0] sm:$0xff]  }
 0x143   : > { %5144 = vmatprep.subr.bf16.mxu1 %v5475_v36  ;;  %2649 = vmatprep.mubr.bf16.mxu1 %v4577_v52  ;;  %v2186_v27 = vsel %vm6449_vm3, %v6483_v11, %v2185_v22  ;;  %v5496_v11 = vld [vmem:[%s6343_s18 + $0x200] sm:$0xff]   ;;  %v2967_v52 = vshll.u32 %v4663_v49, 16  ;;  %v5508_v7 = vld [vmem:[%s6343_s18 + $0x3b0] sm:$0xff]   ;;  %v5514_v22 = vld [vmem:[%s6343_s18 + $0x328] sm:$0xff]  }
 0x144   : > { %2396 = vmatprep.mubr.bf16.mxu0 %v4513_v1  ;;  %v4515_v32 = vcombine.high %v2172_v26, %v2186_v27  ;;  %v4514_v34 = vcombine.low %v2172_v26, %v2186_v27  ;;  %v5497_v36 = vld [vmem:[%s6343_s18 + $0x280] sm:$0xff]   ;;  %v3005_v1 = vrot.slane %v3003_v43, 5  ;;  %v5523_v43 = vld [vmem:[%s6343_s18 + $0x358] sm:$0xff]  }
 0x145   : > { %5105 = vmatpush3.bf16.msra.mxu0 %v5476_v38  ;;  %v6580_v38 = vrot.slane %v2978_v29, 4  ;;  %v5516_v27 = vld [vmem:[%s6343_s18 + $0x360] sm:$0xff]   ;;  %v5525_v49 = vld [vmem:[%s6343_s18 + $0x318] sm:$0xff]  }
 0x146   : > { %5145 = vmatpush3.bf16.msra.mxu1 %v5477_v40  ;;  %5106 = vmatprep.subr.bf16.mxu0 %v5480_v51  ;;  %v2992_v40 = vor.u32 %v2991_v31, %v2988_v20  ;;  %v2953_v51 = vshll.u32 %v4661_v48, 16  ;;  %v5513_v20 = vld [vmem:[%s6343_s18 + $0x3e8] sm:$0xff]   ;;  %v3006_v21 = vor.u32 %v3005_v1, %v6583_v42  ;;  %v5531_v1 = vld [vmem:[%s6339_s17 + $0x214] ss:$16 sps:$4 sm:$0xff]  }
 0x147   : > { %5146 = vmatprep.subr.bf16.mxu1 %v5481_v58  ;;  %v2969_v58 = vrot.slane %v2967_v52, 5  ;;  %v5522_v42 = vld [vmem:[%s6339_s17 + $0x1f0] ss:$16 sps:$4 sm:$0xff]  }
 0x148   : > { %2397 = vmatmul.mubr.bf16.gmra.mxu0 %v4512_v2  ;;  %v2955_v56 = vrot.slane %v2953_v51, 5 }
 0x149   : > { %2650 = vmatmul.mubr.bf16.gmra.mxu1 %v4576_v54  ;;  %5107 = vmatpush3.bf16.msra.mxu0 %v5482_v59  ;;  %v5501_v54 = vld [vmem:[%s6343_s18 + $0x378] sm:$0xff]   ;;  %v2993_v59 = vrot.slane %v2992_v40, 4 }
 0x14a   : > { %5147 = vmatpush3.bf16.msra.mxu1 %v5483_v62  ;;  %5108 = vmatprep.subr.bf16.mxu0 %v5484_v3  ;;  %v2956_v61 = vsel %vm6449_vm3, %v2951_v35, %v2955_v56  ;;  %v2970_v62 = vsel %vm6449_vm3, %v2965_v37, %v2969_v58  ;;  %v3042_v35 = vshrl.u32 %v6556_v15, 16  ;;  %v4669_v37 = vld [vmem:[%s6339_s17 + $0x168] sm:$0x11] }
 0x14b   : > { %5148 = vmatprep.subr.bf16.mxu1 %v5485_v63  ;;  %2657 = vmatprep.mubr.bf16.mxu1 %v4579_v16  ;;  %v4708_v2 = vcombine.low %v2956_v61, %v2970_v62  ;;  %v4709_v3 = vcombine.high %v2956_v61, %v2970_v62  ;;  %v3016_v63 = vrot.slane %v3014_v44, 4  ;;  %v2981_v16 = vshll.u32 %v4665_v57, 16  ;;  %v5529_v61 = vld [vmem:[%s6343_s18 + $0x310] sm:$0xff]   ;;  %v5535_v57 = vld [vmem:[%s6343_s18 + $0x3c8] sm:$0xff]  }
 0x14c   : > { %2404 = vmatprep.mubr.bf16.mxu0 %v4515_v32  ;;  %v5517_v32 = vld [vmem:[%s6343_s18 + $0x3e0] sm:$0xff]   ;;  %v3009_v40 = vshll.u32 %v4669_v37, 16 }
 0x14d   : > { %5109 = vmatpush3.bf16.msra.mxu0 %v5486_v5  ;;  %v3017_v5 = vshll.u32 %v6528_v50, 16  ;;  %v2995_v50 = vshll.u32 %v4667_v13, 16  ;;  %v5536_v13 = vld [vmem:[%s6343_s18 + $0x308] sm:$0xff]  }
 0x14e   : > { %5149 = vmatpush3.bf16.msra.mxu1 %v5487_v8  ;;  %5110 = vmatprep.subr.bf16.mxu0 %v5490_v19  ;;  %v3028_v8 = vshrl.u32 %v6553_v14, 16  ;;  %v5512_v19 = vld [vmem:[%s6343_s18 + $0x368] sm:$0xff]   ;;  %v2983_v14 = vrot.slane %v2981_v16, 5  ;;  %v3011_v48 = vrot.slane %v3009_v40, 5 }
 0x14f   : > { %5150 = vmatprep.subr.bf16.mxu1 %v5491_v18  ;;  %v3019_v12 = vrot.slane %v3017_v5, 5  ;;  %v5533_v5 = vld [vmem:[%s6339_s17 + $0x210] ss:$16 sps:$4 sm:$0xff]  }
 0x150   : > { %2405 = vmatmul.mubr.bf16.gmra.mxu0 %v4514_v34  ;;  %v2984_v25 = vsel %vm6449_vm3, %v6580_v38, %v2983_v14  ;;  %v3030_v33 = vrot.slane %v3028_v8, 4  ;;  %v3045_v38 = vshll.u32 %v6556_v15, 16  ;;  %v5526_v15 = vld [vmem:[%s6343_s18 + $0x398] sm:$0xff]   ;;  %v5539_v14 = vld [vmem:[%s6343_s18 + $0x3c0] sm:$0xff]   ;;  %v5556_v40 = vld [vmem:[%s6343_s18 + $0x468] sm:$0xff]  }
 0x151   : > { %2658 = vmatmul.mubr.bf16.gmra.mxu1 %v4578_v17  ;;  %5111 = vmatpush3.bf16.msra.mxu0 %v5492_v23  ;;  %v5511_v17 = vld [vmem:[%s6339_s17 + $0x1d0] ss:$16 sps:$4 sm:$0xff]   ;;  %v3020_v18 = vor.u32 %v3019_v12, %v3016_v63  ;;  %v2997_v23 = vrot.slane %v2995_v50, 5  ;;  %v4675_v63 = vld [vmem:[%s6339_s17 + $0x198] sm:$0x11] }
 0x152   : > { %5151 = vmatpush3.bf16.msra.mxu1 %v5493_v28  ;;  %5112 = vmatprep.subr.bf16.mxu0 %v5494_v30  ;;  %v3007_v28 = vrot.slane %v3006_v21, 4  ;;  %v5518_v30 = vld [vmem:[%s6343_s18 + $0x320] sm:$0xff]   ;;  %v3047_v62 = vrot.slane %v3045_v38, 5 }
 0x153   : > { %5152 = vmatprep.subr.bf16.mxu1 %v5495_v9  ;;  %2886 = vmatprep.mubr.bf16.mxu0 %v5500_v39  ;;  %v2998_v26 = vsel %vm6449_vm3, %v2993_v59, %v2997_v23  ;;  %v3021_v34 = vrot.slane %v3020_v18, 4  ;;  %v5519_v9 = vld [vmem:[%s6343_s18 + $0x3a0] sm:$0xff]   ;;  %v4671_v39 = vld [vmem:[%s6339_s17 + $0x178] sm:$0x11]  ;;  %v4732_v23 = vld [vmem:[%s6339_s17 + $0x10] sm:$0xff] }
 0x154   : > { %3248 = vmatprep.mubr.bf16.mxu1 %v4709_v3  ;;  %v4711_v29 = vcombine.high %v2984_v25, %v2998_v26  ;;  %v4710_v31 = vcombine.low %v2984_v25, %v2998_v26  ;;  %v3023_v44 = vshll.u32 %v4671_v39, 16  ;;  %v3012_v52 = vsel %vm6449_vm3, %v3007_v28, %v3011_v48  ;;  %v5528_v59 = vld [vmem:[%s6343_s18 + $0x3d0] sm:$0xff]   ;;  %v5538_v50 = vld [vmem:[%s6343_s18 + $0x340] sm:$0xff]  }
 0x155   : > { %5113 = vmatpush3.bf16.msra.mxu0 %v5496_v11  ;;  %v3033_v11 = vrot.slane %v3031_v53, 5  ;;  %v3051_v53 = vshll.u32 %v4675_v63, 16  ;;  %v5541_v18 = vld [vmem:[%s6343_s18 + $0x380] sm:$0xff]  }
 0x156   : > { %5153 = vmatpush3.bf16.msra.mxu1 %v5497_v36  ;;  %5178 = vmatprep.subr.bf16.mxu0 %v5501_v54  ;;  %v5520_v36 = vld [vmem:[%s6339_s17 + $0x1f4] ss:$16 sps:$4 sm:$0xff]   ;;  %v3025_v51 = vrot.slane %v3023_v44, 5  ;;  %v5544_v28 = vld [vmem:[%s6339_s17 + $0xa0] ss:$16 sps:$4 sm:$0xff]  }
 0x157   : > { %5218 = vmatprep.subr.bf16.mxu1 %v5502_v55  ;;  %v5527_v55 = vld [vmem:[%s6343_s18 + $0x350] sm:$0xff]   ;;  %v3034_v56 = vor.u32 %v3033_v11, %v3030_v33  ;;  %v3053_v12 = vrot.slane %v3051_v53, 5  ;;  %v3816_v33 = vshll.u32 %v4732_v23, 16  ;;  %v6667_v11 = vld [vmem:[%s6339_s17 + $0x40] sm:$0xff] }
 0x158   : > { %2887 = vmatmul.mubr.bf16.vlgmr.msra.gmra.mxu0 %v5498_v47  ;;  %v5524_v47 = vld [vmem:[%s6343_s18 + $0x3d8] sm:$0xff]   ;;  %v3026_v54 = vsel %vm6449_vm3, %v3021_v34, %v3025_v51  ;;  %v5549_v34 = vld [vmem:[%s6343_s18 + $0x470] sm:$0xff]  }
 0x159   : > { %5179 = vmatpush3.bf16.msra.mxu0 %v5503_v46  ;;  %3249 = vmatmul.mubr.bf16.vlgmr.msra.gmra.mxu1 %v4708_v2  ;;  %v4713_v58 = vcombine.high %v3012_v52, %v3026_v54  ;;  %v4712_v46 = vcombine.low %v3012_v52, %v3026_v54  ;;  %v4673_v2 = vld [vmem:[%s6339_s17 + $0x188] sm:$0x11]  ;;  %v3035_v3 = vrot.slane %v3034_v56, 4  ;;  %v3818_v44 = vrot.slane %v3816_v33, 5  ;;  %v4736_v51 = vld [vmem:[%s6339_s17 + $0x50] sm:$0xff] }
 0x15a   : > { %5180 = vmatprep.subr.bf16.mxu0 %v5505_v0  ;;  %5219 = vmatpush3.bf16.msra.mxu1 %v5504_v60  ;;  %v3044_v60 = vrot.slane %v3042_v35, 4  ;;  %v5530_v0 = vld [vmem:[%s6343_s18 + $0x390] sm:$0xff]  }
 0x15b   : > { %5220 = vmatprep.subr.bf16.mxu1 %v5506_v4  ;;  %2894 = vmatprep.mubr.bf16.mxu0 %v5509_v10 }
 0x15c   : > { %3256 = vmatprep.mubr.bf16.mxu1 %v4711_v29  ;;  %v3048_v4 = vor.u32 %v3047_v62, %v3044_v60  ;;  %v5547_v29 = vld [vmem:[%s6343_s18 + $0x478] sm:$0xff]   ;;  %v3869_v60 = vshrl.u32 %v4736_v51, 16 }
 0x15d   : > { %5181 = vmatpush3.bf16.msra.mxu0 %v5507_v6  ;;  %v3037_v6 = vshll.u32 %v4673_v2, 16  ;;  %v5565_v62 = vld [vmem:[%s6343_s18 + $0x458] sm:$0xff]  }
 0x15e   : > { %5182 = vmatprep.subr.bf16.mxu0 %v5512_v19  ;;  %5221 = vmatpush3.bf16.msra.mxu1 %v5508_v7  ;;  %v5534_v7 = vld [vmem:[%s6343_s18 + $0x348] sm:$0xff]   ;;  %v3049_v8 = vrot.slane %v3048_v4, 4  ;;  %v3871_v63 = vrot.slane %v3869_v60, 4 }
 0x15f   : > { %5222 = vmatprep.subr.bf16.mxu1 %v5513_v20  ;;  %v3039_v10 = vrot.slane %v3037_v6, 5  ;;  %v5567_v6 = vld [vmem:[%s6343_s18 + $0x450] sm:$0xff]  }
 0x160   : > { %2895 = vmatmul.mubr.bf16.gmra.mxu0 %v5511_v17  ;;  %v5537_v17 = vld [vmem:[%s6343_s18 + $0x388] sm:$0xff]   ;;  %v3054_v19 = vsel %vm6449_vm3, %v3049_v8, %v3053_v12  ;;  %v6688_v8 = vld [vmem:[%s6339_s17 + $0x80] sm:$0xff] }
 0x161   : > { %5183 = vmatpush3.bf16.msra.mxu0 %v5514_v22  ;;  %3257 = vmatmul.mubr.bf16.gmra.mxu1 %v4710_v31  ;;  %v3040_v16 = vsel %vm6449_vm3, %v3035_v3, %v3039_v10  ;;  %v5540_v22 = vld [vmem:[%s6343_s18 + $0x300] sm:$0xff]   ;;  %v5548_v31 = vld [vmem:[%s6343_s18 + $0x438] sm:$0xff]  }
 0x162   : > { %5184 = vmatprep.subr.bf16.mxu0 %v5516_v27  ;;  %5223 = vmatpush3.bf16.msra.mxu1 %v5515_v24  ;;  %v4715_v20 = vcombine.high %v3040_v16, %v3054_v19  ;;  %v4714_v21 = vcombine.low %v3040_v16, %v3054_v19  ;;  %v4733_v24 = vld [vmem:[%s6339_s17 + $0x20] sm:$0xff]  ;;  %v3858_v19 = vshll.u32 %v6667_v11, 16 }
 0x163   : > { %5224 = vmatprep.subr.bf16.mxu1 %v5517_v32  ;;  %2902 = vmatprep.mubr.bf16.mxu0 %v5520_v36  ;;  %v4772_v25 = vcombine.low %v4732_v23, %v4733_v24  ;;  %v4773_v26 = vcombine.high %v4732_v23, %v4733_v24  ;;  %v5546_v27 = vld [vmem:[%s6339_s17 + $0xa4] ss:$16 sps:$4 sm:$0xff]   ;;  %v3813_v32 = vshrl.u32 %v4732_v23, 16  ;;  %v3827_v38 = vshrl.u32 %v4733_v24, 16  ;;  %v5566_v3 = vld [vmem:[%s6343_s18 + $0x418] sm:$0xff]   ;;  %v5574_v23 = vld [vmem:[%s6343_s18 + $0x448] sm:$0xff]  }
 0x164   : > { %3264 = vmatprep.mubr.bf16.mxu1 %v4713_v58  ;;  %v5552_v36 = vld [vmem:[%s6339_s17 + $0xc4] ss:$16 sps:$4 sm:$0xff]   ;;  %v5564_v12 = vld [vmem:[%s6339_s17 + $0xe0] ss:$16 sps:$4 sm:$0xff]  }
 0x165   : > { %5185 = vmatpush3.bf16.msra.mxu0 %v5518_v30  ;;  %v5550_v30 = vld [vmem:[%s6343_s18 + $0x430] sm:$0xff]   ;;  %v3815_v37 = vrot.slane %v3813_v32, 4  ;;  %v3829_v52 = vrot.slane %v3827_v38, 4  ;;  %v4863_v32 = vld [vmem:[%s6339_s17 + $0x28] sm:$0x11] }
 0x166   : > { %5225 = vmatpush3.bf16.msra.mxu1 %v5519_v9  ;;  %5186 = vmatprep.subr.bf16.mxu0 %v5523_v43  ;;  %v4734_v9 = vld [vmem:[%s6339_s17 + $0x30] sm:$0xff] }
 0x167   : > { %5226 = vmatprep.subr.bf16.mxu1 %v5524_v47  ;;  %v4775_v35 = vcombine.high %v4734_v9, %v6667_v11  ;;  %v4774_v39 = vcombine.low %v4734_v9, %v6667_v11  ;;  %v5557_v43 = vld [vmem:[%s6343_s18 + $0x428] sm:$0xff]   ;;  %v5558_v47 = vld [vmem:[%s6343_s18 + $0x460] sm:$0xff]   ;;  %v3841_v48 = vshrl.u32 %v4734_v9, 16 }
 0x168   : > { %2903 = vmatmul.mubr.bf16.gmra.mxu0 %v5522_v42  ;;  %v3830_v42 = vshll.u32 %v4733_v24, 16  ;;  %v5561_v58 = vld [vmem:[%s6339_s17 + $0xe4] ss:$16 sps:$4 sm:$0xff]  }
 0x169   : > { %5187 = vmatpush3.bf16.msra.mxu0 %v5525_v49  ;;  %3265 = vmatmul.mubr.bf16.gmra.mxu1 %v4712_v46  ;;  %v5555_v49 = vld [vmem:[%s6339_s17 + $0xc0] ss:$16 sps:$4 sm:$0xff]   ;;  %v3843_v46 = vrot.slane %v3841_v48, 4 }
 0x16a   : > { %5227 = vmatpush3.bf16.msra.mxu1 %v5526_v15  ;;  %5188 = vmatprep.subr.bf16.mxu0 %v5527_v55  ;;  %v4737_v15 = vld [vmem:[%s6339_s17 + $0x60] sm:$0xff]  ;;  %v3832_v54 = vrot.slane %v3830_v42, 5 }
 0x16b   : > { %5228 = vmatprep.subr.bf16.mxu1 %v5528_v59  ;;  %2910 = vmatprep.mubr.bf16.mxu0 %v5531_v1  ;;  %v5559_v55 = vld [vmem:[%s6343_s18 + $0x420] sm:$0xff]   ;;  %v4777_v56 = vcombine.high %v4736_v51, %v4737_v15  ;;  %v3844_v59 = vshll.u32 %v4734_v9, 16  ;;  %v3872_v1 = vshll.u32 %v4736_v51, 16  ;;  %v4776_v2 = vcombine.low %v4736_v51, %v4737_v15 }
 0x16c   : > { %3272 = vmatprep.mubr.bf16.mxu1 %v4715_v20  ;;  %v3833_v4 = vor.u32 %v3832_v54, %v3829_v52  ;;  %v3883_v53 = vshrl.u32 %v4737_v15, 16  ;;  %v3886_v10 = vshll.u32 %v4737_v15, 16  ;;  %v3836_v9 = vshll.u32 %v4863_v32, 16  ;;  %v5573_v48 = vld [vmem:[%s6339_s17 + $0x100] ss:$16 sps:$4 sm:$0xff]  }
 0x16d   : > { %5189 = vmatpush3.bf16.msra.mxu0 %v5529_v61  ;;  %v3855_v61 = vshrl.u32 %v6667_v11, 16  ;;  %v4871_v11 = vld [vmem:[%s6339_s17 + $0x68] sm:$0x11] }
 0x16e   : > { %5229 = vmatpush3.bf16.msra.mxu1 %v5530_v0  ;;  %5190 = vmatprep.subr.bf16.mxu0 %v5534_v7  ;;  %v3819_v0 = vor.u32 %v3818_v44, %v3815_v37  ;;  %v6685_v7 = vld [vmem:[%s6339_s17 + $0x70] sm:$0xff]  ;;  %v3834_v20 = vrot.slane %v3833_v4, 4  ;;  %v3888_v24 = vrot.slane %v3886_v10, 5  ;;  %v3892_v38 = vshll.u32 %v4871_v11, 16  ;;  %v5577_v54 = vld [vmem:[%s6343_s18 + $0x400] sm:$0xff]  }
 0x16f   : > { %5230 = vmatprep.subr.bf16.mxu1 %v5535_v57  ;;  %v3846_v57 = vrot.slane %v3844_v59, 5  ;;  %v3897_v52 = vshrl.u32 %v6685_v7, 16  ;;  %v4873_v59 = vld [vmem:[%s6339_s17 + $0x78] sm:$0x11] }
 0x170   : > { %2911 = vmatmul.mubr.bf16.gmra.mxu0 %v5533_v5  ;;  %v3874_v5 = vrot.slane %v3872_v1, 5  ;;  %v3820_v16 = vrot.slane %v3819_v0, 4  ;;  %v4875_v0 = vld [vmem:[%s6339_s17 + $0x88] sm:$0x11] }
 0x171   : > { %5191 = vmatpush3.bf16.msra.mxu0 %v5536_v13  ;;  %3273 = vmatmul.mubr.bf16.gmra.mxu1 %v4714_v21  ;;  %v4779_v13 = vcombine.high %v6685_v7, %v6688_v8  ;;  %v3885_v21 = vrot.slane %v3883_v53, 4  ;;  %v3911_v53 = vshrl.u32 %v6688_v8, 16 }
 0x172   : > { %5231 = vmatpush3.bf16.msra.mxu1 %v5537_v17  ;;  %5192 = vmatprep.subr.bf16.mxu0 %v5538_v50  ;;  %v3875_v17 = vor.u32 %v3874_v5, %v3871_v63  ;;  %v5570_v50 = vld [vmem:[%s6339_s17 + $0x104] ss:$16 sps:$4 sm:$0xff]   ;;  %v3899_v63 = vrot.slane %v3897_v52, 4  ;;  %v3906_v5 = vshll.u32 %v4873_v59, 16 }
 0x173   : > { %5232 = vmatprep.subr.bf16.mxu1 %v5539_v14  ;;  %3502 = vmatprep.mubr.bf16.mxu0 %v4773_v26  ;;  %v3847_v14 = vor.u32 %v3846_v57, %v3843_v46  ;;  %v3914_v57 = vshll.u32 %v6688_v8, 16 }
 0x174   : > { %3755 = vmatprep.mubr.bf16.mxu1 %v5546_v27  ;;  %v3876_v26 = vrot.slane %v3875_v17, 4  ;;  %v3913_v17 = vrot.slane %v3911_v53, 4 }
 0x175   : > { %5193 = vmatpush3.bf16.msra.mxu0 %v5540_v22  ;;  %v5568_v22 = vld [vmem:[%s6343_s18 + $0x410] sm:$0xff]   ;;  %v3848_v27 = vrot.slane %v3847_v14, 4 }
 0x176   : > { %5233 = vmatpush3.bf16.msra.mxu1 %v5541_v18  ;;  %5258 = vmatprep.subr.bf16.mxu0 %v5547_v29  ;;  %v3857_v18 = vrot.slane %v3855_v61, 4 }
 0x177   : > { %5298 = vmatprep.subr.bf16.mxu1 %v5547_v29  ;;  %v5576_v29 = vld [vmem:[%s6343_s18 + $0x440] sm:$0xff]  }
 0x178   : > { %3503 = vmatmul.mubr.bf16.vlgmr.msra.gmra.mxu0 %v4772_v25  ;;  %v5575_v25 = vld [vmem:[%s6343_s18 + $0x408] sm:$0xff]  }
 0x179   : > { %5259 = vmatpush3.bf16.msra.mxu0 %v5548_v31  ;;  %3756 = vmatmul.mubr.bf16.vlgmr.msra.gmra.mxu1 %v5544_v28  ;;  %v4778_v28 = vcombine.low %v6685_v7, %v6688_v8 }
 0x17a   : > { %5260 = vmatprep.subr.bf16.mxu0 %v5549_v34  ;;  %5306 = vmatpush3.bf16.msra.mxu1 %v5548_v31  ;;  %v4861_v31 = vld [vmem:[%s6339_s17 + $0x18] sm:$0x11] }
 0x17b   : > { %5299 = vmatprep.subr.bf16.mxu1 %v5549_v34  ;;  %3510 = vmatprep.mubr.bf16.mxu0 %v4775_v35  ;;  %v4869_v34 = vld [vmem:[%s6339_s17 + $0x58] sm:$0x11]  ;;  %v3822_v33 = vshll.u32 %v4861_v31, 16 }
 0x17c   : > { %3763 = vmatprep.mubr.bf16.mxu1 %v5552_v36  ;;  %v3878_v35 = vshll.u32 %v4869_v34, 16  ;;  %v3860_v36 = vrot.slane %v3858_v19, 5  ;;  %v3916_v19 = vrot.slane %v3914_v57, 5 }
 0x17d   : > { %5261 = vmatpush3.bf16.msra.mxu0 %v5550_v30  ;;  %v3824_v42 = vrot.slane %v3822_v33, 5 }
 0x17e   : > { %5262 = vmatprep.subr.bf16.mxu0 %v5556_v40  ;;  %5307 = vmatpush3.bf16.msra.mxu1 %v5550_v30  ;;  %v3889_v30 = vor.u32 %v3888_v24, %v3885_v21  ;;  %v3880_v44 = vrot.slane %v3878_v35, 5  ;;  %v3861_v51 = vor.u32 %v3860_v36, %v3857_v18  ;;  %v3917_v21 = vor.u32 %v3916_v19, %v3913_v17 }
 0x17f   : > { %5300 = vmatprep.subr.bf16.mxu1 %v5556_v40  ;;  %v4867_v40 = vld [vmem:[%s6339_s17 + $0x48] sm:$0x11] }
 0x180   : > { %3511 = vmatmul.mubr.bf16.gmra.mxu0 %v4774_v39  ;;  %v3890_v37 = vrot.slane %v3889_v30, 4  ;;  %v4865_v39 = vld [vmem:[%s6339_s17 + $0x38] sm:$0x11]  ;;  %v3864_v15 = vshll.u32 %v4867_v40, 16  ;;  %v3918_v18 = vrot.slane %v3917_v21, 4 }
 0x181   : > { %5263 = vmatpush3.bf16.msra.mxu0 %v5557_v43  ;;  %3518 = vmatprep.mubr.bf16.mxu0 %v4777_v56 }
 0x182   : > { %5264 = vmatprep.subr.bf16.mxu0 %v5558_v47  ;;  %3764 = vmatmul.mubr.bf16.gmra.mxu1 %v5555_v49  ;;  %v3894_v49 = vrot.slane %v3892_v38, 5  ;;  %v3866_v4 = vrot.slane %v3864_v15, 5 }
 0x183   : > { %5308 = vmatpush3.bf16.msra.mxu1 %v5557_v43  ;;  %3771 = vmatprep.mubr.bf16.mxu1 %v5561_v58  ;;  %v3838_v43 = vrot.slane %v3836_v9, 5  ;;  %v3881_v58 = vsel %vm6449_vm3, %v3876_v26, %v3880_v44 }
 0x184   : > { %5301 = vmatprep.subr.bf16.mxu1 %v5558_v47  ;;  %v3850_v47 = vshll.u32 %v4865_v39, 16  ;;  %v3895_v61 = vsel %vm6449_vm3, %v3890_v37, %v3894_v49 }
 0x185   : > { %5265 = vmatpush3.bf16.msra.mxu0 %v5559_v55  ;;  %v3839_v56 = vsel %vm6449_vm3, %v3834_v20, %v3838_v43  ;;  %v3908_v20 = vrot.slane %v3906_v5, 5 }
 0x186   : > { %5266 = vmatprep.subr.bf16.mxu0 %v5565_v62  ;;  %v3852_v46 = vrot.slane %v3850_v47, 5 }
 0x187   : > { %5309 = vmatpush3.bf16.msra.mxu1 %v5559_v55  ;;  %v3825_v55 = vsel %vm6449_vm3, %v3820_v16, %v3824_v42 }
 0x188   : > { %3519 = vmatmul.mubr.bf16.gmra.mxu0 %v4776_v2  ;;  %5302 = vmatprep.subr.bf16.mxu1 %v5565_v62  ;;  %v4909_v60 = vcombine.high %v3825_v55, %v3839_v56  ;;  %v3862_v62 = vrot.slane %v3861_v51, 4  ;;  %v4908_v1 = vcombine.low %v3825_v55, %v3839_v56  ;;  %v4913_v2 = vcombine.high %v3881_v58, %v3895_v61 }
 0x189   : > { %5267 = vmatpush3.bf16.msra.mxu0 %v5566_v3  ;;  %3526 = vmatprep.mubr.bf16.mxu0 %v4779_v13 }
 0x18a   : > { %5268 = vmatprep.subr.bf16.mxu0 %v5567_v6  ;;  %3772 = vmatmul.mubr.bf16.gmra.mxu1 %v5564_v12  ;;  %v3867_v10 = vsel %vm6449_vm3, %v3862_v62, %v3866_v4  ;;  %v3920_v12 = vshll.u32 %v4875_v0, 16 }
 0x18b   : > { %5310 = vmatpush3.bf16.msra.mxu1 %v5566_v3  ;;  %3779 = vmatprep.mubr.bf16.mxu1 %v5570_v50  ;;  %v3853_v3 = vsel %vm6449_vm3, %v3848_v27, %v3852_v46  ;;  %v4912_v50 = vcombine.low %v3881_v58, %v3895_v61 }
 0x18c   : > { %5303 = vmatprep.subr.bf16.mxu1 %v5567_v6  ;;  %v3900_v6 = vshll.u32 %v6685_v7, 16  ;;  %v4911_v13 = vcombine.high %v3853_v3, %v3867_v10  ;;  %v3922_v14 = vrot.slane %v3920_v12, 5 }
 0x18d   : > { %5269 = vmatpush3.bf16.msra.mxu0 %v5568_v22 }
 0x18e   : > { %5270 = vmatprep.subr.bf16.mxu0 %v5574_v23  ;;  %v3902_v16 = vrot.slane %v3900_v6, 5  ;;  %v3923_v24 = vsel %vm6449_vm3, %v3918_v18, %v3922_v14 }
 0x18f   : > { %5311 = vmatpush3.bf16.msra.mxu1 %v5568_v22 }
 0x190   : > { %3527 = vmatmul.mubr.bf16.gmra.mxu0 %v4778_v28  ;;  %5304 = vmatprep.subr.bf16.mxu1 %v5574_v23  ;;  %v3903_v7 = vor.u32 %v3902_v16, %v3899_v63  ;;  %v4910_v23 = vcombine.low %v3853_v3, %v3867_v10 }
 0x191   : > { %5271 = vmatpush3.bf16.msra.mxu0 %v5575_v25  ;;  %4117 = vmatprep.mubr.bf16.mxu0 %v4909_v60 }
 0x192   : > { %5272 = vmatprep.subr.bf16.mxu0 %v5576_v29  ;;  %3780 = vmatmul.mubr.bf16.gmra.mxu1 %v5573_v48  ;;  %v3904_v22 = vrot.slane %v3903_v7, 4 }
 0x193   : > { %5312 = vmatpush3.bf16.msra.mxu1 %v5575_v25  ;;  %4133 = vmatprep.mubr.bf16.mxu1 %v4913_v2 }
 0x194   : > { %5305 = vmatprep.subr.bf16.mxu1 %v5576_v29  ;;  %v3909_v8 = vsel %vm6449_vm3, %v3904_v22, %v3908_v20 }
 0x195   : > { %5273 = vmatpush3.bf16.msra.mxu0 %v5577_v54  ;;  %v4915_v25 = vcombine.high %v3909_v8, %v3923_v24  ;;  %v4914_v26 = vcombine.low %v3909_v8, %v3923_v24 }
 0x197   : > { %5313 = vmatpush3.bf16.msra.mxu1 %v5577_v54 }
 0x198   : > { %4118 = vmatmul.mubr.bf16.vlgmr.msra.gmra.mxu0 %v4908_v1 }
 0x199   : > { %4125 = vmatprep.mubr.bf16.mxu0 %v4911_v13 }
 0x19a   : > { %4134 = vmatmul.mubr.bf16.vlgmr.msra.gmra.mxu1 %v4912_v50 }
 0x19b   : > { %4141 = vmatprep.mubr.bf16.mxu1 %v4915_v25 }
 0x1a0   : > { %4126 = vmatmul.mubr.bf16.gmra.mxu0 %v4910_v23 }
 0x1a2   : > { %4142 = vmatmul.mubr.bf16.gmra.mxu1 %v4914_v26 }
 0x1d8   : > { %v4954_v27 = vpop.f32.mrf.mxu0 }
 0x1d9   : > { %v4994_v28 = vpop.f32.mrf.mxu1 }
 0x1da   : > { %v4955_v29 = vpop.f32.mrf.mxu0 }
 0x1db   : > { %v4956_v31 = vadd.f32 %v4955_v29, %v4954_v27  ;;  %v4995_v32 = vpop.f32.mrf.mxu1 }
 0x1dc   : > { %v4996_v34 = vadd.f32 %v4995_v32, %v4994_v28  ;;  %v4957_v30 = vpop.f32.mrf.mxu0 }
 0x1dd   : > { %v4997_v33 = vpop.f32.mrf.mxu1 }
 0x1de   : > { %v2026_v9 = vadd.f32 %v4996_v34, %v4956_v31  ;;  %v4958_v11 = vpop.f32.mrf.mxu0 }
 0x1df   : > { %v4959_v35 = vadd.f32 %v4958_v11, %v4957_v30  ;;  %v4998_v36 = vpop.f32.mrf.mxu1 }
 0x1e0   : > { %v4999_v37 = vadd.f32 %v4998_v36, %v4997_v33  ;;  %v4960_v45 = vpop.f32.mrf.mxu0 }
 0x1e1   : > { %v5000_v39 = vpop.f32.mrf.mxu1 }
 0x1e2   : > { %v2029_v38 = vadd.f32 %v4999_v37, %v4959_v35  ;;  %v4961_v40 = vpop.f32.mrf.mxu0 }
 0x1e3   : > { %v4962_v42 = vadd.f32 %v4961_v40, %v4960_v45  ;;  %v5001_v43 = vpop.f32.mrf.mxu1 }
 0x1e4   : > { %v4963_v44 = vpop.f32.mrf.mxu0  ;;  %v5002_v47 = vadd.f32 %v5001_v43, %v5000_v39 }
 0x1e5   : > { %v5003_v48 = vpop.f32.mrf.mxu1 }
 0x1e6   : > { %v4964_v49 = vpop.f32.mrf.mxu0  ;;  %v2034_v51 = vadd.f32 %v5002_v47, %v4962_v42 }
 0x1e7   : > { %v4965_v15 = vadd.f32 %v4964_v49, %v4963_v44  ;;  %v5004_v52 = vpop.f32.mrf.mxu1 }
 0x1e8   : > { %v5005_v54 = vadd.f32 %v5004_v52, %v5003_v48  ;;  %v4966_v55 = vpop.f32.mrf.mxu0 }
 0x1e9   : > { %v5006_v58 = vpop.f32.mrf.mxu1 }
 0x1ea   : > { %v2037_v56 = vadd.f32 %v5005_v54, %v4965_v15  ;;  %v4967_v46 = vpop.f32.mrf.mxu0 }
 0x1eb   : > { %v4968_v59 = vadd.f32 %v4967_v46, %v4966_v55  ;;  %v5007_v60 = vpop.f32.mrf.mxu1 }
 0x1ec   : > { %v4969_v61 = vpop.f32.mrf.mxu0  ;;  %v5008_v62 = vadd.f32 %v5007_v60, %v5006_v58 }
 0x1ed   : > { %v5009_v0 = vpop.f32.mrf.mxu1 }
 0x1ee   : > { %v4970_v1 = vpop.f32.mrf.mxu0  ;;  %v2042_v2 = vadd.f32 %v5008_v62, %v4968_v59 }
 0x1ef   : > { %v4971_v3 = vadd.f32 %v4970_v1, %v4969_v61  ;;  %v5010_v4 = vpop.f32.mrf.mxu1 }
 0x1f0   : > { %v5011_v63 = vadd.f32 %v5010_v4, %v5009_v0  ;;  %v4972_v6 = vpop.f32.mrf.mxu0 }
 0x1f1   : > { %v5012_v53 = vpop.f32.mrf.mxu1 }
 0x1f2   : > { %v6731_v5 = vadd.f32 %v5011_v63, %v4971_v3  ;;  %v4973_v10 = vpop.f32.mrf.mxu0 }
 0x1f3   : > { %v4974_v57 = vadd.f32 %v4973_v10, %v4972_v6  ;;  %v5013_v12 = vpop.f32.mrf.mxu1 }
 0x1f4   : > { %v4975_v13 = vpop.f32.mrf.mxu0  ;;  %v5014_v16 = vadd.f32 %v5013_v12, %v5012_v53 }
 0x1f5   : > { %v5015_v17 = vpop.f32.mrf.mxu1 }
 0x1f6   : > { %v4976_v19 = vpop.f32.mrf.mxu0  ;;  %v6733_v50 = vadd.f32 %v5014_v16, %v4974_v57 }
 0x1f7   : > { %v4977_v7 = vadd.f32 %v4976_v19, %v4975_v13  ;;  %v5016_v20 = vpop.f32.mrf.mxu1 }
 0x1f8   : > { %v5017_v21 = vadd.f32 %v5016_v20, %v5015_v17  ;;  %v5034_v23 = vpop.f32.mrf.mxu0 }
 0x1f9   : > { %v5074_v22 = vpop.f32.mrf.mxu1 }
 0x1fa   : > { %v6735_v14 = vadd.f32 %v5017_v21, %v4977_v7  ;;  %v5035_v25 = vpop.f32.mrf.mxu0 }
 0x1fb   : > { %v5075_v18 = vpop.f32.mrf.mxu1  ;;  %v5036_v27 = vadd.f32 %v5035_v25, %v5034_v23 }
 0x1fc   : > { %v5076_v8 = vadd.f32 %v5075_v18, %v5074_v22  ;;  %v5037_v29 = vpop.f32.mrf.mxu0 }
 0x1fd   : > { %v5077_v24 = vpop.f32.mrf.mxu1  ;;  %v2413_v31 = vadd.f32 %v5036_v27, %v2026_v9 }
 0x1fe   : > { %v5038_v34 = vpop.f32.mrf.mxu0 }
 0x1ff   : > { %v5078_v26 = vpop.f32.mrf.mxu1  ;;  %v6737_v30 = vadd.f32 %v5076_v8, %v2413_v31  ;;  %v5039_v33 = vadd.f32 %v5038_v34, %v5037_v29 }
 0x200   : > { %v5079_v28 = vadd.f32 %v5078_v26, %v5077_v24  ;;  %v5040_v45 = vpop.f32.mrf.mxu0 }
 0x201   : > { %v5080_v32 = vpop.f32.mrf.mxu1  ;;  %v2414_v36 = vadd.f32 %v5039_v33, %v2029_v38 }
 0x202   : > { %v5041_v42 = vpop.f32.mrf.mxu0 }
 0x203   : > { %v5081_v11 = vpop.f32.mrf.mxu1  ;;  %v6739_v39 = vadd.f32 %v5079_v28, %v2414_v36  ;;  %v5042_v44 = vadd.f32 %v5041_v42, %v5040_v45 }
 0x204   : > { %v5082_v35 = vadd.f32 %v5081_v11, %v5080_v32  ;;  %v5043_v47 = vpop.f32.mrf.mxu0 }
 0x205   : > { %v5083_v37 = vpop.f32.mrf.mxu1  ;;  %v2415_v48 = vadd.f32 %v5042_v44, %v2034_v51 }
 0x206   : > { %v5044_v9 = vpop.f32.mrf.mxu0 }
 0x207   : > { %v5084_v40 = vpop.f32.mrf.mxu1  ;;  %v6741_v15 = vadd.f32 %v5082_v35, %v2415_v48  ;;  %v5045_v52 = vadd.f32 %v5044_v9, %v5043_v47 }
 0x208   : > { %v5085_v43 = vadd.f32 %v5084_v40, %v5083_v37  ;;  %v5046_v46 = vpop.f32.mrf.mxu0 }
 0x209   : > { %v5086_v49 = vpop.f32.mrf.mxu1  ;;  %v2416_v58 = vadd.f32 %v5045_v52, %v2037_v56 }
 0x20a   : > { %v5047_v60 = vpop.f32.mrf.mxu0 }
 0x20b   : > { %v5087_v54 = vpop.f32.mrf.mxu1  ;;  %v6743_v59 = vadd.f32 %v5085_v43, %v2416_v58  ;;  %v5048_v62 = vadd.f32 %v5047_v60, %v5046_v46 }
 0x20c   : > { %v5088_v55 = vadd.f32 %v5087_v54, %v5086_v49  ;;  %v5049_v1 = vpop.f32.mrf.mxu0 }
 0x20d   : > { %v5089_v38 = vpop.f32.mrf.mxu1  ;;  %v2417_v3 = vadd.f32 %v5048_v62, %v2042_v2 }
 0x20e   : > { %v5050_v51 = vpop.f32.mrf.mxu0 }
 0x20f   : > { %v5090_v61 = vpop.f32.mrf.mxu1  ;;  %v6745_v63 = vadd.f32 %v5088_v55, %v2417_v3  ;;  %v5051_v6 = vadd.f32 %v5050_v51, %v5049_v1 }
 0x210   : > { %v5091_v0 = vadd.f32 %v5090_v61, %v5089_v38  ;;  %v5052_v56 = vpop.f32.mrf.mxu0 }
 0x211   : > { %v5092_v4 = vpop.f32.mrf.mxu1  ;;  %v2418_v57 = vadd.f32 %v5051_v6, %v6731_v5 }
 0x212   : > { %v5053_v16 = vpop.f32.mrf.mxu0 }
 0x213   : > { %v5093_v53 = vpop.f32.mrf.mxu1  ;;  %v6748_v13 = vadd.f32 %v5091_v0, %v2418_v57  ;;  %v5054_v19 = vadd.f32 %v5053_v16, %v5052_v56 }
 0x214   : > { %v5094_v10 = vadd.f32 %v5093_v53, %v5092_v4  ;;  %v5055_v20 = vpop.f32.mrf.mxu0 }
 0x215   : > { %v5095_v12 = vpop.f32.mrf.mxu1  ;;  %v2419_v2 = vadd.f32 %v5054_v19, %v6733_v50 }
 0x216   : > { %v5056_v21 = vpop.f32.mrf.mxu0 }
 0x217   : > { %v5096_v17 = vpop.f32.mrf.mxu1  ;;  %v6751_v22 = vadd.f32 %v5094_v10, %v2419_v2  ;;  %v5057_v18 = vadd.f32 %v5056_v21, %v5055_v20 }
 0x218   : > { %v5097_v7 = vadd.f32 %v5096_v17, %v5095_v12  ;;  %v5114_v8 = vpop.f32.mrf.mxu0 }
 0x219   : > { %6871 = vst [vmem:[#allocation7_spill] sm:$0xff] %v6751_v22  ;;  %v2420_v23 = vadd.f32 %v5057_v18, %v6735_v14  ;;  %v5154_v25 = vpop.f32.mrf.mxu1 }
 0x21a   : > { %v5115_v24 = vpop.f32.mrf.mxu0 }
 0x21b   : > { %v6754_v5 = vadd.f32 %v5097_v7, %v2420_v23  ;;  %v5155_v27 = vpop.f32.mrf.mxu1  ;;  %v5116_v21 = vadd.f32 %v5115_v24, %v5114_v8 }
 0x21c   : > { %v5117_v26 = vpop.f32.mrf.mxu0 }
 0x21d   : > { %6872 = vst [vmem:[#allocation8_spill] sm:$0xff] %v6754_v5  ;;  %v5157_v29 = vpop.f32.mrf.mxu1 }
 0x21e   : > { %v5118_v28 = vpop.f32.mrf.mxu0 }
 0x21f   : > { %v5158_v32 = vpop.f32.mrf.mxu1 }
 0x220   : > { %v5120_v31 = vpop.f32.mrf.mxu0 }
 0x221   : > { %v5160_v50 = vpop.f32.mrf.mxu1 }
 0x222   : > { %v5121_v34 = vpop.f32.mrf.mxu0 }
 0x223   : > { %v5161_v35 = vpop.f32.mrf.mxu1 }
 0x224   : > { %v5123_v33 = vpop.f32.mrf.mxu0  ;;  %v5162_v8 = vadd.f32 %v5161_v35, %v5160_v50 }
 0x225   : > { %v6756_v37 = vpop.f32.mrf.mxu1 }
 0x226   : > { %v5124_v11 = vpop.f32.mrf.mxu0 }
 0x227   : > { %v6758_v14 = vpop.f32.mrf.mxu1  ;;  %v5125_v24 = vadd.f32 %v5124_v11, %v5123_v33 }
 0x228   : > { %v5126_v36 = vpop.f32.mrf.mxu0 }
 0x229   : > { %v5166_v43 = vpop.f32.mrf.mxu1  ;;  %v2922_v11 = vadd.f32 %v5125_v24, %v6743_v59 }
 0x22a   : > { %v5127_v45 = vpop.f32.mrf.mxu0 }
 0x22b   : > { %v5167_v44 = vpop.f32.mrf.mxu1 }
 0x22c   : > { %v5129_v40 = vpop.f32.mrf.mxu0 }
 0x22d   : > { %v5169_v48 = vpop.f32.mrf.mxu1 }
 0x22e   : > { %v5130_v42 = vpop.f32.mrf.mxu0 }
 0x22f   : > { %v5170_v9 = vpop.f32.mrf.mxu1 }
 0x230   : > { %v5132_v47 = vpop.f32.mrf.mxu0 }
 0x231   : > { %v6762_v54 = vpop.f32.mrf.mxu1 }
 0x232   : > { %v5133_v49 = vpop.f32.mrf.mxu0  ;;  %6874 = vst [vmem:[#allocation10_spill] sm:$0xff] %v6762_v54 }
 0x233   : > { %v6766_v58 = vpop.f32.mrf.mxu1 }
 0x234   : > { %v6760_v52 = vpop.f32.mrf.mxu0  ;;  %6876 = vst [vmem:[#allocation12_spill] sm:$0xff] %v6766_v58 }
 0x235   : > { %6873 = vst [vmem:[#allocation9_spill] sm:$0xff] %v6760_v52  ;;  %v6768_v46 = vpop.f32.mrf.mxu1 }
 0x236   : > { %v6764_v55 = vpop.f32.mrf.mxu0  ;;  %6877 = vst [vmem:[#allocation13_spill] sm:$0xff] %v6768_v46  ;;  %v5122_v46 = vadd.f32 %v5121_v34, %v5120_v31  ;;  %v5171_v34 = vadd.f32 %v5170_v9, %v5169_v48 }
 0x237   : > { %6875 = vst [vmem:[#allocation11_spill] sm:$0xff] %v6764_v55  ;;  %v6770_v60 = vpop.f32.mrf.mxu1  ;;  %v5159_v55 = vadd.f32 %v5158_v32, %v5157_v29 }
 0x238   : > { %v5194_v38 = vpop.f32.mrf.mxu0  ;;  %6878 = vst [vmem:[#allocation14_spill] sm:$0xff] %v6770_v60  ;;  %v5119_v60 = vadd.f32 %v5118_v28, %v5117_v26  ;;  %v2921_v52 = vadd.f32 %v5122_v46, %v6741_v15 }
 0x239   : > { %v5234_v62 = vpop.f32.mrf.mxu1 }
 0x23a   : > { %v5195_v61 = vpop.f32.mrf.mxu0  ;;  %v2920_v54 = vadd.f32 %v5119_v60, %v6739_v39  ;;  %v3283_v33 = vadd.f32 %v5162_v8, %v2921_v52 }
 0x23b   : > { %v5235_v1 = vpop.f32.mrf.mxu1 }
 0x23c   : > { %v5197_v0 = vpop.f32.mrf.mxu0  ;;  %v5236_v32 = vadd.f32 %v5235_v1, %v5234_v62  ;;  %v3282_v50 = vadd.f32 %v5159_v55, %v2920_v54  ;;  %v6889_v1 = vld [vmem:[#allocation12_spill] sm:$0xff] }
 0x23d   : > { %v5237_v4 = vpop.f32.mrf.mxu1 }
 0x23e   : > { %v5198_v3 = vpop.f32.mrf.mxu0  ;;  %v6887_v48 = vld [vmem:[#allocation11_spill] sm:$0xff] }
 0x23f   : > { %v5238_v6 = vpop.f32.mrf.mxu1 }
 0x240   : > { %v5200_v51 = vpop.f32.mrf.mxu0 }
 0x242   : > { %v5201_v53 = vpop.f32.mrf.mxu0  ;;  %v6772_v10 = vpop.f32.mrf.mxu1 }
 0x243   : > { %6879 = vst [vmem:[#allocation15_spill] sm:$0xff] %v6772_v10  ;;  %v5128_v10 = vadd.f32 %v5127_v45, %v5126_v36  ;;  %v5199_v36 = vadd.f32 %v5198_v3, %v5197_v0  ;;  %v5202_v35 = vadd.f32 %v5201_v53, %v5200_v51  ;;  %v6888_v0 = vld [vmem:[#allocation10_spill] sm:$0xff] }
 0x244   : > { %v6774_v57 = vpop.f32.mrf.mxu0  ;;  %v6776_v56 = vpop.f32.mrf.mxu1  ;;  %v5174_v3 = vadd.f32 %v6889_v1, %v6888_v0 }
 0x245   : > { %6880 = vst [vmem:[#allocation16_spill] sm:$0xff] %v6774_v57  ;;  %6881 = vst [vmem:[#allocation17_spill] sm:$0xff] %v6776_v56  ;;  %v2919_v57 = vadd.f32 %v5116_v21, %v6737_v30  ;;  %v5156_v56 = vadd.f32 %v5155_v27, %v5154_v25  ;;  %v2923_v30 = vadd.f32 %v5128_v10, %v6745_v63 }
 0x246   : > { %v6778_v12 = vpop.f32.mrf.mxu0  ;;  %v6780_v16 = vpop.f32.mrf.mxu1  ;;  %v5168_v25 = vadd.f32 %v5167_v44, %v5166_v43  ;;  %v5134_v27 = vadd.f32 %v5133_v49, %v5132_v47  ;;  %v5165_v63 = vadd.f32 %v6758_v14, %v6756_v37  ;;  %v6886_v47 = vld [vmem:[#allocation9_spill] sm:$0xff]  ;;  %v3536_v46 = vadd.f32 %v5199_v36, %v3282_v50  ;;  %v6897_v36 = vld [vmem:[#allocation14_spill] sm:$0xff] }
 0x247   : > { %6882 = vst [vmem:[#allocation18_spill] sm:$0xff] %v6778_v12  ;;  %6883 = vst [vmem:[#allocation19_spill] sm:$0xff] %v6780_v16  ;;  %v5131_v12 = vadd.f32 %v5130_v42, %v5129_v40  ;;  %v3281_v28 = vadd.f32 %v5156_v56, %v2919_v57  ;;  %v5137_v49 = vadd.f32 %v6887_v48, %v6886_v47 }
 0x248   : > { %v5206_v17 = vpop.f32.mrf.mxu0  ;;  %v6782_v19 = vpop.f32.mrf.mxu1  ;;  %v3285_v43 = vadd.f32 %v5168_v25, %v2923_v30  ;;  %v3537_v37 = vadd.f32 %v5202_v35, %v3283_v33 }
 0x249   : > { %6884 = vst [vmem:[#allocation20_spill] sm:$0xff] %v6782_v19  ;;  %v5196_v19 = vadd.f32 %v5195_v61, %v5194_v38  ;;  %v2924_v31 = vadd.f32 %v5131_v12, %v6748_v13  ;;  %v6885_v13 = vld [vmem:[#allocation7_spill] sm:$0xff]  ;;  %v5239_v38 = vadd.f32 %v5238_v6, %v5237_v4  ;;  %v3284_v4 = vadd.f32 %v5165_v63, %v2922_v11  ;;  %v6894_v6 = vld [vmem:[#allocation8_spill] sm:$0xff] }
 0x24a   : > { %v5207_v7 = vpop.f32.mrf.mxu0  ;;  %v5246_v20 = vpop.f32.mrf.mxu1  ;;  %v2925_v44 = vadd.f32 %v5134_v27, %v6885_v13  ;;  %v6890_v14 = vld [vmem:[#allocation15_spill] sm:$0xff] }
 0x24b   : > { %v3535_v29 = vadd.f32 %v5196_v19, %v3281_v28  ;;  %v5208_v15 = vadd.f32 %v5207_v7, %v5206_v17  ;;  %v3286_v9 = vadd.f32 %v5171_v34, %v2924_v31  ;;  %v2926_v19 = vadd.f32 %v5137_v49, %v6894_v6  ;;  %v6895_v28 = vld [vmem:[#allocation6_spill] sm:$0xff]  ;;  %v6896_v34 = vld [vmem:[#allocation13_spill] sm:$0xff] }
 0x24c   : > { %v5209_v2 = vpop.f32.mrf.mxu0  ;;  %v5247_v18 = vpop.f32.mrf.mxu1  ;;  %v6891_v51 = vld [vmem:[#allocation17_spill] sm:$0xff]  ;;  %v6892_v10 = vld [vmem:[#allocation16_spill] sm:$0xff]  ;;  %v3287_v31 = vadd.f32 %v5174_v3, %v2925_v44 }
 0x24d   : > { %v3788_v59 = vadd.f32 %v5236_v32, %v3535_v29  ;;  %v3539_v60 = vadd.f32 %v5208_v15, %v3285_v43  ;;  %v5248_v61 = vadd.f32 %v5247_v18, %v5246_v20  ;;  %v5242_v53 = vadd.f32 %v6891_v51, %v6890_v14 }
 0x24e   : > { %v5210_v23 = vpop.f32.mrf.mxu0  ;;  %v5249_v41 = vpop.f32.mrf.mxu1  ;;  %v6893_v57 = vld [vmem:[#allocation18_spill] sm:$0xff]  ;;  %v5177_v29 = vadd.f32 %v6897_v36, %v6896_v34  ;;  %v6898_v11 = vld [vmem:[#allocation19_spill] sm:$0xff] }
 0x24f   : > { %v5211_v54 = vadd.f32 %v5210_v23, %v5209_v2  ;;  %v5205_v56 = vadd.f32 %v6893_v57, %v6892_v10  ;;  %v3789_v2 = vadd.f32 %v5239_v38, %v3536_v46  ;;  %v3792_v24 = vadd.f32 %v5248_v61, %v3539_v60  ;;  %v4188_v38 = vld [vmem:[%s6345_s19] sm:$0xff]  ;;  %v4189_v57 = vld [vmem:[%s6345_s19 + $0x8] sm:$0xff] }
 0x250   : > { %v5212_v5 = vpop.f32.mrf.mxu0  ;;  %v5250_v58 = vpop.f32.mrf.mxu1  ;;  %v3790_v32 = vadd.f32 %v5242_v53, %v3537_v37  ;;  %v6899_v35 = vld [vmem:[#allocation20_spill] sm:$0xff] }
 0x251   : > { %v3540_v21 = vadd.f32 %v5211_v54, %v3286_v9  ;;  %v5251_v20 = vadd.f32 %v5250_v58, %v5249_v41  ;;  %v3538_v15 = vadd.f32 %v5205_v56, %v3284_v4  ;;  %v5245_v41 = vadd.f32 %v6899_v35, %v6898_v11 }
 0x252   : > { %v5213_v16 = vpop.f32.mrf.mxu0  ;;  %v6787_v22 = vpop.f32.mrf.mxu1  ;;  %v3288_v54 = vadd.f32 %v5177_v29, %v2926_v19  ;;  %v4191_v29 = vld [vmem:[%s6345_s19 + $0x18] sm:$0xff] }
 0x253   : > { %v5214_v18 = vadd.f32 %v5213_v16, %v5212_v5  ;;  %v3791_v61 = vadd.f32 %v5245_v41, %v3538_v15 }
 0x254   : > { %v6789_v26 = vpop.f32.mrf.mxu0  ;;  %v5253_v39 = vpop.f32.mrf.mxu1 }
 0x255   : > { %v3541_v63 = vadd.f32 %v5214_v18, %v3287_v31  ;;  %v5254_v43 = vadd.f32 %v5253_v39, %v6787_v22 }
 0x256   : > { %v5216_v45 = vpop.f32.mrf.mxu0  ;;  %v6794_v40 = vpop.f32.mrf.mxu1 }
 0x257   : > { %v5217_v13 = vadd.f32 %v5216_v45, %v6789_v26  ;;  %v3794_v14 = vadd.f32 %v5254_v43, %v3541_v63  ;;  %v4195_v63 = vld [vmem:[%s6345_s19 + $0x38] sm:$0xff] }
 0x258   : > { %v5274_v42 = vpop.f32.mrf.mxu0  ;;  %v5256_v52 = vpop.f32.mrf.mxu1 }
 0x259   : > { %v3542_v39 = vadd.f32 %v5217_v13, %v3288_v54  ;;  %v5257_v26 = vadd.f32 %v5256_v52, %v6794_v40 }
 0x25a   : > { %v5275_v55 = vpop.f32.mrf.mxu0  ;;  %v5286_v12 = vpop.f32.mrf.mxu1 }
 0x25b   : > { %v5276_v62 = vadd.f32 %v5275_v55, %v5274_v42  ;;  %v3793_v42 = vadd.f32 %v5251_v20, %v3540_v21  ;;  %v3795_v52 = vadd.f32 %v5257_v26, %v3542_v39 }
 0x25c   : > { %v5277_v17 = vpop.f32.mrf.mxu0  ;;  %v5287_v23 = vpop.f32.mrf.mxu1 }
 0x25d   : > { %v4150_v7 = vadd.f32 %v5276_v62, %v3788_v59  ;;  %v5288_v25 = vadd.f32 %v5287_v23, %v5286_v12 }
 0x25e   : > { %v5278_v8 = vpop.f32.mrf.mxu0  ;;  %v5289_v50 = vpop.f32.mrf.mxu1 }
 0x25f   : > { %v4164_v30 = vadd.f32 %v6895_v28, %v4150_v7  ;;  %v5279_v27 = vadd.f32 %v5278_v8, %v5277_v17  ;;  %v4154_v5 = vadd.f32 %v5288_v25, %v3792_v24  ;;  %v4192_v24 = vld [vmem:[%s6345_s19 + $0x20] sm:$0xff] }
 0x260   : > { %v5280_v33 = vpop.f32.mrf.mxu0  ;;  %v5290_v44 = vpop.f32.mrf.mxu1 }
 0x261   : > { %v4151_v58 = vadd.f32 %v5279_v27, %v3789_v2  ;;  %v4172_v16 = vmul.f32 0.01, %v4164_v30  ;;  %v4168_v48 = vadd.f32 %v6895_v28, %v4154_v5  ;;  %v5291_v9 = vadd.f32 %v5290_v44, %v5289_v50  ;;  %v4190_v2 = vld [vmem:[%s6345_s19 + $0x10] sm:$0xff] }
 0x262   : > { %v5281_v47 = vpop.f32.mrf.mxu0  ;;  %v5292_v55 = vpop.f32.mrf.mxu1 }
 0x263   : > { %v4165_v49 = vadd.f32 %v6895_v28, %v4151_v58  ;;  %v5282_v46 = vadd.f32 %v5281_v47, %v5280_v33  ;;  %v4180_v60 = vmax.f32 %v4164_v30, %v4172_v16  ;;  %v4155_v0 = vadd.f32 %v5291_v9, %v3793_v42  ;;  %v4194_v33 = vld [vmem:[%s6345_s19 + $0x30] sm:$0xff]  ;;  %v4193_v58 = vld [vmem:[%s6345_s19 + $0x28] sm:$0xff] }
 0x264   : > { %v5283_v59 = vpop.f32.mrf.mxu0  ;;  %v4176_v45 = vmul.f32 0.01, %v4168_v48  ;;  %v5293_v1 = vpop.f32.mrf.mxu1 }
 0x265   : > { %v4173_v62 = vmul.f32 0.01, %v4165_v49  ;;  %v4152_v22 = vadd.f32 %v5282_v46, %v3790_v32  ;;  %v4196_v37 = vmul.f32 %v4188_v38, %v4180_v60  ;;  %v5294_v53 = vadd.f32 %v5293_v1, %v5292_v55  ;;  %v4233_v1 = vld [vmem:[#allocation2] sm:$0x1] }
 0x266   : > { %v5284_v3 = vpop.f32.mrf.mxu0  ;;  %v4169_v56 = vadd.f32 %v6895_v28, %v4155_v0  ;;  %v5295_v12 = vpop.f32.mrf.mxu1  ;;  %v4184_v21 = vmax.f32 %v4168_v48, %v4176_v45 }
 0x267   : > { %v4166_v51 = vadd.f32 %v6895_v28, %v4152_v22  ;;  %v5285_v10 = vadd.f32 %v5284_v3, %v5283_v59  ;;  %4204 = vadd.xlane.f32.xlu0 %v4196_v37  ;;  %v4181_v17 = vmax.f32 %v4165_v49, %v4173_v62  ;;  %v4156_v4 = vadd.f32 %v5294_v53, %v3794_v14 }
 0x268   : > { %v5296_v19 = vpop.f32.mrf.mxu1  ;;  %v4177_v30 = vmul.f32 0.01, %v4169_v56  ;;  %v4200_v36 = vmul.f32 %v4192_v24, %v4184_v21 }
 0x269   : > { %v4153_v6 = vadd.f32 %v5285_v10, %v3791_v61  ;;  %v4174_v40 = vmul.f32 0.01, %v4166_v51  ;;  %v4197_v7 = vmul.f32 %v4189_v57, %v4181_v17  ;;  %v4170_v20 = vadd.f32 %v6895_v28, %v4156_v4 }
 0x26a   : > { %v5297_v23 = vadd.f32 %v5296_v19, %v5295_v12  ;;  %v4185_v41 = vmax.f32 %v4169_v56, %v4177_v30 }
 0x26b   : > { %v4167_v18 = vadd.f32 %v6895_v28, %v4153_v6  ;;  %v4182_v8 = vmax.f32 %v4166_v51, %v4174_v40  ;;  %4206 = vadd.xlane.f32.xlu0 %v4197_v7  ;;  %v4178_v25 = vmul.f32 0.01, %v4170_v20  ;;  %v4243_v51 = vld [vmem:[#allocation3] sm:$0x1] (%p4237_p13) }
 0x26c   : > { %v4157_v31 = vadd.f32 %v5297_v23, %v3795_v52  ;;  %v4201_v16 = vmul.f32 %v4193_v58, %v4185_v41 }
 0x26d   : > { %v4175_v27 = vmul.f32 0.01, %v4167_v18  ;;  %v4198_v34 = vmul.f32 %v4190_v2, %v4182_v8  ;;  %v4186_v50 = vmax.f32 %v4170_v20, %v4178_v25 }
 0x26e   : > { %v4171_v32 = vadd.f32 %v6895_v28, %v4157_v31 }
 0x26f   : > { %4208 = vadd.xlane.f32.xlu1 %v4198_v34  ;;  %v4183_v15 = vmax.f32 %v4167_v18, %v4175_v27  ;;  %4212 = vadd.xlane.f32.xlu0 %v4200_v36  ;;  %v4202_v5 = vmul.f32 %v4194_v33, %v4186_v50 }
 0x270   : > { %v4179_v11 = vmul.f32 0.01, %v4171_v32 }
 0x271   : > { %v4199_v35 = vmul.f32 %v4191_v29, %v4183_v15 }
 0x272   : > { %v4187_v42 = vmax.f32 %v4171_v32, %v4179_v11 }
 0x273   : > { %4210 = vadd.xlane.f32.xlu1 %v4199_v35  ;;  %4216 = vadd.xlane.f32.xlu0 %v4202_v5 }
 0x274   : > { %v4203_v43 = vmul.f32 %v4195_v63, %v4187_v42 }
 0x277   : > { %4214 = vadd.xlane.f32.xlu1 %v4201_v16 }
 0x27b   : > { %4218 = vadd.xlane.f32.xlu1 %v4203_v43 }
 0x2f0   : > { %v4205_v28 = vpop.xlane.xlu0 %4204 }
 0x2f4   : > { %v4207_v13 = vpop.xlane.xlu0 %4206 }
 0x2f5   : > { %v4220_v47 = vadd.f32 %v4207_v13, %v4205_v28 }
 0x2f8   : > { %v4209_v44 = vpop.xlane.xlu1 %4208  ;;  %v4213_v49 = vpop.xlane.xlu0 %4212 }
 0x2f9   : > { %v4221_v48 = vadd.f32 %v4220_v47, %v4209_v44 }
 0x2fc   : > { %v4211_v9 = vpop.xlane.xlu1 %4210  ;;  %v4217_v59 = vpop.xlane.xlu0 %4216 }
 0x2fd   : > { %v4222_v46 = vadd.f32 %v4221_v48, %v4211_v9 }
 0x2ff   : > { %v4223_v38 = vadd.f32 %v4222_v46, %v4213_v49 }
 0x300   : > { %v4215_v54 = vpop.xlane.xlu1 %4214 }
 0x301   : > { %v4224_v55 = vadd.f32 %v4223_v38, %v4215_v54 }
 0x303   : > { %v4225_v60 = vadd.f32 %v4224_v55, %v4217_v59 }
 0x304   : > { %v4219_v61 = vpop.xlane.xlu1 %4218 }
 0x305   : > { %v4226_v62 = vadd.f32 %v4225_v60, %v4219_v61 }
 0x307   : > { %v4227_v0 = vrot.slane %v4226_v62, 4 }
 0x309   : > { %v4228_v22 = vadd.f32 %v4227_v0, %v4226_v62 }
 0x30b   : > { %v4229_v39 = vrot.slane %v4228_v22, 2 }
 0x30d   : > { %v4230_v26 = vadd.f32 %v4229_v39, %v4228_v22 }
 0x30f   : > { %v4231_v45 = vrot.slane %v4230_v26, 1 }
 0x311   : > { %v4232_v3 = vadd.f32 %v4231_v45, %v4230_v26  ;;  %4241 = sbr.rel (!%p4237_p13) target bundleno = 800 (0x320), region = 127 }
 0x313   : > { %v4234_v37 = vadd.f32 %v4233_v1, %v4232_v3 }
 0x315   : > { %4236 = vst.msk [vmem:[#allocation2] sm:$0x1] %vm4235_vm4, %v4234_v37 }
 0x31c   : > { %v4242_v14 = vld [vmem:[#allocation2] sm:$0x1] }
 0x31d   : > { %v4244_v53 = vadd.f32 %v4243_v51, %v4242_v14 }
 0x31f   : > { %4245 = vst.msk [vmem:[%s1555_s12] sm:$0x1] %vm4235_vm4, %v4244_v53 }
 0x320 PF: > { %s17_s26 = sadd.s32 1, %s5632_s26   ;;  %s6900_s20 = smov %s5612_s21 }
 0x321   : > { %p14_p0 = scmp.ge.s32.totalorder %s17_s26, 6   ;;  %s6901_s21 = smov %s5721_s6 }
 0x322   : > { %s6902_s22 = smov %s5624_s24  ;;  %s6903_s23 = smov %s5628_s25 }
 0x323   : > { %s6904_s24 = smov %s6907_s4  ;;  %s6905_s25 = smov %s6911_s27 }
 0x324   :  { %16 = sbr.rel (!%p14_p0) target bundleno = 7 (0x7), region = 190 }

</bundles_post_ra>
